<compile_context>
chip_gen: v5e
topology: v5e:2x2
jax: 0.10.0
libtpu: 0.0.40
codegen_flags: <defaults>
</compile_context>

<pallas_src>
import numpy as np
import jax
import jax.numpy as jnp
from jax import lax
from jax.experimental import pallas as pl
from jax.experimental.pallas import tpu as pltpu

# --- model hyperparameters (PyTorch defaults) ---------------------------------
X_CH = 64          # x_channels
H_CH = 32          # channels (hidden)
C_PAD = 128        # lane-padded input-channel count for the fused pass-1 conv
assert X_CH + H_CH <= C_PAD


# --- the Pallas kernel ---------------------------------------------------------
def convgru_kernel(xpad_ref, h_ref, wzrc_ref, bzrc_ref, wu_ref, bu_ref,
                   out_ref, pad2_ref):
  # xpad_ref: (1, hh+2, ww+2, C_PAD) bf16   wrapper-padded [x || h || 0]
  # h_ref:    (1, hh, ww, ch)        f32    previous hidden state
  # wzrc_ref: (9, C_PAD, C_PAD)      bf16   fused z|r|cand weights (tap-major)
  # bzrc_ref: (1, C_PAD)             f32
  # wu_ref:   (9, ch, ch)            bf16   conv_u weights (tap-major)
  # bu_ref:   (1, ch)                f32
  # pad2_ref: (1, hh+2, ww+2, ch)    bf16   scratch for the r*h padded window
  _, hh, ww, ch = h_ref.shape
  cpad = xpad_ref.shape[-1]
  rows = hh * ww

  # ---- pass 1: fused z | r | candidate_x pre-activations --------------------
  # 9 direct matmuls (K = 128) over the shifted windows, accumulated in f32.
  acc = jnp.zeros((rows, cpad), jnp.float32)
  for k in range(9):                                   # static tap loop
    kh, kw = divmod(k, 3)
    win = xpad_ref[:, kh:kh + hh, kw:kw + ww, :].reshape(rows, cpad)   # bf16
    acc = acc + jnp.dot(win, wzrc_ref[k], preferred_element_type=jnp.float32)
  acc = acc + bzrc_ref[...]                            # lane-dense (rows, 128)

  # sigmoid via exp + approx reciprocal (both EUP) -- keeps the VALU free.
  z = pl.reciprocal(1.0 + jnp.exp(-acc[:, 0:ch]), approx=True)
  r = pl.reciprocal(1.0 + jnp.exp(-acc[:, ch:2 * ch]), approx=True)
  cand_x = acc[:, 2 * ch:3 * ch]                       # conv(x) + b_c

  # ---- pass 2: conv_u(r_t * h_{t-1}) -----------------------------------------
  h_prev = h_ref[...].reshape(rows, ch)                # f32
  rh = (r * h_prev).astype(pad2_ref.dtype)             # bf16 matmul operand

  # Fill pad2 completely each step: 1-pixel zero halo + r*h interior (~20 KB).
  zrow = jnp.zeros((1, 1, ww + 2, ch), pad2_ref.dtype)
  zcol = jnp.zeros((1, hh, 1, ch), pad2_ref.dtype)
  pad2_ref[:, 0:1, :, :] = zrow
  pad2_ref[:, hh + 1:hh + 2, :, :] = zrow
  pad2_ref[:, 1:hh + 1, 0:1, :] = zcol
  pad2_ref[:, 1:hh + 1, ww + 1:ww + 2, :] = zcol
  pad2_ref[:, 1:hh + 1, 1:ww + 1, :] = rh.reshape(1, hh, ww, ch)

  u = jnp.zeros((rows, ch), jnp.float32)
  for k in range(9):                                   # 9 matmuls, K = 32
    kh, kw = divmod(k, 3)
    win = pad2_ref[:, kh:kh + hh, kw:kw + ww, :].reshape(rows, ch)
    u = u + jnp.dot(win, wu_ref[k], preferred_element_type=jnp.float32)
  u = u + bu_ref[...]

  # ---- GRU gating (f32 on the VPU) -------------------------------------------
  pre = cand_x + u
  h_hat = jnp.where(pre >= 0.0, pre, 0.2 * pre)        # LeakyReLU(0.2)
  h_t = (1.0 - z) * h_prev + z * h_hat
  out_ref[...] = h_t.reshape(1, hh, ww, ch)


# --- parameter construction & packing ------------------------------------------
def _conv_init(key, cout, cin):
  """Deterministic stand-in for nn.Conv2d's default init."""
  kw_, kb_ = jax.random.split(key)
  fan_in = cin * 9
  bound = 1.0 / (fan_in ** 0.5)
  w = jax.random.uniform(kw_, (cout, cin, 3, 3), jnp.float32, -bound, bound)
  b = jax.random.uniform(kb_, (cout,), jnp.float32, -bound, bound)
  return w, b


def build_params(key):
  keys = jax.random.split(key, 6)
  p = {}
  p['w_x_z'], p['b_x_z'] = _conv_init(keys[0], H_CH, X_CH)
  p['w_h_z'], p['b_h_z'] = _conv_init(keys[1], H_CH, H_CH)
  p['w_x_r'], p['b_x_r'] = _conv_init(keys[2], H_CH, X_CH)
  p['w_h_r'], p['b_h_r'] = _conv_init(keys[3], H_CH, H_CH)
  p['w_c'],   p['b_c']   = _conv_init(keys[4], H_CH, X_CH)
  p['w_u'],   p['b_u']   = _conv_init(keys[5], H_CH, H_CH)
  return p


def _to_k_cin_cout(w):
  """torch conv weight (Cout, Cin, 3, 3) -> (9, Cin, Cout), tap k = kh*3 + kw."""
  co, ci = w.shape[0], w.shape[1]
  return jnp.transpose(w, (2, 3, 1, 0)).reshape(9, ci, co)


def pack_params(p):
  """Pack the six convs into per-tap matmul operands (done once, outside jit)."""
  # Pass-1 weight: input lanes [x(0:64) | h(64:96) | 0(96:128)],
  #                output lanes [z(0:32) | r(32:64) | cand(64:96) | 0(96:128)].
  wbig = jnp.zeros((9, C_PAD, C_PAD), jnp.float32)
  wbig = wbig.at[:, 0:X_CH, 0:H_CH].set(_to_k_cin_cout(p['w_x_z']))
  wbig = wbig.at[:, X_CH:X_CH + H_CH, 0:H_CH].set(_to_k_cin_cout(p['w_h_z']))
  wbig = wbig.at[:, 0:X_CH, H_CH:2 * H_CH].set(_to_k_cin_cout(p['w_x_r']))
  wbig = wbig.at[:, X_CH:X_CH + H_CH, H_CH:2 * H_CH].set(_to_k_cin_cout(p['w_h_r']))
  wbig = wbig.at[:, 0:X_CH, 2 * H_CH:3 * H_CH].set(_to_k_cin_cout(p['w_c']))
  bbig = jnp.zeros((1, C_PAD), jnp.float32)
  bbig = bbig.at[0, 0:3 * H_CH].set(jnp.concatenate(
      [p['b_x_z'] + p['b_h_z'], p['b_x_r'] + p['b_h_r'], p['b_c']]))
  # Pass-2 weight: plain (9, 32, 32) -- no zero-row padding.
  wu = _to_k_cin_cout(p['w_u'])
  bu = p['b_u'][None, :]
  return (wbig.astype(jnp.bfloat16), bbig,
          wu.astype(jnp.bfloat16), bu)


# --- wrapper --------------------------------------------------------------------
@jax.jit
def convgru_forward(x_nchw, h_nchw, w_zrc, b_zrc, w_u, b_u):
  x = jnp.transpose(x_nchw, (0, 2, 3, 1)).astype(jnp.float32)   # NCHW -> NHWC
  h = jnp.transpose(h_nchw, (0, 2, 3, 1)).astype(jnp.float32)
  n, hh, ww, cx = x.shape
  ch = h.shape[-1]

  # Lane-padded bf16 slab [x || h || 0], spatially padded in the wrapper so the
  # kernel needs no halo zeroing / interior copy for pass 1.
  xh = jnp.concatenate(
      [x, h, jnp.zeros((n, hh, ww, C_PAD - cx - ch), jnp.float32)],
      axis=-1).astype(jnp.bfloat16)
  xh_pad = jnp.pad(xh, ((0, 0), (1, 1), (1, 1), (0, 0)))

  out_nhwc = pl.pallas_call(
      convgru_kernel,
      out_shape=jax.ShapeDtypeStruct((n, hh, ww, ch), jnp.float32),
      grid_spec=pltpu.PrefetchScalarGridSpec(
          num_scalar_prefetch=0,
          grid=(n,),                                   # one image per grid step
          in_specs=[
              pl.BlockSpec((1, hh + 2, ww + 2, C_PAD), lambda b: (b, 0, 0, 0)),
              pl.BlockSpec((1, hh, ww, ch), lambda b: (b, 0, 0, 0)),
              # constant index_maps -> weights stay VMEM-resident across steps
              pl.BlockSpec((9, C_PAD, C_PAD), lambda b: (0, 0, 0)),
              pl.BlockSpec((1, C_PAD), lambda b: (0, 0)),
              pl.BlockSpec((9, ch, ch), lambda b: (0, 0, 0)),
              pl.BlockSpec((1, ch), lambda b: (0, 0)),
          ],
          out_specs=pl.BlockSpec((1, hh, ww, ch), lambda b: (b, 0, 0, 0)),
          scratch_shapes=[
              pltpu.VMEM((1, hh + 2, ww + 2, ch), jnp.bfloat16),   # r*h padded
          ]),
      compiler_params=pltpu.CompilerParams(
          dimension_semantics=("parallel",)),          # both TCs on v7x
  )(xh_pad, h, w_zrc, b_zrc, w_u, b_u)

  return jnp.transpose(out_nhwc, (0, 3, 1, 2))                   # NHWC -> NCHW


# --- pure-JAX reference (loose numerical sanity check) ---------------------------
def _conv2d_nchw(x, w, b):
  y = lax.conv_general_dilated(
      x, w, window_strides=(1, 1), padding=((1, 1), (1, 1)),
      dimension_numbers=('NCHW', 'OIHW', 'NCHW'))
  return y + b[None, :, None, None]


def convgru_reference(x, h, p):
  z = jax.nn.sigmoid(_conv2d_nchw(x, p['w_x_z'], p['b_x_z']) +
                     _conv2d_nchw(h, p['w_h_z'], p['b_h_z']))
  r = jax.nn.sigmoid(_conv2d_nchw(x, p['w_x_r'], p['b_x_r']) +
                     _conv2d_nchw(h, p['w_h_r'], p['b_h_r']))
  h_hat = jax.nn.leaky_relu(_conv2d_nchw(x, p['w_c'], p['b_c']) +
                            _conv2d_nchw(r * h, p['w_u'], p['b_u']),
                            negative_slope=0.2)
  return (1.0 - z) * h + z * h_hat


# --- demo ------------------------------------------------------------------------
if __name__ == "__main__":
  key = jax.random.PRNGKey(0)
  kx, kh, kp = jax.random.split(key, 3)

  # PyTorch-style NCHW inputs: x (2, 64, 16, 16), h_{t-1} (2, 32, 16, 16)
  x = jax.random.normal(kx, (2, X_CH, 16, 16), dtype=jnp.float32)
  h0 = jax.random.normal(kh, (2, H_CH, 16, 16), dtype=jnp.float32)

  params = build_params(kp)
  # Pack / cast weights to bf16 once, outside the per-step jitted call.
  w_zrc, b_zrc, w_u, b_u = pack_params(params)

  h_t = convgru_forward(x, h0, w_zrc, b_zrc, w_u, b_u)
  jax.block_until_ready(h_t)

  assert h_t.shape == (2, H_CH, 16, 16), h_t.shape
  assert h_t.dtype == jnp.float32

  ref = convgru_reference(x, h0, params)
  max_err = float(jnp.max(jnp.abs(h_t - ref)))
  assert np.isfinite(max_err) and max_err < 7.5e-2, f"max abs err = {max_err}"

  print("KERNEL_OK")
</pallas_src>

<mosaic_0001>
module attributes {stable_mosaic.version = 11 : i64} {
  func.func @convgru_kernel(%arg0: i32, %arg1: memref<1x18x18x128xbf16, #tpu.memory_space<vmem>>, %arg2: memref<1x16x16x32xf32, #tpu.memory_space<vmem>>, %arg3: memref<9x128x128xbf16, #tpu.memory_space<vmem>>, %arg4: memref<1x128xf32, #tpu.memory_space<vmem>>, %arg5: memref<9x32x32xbf16, #tpu.memory_space<vmem>>, %arg6: memref<1x32xf32, #tpu.memory_space<vmem>>, %arg7: memref<1x16x16x32xf32, #tpu.memory_space<vmem>>, %arg8: memref<1x18x18x32xbf16, #tpu.memory_space<vmem>>) attributes {dimension_semantics = [#tpu.dimension_semantics<parallel>], iteration_bounds = array<i64: 2>, scalar_prefetch = 0 : i64, scratch_operands = 1 : i64, tpu.core_type = #tpu.core_type<tc>, window_params = [{transform_indices = @transform_0, window_bounds = array<i64: 1, 18, 18, 128>}, {transform_indices = @transform_1, window_bounds = array<i64: 1, 16, 16, 32>}, {pipeline_mode = #tpu.pipeline_mode<synchronous>, transform_indices = @transform_2, window_bounds = array<i64: 9, 128, 128>}, {pipeline_mode = #tpu.pipeline_mode<synchronous>, transform_indices = @transform_3, window_bounds = array<i64: 1, 128>}, {pipeline_mode = #tpu.pipeline_mode<synchronous>, transform_indices = @transform_4, window_bounds = array<i64: 9, 32, 32>}, {pipeline_mode = #tpu.pipeline_mode<synchronous>, transform_indices = @transform_5, window_bounds = array<i64: 1, 32>}, {transform_indices = @transform_6, window_bounds = array<i64: 1, 16, 16, 32>}]} {
    %cst = arith.constant 0.000000e+00 : f32
    %0 = vector.broadcast %cst : f32 to vector<256x128xf32>
    %c0 = arith.constant 0 : index
    %c0_0 = arith.constant 0 : index
    %c0_1 = arith.constant 0 : index
    %c0_2 = arith.constant 0 : index
    %1 = vector.load %arg1[%c0, %c0_0, %c0_1, %c0_2] : memref<1x18x18x128xbf16, #tpu.memory_space<vmem>>, vector<1x16x16x128xbf16>
    %2 = vector.shape_cast %1 : vector<1x16x16x128xbf16> to vector<256x128xbf16>
    %c0_3 = arith.constant 0 : index
    %c0_4 = arith.constant 0 : index
    %c0_5 = arith.constant 0 : index
    %3 = vector.load %arg3[%c0_3, %c0_4, %c0_5] : memref<9x128x128xbf16, #tpu.memory_space<vmem>>, vector<1x128x128xbf16>
    %4 = vector.shape_cast %3 : vector<1x128x128xbf16> to vector<128x128xbf16>
    %cst_6 = arith.constant dense<0.000000e+00> : vector<256x128xf32>
    %5 = tpu.matmul %2, %4, %cst_6 {dimension_numbers = #tpu.dot_dimension_numbers<[1], [0], [0], [1], [0, 0, 1, 1], [], []>} : vector<256x128xbf16>, vector<128x128xbf16>, vector<256x128xf32> -> vector<256x128xf32>
    %6 = arith.addf %0, %5 : vector<256x128xf32>
    %c0_7 = arith.constant 0 : index
    %c0_8 = arith.constant 0 : index
    %c1 = arith.constant 1 : index
    %c0_9 = arith.constant 0 : index
    %7 = vector.load %arg1[%c0_7, %c0_8, %c1, %c0_9] : memref<1x18x18x128xbf16, #tpu.memory_space<vmem>>, vector<1x16x16x128xbf16>
    %8 = vector.shape_cast %7 : vector<1x16x16x128xbf16> to vector<256x128xbf16>
    %c1_10 = arith.constant 1 : index
    %c0_11 = arith.constant 0 : index
    %c0_12 = arith.constant 0 : index
    %9 = vector.load %arg3[%c1_10, %c0_11, %c0_12] : memref<9x128x128xbf16, #tpu.memory_space<vmem>>, vector<1x128x128xbf16>
    %10 = vector.shape_cast %9 : vector<1x128x128xbf16> to vector<128x128xbf16>
    %cst_13 = arith.constant dense<0.000000e+00> : vector<256x128xf32>
    %11 = tpu.matmul %8, %10, %cst_13 {dimension_numbers = #tpu.dot_dimension_numbers<[1], [0], [0], [1], [0, 0, 1, 1], [], []>} : vector<256x128xbf16>, vector<128x128xbf16>, vector<256x128xf32> -> vector<256x128xf32>
    %12 = arith.addf %6, %11 : vector<256x128xf32>
    %c0_14 = arith.constant 0 : index
    %c0_15 = arith.constant 0 : index
    %c2 = arith.constant 2 : index
    %c0_16 = arith.constant 0 : index
    %13 = vector.load %arg1[%c0_14, %c0_15, %c2, %c0_16] : memref<1x18x18x128xbf16, #tpu.memory_space<vmem>>, vector<1x16x16x128xbf16>
    %14 = vector.shape_cast %13 : vector<1x16x16x128xbf16> to vector<256x128xbf16>
    %c2_17 = arith.constant 2 : index
    %c0_18 = arith.constant 0 : index
    %c0_19 = arith.constant 0 : index
    %15 = vector.load %arg3[%c2_17, %c0_18, %c0_19] : memref<9x128x128xbf16, #tpu.memory_space<vmem>>, vector<1x128x128xbf16>
    %16 = vector.shape_cast %15 : vector<1x128x128xbf16> to vector<128x128xbf16>
    %cst_20 = arith.constant dense<0.000000e+00> : vector<256x128xf32>
    %17 = tpu.matmul %14, %16, %cst_20 {dimension_numbers = #tpu.dot_dimension_numbers<[1], [0], [0], [1], [0, 0, 1, 1], [], []>} : vector<256x128xbf16>, vector<128x128xbf16>, vector<256x128xf32> -> vector<256x128xf32>
    %18 = arith.addf %12, %17 : vector<256x128xf32>
    %c0_21 = arith.constant 0 : index
    %c1_22 = arith.constant 1 : index
    %c0_23 = arith.constant 0 : index
    %c0_24 = arith.constant 0 : index
    %19 = vector.load %arg1[%c0_21, %c1_22, %c0_23, %c0_24] : memref<1x18x18x128xbf16, #tpu.memory_space<vmem>>, vector<1x16x16x128xbf16>
    %20 = vector.shape_cast %19 : vector<1x16x16x128xbf16> to vector<256x128xbf16>
    %c3 = arith.constant 3 : index
    %c0_25 = arith.constant 0 : index
    %c0_26 = arith.constant 0 : index
    %21 = vector.load %arg3[%c3, %c0_25, %c0_26] : memref<9x128x128xbf16, #tpu.memory_space<vmem>>, vector<1x128x128xbf16>
    %22 = vector.shape_cast %21 : vector<1x128x128xbf16> to vector<128x128xbf16>
    %cst_27 = arith.constant dense<0.000000e+00> : vector<256x128xf32>
    %23 = tpu.matmul %20, %22, %cst_27 {dimension_numbers = #tpu.dot_dimension_numbers<[1], [0], [0], [1], [0, 0, 1, 1], [], []>} : vector<256x128xbf16>, vector<128x128xbf16>, vector<256x128xf32> -> vector<256x128xf32>
    %24 = arith.addf %18, %23 : vector<256x128xf32>
    %c0_28 = arith.constant 0 : index
    %c1_29 = arith.constant 1 : index
    %c1_30 = arith.constant 1 : index
    %c0_31 = arith.constant 0 : index
    %25 = vector.load %arg1[%c0_28, %c1_29, %c1_30, %c0_31] : memref<1x18x18x128xbf16, #tpu.memory_space<vmem>>, vector<1x16x16x128xbf16>
    %26 = vector.shape_cast %25 : vector<1x16x16x128xbf16> to vector<256x128xbf16>
    %c4 = arith.constant 4 : index
    %c0_32 = arith.constant 0 : index
    %c0_33 = arith.constant 0 : index
    %27 = vector.load %arg3[%c4, %c0_32, %c0_33] : memref<9x128x128xbf16, #tpu.memory_space<vmem>>, vector<1x128x128xbf16>
    %28 = vector.shape_cast %27 : vector<1x128x128xbf16> to vector<128x128xbf16>
    %cst_34 = arith.constant dense<0.000000e+00> : vector<256x128xf32>
    %29 = tpu.matmul %26, %28, %cst_34 {dimension_numbers = #tpu.dot_dimension_numbers<[1], [0], [0], [1], [0, 0, 1, 1], [], []>} : vector<256x128xbf16>, vector<128x128xbf16>, vector<256x128xf32> -> vector<256x128xf32>
    %30 = arith.addf %24, %29 : vector<256x128xf32>
    %c0_35 = arith.constant 0 : index
    %c1_36 = arith.constant 1 : index
    %c2_37 = arith.constant 2 : index
    %c0_38 = arith.constant 0 : index
    %31 = vector.load %arg1[%c0_35, %c1_36, %c2_37, %c0_38] : memref<1x18x18x128xbf16, #tpu.memory_space<vmem>>, vector<1x16x16x128xbf16>
    %32 = vector.shape_cast %31 : vector<1x16x16x128xbf16> to vector<256x128xbf16>
    %c5 = arith.constant 5 : index
    %c0_39 = arith.constant 0 : index
    %c0_40 = arith.constant 0 : index
    %33 = vector.load %arg3[%c5, %c0_39, %c0_40] : memref<9x128x128xbf16, #tpu.memory_space<vmem>>, vector<1x128x128xbf16>
    %34 = vector.shape_cast %33 : vector<1x128x128xbf16> to vector<128x128xbf16>
    %cst_41 = arith.constant dense<0.000000e+00> : vector<256x128xf32>
    %35 = tpu.matmul %32, %34, %cst_41 {dimension_numbers = #tpu.dot_dimension_numbers<[1], [0], [0], [1], [0, 0, 1, 1], [], []>} : vector<256x128xbf16>, vector<128x128xbf16>, vector<256x128xf32> -> vector<256x128xf32>
    %36 = arith.addf %30, %35 : vector<256x128xf32>
    %c0_42 = arith.constant 0 : index
    %c2_43 = arith.constant 2 : index
    %c0_44 = arith.constant 0 : index
    %c0_45 = arith.constant 0 : index
    %37 = vector.load %arg1[%c0_42, %c2_43, %c0_44, %c0_45] : memref<1x18x18x128xbf16, #tpu.memory_space<vmem>>, vector<1x16x16x128xbf16>
    %38 = vector.shape_cast %37 : vector<1x16x16x128xbf16> to vector<256x128xbf16>
    %c6 = arith.constant 6 : index
    %c0_46 = arith.constant 0 : index
    %c0_47 = arith.constant 0 : index
    %39 = vector.load %arg3[%c6, %c0_46, %c0_47] : memref<9x128x128xbf16, #tpu.memory_space<vmem>>, vector<1x128x128xbf16>
    %40 = vector.shape_cast %39 : vector<1x128x128xbf16> to vector<128x128xbf16>
    %cst_48 = arith.constant dense<0.000000e+00> : vector<256x128xf32>
    %41 = tpu.matmul %38, %40, %cst_48 {dimension_numbers = #tpu.dot_dimension_numbers<[1], [0], [0], [1], [0, 0, 1, 1], [], []>} : vector<256x128xbf16>, vector<128x128xbf16>, vector<256x128xf32> -> vector<256x128xf32>
    %42 = arith.addf %36, %41 : vector<256x128xf32>
    %c0_49 = arith.constant 0 : index
    %c2_50 = arith.constant 2 : index
    %c1_51 = arith.constant 1 : index
    %c0_52 = arith.constant 0 : index
    %43 = vector.load %arg1[%c0_49, %c2_50, %c1_51, %c0_52] : memref<1x18x18x128xbf16, #tpu.memory_space<vmem>>, vector<1x16x16x128xbf16>
    %44 = vector.shape_cast %43 : vector<1x16x16x128xbf16> to vector<256x128xbf16>
    %c7 = arith.constant 7 : index
    %c0_53 = arith.constant 0 : index
    %c0_54 = arith.constant 0 : index
    %45 = vector.load %arg3[%c7, %c0_53, %c0_54] : memref<9x128x128xbf16, #tpu.memory_space<vmem>>, vector<1x128x128xbf16>
    %46 = vector.shape_cast %45 : vector<1x128x128xbf16> to vector<128x128xbf16>
    %cst_55 = arith.constant dense<0.000000e+00> : vector<256x128xf32>
    %47 = tpu.matmul %44, %46, %cst_55 {dimension_numbers = #tpu.dot_dimension_numbers<[1], [0], [0], [1], [0, 0, 1, 1], [], []>} : vector<256x128xbf16>, vector<128x128xbf16>, vector<256x128xf32> -> vector<256x128xf32>
    %48 = arith.addf %42, %47 : vector<256x128xf32>
    %c0_56 = arith.constant 0 : index
    %c2_57 = arith.constant 2 : index
    %c2_58 = arith.constant 2 : index
    %c0_59 = arith.constant 0 : index
    %49 = vector.load %arg1[%c0_56, %c2_57, %c2_58, %c0_59] : memref<1x18x18x128xbf16, #tpu.memory_space<vmem>>, vector<1x16x16x128xbf16>
    %50 = vector.shape_cast %49 : vector<1x16x16x128xbf16> to vector<256x128xbf16>
    %c8 = arith.constant 8 : index
    %c0_60 = arith.constant 0 : index
    %c0_61 = arith.constant 0 : index
    %51 = vector.load %arg3[%c8, %c0_60, %c0_61] : memref<9x128x128xbf16, #tpu.memory_space<vmem>>, vector<1x128x128xbf16>
    %52 = vector.shape_cast %51 : vector<1x128x128xbf16> to vector<128x128xbf16>
    %cst_62 = arith.constant dense<0.000000e+00> : vector<256x128xf32>
    %53 = tpu.matmul %50, %52, %cst_62 {dimension_numbers = #tpu.dot_dimension_numbers<[1], [0], [0], [1], [0, 0, 1, 1], [], []>} : vector<256x128xbf16>, vector<128x128xbf16>, vector<256x128xf32> -> vector<256x128xf32>
    %54 = arith.addf %48, %53 : vector<256x128xf32>
    %c0_63 = arith.constant 0 : index
    %c0_64 = arith.constant 0 : index
    %55 = vector.load %arg4[%c0_63, %c0_64] : memref<1x128xf32, #tpu.memory_space<vmem>>, vector<1x128xf32>
    %56 = vector.broadcast %55 : vector<1x128xf32> to vector<256x128xf32>
    %57 = arith.addf %54, %56 : vector<256x128xf32>
    %58 = vector.extract_strided_slice %57 {offsets = [0, 0], sizes = [256, 32], strides = [1, 1]} : vector<256x128xf32> to vector<256x32xf32>
    %cst_65 = arith.constant 0.000000e+00 : f32
    %59 = vector.broadcast %cst_65 : f32 to vector<256x32xf32>
    %60 = arith.subf %59, %58 : vector<256x32xf32>
    %61 = math.exp %60 : vector<256x32xf32>
    %cst_66 = arith.constant 1.000000e+00 : f32
    %62 = vector.broadcast %cst_66 : f32 to vector<256x32xf32>
    %63 = arith.addf %62, %61 : vector<256x32xf32>
    %64 = tpu.reciprocal %63 {approx = true} : vector<256x32xf32> -> vector<256x32xf32>
    %65 = vector.extract_strided_slice %57 {offsets = [0, 32], sizes = [256, 32], strides = [1, 1]} : vector<256x128xf32> to vector<256x32xf32>
    %cst_67 = arith.constant 0.000000e+00 : f32
    %66 = vector.broadcast %cst_67 : f32 to vector<256x32xf32>
    %67 = arith.subf %66, %65 : vector<256x32xf32>
    %68 = math.exp %67 : vector<256x32xf32>
    %cst_68 = arith.constant 1.000000e+00 : f32
    %69 = vector.broadcast %cst_68 : f32 to vector<256x32xf32>
    %70 = arith.addf %69, %68 : vector<256x32xf32>
    %71 = tpu.reciprocal %70 {approx = true} : vector<256x32xf32> -> vector<256x32xf32>
    %72 = vector.extract_strided_slice %57 {offsets = [0, 64], sizes = [256, 32], strides = [1, 1]} : vector<256x128xf32> to vector<256x32xf32>
    %c0_69 = arith.constant 0 : index
    %c0_70 = arith.constant 0 : index
    %c0_71 = arith.constant 0 : index
    %c0_72 = arith.constant 0 : index
    %73 = vector.load %arg2[%c0_69, %c0_70, %c0_71, %c0_72] : memref<1x16x16x32xf32, #tpu.memory_space<vmem>>, vector<1x16x16x32xf32>
    %74 = vector.shape_cast %73 : vector<1x16x16x32xf32> to vector<256x32xf32>
    %75 = arith.mulf %71, %74 : vector<256x32xf32>
    %76 = arith.truncf %75 : vector<256x32xf32> to vector<256x32xbf16>
    %cst_73 = arith.constant 0.000000e+00 : bf16
    %77 = vector.broadcast %cst_73 : bf16 to vector<1x1x18x32xbf16>
    %cst_74 = arith.constant 0.000000e+00 : bf16
    %78 = vector.broadcast %cst_74 : bf16 to vector<1x16x1x32xbf16>
    %c0_75 = arith.constant 0 : index
    %c0_76 = arith.constant 0 : index
    %c0_77 = arith.constant 0 : index
    %c0_78 = arith.constant 0 : index
    %79 = vector.load %arg8[%c0_75, %c0_76, %c0_77, %c0_78] : memref<1x18x18x32xbf16, #tpu.memory_space<vmem>>, vector<1x1x18x32xbf16>
    tpu.vector_store %arg8[%c0_75, %c0_76, %c0_77, %c0_78], %77 {strides = array<i32>} : memref<1x18x18x32xbf16, #tpu.memory_space<vmem>>, vector<1x1x18x32xbf16>,
    %c0_79 = arith.constant 0 : index
    %c17 = arith.constant 17 : index
    %c0_80 = arith.constant 0 : index
    %c0_81 = arith.constant 0 : index
    %80 = vector.load %arg8[%c0_79, %c17, %c0_80, %c0_81] : memref<1x18x18x32xbf16, #tpu.memory_space<vmem>>, vector<1x1x18x32xbf16>
    tpu.vector_store %arg8[%c0_79, %c17, %c0_80, %c0_81], %77 {strides = array<i32>} : memref<1x18x18x32xbf16, #tpu.memory_space<vmem>>, vector<1x1x18x32xbf16>,
    %c0_82 = arith.constant 0 : index
    %c1_83 = arith.constant 1 : index
    %c0_84 = arith.constant 0 : index
    %c0_85 = arith.constant 0 : index
    %81 = vector.load %arg8[%c0_82, %c1_83, %c0_84, %c0_85] : memref<1x18x18x32xbf16, #tpu.memory_space<vmem>>, vector<1x16x1x32xbf16>
    tpu.vector_store %arg8[%c0_82, %c1_83, %c0_84, %c0_85], %78 {strides = array<i32>} : memref<1x18x18x32xbf16, #tpu.memory_space<vmem>>, vector<1x16x1x32xbf16>,
    %c0_86 = arith.constant 0 : index
    %c1_87 = arith.constant 1 : index
    %c17_88 = arith.constant 17 : index
    %c0_89 = arith.constant 0 : index
    %82 = vector.load %arg8[%c0_86, %c1_87, %c17_88, %c0_89] : memref<1x18x18x32xbf16, #tpu.memory_space<vmem>>, vector<1x16x1x32xbf16>
    tpu.vector_store %arg8[%c0_86, %c1_87, %c17_88, %c0_89], %78 {strides = array<i32>} : memref<1x18x18x32xbf16, #tpu.memory_space<vmem>>, vector<1x16x1x32xbf16>,
    %83 = vector.shape_cast %76 : vector<256x32xbf16> to vector<1x16x16x32xbf16>
    %c0_90 = arith.constant 0 : index
    %c1_91 = arith.constant 1 : index
    %c1_92 = arith.constant 1 : index
    %c0_93 = arith.constant 0 : index
    %84 = vector.load %arg8[%c0_90, %c1_91, %c1_92, %c0_93] : memref<1x18x18x32xbf16, #tpu.memory_space<vmem>>, vector<1x16x16x32xbf16>
    tpu.vector_store %arg8[%c0_90, %c1_91, %c1_92, %c0_93], %83 {strides = array<i32>} : memref<1x18x18x32xbf16, #tpu.memory_space<vmem>>, vector<1x16x16x32xbf16>,
    %cst_94 = arith.constant 0.000000e+00 : f32
    %85 = vector.broadcast %cst_94 : f32 to vector<256x32xf32>
    %c0_95 = arith.constant 0 : index
    %c0_96 = arith.constant 0 : index
    %c0_97 = arith.constant 0 : index
    %c0_98 = arith.constant 0 : index
    %86 = vector.load %arg8[%c0_95, %c0_96, %c0_97, %c0_98] : memref<1x18x18x32xbf16, #tpu.memory_space<vmem>>, vector<1x16x16x32xbf16>
    %87 = vector.shape_cast %86 : vector<1x16x16x32xbf16> to vector<256x32xbf16>
    %c0_99 = arith.constant 0 : index
    %c0_100 = arith.constant 0 : index
    %c0_101 = arith.constant 0 : index
    %88 = vector.load %arg5[%c0_99, %c0_100, %c0_101] : memref<9x32x32xbf16, #tpu.memory_space<vmem>>, vector<1x32x32xbf16>
    %89 = vector.shape_cast %88 : vector<1x32x32xbf16> to vector<32x32xbf16>
    %cst_102 = arith.constant dense<0.000000e+00> : vector<256x32xf32>
    %90 = tpu.matmul %87, %89, %cst_102 {dimension_numbers = #tpu.dot_dimension_numbers<[1], [0], [0], [1], [0, 0, 1, 1], [], []>} : vector<256x32xbf16>, vector<32x32xbf16>, vector<256x32xf32> -> vector<256x32xf32>
    %91 = arith.addf %85, %90 : vector<256x32xf32>
    %c0_103 = arith.constant 0 : index
    %c0_104 = arith.constant 0 : index
    %c1_105 = arith.constant 1 : index
    %c0_106 = arith.constant 0 : index
    %92 = vector.load %arg8[%c0_103, %c0_104, %c1_105, %c0_106] : memref<1x18x18x32xbf16, #tpu.memory_space<vmem>>, vector<1x16x16x32xbf16>
    %93 = vector.shape_cast %92 : vector<1x16x16x32xbf16> to vector<256x32xbf16>
    %c1_107 = arith.constant 1 : index
    %c0_108 = arith.constant 0 : index
    %c0_109 = arith.constant 0 : index
    %94 = vector.load %arg5[%c1_107, %c0_108, %c0_109] : memref<9x32x32xbf16, #tpu.memory_space<vmem>>, vector<1x32x32xbf16>
    %95 = vector.shape_cast %94 : vector<1x32x32xbf16> to vector<32x32xbf16>
    %cst_110 = arith.constant dense<0.000000e+00> : vector<256x32xf32>
    %96 = tpu.matmul %93, %95, %cst_110 {dimension_numbers = #tpu.dot_dimension_numbers<[1], [0], [0], [1], [0, 0, 1, 1], [], []>} : vector<256x32xbf16>, vector<32x32xbf16>, vector<256x32xf32> -> vector<256x32xf32>
    %97 = arith.addf %91, %96 : vector<256x32xf32>
    %c0_111 = arith.constant 0 : index
    %c0_112 = arith.constant 0 : index
    %c2_113 = arith.constant 2 : index
    %c0_114 = arith.constant 0 : index
    %98 = vector.load %arg8[%c0_111, %c0_112, %c2_113, %c0_114] : memref<1x18x18x32xbf16, #tpu.memory_space<vmem>>, vector<1x16x16x32xbf16>
    %99 = vector.shape_cast %98 : vector<1x16x16x32xbf16> to vector<256x32xbf16>
    %c2_115 = arith.constant 2 : index
    %c0_116 = arith.constant 0 : index
    %c0_117 = arith.constant 0 : index
    %100 = vector.load %arg5[%c2_115, %c0_116, %c0_117] : memref<9x32x32xbf16, #tpu.memory_space<vmem>>, vector<1x32x32xbf16>
    %101 = vector.shape_cast %100 : vector<1x32x32xbf16> to vector<32x32xbf16>
    %cst_118 = arith.constant dense<0.000000e+00> : vector<256x32xf32>
    %102 = tpu.matmul %99, %101, %cst_118 {dimension_numbers = #tpu.dot_dimension_numbers<[1], [0], [0], [1], [0, 0, 1, 1], [], []>} : vector<256x32xbf16>, vector<32x32xbf16>, vector<256x32xf32> -> vector<256x32xf32>
    %103 = arith.addf %97, %102 : vector<256x32xf32>
    %c0_119 = arith.constant 0 : index
    %c1_120 = arith.constant 1 : index
    %c0_121 = arith.constant 0 : index
    %c0_122 = arith.constant 0 : index
    %104 = vector.load %arg8[%c0_119, %c1_120, %c0_121, %c0_122] : memref<1x18x18x32xbf16, #tpu.memory_space<vmem>>, vector<1x16x16x32xbf16>
    %105 = vector.shape_cast %104 : vector<1x16x16x32xbf16> to vector<256x32xbf16>
    %c3_123 = arith.constant 3 : index
    %c0_124 = arith.constant 0 : index
    %c0_125 = arith.constant 0 : index
    %106 = vector.load %arg5[%c3_123, %c0_124, %c0_125] : memref<9x32x32xbf16, #tpu.memory_space<vmem>>, vector<1x32x32xbf16>
    %107 = vector.shape_cast %106 : vector<1x32x32xbf16> to vector<32x32xbf16>
    %cst_126 = arith.constant dense<0.000000e+00> : vector<256x32xf32>
    %108 = tpu.matmul %105, %107, %cst_126 {dimension_numbers = #tpu.dot_dimension_numbers<[1], [0], [0], [1], [0, 0, 1, 1], [], []>} : vector<256x32xbf16>, vector<32x32xbf16>, vector<256x32xf32> -> vector<256x32xf32>
    %109 = arith.addf %103, %108 : vector<256x32xf32>
    %c0_127 = arith.constant 0 : index
    %c1_128 = arith.constant 1 : index
    %c1_129 = arith.constant 1 : index
    %c0_130 = arith.constant 0 : index
    %110 = vector.load %arg8[%c0_127, %c1_128, %c1_129, %c0_130] : memref<1x18x18x32xbf16, #tpu.memory_space<vmem>>, vector<1x16x16x32xbf16>
    %111 = vector.shape_cast %110 : vector<1x16x16x32xbf16> to vector<256x32xbf16>
    %c4_131 = arith.constant 4 : index
    %c0_132 = arith.constant 0 : index
    %c0_133 = arith.constant 0 : index
    %112 = vector.load %arg5[%c4_131, %c0_132, %c0_133] : memref<9x32x32xbf16, #tpu.memory_space<vmem>>, vector<1x32x32xbf16>
    %113 = vector.shape_cast %112 : vector<1x32x32xbf16> to vector<32x32xbf16>
    %cst_134 = arith.constant dense<0.000000e+00> : vector<256x32xf32>
    %114 = tpu.matmul %111, %113, %cst_134 {dimension_numbers = #tpu.dot_dimension_numbers<[1], [0], [0], [1], [0, 0, 1, 1], [], []>} : vector<256x32xbf16>, vector<32x32xbf16>, vector<256x32xf32> -> vector<256x32xf32>
    %115 = arith.addf %109, %114 : vector<256x32xf32>
    %c0_135 = arith.constant 0 : index
    %c1_136 = arith.constant 1 : index
    %c2_137 = arith.constant 2 : index
    %c0_138 = arith.constant 0 : index
    %116 = vector.load %arg8[%c0_135, %c1_136, %c2_137, %c0_138] : memref<1x18x18x32xbf16, #tpu.memory_space<vmem>>, vector<1x16x16x32xbf16>
    %117 = vector.shape_cast %116 : vector<1x16x16x32xbf16> to vector<256x32xbf16>
    %c5_139 = arith.constant 5 : index
    %c0_140 = arith.constant 0 : index
    %c0_141 = arith.constant 0 : index
    %118 = vector.load %arg5[%c5_139, %c0_140, %c0_141] : memref<9x32x32xbf16, #tpu.memory_space<vmem>>, vector<1x32x32xbf16>
    %119 = vector.shape_cast %118 : vector<1x32x32xbf16> to vector<32x32xbf16>
    %cst_142 = arith.constant dense<0.000000e+00> : vector<256x32xf32>
    %120 = tpu.matmul %117, %119, %cst_142 {dimension_numbers = #tpu.dot_dimension_numbers<[1], [0], [0], [1], [0, 0, 1, 1], [], []>} : vector<256x32xbf16>, vector<32x32xbf16>, vector<256x32xf32> -> vector<256x32xf32>
    %121 = arith.addf %115, %120 : vector<256x32xf32>
    %c0_143 = arith.constant 0 : index
    %c2_144 = arith.constant 2 : index
    %c0_145 = arith.constant 0 : index
    %c0_146 = arith.constant 0 : index
    %122 = vector.load %arg8[%c0_143, %c2_144, %c0_145, %c0_146] : memref<1x18x18x32xbf16, #tpu.memory_space<vmem>>, vector<1x16x16x32xbf16>
    %123 = vector.shape_cast %122 : vector<1x16x16x32xbf16> to vector<256x32xbf16>
    %c6_147 = arith.constant 6 : index
    %c0_148 = arith.constant 0 : index
    %c0_149 = arith.constant 0 : index
    %124 = vector.load %arg5[%c6_147, %c0_148, %c0_149] : memref<9x32x32xbf16, #tpu.memory_space<vmem>>, vector<1x32x32xbf16>
    %125 = vector.shape_cast %124 : vector<1x32x32xbf16> to vector<32x32xbf16>
    %cst_150 = arith.constant dense<0.000000e+00> : vector<256x32xf32>
    %126 = tpu.matmul %123, %125, %cst_150 {dimension_numbers = #tpu.dot_dimension_numbers<[1], [0], [0], [1], [0, 0, 1, 1], [], []>} : vector<256x32xbf16>, vector<32x32xbf16>, vector<256x32xf32> -> vector<256x32xf32>
    %127 = arith.addf %121, %126 : vector<256x32xf32>
    %c0_151 = arith.constant 0 : index
    %c2_152 = arith.constant 2 : index
    %c1_153 = arith.constant 1 : index
    %c0_154 = arith.constant 0 : index
    %128 = vector.load %arg8[%c0_151, %c2_152, %c1_153, %c0_154] : memref<1x18x18x32xbf16, #tpu.memory_space<vmem>>, vector<1x16x16x32xbf16>
    %129 = vector.shape_cast %128 : vector<1x16x16x32xbf16> to vector<256x32xbf16>
    %c7_155 = arith.constant 7 : index
    %c0_156 = arith.constant 0 : index
    %c0_157 = arith.constant 0 : index
    %130 = vector.load %arg5[%c7_155, %c0_156, %c0_157] : memref<9x32x32xbf16, #tpu.memory_space<vmem>>, vector<1x32x32xbf16>
    %131 = vector.shape_cast %130 : vector<1x32x32xbf16> to vector<32x32xbf16>
    %cst_158 = arith.constant dense<0.000000e+00> : vector<256x32xf32>
    %132 = tpu.matmul %129, %131, %cst_158 {dimension_numbers = #tpu.dot_dimension_numbers<[1], [0], [0], [1], [0, 0, 1, 1], [], []>} : vector<256x32xbf16>, vector<32x32xbf16>, vector<256x32xf32> -> vector<256x32xf32>
    %133 = arith.addf %127, %132 : vector<256x32xf32>
    %c0_159 = arith.constant 0 : index
    %c2_160 = arith.constant 2 : index
    %c2_161 = arith.constant 2 : index
    %c0_162 = arith.constant 0 : index
    %134 = vector.load %arg8[%c0_159, %c2_160, %c2_161, %c0_162] : memref<1x18x18x32xbf16, #tpu.memory_space<vmem>>, vector<1x16x16x32xbf16>
    %135 = vector.shape_cast %134 : vector<1x16x16x32xbf16> to vector<256x32xbf16>
    %c8_163 = arith.constant 8 : index
    %c0_164 = arith.constant 0 : index
    %c0_165 = arith.constant 0 : index
    %136 = vector.load %arg5[%c8_163, %c0_164, %c0_165] : memref<9x32x32xbf16, #tpu.memory_space<vmem>>, vector<1x32x32xbf16>
    %137 = vector.shape_cast %136 : vector<1x32x32xbf16> to vector<32x32xbf16>
    %cst_166 = arith.constant dense<0.000000e+00> : vector<256x32xf32>
    %138 = tpu.matmul %135, %137, %cst_166 {dimension_numbers = #tpu.dot_dimension_numbers<[1], [0], [0], [1], [0, 0, 1, 1], [], []>} : vector<256x32xbf16>, vector<32x32xbf16>, vector<256x32xf32> -> vector<256x32xf32>
    %139 = arith.addf %133, %138 : vector<256x32xf32>
    %c0_167 = arith.constant 0 : index
    %c0_168 = arith.constant 0 : index
    %140 = vector.load %arg6[%c0_167, %c0_168] : memref<1x32xf32, #tpu.memory_space<vmem>>, vector<1x32xf32>
    %141 = vector.broadcast %140 : vector<1x32xf32> to vector<256x32xf32>
    %142 = arith.addf %139, %141 : vector<256x32xf32>
    %143 = arith.addf %72, %142 : vector<256x32xf32>
    %cst_169 = arith.constant 0.000000e+00 : f32
    %144 = vector.broadcast %cst_169 : f32 to vector<256x32xf32>
    %145 = arith.cmpf oge, %143, %144 : vector<256x32xf32>
    %cst_170 = arith.constant 2.000000e-01 : f32
    %146 = vector.broadcast %cst_170 : f32 to vector<256x32xf32>
    %147 = arith.mulf %146, %143 : vector<256x32xf32>
    %148 = arith.select %145, %143, %147 : vector<256x32xi1>, vector<256x32xf32>
    %cst_171 = arith.constant 1.000000e+00 : f32
    %149 = vector.broadcast %cst_171 : f32 to vector<256x32xf32>
    %150 = arith.subf %149, %64 : vector<256x32xf32>
    %151 = arith.mulf %150, %74 : vector<256x32xf32>
    %152 = arith.mulf %64, %148 : vector<256x32xf32>
    %153 = arith.addf %151, %152 : vector<256x32xf32>
    %154 = vector.shape_cast %153 : vector<256x32xf32> to vector<1x16x16x32xf32>
    %c0_172 = arith.constant 0 : index
    %c0_173 = arith.constant 0 : index
    %c0_174 = arith.constant 0 : index
    %c0_175 = arith.constant 0 : index
    %155 = vector.load %arg7[%c0_172, %c0_173, %c0_174, %c0_175] : memref<1x16x16x32xf32, #tpu.memory_space<vmem>>, vector<1x16x16x32xf32>
    tpu.vector_store %arg7[%c0_172, %c0_173, %c0_174, %c0_175], %154 {strides = array<i32>} : memref<1x16x16x32xf32, #tpu.memory_space<vmem>>, vector<1x16x16x32xf32>,
    return
  }
  func.func @transform_0(%arg0: i32) -> (i32, i32, i32, i32) {
    %c0_i32 = arith.constant 0 : i32
    %c0_i32_0 = arith.constant 0 : i32
    %c0_i32_1 = arith.constant 0 : i32
    %c0_i32_2 = arith.constant 0 : i32
    return %arg0, %c0_i32, %c0_i32_0, %c0_i32_1 : i32, i32, i32, i32
  }
  func.func @transform_1(%arg0: i32) -> (i32, i32, i32, i32) {
    %c0_i32 = arith.constant 0 : i32
    %c0_i32_0 = arith.constant 0 : i32
    %c0_i32_1 = arith.constant 0 : i32
    %c0_i32_2 = arith.constant 0 : i32
    return %arg0, %c0_i32, %c0_i32_0, %c0_i32_1 : i32, i32, i32, i32
  }
  func.func @transform_2(%arg0: i32) -> (i32, i32, i32) {
    %c0_i32 = arith.constant 0 : i32
    %c0_i32_0 = arith.constant 0 : i32
    %c0_i32_1 = arith.constant 0 : i32
    %c0_i32_2 = arith.constant 0 : i32
    return %c0_i32, %c0_i32_0, %c0_i32_1 : i32, i32, i32
  }
  func.func @transform_3(%arg0: i32) -> (i32, i32) {
    %c0_i32 = arith.constant 0 : i32
    %c0_i32_0 = arith.constant 0 : i32
    %c0_i32_1 = arith.constant 0 : i32
    return %c0_i32, %c0_i32_0 : i32, i32
  }
  func.func @transform_4(%arg0: i32) -> (i32, i32, i32) {
    %c0_i32 = arith.constant 0 : i32
    %c0_i32_0 = arith.constant 0 : i32
    %c0_i32_1 = arith.constant 0 : i32
    %c0_i32_2 = arith.constant 0 : i32
    return %c0_i32, %c0_i32_0, %c0_i32_1 : i32, i32, i32
  }
  func.func @transform_5(%arg0: i32) -> (i32, i32) {
    %c0_i32 = arith.constant 0 : i32
    %c0_i32_0 = arith.constant 0 : i32
    %c0_i32_1 = arith.constant 0 : i32
    return %c0_i32, %c0_i32_0 : i32, i32
  }
  func.func @transform_6(%arg0: i32) -> (i32, i32, i32, i32) {
    %c0_i32 = arith.constant 0 : i32
    %c0_i32_0 = arith.constant 0 : i32
    %c0_i32_1 = arith.constant 0 : i32
    %c0_i32_2 = arith.constant 0 : i32
    return %arg0, %c0_i32, %c0_i32_0, %c0_i32_1 : i32, i32, i32, i32
  }
}

</mosaic_0001>

<bundles_post_ra>
// kernel: convgru_forward.1
= control target key start
LH: loop header
LB: loop body
LE: loop exit
PB: predicated region body
PF: predicated region fallthrough
CT: control target
= control target key end

     0   :  { %11 = vsyncpa [#allocation4], 0  ;;  %s15876_s0 = inlined_call_operand.vmem [shape: bf16[2,18,18,128], index: 0, kind: input, shape index: {}]   ;;  %s15877_s1 = inlined_call_operand.vmem [shape: f32[2,16,16,32], index: 1, kind: input, shape index: {}]   ;;  %s15878_s2 = inlined_call_operand.vmem [shape: bf16[9,128,128], index: 2, kind: input, shape index: {}]   ;;  %s15879_s3 = inlined_call_operand.vmem [shape: f32[1,128], index: 3, kind: input, shape index: {}]   ;;  %s15880_s4 = inlined_call_operand.vmem [shape: bf16[9,32,32], index: 4, kind: input, shape index: {}]   ;;  %s15881_s5 = inlined_call_operand.vmem [shape: f32[1,32], index: 5, kind: input, shape index: {}]   ;;  %s15882_s6 = inlined_call_operand.hbm [shape: f32[2,16,16,32], index: 6, kind: output, shape index: {}]  }
   0x1   :  { %13 = vsyncpa [#allocation4 + $0x1], 0  ;;  %s12090_s21 = smov 0   ;;  %s12092_s22 = smov 0  }
   0x2   :  { %s12094_s23 = smov 0   ;;  %s12096_s24 = smov 0  }
   0x3 LB: > { %s12111_s25 = sadd.s32 4294967295, %s12047_s24   ;;  %s10176_s26 = sadd.s32 4294967294, %s12047_s24   ;;  %s12047_s24 = sphi %s12096_s24, %s16344_s24   ;;  %s12043_s23 = sphi %s12094_s23, %s16343_s23   ;;  %s12039_s22 = sphi %s12092_s22, %s16342_s22   ;;  %s12035_s21 = sphi %s12090_s21, %s16341_s21  }
   0x4   : > { %s12115_s27 = sadd.s32 1, %s12047_s24   ;;  %s162_s28 = sadd.s32 1, %s12043_s23 }
   0x5   : > { %s159_s29 = ssub.s32 %s12047_s24, %s12115_s27  ;;  %p172_p0 = scmp.ne.s32.totalorder %s12043_s23, %s12039_s22 }
   0x6   : > { %p160_p1 = scmp.eq.s32.totalorder %s159_s29, 0  ;;  %p173_p2 = scmp.eq.s32.totalorder %s12111_s25, 1 }
   0x7   : > { %p178_p3 = scmp.ne.s32.totalorder %s12039_s22, %s12035_s21  ;;  %p179_p4 = scmp.eq.s32.totalorder %s10176_s26, 1 }
   0x8   : > { %s12126_s30 = scalar_select %p160_p1, %s12043_s23, %s162_s28  }
   0x9   : > { %p12128_p5 = por %p173_p2, %p172_p0  ;;  %p12132_p6 = por %p179_p4, %p178_p3 }
   0xa   : > { %p10179_p7 = scmp.ge.s32.totalorder %s12047_s24, 1  ;;  %p225_p8 = scmp.lt.s32.totalorder %s12047_s24, 3 }
   0xc   : > { %p226_p9 = pnand %p10179_p7, %p225_p8 }
   0xe   : > { %229 = sbr.rel (%p226_p9) target bundleno = 2056 (0x808), region = 44 }
  0x13   : > { %v11557_v0 = vld [vmem:[%s15878_s2 + $0x78] sm:$0xff]  ;;  %p260_p10 = scmp.lt.s32.totalorder %s12111_s25, 1  ;;  %v11556_v2 = vld [vmem:[%s15878_s2 + $0x70] sm:$0xff]  ;;  %v11555_v4 = vld [vmem:[%s15878_s2 + $0x68] sm:$0xff]  ;;  %vm335_vm0 = vsmask.f32 3328 }
  0x14   : > { %v11549_v1 = vld [vmem:[%s15878_s2 + $0x38] sm:$0xff]  ;;  %11713 = vmatpush.bf16.msra.mxu2 %v11557_v0  ;;  %v11548_v3 = vld [vmem:[%s15878_s2 + $0x30] sm:$0xff]  ;;  %851 = vmatpush.bf16.msra.mxu0 %v11557_v0  ;;  %v11547_v5 = vld [vmem:[%s15878_s2 + $0x28] sm:$0xff]  ;;  %vm336_vm1 = vsmask.f32 7440  ;;  %vm1221_vm3 = vcmask 1042432  }
  0x15   : > { %11721 = vmatpush.bf16.msra.mxu3 %v11549_v1  ;;  %s12152_s17 = scalar_select %p260_p10, %s12111_s25, 1  ;;  %1084 = vmatpush.bf16.msra.mxu1 %v11549_v1  ;;  %v11554_v14 = vld [vmem:[%s15878_s2 + $0x60] sm:$0xff]  ;;  %v11553_v30 = vld [vmem:[%s15878_s2 + $0x58] sm:$0xff]  ;;  %v11552_v38 = vld [vmem:[%s15878_s2 + $0x50] sm:$0xff]  ;;  %vm1222_vm4 = vcmask 1046532   ;;  %vm4855_vm9 = vcmask 253952  }
  0x16   : > { %v11546_v15 = vld [vmem:[%s15878_s2 + $0x20] sm:$0xff]  ;;  %v11545_v31 = vld [vmem:[%s15878_s2 + $0x18] sm:$0xff]  ;;  %v11544_v41 = vld [vmem:[%s15878_s2 + $0x10] sm:$0xff]  ;;  %vm4863_vm6 = vsmask.f32 256  ;;  %s12050_s20 = smov 96  }
  0x17   : > { %s11729_s18 = smul.u32 216, %s12152_s17  ;;  %vm12201_vm2 = vmor %vm335_vm0, %vm336_vm1  ;;  %v11551_v56 = vld [vmem:[%s15878_s2 + $0x48] sm:$0xff]  ;;  %s11525_s13 = sshll.u32 %s12152_s17, 8  ;;  %vm4963_vm7 = vsmask.f32 4368  ;;  %vm4852_vm11 = vcmask 257024  }
  0x18   : > { %11714 = vmatpush.bf16.msra.mxu2 %v11556_v2  ;;  %852 = vmatpush.bf16.msra.mxu0 %v11556_v2  ;;  %v11543_v57 = vld [vmem:[%s15878_s2 + $0x8] sm:$0xff]  ;;  %vm12509_vm5 = vmor %vm1221_vm3, %vm1222_vm4  ;;  %s13144_s16 = scalar_lea.vmem %s15877_s1, %s11525_s13  ;;  %s12049_s17 = smov 32   ;;  %vm4913_vm12 = vsmask.f32 7938  ;;  %vm5996_vm14 = vcmask 261120  }
  0x19   : > { %11722 = vmatpush.bf16.msra.mxu3 %v11548_v3  ;;  %s12164_s10 = scalar_lea.vmem %s15876_s0, %s11729_s18  ;;  %1085 = vmatpush.bf16.msra.mxu1 %v11548_v3  ;;  %vm13485_vm8 = vmor %vm4863_vm6, %vm4963_vm7  ;;  %s12052_s11 = smov 64  }
  0x1a   : > { %v287_v6 = vld [vmem:[%s12164_s10 + $0x60] sm:$0xf]  ;;  %v288_v7 = vld [vmem:[%s12164_s10 + $0x64] sm:$0xf]  ;;  %v327_v20 = vld [vmem:[%s12164_s10 + $0x68] sm:$0x1] }
  0x1b   : > { %v531_v8 = vshrl.u32 %v287_v6, 16  ;;  %v534_v9 = vshll.u32 %v287_v6, 16  ;;  %v540_v10 = vshll.u32 %v288_v7, 16  ;;  %v544_v11 = vshrl.u32 %v288_v7, 16  ;;  %v271_v12 = vld [vmem:[%s12164_s10] sm:$0xf]  ;;  %vm13637_vm10 = vmand %vm4855_vm9, %vm4863_vm6 }
  0x1c   : > { %v12170_v13 = vld [vmem:[%s12164_s10 + $0x4] sm:$0xf]  ;;  %11715 = vmatpush.bf16.msra.mxu2 %v11555_v4  ;;  %853 = vmatpush.bf16.msra.mxu0 %v11555_v4  ;;  %v339_v21 = vshrl.u32 %v271_v12, 16  ;;  %v342_v22 = vshll.u32 %v271_v12, 16  ;;  %v12183_v24 = vld [vmem:[%s12164_s10 + $0x8] sm:$0x1]  ;;  %vm13712_vm13 = vmand %vm4855_vm9, %vm4913_vm12 }
  0x1d   : > { %11723 = vmatpush.bf16.msra.mxu3 %v11547_v5  ;;  %v533_v16 = vrot.slane %v531_v8, 4  ;;  %v536_v17 = vrot.slane %v534_v9, 5  ;;  %v12178_v18 = vrot.slane %v540_v10, 5  ;;  %v546_v19 = vrot.slane %v544_v11, 4  ;;  %1086 = vmatpush.bf16.msra.mxu1 %v11547_v5  ;;  %v289_v40 = vld [vmem:[%s12164_s10 + $0x6c] sm:$0xf]  ;;  %vm13734_vm15 = vmand %vm4852_vm11, %vm4913_vm12 }
  0x1e   : > { %v348_v23 = vshll.u32 %v12170_v13, 16  ;;  %v352_v25 = vshrl.u32 %v12170_v13, 16  ;;  %v341_v27 = vrot.slane %v339_v21, 4  ;;  %v344_v28 = vrot.slane %v342_v22, 5  ;;  %v290_v45 = vld [vmem:[%s12164_s10 + $0x70] sm:$0xf] }
  0x1f   : > { %v537_v26 = vor.u32 %v536_v17, %v533_v16  ;;  %v547_v32 = vor.u32 %v546_v19, %v12178_v18  ;;  %v550_v33 = vshll.u32 %v327_v20, 16  ;;  %v358_v36 = vshll.u32 %v12183_v24, 16  ;;  %v273_v49 = vld [vmem:[%s12164_s10 + $0xc] sm:$0xf]  ;;  %v12208_v51 = vld [vmem:[%s12164_s10 + $0x10] sm:$0xf] }
  0x20   : > { %v350_v29 = vrot.slane %v348_v23, 5  ;;  %11716 = vmatpush.bf16.msra.mxu2 %v11554_v14  ;;  %v354_v34 = vrot.slane %v352_v25, 4  ;;  %854 = vmatpush.bf16.msra.mxu0 %v11554_v14  ;;  %v345_v35 = vor.u32 %v344_v28, %v341_v27  ;;  %v555_v50 = vshrl.u32 %v289_v40, 16  ;;  %v11550_v7 = vld [vmem:[%s15878_s2 + $0x40] sm:$0xff]  ;;  %v328_v11 = vld [vmem:[%s12164_s10 + $0x74] sm:$0x1] }
  0x21   : > { %11724 = vmatpush.bf16.msra.mxu3 %v11546_v15  ;;  %1087 = vmatpush.bf16.msra.mxu1 %v11546_v15  ;;  %v538_v39 = vrot.slane %v537_v26, 4  ;;  %v548_v43 = vrot.slane %v547_v32, 4  ;;  %v552_v44 = vrot.slane %v550_v33, 5  ;;  %v360_v48 = vrot.slane %v358_v36, 5  ;;  %v11542_v8 = vld [vmem:[%s15878_s2] sm:$0xff]  ;;  %v11565_v17 = vld [vmem:[%s15878_s2 + $0xb8] sm:$0xff] }
  0x22   : > { %v355_v37 = vor.u32 %v354_v34, %v350_v29  ;;  %v346_v46 = vrot.slane %v345_v35, 4  ;;  %v558_v53 = vshll.u32 %v289_v40, 16  ;;  %v564_v54 = vshll.u32 %v290_v45, 16  ;;  %v12245_v19 = vld [vmem:[%s12164_s10 + $0x14] sm:$0x1]  ;;  %v11534_v21 = vld [vmem:[%s12164_s10 + $0x60] sm:$0xff] }
  0x23   : > { %v543_v52 = vsel %vm12201_vm2, %v538_v39, %v12178_v18  ;;  %v568_v55 = vshrl.u32 %v290_v45, 16  ;;  %v553_v58 = vsel %vm12201_vm2, %v548_v43, %v552_v44  ;;  %v363_v59 = vshrl.u32 %v273_v49, 16  ;;  %v11589_v18 = vld [vmem:[%s15878_s2 + $0xf8] sm:$0xff]  ;;  %v11526_v27 = vld [vmem:[%s12164_s10] sm:$0xff]  ;;  %v11564_v34 = vld [vmem:[%s15878_s2 + $0xb0] sm:$0xff]  ;;  %s257_s12 = sand.u32 1, %s12039_s22  }
  0x24   : > { %11717 = vmatpush.bf16.msra.mxu2 %v11553_v30  ;;  %855 = vmatpush.bf16.msra.mxu0 %v11553_v30  ;;  %v356_v47 = vrot.slane %v355_v37, 4  ;;  %v366_v60 = vshll.u32 %v273_v49, 16  ;;  %v351_v61 = vsel %vm12201_vm2, %v346_v46, %v350_v29  ;;  %v372_v63 = vshll.u32 %v12208_v51, 16  ;;  %v291_v29 = vld [vmem:[%s12164_s10 + $0x78] sm:$0xf]  ;;  %v11588_v35 = vld [vmem:[%s15878_s2 + $0xf0] sm:$0xff] }
  0x25   : > { %11725 = vmatpush.bf16.msra.mxu3 %v11545_v31  ;;  %1088 = vmatpush.bf16.msra.mxu1 %v11545_v31  ;;  %v376_v0 = vshrl.u32 %v12208_v51, 16  ;;  %v755_v1 = vunpack.c.l.b16 %v543_v52  ;;  %v557_v2 = vrot.slane %v555_v50, 4  ;;  %v756_v3 = vunpack.c.l.b16 %v553_v58  ;;  %v11597_v30 = vld [vmem:[%s15878_s2 + $0x138] sm:$0xff]  ;;  %v11563_v49 = vld [vmem:[%s15878_s2 + $0xa8] sm:$0xff]  ;;  %v329_v58 = vld [vmem:[%s12164_s10 + $0x80] sm:$0x1] }
  0x26   : > { %v361_v62 = vsel %vm12201_vm2, %v356_v47, %v360_v48  ;;  %v560_v4 = vrot.slane %v558_v53, 5  ;;  %v12227_v5 = vrot.slane %v564_v54, 5  ;;  %v570_v6 = vrot.slane %v568_v55, 4  ;;  %v292_v33 = vld [vmem:[%s12164_s10 + $0x7c] sm:$0xf]  ;;  %v11596_v48 = vld [vmem:[%s15878_s2 + $0x130] sm:$0xff] }
  0x27   : > { %v739_v9 = vunpack.c.l.b16 %v351_v61  ;;  %v740_v10 = vunpack.c.l.b16 %v361_v62  ;;  %v365_v12 = vrot.slane %v363_v59, 4  ;;  %v368_v14 = vrot.slane %v366_v60, 5  ;;  %v275_v45 = vld [vmem:[%s12164_s10 + $0x18] sm:$0xf]  ;;  %v12271_v50 = vld [vmem:[%s12164_s10 + $0x1c] sm:$0xf] }
  0x28   : > { %11718 = vmatpush.bf16.msra.mxu2 %v11552_v38  ;;  %856 = vmatpush.bf16.msra.mxu0 %v11552_v38  ;;  %v12236_v15 = vrot.slane %v372_v63, 5  ;;  %v378_v16 = vrot.slane %v376_v0, 4  ;;  %v779_v20 = vpack.c.b16 %v756_v3, %v755_v1  ;;  %v561_v22 = vor.u32 %v560_v4, %v557_v2  ;;  %v11587_v52 = vld [vmem:[%s15878_s2 + $0xe8] sm:$0xff]  ;;  %s10180_s13 = sshll.u32 %s257_s12, 8  ;;  %s11712_s15 = sshll.u32 %s12111_s25, 8 }
  0x29   : > { %11726 = vmatpush.bf16.msra.mxu3 %v11544_v41  ;;  %1089 = vmatpush.bf16.msra.mxu1 %v11544_v41  ;;  %v571_v23 = vor.u32 %v570_v6, %v12227_v5  ;;  %v574_v25 = vshll.u32 %v328_v11, 16  ;;  %v771_v26 = vpack.c.b16 %v740_v10, %v739_v9  ;;  %v369_v28 = vor.u32 %v368_v14, %v365_v12  ;;  %v11595_v2 = vld [vmem:[%s15878_s2 + $0x128] sm:$0xff]  ;;  %s15637_s14 = scalar_lea.vmem [#allocation3], %s10180_s13  ;;  %s10087_s25 = scalar_lea.sflag [#allocation4], %s257_s12 }
  0x2a   : > { %v379_v31 = vor.u32 %v378_v16, %v12236_v15  ;;  %v382_v32 = vshll.u32 %v12245_v19, 16  ;;  %v562_v36 = vrot.slane %v561_v22, 4  ;;  %v579_v39 = vshrl.u32 %v291_v29, 16 }
  0x2b   : > { %v572_v37 = vrot.slane %v571_v23, 4  ;;  %v576_v38 = vrot.slane %v574_v25, 5  ;;  %v370_v40 = vrot.slane %v369_v28, 4  ;;  %v582_v41 = vshll.u32 %v291_v29, 16  ;;  %v293_v28 = vld [vmem:[%s12164_s10 + $0x84] sm:$0xf] }
  0x2c   : > { %11719 = vmatpush.bf16.msra.mxu2 %v11551_v56  ;;  %857 = vmatpush.bf16.msra.mxu0 %v11551_v56  ;;  %v588_v43 = vshll.u32 %v292_v33, 16  ;;  %v592_v44 = vshrl.u32 %v292_v33, 16  ;;  %v380_v46 = vrot.slane %v379_v31, 4  ;;  %v384_v47 = vrot.slane %v382_v32, 5  ;;  %v294_v29 = vld [vmem:[%s12164_s10 + $0x88] sm:$0xf] }
  0x2d   : > { %11727 = vmatpush.bf16.msra.mxu3 %v11543_v57  ;;  %1090 = vmatpush.bf16.msra.mxu1 %v11543_v57  ;;  %v567_v53 = vsel %vm12201_vm2, %v562_v36, %v12227_v5  ;;  %v577_v54 = vsel %vm12201_vm2, %v572_v37, %v576_v38  ;;  %v581_v55 = vrot.slane %v579_v39, 4  ;;  %v387_v56 = vshrl.u32 %v275_v45, 16  ;;  %v277_v31 = vld [vmem:[%s12164_s10 + $0x24] sm:$0xf]  ;;  %v12307_v33 = vld [vmem:[%s12164_s10 + $0x28] sm:$0xf] }
  0x2e   : > { %v375_v57 = vsel %vm12201_vm2, %v370_v40, %v12236_v15  ;;  %v584_v59 = vrot.slane %v582_v41, 5  ;;  %v590_v60 = vrot.slane %v588_v43, 5  ;;  %v594_v61 = vrot.slane %v592_v44, 4  ;;  %v12293_v15 = vld [vmem:[%s12164_s10 + $0x20] sm:$0x1] }
  0x2f   : > { %v385_v62 = vsel %vm12201_vm2, %v380_v46, %v384_v47  ;;  %v390_v63 = vshll.u32 %v275_v45, 16  ;;  %v396_v0 = vshll.u32 %v12271_v50, 16  ;;  %v400_v1 = vshrl.u32 %v12271_v50, 16 }
  0x30   : > { %11720 = vmatpush.bf16.msra.mxu2 %v11550_v7  ;;  %858 = vmatpush.bf16.msra.mxu0 %v11550_v7  ;;  %v757_v3 = vunpack.c.l.b16 %v567_v53  ;;  %v758_v4 = vunpack.c.l.b16 %v577_v54  ;;  %v598_v5 = vshll.u32 %v329_v58, 16  ;;  %v741_v6 = vunpack.c.l.b16 %v375_v57 }
  0x31   : > { %11728 = vmatpush.bf16.msra.mxu3 %v11542_v8  ;;  %1091 = vmatpush.bf16.msra.mxu1 %v11542_v8  ;;  %v742_v7 = vunpack.c.l.b16 %v385_v62  ;;  %v585_v8 = vor.u32 %v584_v59, %v581_v55  ;;  %v389_v9 = vrot.slane %v387_v56, 4  ;;  %v595_v10 = vor.u32 %v594_v61, %v590_v60  ;;  %v330_v59 = vld [vmem:[%s12164_s10 + $0x8c] sm:$0x1] }
  0x32   : > { %v392_v11 = vrot.slane %v390_v63, 5  ;;  %v398_v12 = vrot.slane %v396_v0, 5  ;;  %v402_v14 = vrot.slane %v400_v1, 4  ;;  %v780_v16 = vpack.c.b16 %v758_v4, %v757_v3 }
  0x33   : > { %899 = vmatmul.bf16.vlgmr.msra.gmra.mxu2 %v779_v20  ;;  %859 = vmatmul.bf16.vlgmr.msra.gmra.mxu0 %v771_v26  ;;  %v11527_v20 = vld [vmem:[%s12164_s10 + $0xc] sm:$0xff]  ;;  %v600_v22 = vrot.slane %v598_v5, 5  ;;  %v596_v23 = vrot.slane %v595_v10, 4  ;;  %v603_v40 = vshrl.u32 %v293_v28, 16  ;;  %v606_v41 = vshll.u32 %v293_v28, 16 }
  0x34   : > { %1465 = vmatpush.bf16.msrb.mxu2 %v11565_v17  ;;  %1132 = vmatmul.bf16.vlgmr.msra.gmra.mxu3 %v11534_v21  ;;  %v11535_v17 = vld [vmem:[%s12164_s10 + $0x6c] sm:$0xff]  ;;  %v586_v21 = vrot.slane %v585_v8, 4  ;;  %v393_v25 = vor.u32 %v392_v11, %v389_v9  ;;  %v403_v26 = vor.u32 %v402_v14, %v398_v12  ;;  %v612_v43 = vshll.u32 %v294_v29, 16 }
  0x35   : > { %1780 = vmatpush.bf16.msrb.mxu3 %v11589_v18  ;;  %1092 = vmatmul.bf16.vlgmr.msra.gmra.mxu1 %v11526_v27  ;;  %v772_v18 = vpack.c.b16 %v742_v7, %v741_v6  ;;  %v406_v27 = vshll.u32 %v12293_v15, 16  ;;  %v601_v36 = vsel %vm12201_vm2, %v596_v23, %v600_v22  ;;  %v616_v44 = vshrl.u32 %v294_v29, 16  ;;  %v11536_v6 = vld [vmem:[%s12164_s10 + $0x78] sm:$0xff]  ;;  %v295_v14 = vld [vmem:[%s12164_s10 + $0x90] sm:$0xf] }
  0x36   : > { %2462 = vmatpush.bf16.msrb.mxu0 %v11597_v30  ;;  %v11562_v30 = vld [vmem:[%s15878_s2 + $0xa0] sm:$0xff]  ;;  %v591_v32 = vsel %vm12201_vm2, %v586_v21, %v590_v60  ;;  %v394_v37 = vrot.slane %v393_v25, 4  ;;  %v404_v38 = vrot.slane %v403_v26, 4  ;;  %v411_v45 = vshrl.u32 %v277_v31, 16  ;;  %v11561_v25 = vld [vmem:[%s15878_s2 + $0x98] sm:$0xff] }
  0x37   : > { %v408_v39 = vrot.slane %v406_v27, 5  ;;  %v414_v46 = vshll.u32 %v277_v31, 16  ;;  %v420_v47 = vshll.u32 %v12307_v33, 16  ;;  %v605_v55 = vrot.slane %v603_v40, 4  ;;  %v11593_v31 = vld [vmem:[%s15878_s2 + $0x118] sm:$0xff] }
  0x38   : > { %1466 = vmatpush.bf16.msrb.mxu2 %v11564_v34  ;;  %v11586_v34 = vld [vmem:[%s15878_s2 + $0xe0] sm:$0xff]  ;;  %v399_v53 = vsel %vm12201_vm2, %v394_v37, %v398_v12  ;;  %v608_v56 = vrot.slane %v606_v41, 5  ;;  %v614_v57 = vrot.slane %v612_v43, 5  ;;  %v618_v58 = vrot.slane %v616_v44, 4  ;;  %v11528_v12 = vld [vmem:[%s12164_s10 + $0x18] sm:$0xff] }
  0x39   : > { %1781 = vmatpush.bf16.msrb.mxu3 %v11588_v35  ;;  %v11594_v35 = vld [vmem:[%s15878_s2 + $0x120] sm:$0xff]  ;;  %v409_v54 = vsel %vm12201_vm2, %v404_v38, %v408_v39  ;;  %v413_v60 = vrot.slane %v411_v45, 4  ;;  %v416_v61 = vrot.slane %v414_v46, 5  ;;  %v422_v62 = vrot.slane %v420_v47, 5  ;;  %v331_v44 = vld [vmem:[%s12164_s10 + $0x98] sm:$0x1] }
  0x3a   : > { %2463 = vmatpush.bf16.msrb.mxu0 %v11596_v48  ;;  %v424_v48 = vshrl.u32 %v12307_v33, 16  ;;  %v743_v0 = vunpack.c.l.b16 %v399_v53  ;;  %v744_v1 = vunpack.c.l.b16 %v409_v54  ;;  %v609_v4 = vor.u32 %v608_v56, %v605_v55 }
  0x3b   : > { %v622_v5 = vshll.u32 %v330_v59, 16  ;;  %v619_v7 = vor.u32 %v618_v58, %v614_v57  ;;  %v417_v8 = vor.u32 %v416_v61, %v413_v60  ;;  %v627_v26 = vshrl.u32 %v295_v14, 16 }
  0x3c   : > { %1467 = vmatpush.bf16.msrb.mxu2 %v11563_v49  ;;  %v759_v49 = vunpack.c.l.b16 %v591_v32  ;;  %v426_v63 = vrot.slane %v424_v48, 4  ;;  %v773_v11 = vpack.c.b16 %v744_v1, %v743_v0  ;;  %v630_v27 = vshll.u32 %v295_v14, 16  ;;  %v279_v32 = vld [vmem:[%s12164_s10 + $0x30] sm:$0xf]  ;;  %v11537_v0 = vld [vmem:[%s12164_s10 + $0x84] sm:$0xff] }
  0x3d   : > { %1782 = vmatpush.bf16.msrb.mxu3 %v11587_v52  ;;  %v760_v52 = vunpack.c.l.b16 %v601_v36  ;;  %v418_v21 = vrot.slane %v417_v8, 4  ;;  %v629_v39 = vrot.slane %v627_v26, 4  ;;  %v435_v45 = vshrl.u32 %v279_v32, 16  ;;  %v281_v14 = vld [vmem:[%s12164_s10 + $0x3c] sm:$0xf] }
  0x3e   : > { %2464 = vmatpush.bf16.msrb.mxu0 %v11595_v2  ;;  %v12325_v2 = vld [vmem:[%s12164_s10 + $0x2c] sm:$0x1]  ;;  %v427_v9 = vor.u32 %v426_v63, %v422_v62  ;;  %v632_v40 = vrot.slane %v630_v27, 5  ;;  %v438_v46 = vshll.u32 %v279_v32, 16 }
  0x3f   : > { %v781_v3 = vpack.c.b16 %v760_v52, %v759_v49  ;;  %v430_v10 = vshll.u32 %v12325_v2, 16  ;;  %v423_v37 = vsel %vm12201_vm2, %v418_v21, %v422_v62  ;;  %v437_v58 = vrot.slane %v435_v45, 4  ;;  %v12357_v62 = vld [vmem:[%s12164_s10 + $0x38] sm:$0x1]  ;;  %v332_v45 = vld [vmem:[%s12164_s10 + $0xa4] sm:$0x1] }
  0x40   : > { %1468 = vmatpush.bf16.msrb.mxu2 %v11562_v30  ;;  %v428_v22 = vrot.slane %v427_v9, 4  ;;  %v11585_v30 = vld [vmem:[%s15878_s2 + $0xd8] sm:$0xff]  ;;  %v745_v53 = vunpack.c.l.b16 %v423_v37  ;;  %v633_v55 = vor.u32 %v632_v40, %v629_v39  ;;  %v440_v59 = vrot.slane %v438_v46, 5 }
  0x41   : > { %1783 = vmatpush.bf16.msrb.mxu3 %v11586_v34  ;;  %v432_v23 = vrot.slane %v430_v10, 5  ;;  %v12343_v34 = vld [vmem:[%s12164_s10 + $0x34] sm:$0xf]  ;;  %v454_v9 = vshll.u32 %v12357_v62, 16  ;;  %v297_v10 = vld [vmem:[%s12164_s10 + $0x9c] sm:$0xf] }
  0x42   : > { %2465 = vmatpush.bf16.msrb.mxu0 %v11594_v35  ;;  %v444_v47 = vshll.u32 %v12343_v34, 16  ;;  %v448_v48 = vshrl.u32 %v12343_v34, 16  ;;  %v651_v26 = vshrl.u32 %v297_v10, 16  ;;  %v654_v27 = vshll.u32 %v297_v10, 16 }
  0x43   : > { %904 = vmatmul.bf16.gmra.mxu2 %v780_v16  ;;  %864 = vmatmul.bf16.gmra.mxu0 %v772_v18  ;;  %v296_v16 = vld [vmem:[%s12164_s10 + $0x94] sm:$0xf]  ;;  %v624_v18 = vrot.slane %v622_v5, 5  ;;  %v433_v38 = vsel %vm12201_vm2, %v428_v22, %v432_v23 }
  0x44   : > { %1137 = vmatmul.bf16.gmra.mxu3 %v11535_v17  ;;  %v610_v17 = vrot.slane %v609_v4, 4  ;;  %v636_v28 = vshll.u32 %v296_v16, 16  ;;  %v640_v29 = vshrl.u32 %v296_v16, 16  ;;  %1469 = vmatpush.bf16.msrb.mxu2 %v11561_v25  ;;  %v746_v54 = vunpack.c.l.b16 %v433_v38 }
  0x45   : > { %1097 = vmatmul.bf16.gmra.mxu1 %v11527_v20  ;;  %v620_v20 = vrot.slane %v619_v7, 4  ;;  %1784 = vmatpush.bf16.msrb.mxu3 %v11585_v30  ;;  %v446_v60 = vrot.slane %v444_v47, 5  ;;  %v450_v61 = vrot.slane %v448_v48, 4  ;;  %v634_v4 = vrot.slane %v633_v55, 4 }
  0x46   : > { %2466 = vmatpush.bf16.msrb.mxu0 %v11593_v31  ;;  %v615_v35 = vsel %vm12201_vm2, %v610_v17, %v614_v57  ;;  %v638_v41 = vrot.slane %v636_v28, 5  ;;  %v642_v43 = vrot.slane %v640_v29, 4  ;;  %v646_v57 = vshll.u32 %v331_v44, 16  ;;  %v12371_v17 = vld [vmem:[%s12164_s10 + $0x40] sm:$0xf] }
  0x47   : > { %v625_v36 = vsel %vm12201_vm2, %v620_v20, %v624_v18  ;;  %v761_v49 = vunpack.c.l.b16 %v615_v35  ;;  %v774_v1 = vpack.c.b16 %v746_v54, %v745_v53  ;;  %v441_v7 = vor.u32 %v440_v59, %v437_v58  ;;  %v11584_v18 = vld [vmem:[%s15878_s2 + $0xd0] sm:$0xff]  ;;  %v12389_v54 = vld [vmem:[%s12164_s10 + $0x44] sm:$0x1] }
  0x48   : > { %v762_v52 = vunpack.c.l.b16 %v625_v36  ;;  %v643_v56 = vor.u32 %v642_v43, %v638_v41  ;;  %v648_v5 = vrot.slane %v646_v57, 5  ;;  %v451_v8 = vor.u32 %v450_v61, %v446_v60  ;;  %v11592_v20 = vld [vmem:[%s15878_s2 + $0x110] sm:$0xff] }
  0x49   : > { %v639_v16 = vsel %vm12201_vm2, %v634_v4, %v638_v41  ;;  %v442_v22 = vrot.slane %v441_v7, 4  ;;  %v456_v25 = vrot.slane %v454_v9, 5  ;;  %1785 = vmatpush.bf16.msrb.mxu3 %v11584_v18  ;;  %v459_v30 = vshrl.u32 %v281_v14, 16  ;;  %v11538_v59 = vld [vmem:[%s12164_s10 + $0x90] sm:$0xff]  ;;  %v300_v4 = vld [vmem:[%s12164_s10 + $0xac] sm:$0xf] }
  0x4a   : > { %v782_v63 = vpack.c.b16 %v762_v52, %v761_v49  ;;  %v452_v23 = vrot.slane %v451_v8, 4  ;;  %2467 = vmatpush.bf16.msrb.mxu0 %v11592_v20  ;;  %v462_v31 = vshll.u32 %v281_v14, 16  ;;  %v468_v32 = vshll.u32 %v12371_v17, 16  ;;  %v11583_v20 = vld [vmem:[%s15878_s2 + $0xc8] sm:$0xff] }
  0x4b   : > { %v472_v35 = vshrl.u32 %v12371_v17, 16  ;;  %v763_v36 = vunpack.c.l.b16 %v639_v16  ;;  %v447_v38 = vsel %vm12201_vm2, %v442_v22, %v446_v60  ;;  %v653_v40 = vrot.slane %v651_v26, 4  ;;  %v11605_v22 = vld [vmem:[%s15878_s2 + $0x178] sm:$0xff] }
  0x4c   : > { %v457_v39 = vsel %vm12201_vm2, %v452_v23, %v456_v25  ;;  %v656_v41 = vrot.slane %v654_v27, 5  ;;  %v461_v46 = vrot.slane %v459_v30, 4  ;;  %v464_v47 = vrot.slane %v462_v31, 5  ;;  %v283_v23 = vld [vmem:[%s12164_s10 + $0x48] sm:$0xf]  ;;  %2888 = vmatpush.bf16.msrb.mxu1 %v11605_v22  ;;  %v11590_v22 = vld [vmem:[%s15878_s2 + $0x100] sm:$0xff] }
  0x4d   : > { %v470_v48 = vrot.slane %v468_v32, 5  ;;  %v474_v49 = vrot.slane %v472_v35, 4  ;;  %v747_v52 = vunpack.c.l.b16 %v447_v38  ;;  %v748_v53 = vunpack.c.l.b16 %v457_v39  ;;  %v12410_v25 = vld [vmem:[%s12164_s10 + $0x4c] sm:$0xf]  ;;  %1786 = vmatpush.bf16.msrb.mxu3 %v11583_v20 }
  0x4e   : > { %v657_v55 = vor.u32 %v656_v41, %v653_v40  ;;  %v670_v57 = vshll.u32 %v332_v45, 16  ;;  %v465_v60 = vor.u32 %v464_v47, %v461_v46  ;;  %v684_v16 = vshll.u32 %v300_v4, 16 }
  0x4f   : > { %v475_v61 = vor.u32 %v474_v49, %v470_v48  ;;  %v688_v18 = vshrl.u32 %v300_v4, 16  ;;  %v486_v38 = vshll.u32 %v283_v23, 16  ;;  %v492_v39 = vshll.u32 %v12410_v25, 16 }
  0x50   : > { %v672_v7 = vrot.slane %v670_v57, 5  ;;  %v466_v8 = vrot.slane %v465_v60, 4  ;;  %v686_v32 = vrot.slane %v684_v16, 5  ;;  %v496_v40 = vshrl.u32 %v12410_v25, 16  ;;  %v11531_v60 = vld [vmem:[%s12164_s10 + $0x3c] sm:$0xff] }
  0x51   : > { %v476_v9 = vrot.slane %v475_v61, 4  ;;  %v690_v35 = vrot.slane %v688_v18, 4 }
  0x53   : > { %909 = vmatmul.bf16.gmra.mxu2 %v781_v3  ;;  %869 = vmatmul.bf16.gmra.mxu0 %v773_v11  ;;  %v11529_v3 = vld [vmem:[%s12164_s10 + $0x24] sm:$0xff]  ;;  %v298_v11 = vld [vmem:[%s12164_s10 + $0xa0] sm:$0xf]  ;;  %v691_v47 = vor.u32 %v690_v35, %v686_v32 }
  0x54   : > { %1142 = vmatmul.bf16.gmra.mxu3 %v11536_v6  ;;  %v644_v6 = vrot.slane %v643_v56, 4  ;;  %v660_v28 = vshll.u32 %v298_v11, 16  ;;  %v664_v29 = vshrl.u32 %v298_v11, 16 }
  0x55   : > { %1102 = vmatmul.bf16.gmra.mxu1 %v11528_v12  ;;  %v11560_v12 = vld [vmem:[%s15878_s2 + $0x90] sm:$0xff] }
  0x56   : > { %v649_v21 = vsel %vm12201_vm2, %v644_v6, %v648_v5  ;;  %1470 = vmatpush.bf16.msrb.mxu2 %v11560_v12  ;;  %v662_v43 = vrot.slane %v660_v28, 5  ;;  %v666_v44 = vrot.slane %v664_v29, 4  ;;  %v658_v5 = vrot.slane %v657_v55, 4  ;;  %v11559_v12 = vld [vmem:[%s15878_s2 + $0x88] sm:$0xff] }
  0x57   : > { %v764_v37 = vunpack.c.l.b16 %v649_v21  ;;  %v11591_v21 = vld [vmem:[%s15878_s2 + $0x108] sm:$0xff]  ;;  %v471_v28 = vsel %vm12201_vm2, %v466_v8, %v470_v48  ;;  %v498_v55 = vrot.slane %v496_v40, 4  ;;  %v11558_v8 = vld [vmem:[%s15878_s2 + $0x80] sm:$0xff] }
  0x58   : > { %v667_v56 = vor.u32 %v666_v44, %v662_v43  ;;  %2468 = vmatpush.bf16.msrb.mxu0 %v11591_v21  ;;  %v663_v26 = vsel %vm12201_vm2, %v658_v5, %v662_v43  ;;  %v749_v44 = vunpack.c.l.b16 %v471_v28  ;;  %v11604_v5 = vld [vmem:[%s15878_s2 + $0x170] sm:$0xff]  ;;  %v11603_v21 = vld [vmem:[%s15878_s2 + $0x168] sm:$0xff] }
  0x59   : > { %v783_v58 = vpack.c.b16 %v764_v37, %v763_v36  ;;  %v333_v36 = vld [vmem:[%s12164_s10 + $0xb0] sm:$0x1]  ;;  %v483_v37 = vshrl.u32 %v283_v23, 16  ;;  %v765_v41 = vunpack.c.l.b16 %v663_v26  ;;  %2889 = vmatpush.bf16.msrb.mxu1 %v11604_v5  ;;  %v11532_v5 = vld [vmem:[%s12164_s10 + $0x48] sm:$0xff] }
  0x5a   : > { %v668_v6 = vrot.slane %v667_v56, 4  ;;  %1471 = vmatpush.bf16.msrb.mxu2 %v11559_v12  ;;  %v694_v48 = vshll.u32 %v333_v36, 16  ;;  %v12424_v56 = vld [vmem:[%s12164_s10 + $0x50] sm:$0x1]  ;;  %v11582_v12 = vld [vmem:[%s15878_s2 + $0xc0] sm:$0xff] }
  0x5b   : > { %v485_v49 = vrot.slane %v483_v37, 4  ;;  %v502_v4 = vshll.u32 %v12424_v56, 16  ;;  %1787 = vmatpush.bf16.msrb.mxu3 %v11582_v12 }
  0x5c   : > { %v673_v27 = vsel %vm12201_vm2, %v668_v6, %v672_v7  ;;  %v301_v6 = vld [vmem:[%s12164_s10 + $0xb4] sm:$0xf]  ;;  %v302_v7 = vld [vmem:[%s12164_s10 + $0xb8] sm:$0xf]  ;;  %2469 = vmatpush.bf16.msrb.mxu0 %v11590_v22 }
  0x5d   : > { %v766_v43 = vunpack.c.l.b16 %v673_v27  ;;  %v504_v20 = vrot.slane %v502_v4, 5  ;;  %v699_v23 = vshrl.u32 %v301_v6, 16  ;;  %v702_v26 = vshll.u32 %v301_v6, 16  ;;  %2890 = vmatpush.bf16.msrb.mxu1 %v11603_v21  ;;  %v11599_v21 = vld [vmem:[%s15878_s2 + $0x148] sm:$0xff] }
  0x5e   : > { %1472 = vmatpush.bf16.msrb.mxu2 %v11558_v8  ;;  %v708_v27 = vshll.u32 %v302_v7, 16  ;;  %v712_v28 = vshrl.u32 %v302_v7, 16  ;;  %v11600_v8 = vld [vmem:[%s15878_s2 + $0x150] sm:$0xff] }
  0x5f   : > { %v784_v57 = vpack.c.b16 %v766_v43, %v765_v41  ;;  %v701_v40 = vrot.slane %v699_v23, 4  ;;  %v704_v41 = vrot.slane %v702_v26, 5 }
  0x60   : > { %v710_v43 = vrot.slane %v708_v27, 5 }
  0x63   : > { %914 = vmatmul.bf16.gmra.mxu2 %v782_v63  ;;  %874 = vmatmul.bf16.gmra.mxu0 %v774_v1  ;;  %v478_v63 = vshll.u32 %v12389_v54, 16  ;;  %v11530_v1 = vld [vmem:[%s12164_s10 + $0x30] sm:$0xff] }
  0x64   : > { %1147 = vmatmul.bf16.gmra.mxu3 %v11537_v0  ;;  %v775_v0 = vpack.c.b16 %v748_v53, %v747_v52  ;;  %v488_v52 = vrot.slane %v486_v38, 5  ;;  %v494_v53 = vrot.slane %v492_v39, 5  ;;  %v11602_v39 = vld [vmem:[%s15878_s2 + $0x160] sm:$0xff] }
  0x65   : > { %1107 = vmatmul.bf16.gmra.mxu1 %v11529_v3  ;;  %v299_v3 = vld [vmem:[%s12164_s10 + $0xa8] sm:$0xf]  ;;  %v480_v10 = vrot.slane %v478_v63, 5  ;;  %v696_v63 = vrot.slane %v694_v48, 5 }
  0x66   : > { %v675_v11 = vshrl.u32 %v299_v3, 16  ;;  %v678_v14 = vshll.u32 %v299_v3, 16  ;;  %v499_v3 = vor.u32 %v498_v55, %v494_v53  ;;  %v12461_v55 = vld [vmem:[%s12164_s10 + $0x5c] sm:$0x1]  ;;  %2891 = vmatpush.bf16.msrb.mxu1 %v11602_v39 }
  0x67   : > { %v481_v29 = vsel %vm12201_vm2, %v476_v9, %v480_v10  ;;  %v285_v10 = vld [vmem:[%s12164_s10 + $0x54] sm:$0xf] }
  0x68   : > { %v677_v30 = vrot.slane %v675_v11, 4  ;;  %v680_v31 = vrot.slane %v678_v14, 5  ;;  %v750_v45 = vunpack.c.l.b16 %v481_v29  ;;  %v286_v11 = vld [vmem:[%s12164_s10 + $0x58] sm:$0xf]  ;;  %v500_v18 = vrot.slane %v499_v3, 4 }
  0x69   : > { %v507_v29 = vshrl.u32 %v285_v10, 16  ;;  %v526_v3 = vshll.u32 %v12461_v55, 16 }
  0x6a   : > { %v681_v46 = vor.u32 %v680_v31, %v677_v30  ;;  %v510_v30 = vshll.u32 %v285_v10, 16  ;;  %v516_v31 = vshll.u32 %v286_v11, 16  ;;  %v505_v38 = vsel %vm12201_vm2, %v500_v18, %v504_v20  ;;  %v10536_v18 = vld [vmem:[%s12164_s10 + $0xc] sm:$0xf]  ;;  %v12480_v20 = vld [vmem:[%s12164_s10 + $0x10] sm:$0xf] }
  0x6b   : > { %v528_v12 = vrot.slane %v526_v3, 5 }
  0x6c   : > { %v682_v61 = vrot.slane %v681_v46, 4  ;;  %v509_v46 = vrot.slane %v507_v29, 4  ;;  %v518_v48 = vrot.slane %v516_v31, 5  ;;  %v1953_v29 = vshll.u32 %v10536_v18, 16 }
  0x6d   : > { %v1963_v31 = vshrl.u32 %v12480_v20, 16 }
  0x6e   : > { %v687_v9 = vsel %vm12201_vm2, %v682_v61, %v686_v32  ;;  %v520_v32 = vshrl.u32 %v286_v11, 16  ;;  %v11540_v61 = vld [vmem:[%s12164_s10 + $0xa8] sm:$0xff] }
  0x6f   : > { %v767_v35 = vunpack.c.l.b16 %v687_v9 }
  0x73   : > { %919 = vmatmul.bf16.gmra.mxu2 %v783_v58  ;;  %879 = vmatmul.bf16.gmra.mxu0 %v775_v0  ;;  %v11539_v58 = vld [vmem:[%s12164_s10 + $0x9c] sm:$0xff]  ;;  %v692_v0 = vrot.slane %v691_v47, 4  ;;  %v512_v47 = vrot.slane %v510_v30, 5  ;;  %v1959_v30 = vshll.u32 %v12480_v20, 16 }
  0x74   : > { %1152 = vmatmul.bf16.gmra.mxu3 %v11538_v59  ;;  %v776_v59 = vpack.c.b16 %v750_v45, %v749_v44  ;;  %v714_v44 = vrot.slane %v712_v28, 4  ;;  %v334_v45 = vld [vmem:[%s12164_s10 + $0xbc] sm:$0x1]  ;;  %v1950_v28 = vshrl.u32 %v10536_v18, 16 }
  0x75   : > { %1112 = vmatmul.bf16.gmra.mxu1 %v11530_v1  ;;  %v489_v1 = vor.u32 %v488_v52, %v485_v49  ;;  %v697_v14 = vsel %vm12201_vm2, %v692_v0, %v696_v63  ;;  %v522_v49 = vrot.slane %v520_v32, 4  ;;  %v513_v0 = vor.u32 %v512_v47, %v509_v46  ;;  %v11598_v32 = vld [vmem:[%s15878_s2 + $0x140] sm:$0xff]  ;;  %v10538_v46 = vld [vmem:[%s12164_s10 + $0x14] sm:$0x1] }
  0x76   : > { %v768_v36 = vunpack.c.l.b16 %v697_v14  ;;  %v715_v63 = vor.u32 %v714_v44, %v710_v43  ;;  %v11629_v14 = vld [vmem:[%s15878_s2 + $0x1b8] sm:$0xff]  ;;  %v1965_v44 = vrot.slane %v1963_v31, 4 }
  0x77   : > { %v490_v16 = vrot.slane %v489_v1, 4  ;;  %v523_v1 = vor.u32 %v522_v49, %v518_v48  ;;  %v514_v10 = vrot.slane %v513_v0, 4  ;;  %3203 = vmatpush.bf16.msra.mxu2 %v11629_v14  ;;  %v10632_v0 = vld [vmem:[%s12164_s10 + $0xc] sm:$0xe] }
  0x78   : > { %v716_v9 = vrot.slane %v715_v63, 4 }
  0x79   : > { %v495_v37 = vsel %vm12201_vm2, %v490_v16, %v494_v53  ;;  %v752_v53 = vunpack.c.l.b16 %v505_v38  ;;  %v524_v11 = vrot.slane %v523_v1, 4  ;;  %v11637_v16 = vld [vmem:[%s15878_s2 + $0x1f8] sm:$0xff]  ;;  %v519_v26 = vsel %vm12201_vm2, %v514_v10, %v518_v48 }
  0x7a   : > { %v751_v52 = vunpack.c.l.b16 %v495_v37  ;;  %3885 = vmatpush.bf16.msra.mxu3 %v11637_v16  ;;  %v753_v38 = vunpack.c.l.b16 %v519_v26  ;;  %v11541_v48 = vld [vmem:[%s12164_s10 + $0xb4] sm:$0xff]  ;;  %v2652_v10 = vrot.slane %v10538_v46, 5 }
  0x7b   : > { %v529_v27 = vsel %vm12201_vm2, %v524_v11, %v528_v12 }
  0x7c   : > { %v777_v4 = vpack.c.b16 %v752_v53, %v751_v52  ;;  %v754_v39 = vunpack.c.l.b16 %v529_v27  ;;  %v1173_v52 = vld [vmem:[%s12164_s10] sm:$0xe]  ;;  %v11533_v53 = vld [vmem:[%s12164_s10 + $0x54] sm:$0xff] }
  0x7e   : > { %v778_v49 = vpack.c.b16 %v754_v39, %v753_v38  ;;  %v10541_v38 = vld [vmem:[%s12164_s10 + $0x20] sm:$0x1]  ;;  %v1233_v39 = vrot.slane %v12208_v51, 5  ;;  %v1236_v51 = vrot.slane %v12245_v19, 5  ;;  %v12548_v19 = vld [vmem:[%s12164_s10 + $0x28] sm:$0xf] }
  0x83   : > { %924 = vmatmul.bf16.gmra.mxu2 %v784_v57  ;;  %884 = vmatmul.bf16.gmra.mxu0 %v776_v59  ;;  %v11601_v57 = vld [vmem:[%s15878_s2 + $0x158] sm:$0xff]  ;;  %v705_v59 = vor.u32 %v704_v41, %v701_v40  ;;  %v1952_v40 = vrot.slane %v1950_v28, 4  ;;  %v1955_v41 = vrot.slane %v1953_v29, 5 }
  0x84   : > { %1157 = vmatmul.bf16.gmra.mxu3 %v11539_v58  ;;  %v785_v58 = vpack.c.b16 %v768_v36, %v767_v35  ;;  %2892 = vmatpush.bf16.msrb.mxu1 %v11601_v57  ;;  %v11645_v35 = vld [vmem:[%s15878_s2 + $0x238] sm:$0xff] }
  0x85   : > { %1117 = vmatmul.bf16.gmra.mxu1 %v11531_v60  ;;  %v718_v60 = vshll.u32 %v334_v45, 16  ;;  %v706_v6 = vrot.slane %v705_v59, 4  ;;  %4311 = vmatpush.bf16.msra.mxu0 %v11645_v35  ;;  %v1226_v45 = vrot.slane %v12170_v13, 5  ;;  %v1956_v57 = vor.u32 %v1955_v41, %v1952_v40  ;;  %v11566_v41 = vld [vmem:[%s12164_s10 + $0xc] sm:$0xff] }
  0x86   : > { %v1969_v59 = vshll.u32 %v10538_v46, 16  ;;  %v1229_v13 = vrot.slane %v12183_v24, 5  ;;  %v1993_v46 = vshll.u32 %v10541_v38, 16 }
  0x87   : > { %v720_v7 = vrot.slane %v718_v60, 5  ;;  %v711_v22 = vsel %vm12201_vm2, %v706_v6, %v710_v43  ;;  %v1961_v43 = vrot.slane %v1959_v30, 5  ;;  %v2649_v60 = vrot.slane %v12480_v20, 5  ;;  %v12515_v6 = vld [vmem:[%s12164_s10 + $0x1c] sm:$0xf] }
  0x88   : > { %2893 = vmatpush.bf16.msrb.mxu1 %v11600_v8  ;;  %v769_v36 = vunpack.c.l.b16 %v711_v22  ;;  %v1228_v63 = vrot.slane %v1226_v45, 4  ;;  %v1957_v3 = vrot.slane %v1956_v57, 4  ;;  %v10648_v8 = vrot.slane %v10632_v0, 9  ;;  %v11628_v0 = vld [vmem:[%s15878_s2 + $0x1b0] sm:$0xff] }
  0x89   : > { %v721_v23 = vsel %vm12201_vm2, %v716_v9, %v720_v7  ;;  %v1971_v7 = vrot.slane %v1969_v59, 5  ;;  %v2651_v9 = vrot.slane %v2649_v60, 4  ;;  %v1983_v16 = vshll.u32 %v12515_v6, 16  ;;  %3204 = vmatpush.bf16.msra.mxu2 %v11628_v0 }
  0x8a   : > { %v770_v37 = vunpack.c.l.b16 %v721_v23  ;;  %v1230_v11 = vsel %vm12509_vm5, %v1228_v63, %v1229_v13  ;;  %v1987_v18 = vshrl.u32 %v12515_v6, 16  ;;  %v1962_v20 = vsel %vm12201_vm2, %v1957_v3, %v1961_v43 }
  0x8b   : > { %v2650_v22 = vsel %vm12509_vm5, %v10648_v8, %v2649_v60  ;;  %v2653_v23 = vsel %vm12509_vm5, %v2651_v9, %v2652_v10  ;;  %v1354_v27 = vunpack.c.l.b16 %v1230_v11  ;;  %v1985_v30 = vrot.slane %v1983_v16, 5 }
  0x8c   : > { %2894 = vmatpush.bf16.msrb.mxu1 %v11599_v21  ;;  %v786_v47 = vpack.c.b16 %v770_v37, %v769_v36  ;;  %v1989_v31 = vrot.slane %v1987_v18, 4  ;;  %v2776_v36 = vunpack.c.l.b16 %v2650_v22  ;;  %v2777_v37 = vunpack.c.l.b16 %v2653_v23 }
  0x8d   : > { %v2656_v57 = vrot.slane %v12515_v6, 5  ;;  %v1235_v60 = vrot.slane %v1233_v39, 4  ;;  %v1995_v13 = vrot.slane %v1993_v46, 5  ;;  %v2011_v22 = vshrl.u32 %v12548_v19, 16 }
  0x8f   : > { %v2658_v6 = vrot.slane %v2656_v57, 4 }
  0x90   : > { %2895 = vmatpush.bf16.msrb.mxu1 %v11598_v32  ;;  %v2350_v32 = vunpack.c.l.b16 %v1962_v20 }
  0x93   : > { %929 = vmatmul.bf16.gmra.mxu2 %v785_v58  ;;  %889 = vmatmul.bf16.gmra.mxu0 %v777_v4  ;;  %v1966_v58 = vor.u32 %v1965_v44, %v1961_v43  ;;  %v1174_v43 = vld [vmem:[%s12164_s10 + $0xc] sm:$0xe] }
  0x94   : > { %1162 = vmatmul.bf16.gmra.mxu3 %v11540_v61  ;;  %v10328_v61 = vrot.slane %v1173_v52, 9  ;;  %v10329_v59 = vrot.slane %v1174_v43, 9  ;;  %v10544_v43 = vld [vmem:[%s12164_s10 + $0x2c] sm:$0x1] }
  0x95   : > { %1122 = vmatmul.bf16.gmra.mxu1 %v11532_v5  ;;  %v1967_v4 = vrot.slane %v1966_v58, 4  ;;  %v10539_v5 = vld [vmem:[%s12164_s10 + $0x18] sm:$0xf] }
  0x96   : > { %v1227_v24 = vsel %vm12509_vm5, %v10328_v61, %v1226_v45  ;;  %v1974_v12 = vshrl.u32 %v10539_v5, 16  ;;  %v1977_v14 = vshll.u32 %v10539_v5, 16  ;;  %v1990_v45 = vor.u32 %v1989_v31, %v1985_v30  ;;  %v11636_v5 = vld [vmem:[%s15878_s2 + $0x1f0] sm:$0xff] }
  0x97   : > { %v1972_v21 = vsel %vm12201_vm2, %v1967_v4, %v1971_v7  ;;  %v1353_v26 = vunpack.c.l.b16 %v1227_v24  ;;  %v10542_v4 = vld [vmem:[%s12164_s10 + $0x24] sm:$0xf]  ;;  %v2659_v7 = vrot.slane %v10541_v38, 5  ;;  %v1234_v10 = vsel %vm12509_vm5, %v10329_v59, %v1233_v39  ;;  %3886 = vmatpush.bf16.msra.mxu3 %v11636_v5  ;;  %v11644_v31 = vld [vmem:[%s15878_s2 + $0x230] sm:$0xff] }
  0x98   : > { %v1976_v28 = vrot.slane %v1974_v12, 4  ;;  %v1979_v29 = vrot.slane %v1977_v14, 5  ;;  %v2351_v35 = vunpack.c.l.b16 %v1972_v21  ;;  %v1991_v63 = vrot.slane %v1990_v45, 4  ;;  %4312 = vmatpush.bf16.msra.mxu0 %v11644_v31 }
  0x99   : > { %v1385_v40 = vpack.c.b16 %v1354_v27, %v1353_v26  ;;  %v1237_v24 = vsel %vm12509_vm5, %v1235_v60, %v1236_v51  ;;  %v1998_v16 = vshrl.u32 %v10542_v4, 16  ;;  %v2001_v20 = vshll.u32 %v10542_v4, 16 }
  0x9a   : > { %v1980_v44 = vor.u32 %v1979_v29, %v1976_v28  ;;  %v1996_v14 = vsel %vm12201_vm2, %v1991_v63, %v1995_v13  ;;  %v2007_v21 = vshll.u32 %v12548_v19, 16  ;;  %v2660_v27 = vsel %vm12509_vm5, %v2658_v6, %v2659_v7 }
  0x9b   : > { %v1355_v29 = vunpack.c.l.b16 %v1234_v10  ;;  %v2779_v38 = vunpack.c.l.b16 %v2660_v27  ;;  %v2003_v39 = vrot.slane %v2001_v20, 5  ;;  %v2017_v51 = vshll.u32 %v10544_v43, 16 }
  0x9c   : > { %v1981_v61 = vrot.slane %v1980_v44, 4  ;;  %v2663_v13 = vrot.slane %v12548_v19, 5  ;;  %v10545_v19 = vld [vmem:[%s12164_s10 + $0x30] sm:$0xf] }
  0x9e   : > { %v1986_v12 = vsel %vm12201_vm2, %v1981_v61, %v1985_v30  ;;  %v1356_v30 = vunpack.c.l.b16 %v1237_v24  ;;  %v2665_v10 = vrot.slane %v2663_v13, 4  ;;  %v2666_v24 = vrot.slane %v10544_v43, 5 }
  0xa0   : > { %v2667_v31 = vsel %vm12509_vm5, %v2665_v10, %v2666_v24 }
  0xa1   : > { %v2781_v43 = vunpack.c.l.b16 %v2667_v31 }
  0xa3   : > { %934 = vmatmul.bf16.gmra.mxu2 %v786_v47  ;;  %894 = vmatmul.bf16.gmra.mxu0 %v778_v49  ;;  %v2382_v47 = vpack.c.b16 %v2351_v35, %v2350_v32  ;;  %v2352_v32 = vunpack.c.l.b16 %v1986_v12  ;;  %v2353_v35 = vunpack.c.l.b16 %v1996_v14 }
  0xa4   : > { %1167 = vmatmul.bf16.gmra.mxu3 %v11541_v48  ;;  %v2808_v48 = vpack.c.b16 %v2777_v37, %v2776_v36  ;;  %v2000_v37 = vrot.slane %v1998_v16, 4  ;;  %v12584_v16 = vld [vmem:[%s12164_s10 + $0x34] sm:$0xf] }
  0xa5   : > { %1127 = vmatmul.bf16.gmra.mxu1 %v11533_v53  ;;  %v10633_v53 = vld [vmem:[%s12164_s10 + $0x18] sm:$0xe] }
  0xa6   : > { %v10649_v3 = vrot.slane %v10633_v53, 9  ;;  %v2004_v59 = vor.u32 %v2003_v39, %v2000_v37 }
  0xa8   : > { %v2657_v18 = vsel %vm12509_vm5, %v10649_v3, %v2656_v57  ;;  %v1175_v57 = vld [vmem:[%s12164_s10 + $0x18] sm:$0xe]  ;;  %v10634_v3 = vld [vmem:[%s12164_s10 + $0x24] sm:$0xe]  ;;  %v2005_v6 = vrot.slane %v2004_v59, 4 }
  0xa9   : > { %v2778_v36 = vunpack.c.l.b16 %v2657_v18  ;;  %v10330_v4 = vrot.slane %v1175_v57, 9 }
  0xab   : > { %v2809_v53 = vpack.c.b16 %v2779_v38, %v2778_v36 }
  0xb0   : > { %v860_v49 = vpop.f32.mrf.mxu0 }
  0xb2   : > { %v1093_v52 = vpop.f32.mrf.mxu1 }
  0xb3   : > { %v12537_v58 = vadd.f32 %v1093_v52, %v860_v49  ;;  %1473 = vmatmul.bf16.vlgmr.msrb.gmra.mxu2 %v1385_v40  ;;  %2470 = vmatmul.bf16.vlgmr.msrb.gmra.mxu0 %v2382_v47  ;;  %v2009_v40 = vrot.slane %v2007_v21, 5  ;;  %v1386_v47 = vpack.c.b16 %v1356_v30, %v1355_v29  ;;  %v2383_v49 = vpack.c.b16 %v2353_v35, %v2352_v32 }
  0xb4   : > { %1788 = vmatmul.bf16.vlgmr.msrb.gmra.mxu3 %v11566_v41  ;;  %v2013_v41 = vrot.slane %v2011_v22, 4  ;;  %v1240_v52 = vrot.slane %v12271_v50, 5  ;;  %v1243_v50 = vrot.slane %v12293_v15, 5  ;;  %v2031_v32 = vshll.u32 %v12584_v16, 16 }
  0xb5   : > { %2896 = vmatmul.bf16.vlgmr.msrb.gmra.mxu1 %v2808_v48  ;;  %v11567_v48 = vld [vmem:[%s12164_s10 + $0x18] sm:$0xff]  ;;  %v2010_v21 = vsel %vm12201_vm2, %v2005_v6, %v2009_v40  ;;  %v2035_v35 = vshrl.u32 %v12584_v16, 16 }
  0xb6   : > { %v900_v8 = vpop.f32.mrf.mxu2  ;;  %v2014_v60 = vor.u32 %v2013_v41, %v2009_v40  ;;  %v1242_v5 = vrot.slane %v1240_v52, 4  ;;  %v1241_v20 = vsel %vm12509_vm5, %v10330_v4, %v1240_v52  ;;  %v2354_v39 = vunpack.c.l.b16 %v2010_v21 }
  0xb7   : > { %v1133_v9 = vpop.f32.mrf.mxu3  ;;  %v1357_v37 = vunpack.c.l.b16 %v1241_v20 }
  0xb8   : > { %v12554_v11 = vadd.f32 %v1133_v9, %v900_v8  ;;  %v862_v23 = vpop.f32.mrf.mxu0  ;;  %v2015_v7 = vrot.slane %v2014_v60, 4  ;;  %v2019_v8 = vrot.slane %v2017_v51, 5  ;;  %v10650_v9 = vrot.slane %v10634_v3, 9  ;;  %v11568_v60 = vld [vmem:[%s12164_s10 + $0x24] sm:$0xff] }
  0xb9   : > { %v1244_v15 = vsel %vm12509_vm5, %v1242_v5, %v1243_v50  ;;  %v1247_v51 = vrot.slane %v12307_v33, 5  ;;  %v11627_v33 = vld [vmem:[%s15878_s2 + $0x1a8] sm:$0xff] }
  0xba   : > { %v1095_v26 = vpop.f32.mrf.mxu1  ;;  %v2020_v22 = vsel %vm12201_vm2, %v2015_v7, %v2019_v8  ;;  %v2664_v30 = vsel %vm12509_vm5, %v10650_v9, %v2663_v13  ;;  %v1358_v38 = vunpack.c.l.b16 %v1244_v15  ;;  %v1176_v13 = vld [vmem:[%s12164_s10 + $0x24] sm:$0xe]  ;;  %v2670_v7 = vrot.slane %v12584_v16, 5  ;;  %v10635_v9 = vld [vmem:[%s12164_s10 + $0x30] sm:$0xe]  ;;  %v11635_v16 = vld [vmem:[%s15878_s2 + $0x1e8] sm:$0xff]  ;;  %3205 = vmatpush.bf16.msra.mxu2 %v11627_v33 }
  0xbb   : > { %v12566_v28 = vadd.f32 %v1095_v26, %v862_v23  ;;  %v2022_v23 = vshrl.u32 %v10545_v19, 16  ;;  %v2025_v26 = vshll.u32 %v10545_v19, 16  ;;  %v2355_v40 = vunpack.c.l.b16 %v2020_v22  ;;  %v10548_v19 = vld [vmem:[%s12164_s10 + $0x3c] sm:$0xf]  ;;  %v12620_v15 = vld [vmem:[%s12164_s10 + $0x40] sm:$0xf]  ;;  %3887 = vmatpush.bf16.msra.mxu3 %v11635_v16 }
  0xbc   : > { %v2780_v41 = vunpack.c.l.b16 %v2664_v30  ;;  %v1387_v59 = vpack.c.b16 %v1358_v38, %v1357_v37  ;;  %v10331_v10 = vrot.slane %v1176_v13, 9  ;;  %v1249_v24 = vrot.slane %v1247_v51, 4  ;;  %v11569_v33 = vld [vmem:[%s12164_s10 + $0x30] sm:$0xff] }
  0xbd   : > { %v10651_v22 = vrot.slane %v10635_v9, 9  ;;  %v2046_v30 = vshrl.u32 %v10548_v19, 16  ;;  %v2049_v31 = vshll.u32 %v10548_v19, 16  ;;  %v2677_v16 = vrot.slane %v12620_v15, 5 }
  0xbe   : > { %v902_v44 = vpop.f32.mrf.mxu2  ;;  %v1248_v37 = vsel %vm12509_vm5, %v10331_v10, %v1247_v51 }
  0xbf   : > { %v1135_v45 = vpop.f32.mrf.mxu3 }
  0xc0   : > { %v12572_v46 = vadd.f32 %v1135_v45, %v902_v44  ;;  %v865_v61 = vpop.f32.mrf.mxu0  ;;  %v2024_v44 = vrot.slane %v2022_v23, 4  ;;  %v2027_v45 = vrot.slane %v2025_v26, 5  ;;  %v2672_v23 = vrot.slane %v2670_v7, 4 }
  0xc2   : > { %v1098_v63 = vpop.f32.mrf.mxu1  ;;  %v2028_v3 = vor.u32 %v2027_v45, %v2024_v44  ;;  %v2671_v44 = vsel %vm12509_vm5, %v10651_v22, %v2670_v7  ;;  %v1254_v7 = vrot.slane %v12343_v34, 5 }
  0xc3   : > { %v12578_v0 = vadd.f32 %v1098_v63, %v865_v61  ;;  %1478 = vmatmul.bf16.gmra.mxu2 %v1386_v47  ;;  %2475 = vmatmul.bf16.gmra.mxu0 %v2383_v49  ;;  %v10547_v47 = vld [vmem:[%s12164_s10 + $0x38] sm:$0x1]  ;;  %v2037_v49 = vrot.slane %v2035_v35, 4  ;;  %v2384_v61 = vpack.c.b16 %v2355_v40, %v2354_v39  ;;  %v2810_v63 = vpack.c.b16 %v2781_v43, %v2780_v41 }
  0xc4   : > { %1793 = vmatmul.bf16.gmra.mxu3 %v11567_v48  ;;  %v2033_v48 = vrot.slane %v2031_v32, 5  ;;  %v2041_v4 = vshll.u32 %v10547_v47, 16  ;;  %v2673_v26 = vrot.slane %v10547_v47, 5  ;;  %v2059_v35 = vshrl.u32 %v12620_v15, 16 }
  0xc5   : > { %2901 = vmatmul.bf16.gmra.mxu1 %v2809_v53  ;;  %v2782_v13 = vunpack.c.l.b16 %v2671_v44  ;;  %v1256_v34 = vrot.slane %v1254_v7, 4 }
  0xc6   : > { %v905_v12 = vpop.f32.mrf.mxu2  ;;  %v2038_v6 = vor.u32 %v2037_v49, %v2033_v48  ;;  %v2043_v20 = vrot.slane %v2041_v4, 5  ;;  %v2674_v45 = vsel %vm12509_vm5, %v2672_v23, %v2673_v26  ;;  %v2048_v49 = vrot.slane %v2046_v30, 4  ;;  %v10550_v4 = vld [vmem:[%s12164_s10 + $0x44] sm:$0x1]  ;;  %v10636_v26 = vld [vmem:[%s12164_s10 + $0x3c] sm:$0xe] }
  0xc7   : > { %v1138_v14 = vpop.f32.mrf.mxu3  ;;  %v2061_v51 = vrot.slane %v2059_v35, 4  ;;  %v10652_v35 = vrot.slane %v10636_v26, 9  ;;  %v1261_v26 = vrot.slane %v12371_v17, 5  ;;  %v1264_v17 = vrot.slane %v12389_v54, 5 }
  0xc8   : > { %v12586_v18 = vadd.f32 %v1138_v14, %v905_v12  ;;  %v867_v27 = vpop.f32.mrf.mxu0  ;;  %v1250_v12 = vrot.slane %v12325_v2, 5  ;;  %v2029_v14 = vrot.slane %v2028_v3, 4  ;;  %v2039_v21 = vrot.slane %v2038_v6, 4  ;;  %v1177_v6 = vld [vmem:[%s12164_s10 + $0x30] sm:$0xe] }
  0xc9   : > { %v2055_v2 = vshll.u32 %v12620_v15, 16  ;;  %v2783_v3 = vunpack.c.l.b16 %v2674_v45  ;;  %v10332_v23 = vrot.slane %v1177_v6, 9  ;;  %v2679_v15 = vrot.slane %v2677_v16, 4 }
  0xca   : > { %v1100_v29 = vpop.f32.mrf.mxu1  ;;  %v1251_v38 = vsel %vm12509_vm5, %v1249_v24, %v1250_v12  ;;  %v2034_v41 = vsel %vm12201_vm2, %v2029_v14, %v2033_v48  ;;  %v2044_v43 = vsel %vm12201_vm2, %v2039_v21, %v2043_v20  ;;  %v1359_v48 = vunpack.c.l.b16 %v1248_v37 }
  0xcb   : > { %v12602_v36 = vadd.f32 %v1100_v29, %v867_v27  ;;  %v2065_v12 = vshll.u32 %v10550_v4, 16  ;;  %v2811_v20 = vpack.c.b16 %v2783_v3, %v2782_v13  ;;  %v2680_v37 = vrot.slane %v10550_v4, 5 }
  0xce   : > { %v907_v52 = vpop.f32.mrf.mxu2 }
  0xcf   : > { %v1140_v53 = vpop.f32.mrf.mxu3 }
  0xd0   : > { %v12605_v57 = vadd.f32 %v1140_v53, %v907_v52  ;;  %v870_v5 = vpop.f32.mrf.mxu0  ;;  %v2051_v52 = vrot.slane %v2049_v31, 5  ;;  %v11643_v53 = vld [vmem:[%s15878_s2 + $0x228] sm:$0xff] }
  0xd1   : > { %4313 = vmatpush.bf16.msra.mxu0 %v11643_v53 }
  0xd2   : > { %v1103_v50 = vpop.f32.mrf.mxu1  ;;  %v2052_v9 = vor.u32 %v2051_v52, %v2048_v49 }
  0xd3   : > { %v12611_v8 = vadd.f32 %v1103_v50, %v870_v5  ;;  %1483 = vmatmul.bf16.gmra.mxu2 %v1387_v59  ;;  %2480 = vmatmul.bf16.gmra.mxu0 %v2384_v61  ;;  %v1360_v59 = vunpack.c.l.b16 %v1251_v38  ;;  %v2356_v61 = vunpack.c.l.b16 %v2034_v41  ;;  %v10551_v38 = vld [vmem:[%s12164_s10 + $0x48] sm:$0xf] }
  0xd4   : > { %1798 = vmatmul.bf16.gmra.mxu3 %v11568_v60  ;;  %v2057_v60 = vrot.slane %v2055_v2, 5  ;;  %v2053_v30 = vrot.slane %v2052_v9, 4  ;;  %v2067_v2 = vrot.slane %v2065_v12, 5  ;;  %v2070_v52 = vshrl.u32 %v10551_v38, 16  ;;  %v10553_v12 = vld [vmem:[%s12164_s10 + $0x50] sm:$0x1] }
  0xd5   : > { %2906 = vmatmul.bf16.gmra.mxu1 %v2810_v63  ;;  %v2357_v63 = vunpack.c.l.b16 %v2044_v43  ;;  %v1388_v24 = vpack.c.b16 %v1360_v59, %v1359_v48  ;;  %v1255_v43 = vsel %vm12509_vm5, %v10332_v23, %v1254_v7  ;;  %v2073_v53 = vshll.u32 %v10551_v38, 16 }
  0xd6   : > { %v910_v27 = vpop.f32.mrf.mxu2  ;;  %v2062_v19 = vor.u32 %v2061_v51, %v2057_v60  ;;  %v2058_v44 = vsel %vm12201_vm2, %v2053_v30, %v2057_v60  ;;  %v2678_v48 = vsel %vm12509_vm5, %v10652_v35, %v2677_v16  ;;  %v2681_v59 = vsel %vm12509_vm5, %v2679_v15, %v2680_v37 }
  0xd7   : > { %v1143_v29 = vpop.f32.mrf.mxu3  ;;  %v2385_v14 = vpack.c.b16 %v2357_v63, %v2356_v61  ;;  %v1361_v3 = vunpack.c.l.b16 %v1255_v43  ;;  %v2784_v6 = vunpack.c.l.b16 %v2678_v48  ;;  %v2785_v7 = vunpack.c.l.b16 %v2681_v59 }
  0xd8   : > { %v12625_v32 = vadd.f32 %v1143_v29, %v910_v27  ;;  %v872_v39 = vpop.f32.mrf.mxu0  ;;  %v1257_v29 = vrot.slane %v12357_v62, 5  ;;  %v2063_v31 = vrot.slane %v2062_v19, 4  ;;  %v2072_v9 = vrot.slane %v2070_v52, 4  ;;  %v11634_v52 = vld [vmem:[%s15878_s2 + $0x1e0] sm:$0xff] }
  0xd9   : > { %v1263_v43 = vrot.slane %v1261_v26, 4  ;;  %v2687_v59 = vrot.slane %v10553_v12, 5  ;;  %3888 = vmatpush.bf16.msra.mxu3 %v11634_v52  ;;  %v1268_v52 = vrot.slane %v12410_v25, 5  ;;  %v1271_v25 = vrot.slane %v12424_v56, 5 }
  0xda   : > { %v1105_v40 = vpop.f32.mrf.mxu1  ;;  %v1258_v62 = vsel %vm12509_vm5, %v1256_v34, %v1257_v29  ;;  %v2068_v49 = vsel %vm12201_vm2, %v2063_v31, %v2067_v2  ;;  %v2812_v34 = vpack.c.b16 %v2785_v7, %v2784_v6  ;;  %v1178_v29 = vld [vmem:[%s12164_s10 + $0x3c] sm:$0xe]  ;;  %v2089_v2 = vshll.u32 %v10553_v12, 16 }
  0xdb   : > { %v12641_v47 = vadd.f32 %v1105_v40, %v872_v39  ;;  %v12659_v39 = vld [vmem:[%s12164_s10 + $0x4c] sm:$0xf]  ;;  %v1362_v4 = vunpack.c.l.b16 %v1258_v62  ;;  %v11626_v62 = vld [vmem:[%s15878_s2 + $0x1a0] sm:$0xff] }
  0xdc   : > { %v2079_v51 = vshll.u32 %v12659_v39, 16  ;;  %v2083_v61 = vshrl.u32 %v12659_v39, 16  ;;  %v2684_v37 = vrot.slane %v12659_v39, 5  ;;  %v2091_v39 = vrot.slane %v2089_v2, 5  ;;  %3206 = vmatpush.bf16.msra.mxu2 %v11626_v62  ;;  %v11571_v62 = vld [vmem:[%s12164_s10 + $0x48] sm:$0xff] }
  0xde   : > { %v912_v5 = vpop.f32.mrf.mxu2  ;;  %v2085_v19 = vrot.slane %v2083_v61, 4  ;;  %v2686_v48 = vrot.slane %v2684_v37, 4 }
  0xdf   : > { %v1145_v50 = vpop.f32.mrf.mxu3 }
  0xe0   : > { %v12649_v10 = vadd.f32 %v1145_v50, %v912_v5  ;;  %v875_v21 = vpop.f32.mrf.mxu0  ;;  %v2358_v5 = vunpack.c.l.b16 %v2058_v44  ;;  %v2359_v50 = vunpack.c.l.b16 %v2068_v49  ;;  %v2688_v12 = vsel %vm12509_vm5, %v2686_v48, %v2687_v59 }
  0xe2   : > { %v1108_v22 = vpop.f32.mrf.mxu1  ;;  %v2386_v23 = vpack.c.b16 %v2359_v50, %v2358_v5 }
  0xe3   : > { %v12654_v27 = vadd.f32 %v1108_v22, %v875_v21  ;;  %1488 = vmatmul.bf16.gmra.mxu2 %v1388_v24  ;;  %2485 = vmatmul.bf16.gmra.mxu0 %v2385_v14  ;;  %v2075_v24 = vrot.slane %v2073_v53, 5  ;;  %v1389_v21 = vpack.c.b16 %v1362_v4, %v1361_v3  ;;  %v11570_v22 = vld [vmem:[%s12164_s10 + $0x3c] sm:$0xff]  ;;  %v1265_v4 = vsel %vm12509_vm5, %v1263_v43, %v1264_v17 }
  0xe4   : > { %1803 = vmatmul.bf16.gmra.mxu3 %v11569_v33  ;;  %v2081_v33 = vrot.slane %v2079_v51, 5  ;;  %v10554_v51 = vld [vmem:[%s12164_s10 + $0x54] sm:$0xf] }
  0xe5   : > { %2911 = vmatmul.bf16.gmra.mxu1 %v2811_v20  ;;  %v2076_v30 = vor.u32 %v2075_v24, %v2072_v9  ;;  %v2094_v6 = vshrl.u32 %v10554_v51, 16  ;;  %v2097_v7 = vshll.u32 %v10554_v51, 16 }
  0xe6   : > { %v915_v40 = vpop.f32.mrf.mxu2  ;;  %v2086_v31 = vor.u32 %v2085_v19, %v2081_v33 }
  0xe7   : > { %v1148_v41 = vpop.f32.mrf.mxu3  ;;  %v2077_v44 = vrot.slane %v2076_v30, 4  ;;  %v2787_v30 = vunpack.c.l.b16 %v2688_v12  ;;  %v2099_v2 = vrot.slane %v2097_v7, 5 }
  0xe8   : > { %v12667_v45 = vadd.f32 %v1148_v41, %v915_v40  ;;  %v877_v63 = vpop.f32.mrf.mxu0  ;;  %v10637_v40 = vld [vmem:[%s12164_s10 + $0x48] sm:$0xe]  ;;  %v10333_v41 = vrot.slane %v1178_v29, 9  ;;  %v2087_v49 = vrot.slane %v2086_v31, 4  ;;  %v2096_v31 = vrot.slane %v2094_v6, 4 }
  0xe9   : > { %v10653_v53 = vrot.slane %v10637_v40, 9  ;;  %v2082_v5 = vsel %vm12201_vm2, %v2077_v44, %v2081_v33  ;;  %v11642_v33 = vld [vmem:[%s15878_s2 + $0x220] sm:$0xff]  ;;  %v1270_v6 = vrot.slane %v1268_v52, 4 }
  0xea   : > { %v1110_v60 = vpop.f32.mrf.mxu1  ;;  %v1262_v3 = vsel %vm12509_vm5, %v10333_v41, %v1261_v26  ;;  %v2092_v50 = vsel %vm12201_vm2, %v2087_v49, %v2091_v39  ;;  %v2360_v26 = vunpack.c.l.b16 %v2082_v5  ;;  %4314 = vmatpush.bf16.msra.mxu0 %v11642_v33  ;;  %v1179_v39 = vld [vmem:[%s12164_s10 + $0x48] sm:$0xe] }
  0xeb   : > { %v12677_v13 = vadd.f32 %v1110_v60, %v877_v63  ;;  %v12698_v63 = vld [vmem:[%s12164_s10 + $0x58] sm:$0xf]  ;;  %v2685_v19 = vsel %vm12509_vm5, %v10653_v53, %v2684_v37  ;;  %v2100_v53 = vor.u32 %v2099_v2, %v2096_v31  ;;  %v10334_v5 = vrot.slane %v1179_v39, 9 }
  0xec   : > { %v2786_v29 = vunpack.c.l.b16 %v2685_v19 }
  0xed   : > { %v2101_v7 = vrot.slane %v2100_v53, 4  ;;  %v1269_v56 = vsel %vm12509_vm5, %v10334_v5, %v1268_v52  ;;  %v1180_v5 = vld [vmem:[%s12164_s10 + $0x54] sm:$0xe] }
  0xee   : > { %v917_v14 = vpop.f32.mrf.mxu2  ;;  %v2813_v49 = vpack.c.b16 %v2787_v30, %v2786_v29  ;;  %v1272_v30 = vsel %vm12509_vm5, %v1270_v6, %v1271_v25 }
  0xef   : > { %v1150_v20 = vpop.f32.mrf.mxu3  ;;  %v1366_v39 = vunpack.c.l.b16 %v1272_v30 }
  0xf0   : > { %v12680_v16 = vadd.f32 %v1150_v20, %v917_v14  ;;  %v880_v35 = vpop.f32.mrf.mxu0  ;;  %v2103_v14 = vshll.u32 %v12698_v63, 16  ;;  %v2107_v20 = vshrl.u32 %v12698_v63, 16 }
  0xf2   : > { %v1113_v15 = vpop.f32.mrf.mxu1  ;;  %v2109_v37 = vrot.slane %v2107_v20, 4 }
  0xf3   : > { %v12686_v38 = vadd.f32 %v1113_v15, %v880_v35  ;;  %1493 = vmatmul.bf16.gmra.mxu2 %v1389_v21  ;;  %2490 = vmatmul.bf16.gmra.mxu0 %v2386_v23  ;;  %v1364_v23 = vunpack.c.l.b16 %v1265_v4  ;;  %v10556_v35 = vld [vmem:[%s12164_s10 + $0x5c] sm:$0x1]  ;;  %v2105_v15 = vrot.slane %v2103_v14, 5  ;;  %v10638_v4 = vld [vmem:[%s12164_s10 + $0x54] sm:$0xe] }
  0xf4   : > { %1808 = vmatmul.bf16.gmra.mxu3 %v11570_v22  ;;  %v1363_v22 = vunpack.c.l.b16 %v1262_v3  ;;  %v2113_v48 = vshll.u32 %v10556_v35, 16  ;;  %v10654_v12 = vrot.slane %v10638_v4, 9 }
  0xf5   : > { %2916 = vmatmul.bf16.gmra.mxu1 %v2812_v34  ;;  %v2361_v34 = vunpack.c.l.b16 %v2092_v50  ;;  %v10557_v50 = vld [vmem:[%s12164_s10 + $0x60] sm:$0xf] }
  0xf6   : > { %v920_v61 = vpop.f32.mrf.mxu2  ;;  %v1390_v17 = vpack.c.b16 %v1364_v23, %v1363_v22  ;;  %v2118_v22 = vshrl.u32 %v10557_v50, 16  ;;  %v2121_v23 = vshll.u32 %v10557_v50, 16  ;;  %v11905_v50 = vld [vmem:[%s12164_s10 + $0x58] sm:$0xf] }
  0xf7   : > { %v1153_v54 = vpop.f32.mrf.mxu3  ;;  %v2387_v44 = vpack.c.b16 %v2361_v34, %v2360_v26  ;;  %v1275_v6 = vrot.slane %v11905_v50, 5 }
  0xf8   : > { %v12700_v60 = vadd.f32 %v1153_v54, %v920_v61  ;;  %v882_v9 = vpop.f32.mrf.mxu0  ;;  %v2110_v61 = vor.u32 %v2109_v37, %v2105_v15  ;;  %v2691_v54 = vrot.slane %v12698_v63, 5  ;;  %v2694_v63 = vrot.slane %v10556_v35, 5 }
  0xf9   : > { %v2106_v35 = vsel %vm12201_vm2, %v2101_v7, %v2105_v15  ;;  %v1277_v30 = vrot.slane %v1275_v6, 4 }
  0xfa   : > { %v1115_v24 = vpop.f32.mrf.mxu1  ;;  %v2111_v19 = vrot.slane %v2110_v61, 4  ;;  %v2693_v14 = vrot.slane %v2691_v54, 4  ;;  %v2362_v53 = vunpack.c.l.b16 %v2106_v35  ;;  %v10559_v61 = vld [vmem:[%s12164_s10 + $0x68] sm:$0x1] }
  0xfb   : > { %v12716_v21 = vadd.f32 %v1115_v24, %v882_v9  ;;  %v2115_v9 = vrot.slane %v2113_v48, 5  ;;  %v12734_v24 = vld [vmem:[%s12164_s10 + $0x64] sm:$0xf] }
  0xfc   : > { %v2127_v34 = vshll.u32 %v12734_v24, 16  ;;  %v2131_v29 = vshrl.u32 %v12734_v24, 16 }
  0xfd   : > { %v2116_v37 = vsel %vm12201_vm2, %v2111_v19, %v2115_v9  ;;  %v11572_v19 = vld [vmem:[%s12164_s10 + $0x54] sm:$0xff] }
  0xfe   : > { %v922_v40 = vpop.f32.mrf.mxu2  ;;  %v2129_v52 = vrot.slane %v2127_v34, 5  ;;  %v2133_v15 = vrot.slane %v2131_v29, 4  ;;  %v2363_v48 = vunpack.c.l.b16 %v2116_v37  ;;  %v10335_v34 = vrot.slane %v1180_v5, 9  ;;  %v10639_v29 = vld [vmem:[%s12164_s10 + $0x60] sm:$0xe] }
  0xff   : > { %v1155_v41 = vpop.f32.mrf.mxu3 }
 0x100   : > { %v12722_v43 = vadd.f32 %v1155_v41, %v922_v40  ;;  %v885_v59 = vpop.f32.mrf.mxu0  ;;  %v2692_v40 = vsel %vm12509_vm5, %v10654_v12, %v2691_v54  ;;  %v2695_v41 = vsel %vm12509_vm5, %v2693_v14, %v2694_v63  ;;  %v2134_v12 = vor.u32 %v2133_v15, %v2129_v52 }
 0x101   : > { %v2137_v14 = vshll.u32 %v10559_v61, 16  ;;  %v2388_v63 = vpack.c.b16 %v2363_v48, %v2362_v53  ;;  %v1276_v53 = vsel %vm12509_vm5, %v10335_v34, %v1275_v6 }
 0x102   : > { %v1118_v51 = vpop.f32.mrf.mxu1  ;;  %v2135_v35 = vrot.slane %v2134_v12, 4  ;;  %v1367_v12 = vunpack.c.l.b16 %v1276_v53 }
 0x103   : > { %v12728_v3 = vadd.f32 %v1118_v51, %v885_v59  ;;  %1498 = vmatmul.bf16.gmra.mxu2 %v1390_v17  ;;  %2495 = vmatmul.bf16.gmra.mxu0 %v2387_v44  ;;  %v2123_v44 = vrot.slane %v2121_v23, 5  ;;  %v2788_v59 = vunpack.c.l.b16 %v2692_v40  ;;  %v2789_v51 = vunpack.c.l.b16 %v2695_v41 }
 0x104   : > { %1813 = vmatmul.bf16.gmra.mxu3 %v11571_v62  ;;  %v2120_v62 = vrot.slane %v2118_v22, 4  ;;  %v2139_v37 = vrot.slane %v2137_v14, 5  ;;  %v10655_v40 = vrot.slane %v10639_v29, 9 }
 0x105   : > { %2921 = vmatmul.bf16.gmra.mxu1 %v2813_v49  ;;  %v1365_v49 = vunpack.c.l.b16 %v1269_v56 }
 0x106   : > { %v925_v20 = vpop.f32.mrf.mxu2  ;;  %v2124_v25 = vor.u32 %v2123_v44, %v2120_v62  ;;  %v2701_v62 = vrot.slane %v10559_v61, 5  ;;  %v10560_v44 = vld [vmem:[%s12164_s10 + $0x6c] sm:$0xf]  ;;  %v2140_v61 = vsel %vm12201_vm2, %v2135_v35, %v2139_v37 }
 0x107   : > { %v1158_v33 = vpop.f32.mrf.mxu3  ;;  %v1391_v9 = vpack.c.b16 %v1366_v39, %v1365_v49  ;;  %v11633_v49 = vld [vmem:[%s15878_s2 + $0x1d8] sm:$0xff] }
 0x108   : > { %v12736_v26 = vadd.f32 %v1158_v33, %v925_v20  ;;  %v887_v31 = vpop.f32.mrf.mxu0  ;;  %v2814_v20 = vpack.c.b16 %v2789_v51, %v2788_v59  ;;  %v2698_v33 = vrot.slane %v12734_v24, 5  ;;  %v11625_v24 = vld [vmem:[%s15878_s2 + $0x198] sm:$0xff]  ;;  %3889 = vmatpush.bf16.msra.mxu3 %v11633_v49  ;;  %v11906_v49 = vld [vmem:[%s12164_s10 + $0x64] sm:$0xf] }
 0x109   : > { %3207 = vmatpush.bf16.msra.mxu2 %v11625_v24 }
 0x10a   : > { %v1120_v2 = vpop.f32.mrf.mxu1  ;;  %v2700_v41 = vrot.slane %v2698_v33, 4  ;;  %v2699_v5 = vsel %vm12509_vm5, %v10655_v40, %v2698_v33 }
 0x10b   : > { %v12752_v17 = vadd.f32 %v1120_v2, %v887_v31  ;;  %v1278_v31 = vrot.slane %v12461_v55, 5  ;;  %v2125_v2 = vrot.slane %v2124_v25, 4  ;;  %v12773_v55 = vld [vmem:[%s12164_s10 + $0x70] sm:$0xf]  ;;  %v2790_v33 = vunpack.c.l.b16 %v2699_v5 }
 0x10c   : > { %v2702_v50 = vsel %vm12509_vm5, %v2700_v41, %v2701_v62  ;;  %v2151_v6 = vshll.u32 %v12773_v55, 16  ;;  %v2155_v25 = vshrl.u32 %v12773_v55, 16  ;;  %v11573_v41 = vld [vmem:[%s12164_s10 + $0x60] sm:$0xff] }
 0x10d   : > { %v1279_v48 = vsel %vm12509_vm5, %v1277_v30, %v1278_v31  ;;  %v2130_v59 = vsel %vm12201_vm2, %v2125_v2, %v2129_v52  ;;  %v10562_v31 = vld [vmem:[%s12164_s10 + $0x74] sm:$0x1]  ;;  %v11641_v2 = vld [vmem:[%s15878_s2 + $0x218] sm:$0xff] }
 0x10e   : > { %v927_v54 = vpop.f32.mrf.mxu2  ;;  %v1368_v14 = vunpack.c.l.b16 %v1279_v48  ;;  %v2153_v29 = vrot.slane %v2151_v6, 5  ;;  %v2157_v30 = vrot.slane %v2155_v25, 4  ;;  %4315 = vmatpush.bf16.msra.mxu0 %v11641_v2  ;;  %v10640_v6 = vld [vmem:[%s12164_s10 + $0x6c] sm:$0xe] }
 0x10f   : > { %v1160_v4 = vpop.f32.mrf.mxu3 }
 0x110   : > { %v12757_v7 = vadd.f32 %v1160_v4, %v927_v54  ;;  %v890_v22 = vpop.f32.mrf.mxu0  ;;  %v2142_v54 = vshrl.u32 %v10560_v44, 16  ;;  %v2145_v4 = vshll.u32 %v10560_v44, 16  ;;  %v1392_v40 = vpack.c.b16 %v1368_v14, %v1367_v12  ;;  %v1181_v44 = vld [vmem:[%s12164_s10 + $0x60] sm:$0xe] }
 0x111   : > { %v2158_v48 = vor.u32 %v2157_v30, %v2153_v29 }
 0x112   : > { %v1123_v23 = vpop.f32.mrf.mxu1  ;;  %v2147_v34 = vrot.slane %v2145_v4, 5  ;;  %v2705_v4 = vrot.slane %v12773_v55, 5  ;;  %v12809_v55 = vld [vmem:[%s12164_s10 + $0x7c] sm:$0xf] }
 0x113   : > { %v12762_v56 = vadd.f32 %v1123_v23, %v890_v22  ;;  %1503 = vmatmul.bf16.gmra.mxu2 %v1391_v9  ;;  %2500 = vmatmul.bf16.gmra.mxu0 %v2388_v63  ;;  %v2364_v63 = vunpack.c.l.b16 %v2130_v59  ;;  %v2791_v22 = vunpack.c.l.b16 %v2702_v50  ;;  %v2144_v23 = vrot.slane %v2142_v54, 4 }
 0x114   : > { %1818 = vmatmul.bf16.gmra.mxu3 %v11572_v19  ;;  %v2161_v59 = vshll.u32 %v10562_v31, 16  ;;  %v10336_v50 = vrot.slane %v1181_v44, 9  ;;  %v2159_v14 = vrot.slane %v2158_v48, 4  ;;  %v2175_v44 = vshll.u32 %v12809_v55, 16 }
 0x115   : > { %2926 = vmatmul.bf16.gmra.mxu1 %v2814_v20  ;;  %v2365_v20 = vunpack.c.l.b16 %v2140_v61  ;;  %v2148_v53 = vor.u32 %v2147_v34, %v2144_v23  ;;  %v2708_v23 = vrot.slane %v10562_v31, 5 }
 0x116   : > { %v930_v39 = vpop.f32.mrf.mxu2 }
 0x117   : > { %v1163_v15 = vpop.f32.mrf.mxu3  ;;  %v2389_v62 = vpack.c.b16 %v2365_v20, %v2364_v63  ;;  %v2149_v12 = vrot.slane %v2148_v53, 4  ;;  %v2163_v63 = vrot.slane %v2161_v59, 5  ;;  %v10563_v20 = vld [vmem:[%s12164_s10 + $0x78] sm:$0xf] }
 0x118   : > { %v12781_v51 = vadd.f32 %v1163_v15, %v930_v39  ;;  %v892_v52 = vpop.f32.mrf.mxu0  ;;  %v1282_v39 = vrot.slane %v11906_v49, 5  ;;  %v2815_v15 = vpack.c.b16 %v2791_v22, %v2790_v33  ;;  %v10656_v33 = vrot.slane %v10640_v6, 9 }
 0x119   : > { %v2707_v22 = vrot.slane %v2705_v4, 4  ;;  %v2164_v31 = vsel %vm12201_vm2, %v2159_v14, %v2163_v63  ;;  %v2179_v49 = vshrl.u32 %v12809_v55, 16  ;;  %v10565_v63 = vld [vmem:[%s12164_s10 + $0x80] sm:$0x1] }
 0x11a   : > { %v1125_v9 = vpop.f32.mrf.mxu1  ;;  %v1284_v25 = vrot.slane %v1282_v39, 4  ;;  %v1283_v2 = vsel %vm12509_vm5, %v10336_v50, %v1282_v39  ;;  %v2706_v53 = vsel %vm12509_vm5, %v10656_v33, %v2705_v4  ;;  %v2367_v50 = vunpack.c.l.b16 %v2164_v31  ;;  %v11908_v33 = vld [vmem:[%s12164_s10 + $0x70] sm:$0xf] }
 0x11b   : > { %v12791_v19 = vadd.f32 %v1125_v9, %v892_v52  ;;  %v11907_v52 = vld [vmem:[%s12164_s10 + $0x68] sm:$0x1]  ;;  %v2709_v48 = vsel %vm12509_vm5, %v2707_v22, %v2708_v23  ;;  %v2181_v14 = vrot.slane %v2179_v49, 4  ;;  %v1289_v22 = vrot.slane %v11908_v33, 5 }
 0x11c   : > { %v1285_v9 = vrot.slane %v11907_v52, 5  ;;  %v2792_v52 = vunpack.c.l.b16 %v2706_v53  ;;  %v2185_v31 = vshll.u32 %v10565_v63, 16  ;;  %v2712_v49 = vrot.slane %v12809_v55, 5 }
 0x11d   : > { %v1291_v53 = vrot.slane %v1289_v22, 4 }
 0x11e   : > { %v932_v35 = vpop.f32.mrf.mxu2  ;;  %v2714_v55 = vrot.slane %v2712_v49, 4 }
 0x11f   : > { %v1165_v37 = vpop.f32.mrf.mxu3 }
 0x120   : > { %v12797_v24 = vadd.f32 %v1165_v37, %v932_v35  ;;  %v895_v61 = vpop.f32.mrf.mxu0  ;;  %v1286_v37 = vsel %vm12509_vm5, %v1284_v25, %v1285_v9  ;;  %v2793_v9 = vunpack.c.l.b16 %v2709_v48  ;;  %v11909_v48 = vld [vmem:[%s12164_s10 + $0x74] sm:$0x1] }
 0x122   : > { %v1128_v54 = vpop.f32.mrf.mxu1 }
 0x123   : > { %v12803_v5 = vadd.f32 %v1128_v54, %v895_v61  ;;  %1508 = vmatmul.bf16.gmra.mxu2 %v1392_v40  ;;  %2505 = vmatmul.bf16.gmra.mxu0 %v2389_v62  ;;  %v2166_v40 = vshrl.u32 %v10563_v20, 16  ;;  %v2154_v62 = vsel %vm12201_vm2, %v2149_v12, %v2153_v29  ;;  %v1369_v29 = vunpack.c.l.b16 %v1283_v2  ;;  %v1182_v2 = vld [vmem:[%s12164_s10 + $0x6c] sm:$0xe] }
 0x124   : > { %1823 = vmatmul.bf16.gmra.mxu3 %v11573_v41  ;;  %v2169_v41 = vshll.u32 %v10563_v20, 16  ;;  %v1370_v61 = vunpack.c.l.b16 %v1286_v37  ;;  %v2366_v54 = vunpack.c.l.b16 %v2154_v62  ;;  %v2177_v12 = vrot.slane %v2175_v44, 5 }
 0x125   : > { %2931 = vmatmul.bf16.gmra.mxu1 %v2815_v15  ;;  %v2168_v6 = vrot.slane %v2166_v40, 4  ;;  %v2816_v40 = vpack.c.b16 %v2793_v9, %v2792_v52  ;;  %v2715_v52 = vrot.slane %v10565_v63, 5  ;;  %v12843_v9 = vld [vmem:[%s12164_s10 + $0x88] sm:$0xf] }
 0x126   : > { %v935_v34 = vpop.f32.mrf.mxu2  ;;  %v2171_v25 = vrot.slane %v2169_v41, 5  ;;  %v2390_v62 = vpack.c.b16 %v2367_v50, %v2366_v54  ;;  %v2182_v41 = vor.u32 %v2181_v14, %v2177_v12  ;;  %v2187_v50 = vrot.slane %v2185_v31, 5  ;;  %v11632_v14 = vld [vmem:[%s15878_s2 + $0x1d0] sm:$0xff] }
 0x127   : > { %v1168_v30 = vpop.f32.mrf.mxu3  ;;  %3890 = vmatpush.bf16.msra.mxu3 %v11632_v14  ;;  %v2199_v31 = vshll.u32 %v12843_v9, 16 }
 0x128   : > { %v12813_v35 = vadd.f32 %v1168_v30, %v935_v34  ;;  %v897_v15 = vpop.f32.mrf.mxu0  ;;  %v1393_v34 = vpack.c.b16 %v1370_v61, %v1369_v29  ;;  %v11574_v30 = vld [vmem:[%s12164_s10 + $0x6c] sm:$0xff]  ;;  %v2172_v37 = vor.u32 %v2171_v25, %v2168_v6  ;;  %v2183_v54 = vrot.slane %v2182_v41, 4  ;;  %v10566_v6 = vld [vmem:[%s12164_s10 + $0x84] sm:$0xf] }
 0x129   : > { %v11624_v61 = vld [vmem:[%s15878_s2 + $0x190] sm:$0xff] }
 0x12a   : > { %15986 = vst [vmem:[#allocation6_spill] sm:$0xff] %v12813_v35  ;;  %v1130_v39 = vpop.f32.mrf.mxu1  ;;  %v2173_v29 = vrot.slane %v2172_v37, 4  ;;  %3208 = vmatpush.bf16.msra.mxu2 %v11624_v61  ;;  %v2188_v41 = vsel %vm12201_vm2, %v2183_v54, %v2187_v50 }
 0x12b   : > { %v12827_v59 = vadd.f32 %v1130_v39, %v897_v15  ;;  %v10337_v39 = vrot.slane %v1182_v2, 9  ;;  %v2369_v54 = vunpack.c.l.b16 %v2188_v41 }
 0x12c   : > { %v2178_v63 = vsel %vm12201_vm2, %v2173_v29, %v2177_v12  ;;  %v2716_v12 = vsel %vm12509_vm5, %v2714_v55, %v2715_v52 }
 0x12d   : > { %v2368_v29 = vunpack.c.l.b16 %v2178_v63 }
 0x12e   : > { %v937_v4 = vpop.f32.mrf.mxu2 }
 0x12f   : > { %v1170_v20 = vpop.f32.mrf.mxu3 }
 0x130   : > { %v12831_v23 = vadd.f32 %v1170_v20, %v937_v4  ;;  %v2471_v15 = vpop.f32.mrf.mxu0  ;;  %v1292_v4 = vrot.slane %v11909_v48, 5  ;;  %v10641_v20 = vld [vmem:[%s12164_s10 + $0x78] sm:$0xe]  ;;  %v2203_v48 = vshrl.u32 %v12843_v9, 16 }
 0x131   : > { %v10657_v25 = vrot.slane %v10641_v20, 9 }
 0x132   : > { %15987 = vst [vmem:[#allocation7_spill] sm:$0xff] %v12831_v23  ;;  %v2897_v44 = vpop.f32.mrf.mxu1  ;;  %v1293_v2 = vsel %vm12509_vm5, %v1291_v53, %v1292_v4 }
 0x133   : > { %1513 = vmatmul.bf16.gmra.mxu2 %v1393_v34  ;;  %2510 = vmatmul.bf16.gmra.mxu0 %v2390_v62  ;;  %v2190_v62 = vshrl.u32 %v10566_v6, 16  ;;  %v1372_v4 = vunpack.c.l.b16 %v1293_v2 }
 0x134   : > { %1828 = vmatmul.bf16.gmra.mxu3 %v11574_v30  ;;  %v1290_v30 = vsel %vm12509_vm5, %v10337_v39, %v1289_v22 }
 0x135   : > { %2936 = vmatmul.bf16.gmra.mxu1 %v2816_v40  ;;  %v2193_v40 = vshll.u32 %v10566_v6, 16  ;;  %v1371_v53 = vunpack.c.l.b16 %v1290_v30  ;;  %v2192_v50 = vrot.slane %v2190_v62, 4  ;;  %v11910_v30 = vld [vmem:[%s12164_s10 + $0x7c] sm:$0xf] }
 0x136   : > { %v1474_v33 = vpop.f32.mrf.mxu2  ;;  %v11575_v62 = vld [vmem:[%s12164_s10 + $0x78] sm:$0xff] }
 0x137   : > { %v1789_v34 = vpop.f32.mrf.mxu3  ;;  %v1554_v37 = vadd.f32 %v1474_v33, %v12537_v58  ;;  %v2713_v58 = vsel %vm12509_vm5, %v10657_v25, %v2712_v49  ;;  %v2195_v6 = vrot.slane %v2193_v40, 5  ;;  %v2795_v33 = vunpack.c.l.b16 %v2716_v12  ;;  %v10568_v49 = vld [vmem:[%s12164_s10 + $0x8c] sm:$0x1]  ;;  %v11640_v25 = vld [vmem:[%s15878_s2 + $0x210] sm:$0xff]  ;;  %v1183_v40 = vld [vmem:[%s12164_s10 + $0x78] sm:$0xe] }
 0x138   : > { %v2473_v22 = vpop.f32.mrf.mxu0  ;;  %v2794_v14 = vunpack.c.l.b16 %v2713_v58  ;;  %v1394_v63 = vpack.c.b16 %v1372_v4, %v1371_v53  ;;  %4316 = vmatpush.bf16.msra.mxu0 %v11640_v25  ;;  %v10642_v4 = vld [vmem:[%s12164_s10 + $0x84] sm:$0xe] }
 0x139   : > { %v1869_v20 = vadd.f32 %v1789_v34, %v1554_v37  ;;  %v2201_v34 = vrot.slane %v2199_v31, 5  ;;  %v2205_v37 = vrot.slane %v2203_v48, 4  ;;  %v2196_v41 = vor.u32 %v2195_v6, %v2192_v50 }
 0x13a   : > { %v2899_v39 = vpop.f32.mrf.mxu1  ;;  %v2817_v31 = vpack.c.b16 %v2795_v33, %v2794_v14  ;;  %v10569_v14 = vld [vmem:[%s12164_s10 + $0x90] sm:$0xf] }
 0x13b   : > { %v2551_v61 = vadd.f32 %v2471_v15, %v1869_v20  ;;  %v1296_v15 = vrot.slane %v11910_v30, 5  ;;  %v2206_v48 = vor.u32 %v2205_v37, %v2201_v34  ;;  %v2209_v20 = vshll.u32 %v10568_v49, 16 }
 0x13c   : > { %v10338_v30 = vrot.slane %v1183_v40, 9  ;;  %v2197_v6 = vrot.slane %v2196_v41, 4  ;;  %v10658_v37 = vrot.slane %v10642_v4, 9  ;;  %v2217_v41 = vshll.u32 %v10569_v14, 16 }
 0x13d   : > { %v12863_v23 = vadd.f32 %v2897_v44, %v2551_v61  ;;  %v2391_v44 = vpack.c.b16 %v2369_v54, %v2368_v29  ;;  %v1298_v35 = vrot.slane %v1296_v15, 4  ;;  %v2207_v29 = vrot.slane %v2206_v48, 4 }
 0x13e   : > { %v1476_v55 = vpop.f32.mrf.mxu2  ;;  %v2211_v54 = vrot.slane %v2209_v20, 5  ;;  %v2202_v40 = vsel %vm12201_vm2, %v2197_v6, %v2201_v34 }
 0x13f   : > { %15988 = vst [vmem:[#allocation8_spill] sm:$0xff] %v12863_v23  ;;  %v1791_v52 = vpop.f32.mrf.mxu3  ;;  %v1555_v2 = vadd.f32 %v1476_v55, %v12566_v28  ;;  %v2719_v23 = vrot.slane %v12843_v9, 5  ;;  %v11911_v28 = vld [vmem:[%s12164_s10 + $0x80] sm:$0x1]  ;;  %v2722_v9 = vrot.slane %v10568_v49, 5 }
 0x140   : > { %v2476_v12 = vpop.f32.mrf.mxu0  ;;  %v1299_v53 = vrot.slane %v11911_v28, 5  ;;  %v12880_v55 = vld [vmem:[%s12164_s10 + $0x94] sm:$0xf]  ;;  %v2212_v49 = vsel %vm12201_vm2, %v2207_v29, %v2211_v54 }
 0x141   : > { %v1870_v58 = vadd.f32 %v1791_v52, %v1555_v2  ;;  %v2721_v25 = vrot.slane %v2719_v23, 4 }
 0x142   : > { %v2902_v61 = vpop.f32.mrf.mxu1 }
 0x143   : > { %1518 = vmatmul.bf16.gmra.mxu2 %v1394_v63  ;;  %v2552_v50 = vadd.f32 %v2473_v22, %v1870_v58  ;;  %2515 = vmatmul.bf16.gmra.mxu0 %v2391_v44  ;;  %v1297_v63 = vsel %vm12509_vm5, %v10338_v30, %v1296_v15  ;;  %v1300_v22 = vsel %vm12509_vm5, %v1298_v35, %v1299_v53  ;;  %v2223_v44 = vshll.u32 %v12880_v55, 16 }
 0x144   : > { %1833 = vmatmul.bf16.gmra.mxu3 %v11575_v62  ;;  %v2720_v35 = vsel %vm12509_vm5, %v10658_v37, %v2719_v23  ;;  %v1373_v34 = vunpack.c.l.b16 %v1297_v63  ;;  %v1374_v58 = vunpack.c.l.b16 %v1300_v22  ;;  %v2370_v30 = vunpack.c.l.b16 %v2202_v40  ;;  %v10571_v23 = vld [vmem:[%s12164_s10 + $0x98] sm:$0x1]  ;;  %v11576_v22 = vld [vmem:[%s12164_s10 + $0x84] sm:$0xff] }
 0x145   : > { %2941 = vmatmul.bf16.gmra.mxu1 %v2817_v31  ;;  %v12877_v33 = vadd.f32 %v2899_v39, %v2552_v50  ;;  %v2214_v39 = vshrl.u32 %v10569_v14, 16  ;;  %v2227_v31 = vshrl.u32 %v12880_v55, 16  ;;  %v2371_v53 = vunpack.c.l.b16 %v2212_v49 }
 0x146   : > { %v1479_v52 = vpop.f32.mrf.mxu2  ;;  %v2219_v50 = vrot.slane %v2217_v41, 5  ;;  %v2796_v6 = vunpack.c.l.b16 %v2720_v35  ;;  %v2225_v54 = vrot.slane %v2223_v44, 5  ;;  %v2233_v44 = vshll.u32 %v10571_v23, 16 }
 0x147   : > { %v1794_v2 = vpop.f32.mrf.mxu3  ;;  %v1556_v62 = vadd.f32 %v1479_v52, %v12578_v0  ;;  %v2723_v0 = vsel %vm12509_vm5, %v2721_v25, %v2722_v9  ;;  %v2216_v4 = vrot.slane %v2214_v39, 4  ;;  %v2229_v14 = vrot.slane %v2227_v31, 4  ;;  %v11912_v25 = vld [vmem:[%s12164_s10 + $0x88] sm:$0xf] }
 0x148   : > { %v2478_v20 = vpop.f32.mrf.mxu0  ;;  %v2797_v29 = vunpack.c.l.b16 %v2723_v0  ;;  %v1303_v9 = vrot.slane %v11912_v25, 5  ;;  %v2392_v39 = vpack.c.b16 %v2371_v53, %v2370_v30  ;;  %v2726_v35 = vrot.slane %v12880_v55, 5  ;;  %v11913_v25 = vld [vmem:[%s12164_s10 + $0x8c] sm:$0x1] }
 0x149   : > { %v1871_v48 = vadd.f32 %v1794_v2, %v1556_v62  ;;  %v1184_v62 = vld [vmem:[%s12164_s10 + $0x84] sm:$0xe]  ;;  %v2220_v40 = vor.u32 %v2219_v50, %v2216_v4  ;;  %v2230_v49 = vor.u32 %v2229_v14, %v2225_v54  ;;  %v11623_v30 = vld [vmem:[%s15878_s2 + $0x188] sm:$0xff]  ;;  %v2235_v4 = vrot.slane %v2233_v44, 5  ;;  %v10572_v50 = vld [vmem:[%s12164_s10 + $0x9c] sm:$0xf] }
 0x14a   : > { %v2904_v15 = vpop.f32.mrf.mxu1  ;;  %v2818_v41 = vpack.c.b16 %v2797_v29, %v2796_v6  ;;  %v10339_v0 = vrot.slane %v1184_v62, 9  ;;  %v2728_v29 = vrot.slane %v2726_v35, 4  ;;  %v2729_v14 = vrot.slane %v10571_v23, 5  ;;  %3209 = vmatpush.bf16.msra.mxu2 %v11623_v30 }
 0x14b   : > { %v2553_v28 = vadd.f32 %v2476_v12, %v1871_v48  ;;  %v1395_v12 = vpack.c.b16 %v1374_v58, %v1373_v34  ;;  %v2221_v58 = vrot.slane %v2220_v40, 4  ;;  %v2231_v53 = vrot.slane %v2230_v49, 4 }
 0x14c   : > { %v2238_v62 = vshrl.u32 %v10572_v50, 16  ;;  %v2241_v40 = vshll.u32 %v10572_v50, 16 }
 0x14d   : > { %v12897_v52 = vadd.f32 %v2902_v61, %v2553_v28  ;;  %v1305_v28 = vrot.slane %v1303_v9, 4  ;;  %v2226_v23 = vsel %vm12201_vm2, %v2221_v58, %v2225_v54  ;;  %v2730_v54 = vsel %vm12509_vm5, %v2728_v29, %v2729_v14 }
 0x14e   : > { %v1481_v37 = vpop.f32.mrf.mxu2  ;;  %v2243_v58 = vrot.slane %v2241_v40, 5 }
 0x14f   : > { %15989 = vst [vmem:[#allocation9_spill] sm:$0xff] %v12897_v52  ;;  %v1796_v2 = vpop.f32.mrf.mxu3  ;;  %v1557_v63 = vadd.f32 %v1481_v37, %v12602_v36  ;;  %v1306_v52 = vrot.slane %v11913_v25, 5  ;;  %v10643_v36 = vld [vmem:[%s12164_s10 + $0x90] sm:$0xe]  ;;  %v12914_v37 = vld [vmem:[%s12164_s10 + $0xa0] sm:$0xf] }
 0x150   : > { %v2481_v61 = vpop.f32.mrf.mxu0  ;;  %v10659_v6 = vrot.slane %v10643_v36, 9  ;;  %v2251_v49 = vshrl.u32 %v12914_v37, 16 }
 0x151   : > { %v1872_v31 = vadd.f32 %v1796_v2, %v1557_v63 }
 0x152   : > { %v2907_v48 = vpop.f32.mrf.mxu1  ;;  %v2253_v50 = vrot.slane %v2251_v49, 4 }
 0x153   : > { %1523 = vmatmul.bf16.gmra.mxu2 %v1395_v12  ;;  %v2554_v34 = vadd.f32 %v2478_v20, %v1872_v31  ;;  %2520 = vmatmul.bf16.gmra.mxu0 %v2392_v39  ;;  %v11631_v20 = vld [vmem:[%s15878_s2 + $0x1c8] sm:$0xff]  ;;  %v1304_v12 = vsel %vm12509_vm5, %v10339_v0, %v1303_v9  ;;  %v2236_v39 = vsel %vm12201_vm2, %v2231_v53, %v2235_v4  ;;  %v2799_v53 = vunpack.c.l.b16 %v2730_v54 }
 0x154   : > { %1838 = vmatmul.bf16.gmra.mxu3 %v11576_v22  ;;  %v1307_v22 = vsel %vm12509_vm5, %v1305_v28, %v1306_v52  ;;  %v1375_v52 = vunpack.c.l.b16 %v1304_v12  ;;  %v2372_v28 = vunpack.c.l.b16 %v2226_v23  ;;  %v2373_v36 = vunpack.c.l.b16 %v2236_v39 }
 0x155   : > { %2946 = vmatmul.bf16.gmra.mxu1 %v2818_v41  ;;  %v12911_v55 = vadd.f32 %v2904_v15, %v2554_v34  ;;  %3891 = vmatpush.bf16.msra.mxu3 %v11631_v20  ;;  %v2247_v41 = vshll.u32 %v12914_v37, 16  ;;  %v1376_v0 = vunpack.c.l.b16 %v1307_v22  ;;  %v2240_v34 = vrot.slane %v2238_v62, 4  ;;  %v11577_v22 = vld [vmem:[%s12164_s10 + $0x90] sm:$0xff] }
 0x156   : > { %v1484_v2 = vpop.f32.mrf.mxu2 }
 0x157   : > { %v1799_v63 = vpop.f32.mrf.mxu3  ;;  %v1558_v15 = vadd.f32 %v1484_v2, %v12611_v8  ;;  %v2727_v8 = vsel %vm12509_vm5, %v10659_v6, %v2726_v35  ;;  %v2249_v4 = vrot.slane %v2247_v41, 5  ;;  %v10574_v35 = vld [vmem:[%s12164_s10 + $0xa4] sm:$0x1]  ;;  %v11639_v6 = vld [vmem:[%s15878_s2 + $0x208] sm:$0xff]  ;;  %v11914_v2 = vld [vmem:[%s12164_s10 + $0x94] sm:$0xf]  ;;  %v1396_v12 = vpack.c.b16 %v1376_v0, %v1375_v52 }
 0x158   : > { %v2483_v9 = vpop.f32.mrf.mxu0  ;;  %v2798_v30 = vunpack.c.l.b16 %v2727_v8  ;;  %v2244_v23 = vor.u32 %v2243_v58, %v2240_v34  ;;  %4317 = vmatpush.bf16.msra.mxu0 %v11639_v6  ;;  %v2257_v39 = vshll.u32 %v10574_v35, 16  ;;  %v2733_v8 = vrot.slane %v12914_v37, 5  ;;  %v10644_v0 = vld [vmem:[%s12164_s10 + $0x9c] sm:$0xe] }
 0x159   : > { %v1873_v44 = vadd.f32 %v1799_v63, %v1558_v15  ;;  %v1185_v15 = vld [vmem:[%s12164_s10 + $0x90] sm:$0xe]  ;;  %v2254_v40 = vor.u32 %v2253_v50, %v2249_v4  ;;  %v10660_v50 = vrot.slane %v10644_v0, 9  ;;  %v2736_v37 = vrot.slane %v10574_v35, 5 }
 0x15a   : > { %v2909_v31 = vpop.f32.mrf.mxu1  ;;  %v2819_v62 = vpack.c.b16 %v2799_v53, %v2798_v30  ;;  %v10340_v54 = vrot.slane %v1185_v15, 9  ;;  %v2245_v58 = vrot.slane %v2244_v23, 4  ;;  %v10575_v30 = vld [vmem:[%s12164_s10 + $0xa8] sm:$0xf]  ;;  %v2735_v6 = vrot.slane %v2733_v8, 4 }
 0x15b   : > { %v2555_v25 = vadd.f32 %v2481_v61, %v1873_v44  ;;  %v1310_v61 = vrot.slane %v11914_v2, 5  ;;  %v2265_v15 = vshll.u32 %v10575_v30, 16 }
 0x15d   : > { %v12934_v20 = vadd.f32 %v2907_v48, %v2555_v25  ;;  %v2393_v48 = vpack.c.b16 %v2373_v36, %v2372_v28  ;;  %v1312_v25 = vrot.slane %v1310_v61, 4  ;;  %v2255_v28 = vrot.slane %v2254_v40, 4 }
 0x15e   : > { %v1486_v29 = vpop.f32.mrf.mxu2  ;;  %v2259_v36 = vrot.slane %v2257_v39, 5  ;;  %v2734_v39 = vsel %vm12509_vm5, %v10660_v50, %v2733_v8  ;;  %v2267_v0 = vrot.slane %v2265_v15, 5  ;;  %v10577_v8 = vld [vmem:[%s12164_s10 + $0xb0] sm:$0x1] }
 0x15f   : > { %v1801_v14 = vpop.f32.mrf.mxu3  ;;  %v1559_v63 = vadd.f32 %v1486_v29, %v12641_v47  ;;  %v11915_v47 = vld [vmem:[%s12164_s10 + $0x98] sm:$0x1]  ;;  %v12951_v29 = vld [vmem:[%s12164_s10 + $0xac] sm:$0xf] }
 0x160   : > { %v2486_v49 = vpop.f32.mrf.mxu0  ;;  %v1313_v52 = vrot.slane %v11915_v47, 5  ;;  %v2260_v35 = vsel %vm12201_vm2, %v2255_v28, %v2259_v36  ;;  %v2271_v23 = vshll.u32 %v12951_v29, 16 }
 0x161   : > { %v1874_v41 = vadd.f32 %v1801_v14, %v1559_v63  ;;  %v1311_v63 = vsel %vm12509_vm5, %v10340_v54, %v1310_v61  ;;  %v2375_v47 = vunpack.c.l.b16 %v2260_v35  ;;  %v2281_v35 = vshll.u32 %v10577_v8, 16 }
 0x162   : > { %v2912_v44 = vpop.f32.mrf.mxu1  ;;  %v2273_v28 = vrot.slane %v2271_v23, 5 }
 0x163   : > { %1528 = vmatmul.bf16.gmra.mxu2 %v1396_v12  ;;  %v2556_v34 = vadd.f32 %v2483_v9, %v1874_v41  ;;  %2525 = vmatmul.bf16.gmra.mxu0 %v2393_v48  ;;  %v1314_v9 = vsel %vm12509_vm5, %v1312_v25, %v1313_v52  ;;  %v2275_v48 = vshrl.u32 %v12951_v29, 16 }
 0x164   : > { %1843 = vmatmul.bf16.gmra.mxu3 %v11577_v22  ;;  %v2250_v22 = vsel %vm12201_vm2, %v2245_v58, %v2249_v4  ;;  %v1377_v4 = vunpack.c.l.b16 %v1311_v63  ;;  %v1378_v41 = vunpack.c.l.b16 %v1314_v9  ;;  %v11578_v63 = vld [vmem:[%s12164_s10 + $0x9c] sm:$0xff] }
 0x165   : > { %2951 = vmatmul.bf16.gmra.mxu1 %v2819_v62  ;;  %v12948_v53 = vadd.f32 %v2909_v31, %v2556_v34  ;;  %v2262_v31 = vshrl.u32 %v10575_v30, 16  ;;  %v2374_v54 = vunpack.c.l.b16 %v2250_v22  ;;  %v2800_v34 = vunpack.c.l.b16 %v2734_v39  ;;  %v1186_v9 = vld [vmem:[%s12164_s10 + $0x9c] sm:$0xe] }
 0x166   : > { %v1489_v14 = vpop.f32.mrf.mxu2  ;;  %v2277_v36 = vrot.slane %v2275_v48, 4  ;;  %v10341_v39 = vrot.slane %v1186_v9, 9 }
 0x167   : > { %v1804_v2 = vpop.f32.mrf.mxu3  ;;  %v1560_v12 = vadd.f32 %v1489_v14, %v12654_v27  ;;  %v2737_v27 = vsel %vm12509_vm5, %v2735_v6, %v2736_v37  ;;  %v2264_v52 = vrot.slane %v2262_v31, 4  ;;  %v11916_v6 = vld [vmem:[%s12164_s10 + $0xa0] sm:$0xf]  ;;  %v2394_v22 = vpack.c.b16 %v2375_v47, %v2374_v54 }
 0x168   : > { %v2488_v40 = vpop.f32.mrf.mxu0  ;;  %v2801_v58 = vunpack.c.l.b16 %v2737_v27  ;;  %v1317_v37 = vrot.slane %v11916_v6, 5  ;;  %v2278_v15 = vor.u32 %v2277_v36, %v2273_v28  ;;  %v11622_v47 = vld [vmem:[%s15878_s2 + $0x180] sm:$0xff] }
 0x169   : > { %v1875_v62 = vadd.f32 %v1804_v2, %v1560_v12  ;;  %v2268_v12 = vor.u32 %v2267_v0, %v2264_v52  ;;  %v2283_v0 = vrot.slane %v2281_v35, 5  ;;  %3210 = vmatpush.bf16.msra.mxu2 %v11622_v47 }
 0x16a   : > { %v2914_v61 = vpop.f32.mrf.mxu1  ;;  %v2820_v31 = vpack.c.b16 %v2801_v58, %v2800_v34  ;;  %v1319_v27 = vrot.slane %v1317_v37, 4  ;;  %v2279_v52 = vrot.slane %v2278_v15, 4  ;;  %v10578_v34 = vld [vmem:[%s12164_s10 + $0xb4] sm:$0xf] }
 0x16b   : > { %v2557_v25 = vadd.f32 %v2486_v49, %v1875_v62  ;;  %v1397_v49 = vpack.c.b16 %v1378_v41, %v1377_v4  ;;  %v2740_v62 = vrot.slane %v12951_v29, 5  ;;  %v10645_v4 = vld [vmem:[%s12164_s10 + $0xa8] sm:$0xe]  ;;  %v2269_v54 = vrot.slane %v2268_v12, 4 }
 0x16c   : > { %v10661_v58 = vrot.slane %v10645_v4, 9  ;;  %v2286_v9 = vshrl.u32 %v10578_v34, 16  ;;  %v2289_v12 = vshll.u32 %v10578_v34, 16 }
 0x16d   : > { %v12968_v30 = vadd.f32 %v2912_v44, %v2557_v25  ;;  %v11917_v25 = vld [vmem:[%s12164_s10 + $0xa4] sm:$0x1]  ;;  %v2742_v36 = vrot.slane %v2740_v62, 4 }
 0x16e   : > { %v1491_v50 = vpop.f32.mrf.mxu2 }
 0x16f   : > { %v1806_v14 = vpop.f32.mrf.mxu3  ;;  %v1561_v2 = vadd.f32 %v1491_v50, %v12677_v13  ;;  %v1320_v13 = vrot.slane %v11917_v25, 5  ;;  %v2743_v50 = vrot.slane %v10577_v8, 5  ;;  %v2274_v8 = vsel %vm12201_vm2, %v2269_v54, %v2273_v28 }
 0x170   : > { %v2491_v44 = vpop.f32.mrf.mxu0  ;;  %v2376_v25 = vunpack.c.l.b16 %v2274_v8  ;;  %v2291_v54 = vrot.slane %v2289_v12, 5 }
 0x171   : > { %v1876_v23 = vadd.f32 %v1806_v14, %v1561_v2  ;;  %v12987_v14 = vld [vmem:[%s12164_s10 + $0xb8] sm:$0xf]  ;;  %v2744_v28 = vsel %vm12509_vm5, %v2742_v36, %v2743_v50  ;;  %v11918_v50 = vld [vmem:[%s12164_s10 + $0xac] sm:$0xf] }
 0x172   : > { %v12975_v48 = vpop.f32.mrf.mxu1  ;;  %v2299_v15 = vshrl.u32 %v12987_v14, 16 }
 0x173   : > { %1533 = vmatmul.bf16.gmra.mxu2 %v1397_v49  ;;  %v2558_v41 = vadd.f32 %v2488_v40, %v1876_v23  ;;  %2530 = vmatmul.bf16.gmra.mxu0 %v2394_v22  ;;  %v11630_v40 = vld [vmem:[%s15878_s2 + $0x1c0] sm:$0xff]  ;;  %v1318_v49 = vsel %vm12509_vm5, %v10341_v39, %v1317_v37  ;;  %v2284_v22 = vsel %vm12201_vm2, %v2279_v52, %v2283_v0  ;;  %v2803_v52 = vunpack.c.l.b16 %v2744_v28 }
 0x174   : > { %1848 = vmatmul.bf16.gmra.mxu3 %v11578_v63  ;;  %v1321_v63 = vsel %vm12509_vm5, %v1319_v27, %v1320_v13  ;;  %v1379_v39 = vunpack.c.l.b16 %v1318_v49  ;;  %v2377_v4 = vunpack.c.l.b16 %v2284_v22  ;;  %v2301_v34 = vrot.slane %v2299_v15, 4  ;;  %v11579_v49 = vld [vmem:[%s12164_s10 + $0xa8] sm:$0xff] }
 0x175   : > { %2956 = vmatmul.bf16.gmra.mxu1 %v2820_v31  ;;  %v12984_v29 = vadd.f32 %v2914_v61, %v2558_v41  ;;  %3892 = vmatpush.bf16.msra.mxu3 %v11630_v40  ;;  %v2295_v31 = vshll.u32 %v12987_v14, 16  ;;  %v1380_v27 = vunpack.c.l.b16 %v1321_v63  ;;  %v2288_v41 = vrot.slane %v2286_v9, 4  ;;  %v10580_v40 = vld [vmem:[%s12164_s10 + $0xbc] sm:$0x1]  ;;  %v1187_v63 = vld [vmem:[%s12164_s10 + $0xa8] sm:$0xe] }
 0x176   : > { %v1494_v6 = vpop.f32.mrf.mxu2  ;;  %v2395_v8 = vpack.c.b16 %v2377_v4, %v2376_v25  ;;  %v2305_v22 = vshll.u32 %v10580_v40, 16  ;;  %v10342_v28 = vrot.slane %v1187_v63, 9 }
 0x177   : > { %v1809_v2 = vpop.f32.mrf.mxu3  ;;  %v1562_v61 = vadd.f32 %v1494_v6, %v12686_v38  ;;  %v2741_v38 = vsel %vm12509_vm5, %v10661_v58, %v2740_v62  ;;  %v2297_v0 = vrot.slane %v2295_v31, 5  ;;  %v11638_v62 = vld [vmem:[%s15878_s2 + $0x200] sm:$0xff]  ;;  %v1324_v6 = vrot.slane %v11918_v50, 5 }
 0x178   : > { %v2493_v37 = vpop.f32.mrf.mxu0  ;;  %v2802_v47 = vunpack.c.l.b16 %v2741_v38  ;;  %4318 = vmatpush.bf16.msra.mxu0 %v11638_v62  ;;  %v2747_v38 = vrot.slane %v12987_v14, 5  ;;  %v2750_v62 = vrot.slane %v10580_v40, 5  ;;  %v13028_v14 = vld [vmem:[%s12164_s10 + $0xc4] sm:$0xf] }
 0x179   : > { %v1877_v35 = vadd.f32 %v1809_v2, %v1562_v61  ;;  %v1398_v2 = vpack.c.b16 %v1380_v27, %v1379_v39  ;;  %v2292_v61 = vor.u32 %v2291_v54, %v2288_v41  ;;  %v2302_v12 = vor.u32 %v2301_v34, %v2297_v0  ;;  %v11919_v39 = vld [vmem:[%s12164_s10 + $0xb0] sm:$0x1] }
 0x17a   : > { %v13003_v23 = vpop.f32.mrf.mxu1  ;;  %v2821_v9 = vpack.c.b16 %v2803_v52, %v2802_v47  ;;  %v1327_v27 = vrot.slane %v11919_v39, 5  ;;  %v2307_v54 = vrot.slane %v2305_v22, 5  ;;  %v10581_v47 = vld [vmem:[%s12164_s10 + $0xc0] sm:$0xf]  ;;  %v2749_v34 = vrot.slane %v2747_v38, 4 }
 0x17b   : > { %v13009_v13 = vadd.f32 %v2491_v44, %v1877_v35  ;;  %v2293_v25 = vrot.slane %v2292_v61, 4  ;;  %v2303_v4 = vrot.slane %v2302_v12, 4  ;;  %v2310_v63 = vshrl.u32 %v10581_v47, 16 }
 0x17c   : > { %v2313_v61 = vshll.u32 %v10581_v47, 16 }
 0x17d   : > { %v2308_v40 = vsel %vm12201_vm2, %v2303_v4, %v2307_v54 }
 0x17e   : > { %v1496_v58 = vpop.f32.mrf.mxu2 }
 0x17f   : > { %v1811_v36 = vpop.f32.mrf.mxu3  ;;  %v1563_v44 = vadd.f32 %v1496_v58, %v12716_v21  ;;  %v1326_v21 = vrot.slane %v1324_v6, 4  ;;  %v10646_v58 = vld [vmem:[%s12164_s10 + $0xb4] sm:$0xe] }
 0x180   : > { %v2496_v15 = vpop.f32.mrf.mxu0  ;;  %v10662_v52 = vrot.slane %v10646_v58, 9  ;;  %v2312_v58 = vrot.slane %v2310_v63, 4 }
 0x181   : > { %v1878_v31 = vadd.f32 %v1811_v36, %v1563_v44  ;;  %v1325_v44 = vsel %vm12509_vm5, %v10342_v28, %v1324_v6 }
 0x182   : > { %v13019_v35 = vpop.f32.mrf.mxu1 }
 0x183   : > { %15990 = vst [vmem:[#allocation10_spill] sm:$0xff] %v13019_v35  ;;  %1538 = vmatmul.bf16.gmra.mxu2 %v1398_v2  ;;  %v13024_v41 = vadd.f32 %v2493_v37, %v1878_v31  ;;  %2535 = vmatmul.bf16.gmra.mxu0 %v2395_v8  ;;  %v1328_v37 = vsel %vm12509_vm5, %v1326_v21, %v1327_v27  ;;  %v2319_v8 = vshll.u32 %v13028_v14, 16  ;;  %v1381_v31 = vunpack.c.l.b16 %v1325_v44  ;;  %v1188_v44 = vld [vmem:[%s12164_s10 + $0xb4] sm:$0xe] }
 0x184   : > { %1853 = vmatmul.bf16.gmra.mxu3 %v11579_v49  ;;  %v2298_v49 = vsel %vm12201_vm2, %v2293_v25, %v2297_v0  ;;  %v2751_v0 = vsel %vm12509_vm5, %v2749_v34, %v2750_v62  ;;  %v1382_v28 = vunpack.c.l.b16 %v1328_v37  ;;  %v2379_v27 = vunpack.c.l.b16 %v2308_v40 }
 0x185   : > { %2961 = vmatmul.bf16.gmra.mxu1 %v2821_v9  ;;  %v2323_v9 = vshrl.u32 %v13028_v14, 16  ;;  %v2378_v21 = vunpack.c.l.b16 %v2298_v49  ;;  %v2315_v25 = vrot.slane %v2313_v61, 5  ;;  %v2805_v54 = vunpack.c.l.b16 %v2751_v0 }
 0x186   : > { %v1499_v36 = vpop.f32.mrf.mxu2  ;;  %v2321_v47 = vrot.slane %v2319_v8, 5  ;;  %v1399_v62 = vpack.c.b16 %v1382_v28, %v1381_v31  ;;  %v10343_v0 = vrot.slane %v1188_v44, 9  ;;  %v10647_v28 = vld [vmem:[%s12164_s10 + $0xc0] sm:$0xe] }
 0x187   : > { %v1814_v50 = vpop.f32.mrf.mxu3  ;;  %v1564_v2 = vadd.f32 %v1499_v36, %v12728_v3  ;;  %v2748_v3 = vsel %vm12509_vm5, %v10662_v52, %v2747_v38  ;;  %v2325_v36 = vrot.slane %v2323_v9, 4  ;;  %v2316_v37 = vor.u32 %v2315_v25, %v2312_v58 }
 0x188   : > { %v2498_v6 = vpop.f32.mrf.mxu0  ;;  %v2804_v4 = vunpack.c.l.b16 %v2748_v3  ;;  %v2396_v49 = vpack.c.b16 %v2379_v27, %v2378_v21  ;;  %v2754_v3 = vrot.slane %v13028_v14, 5  ;;  %v13063_v14 = vld [vmem:[%s12164_s10 + $0x1c] sm:$0xf] }
 0x189   : > { %v1879_v12 = vadd.f32 %v1814_v50, %v1564_v2  ;;  %v10583_v50 = vld [vmem:[%s12164_s10 + $0xc8] sm:$0x1]  ;;  %v11920_v2 = vld [vmem:[%s12164_s10 + $0xb8] sm:$0xf]  ;;  %v2326_v61 = vor.u32 %v2325_v36, %v2321_v47  ;;  %v2317_v21 = vrot.slane %v2316_v37, 4 }
 0x18a   : > { %v13041_v22 = vpop.f32.mrf.mxu1  ;;  %v1331_v35 = vrot.slane %v11920_v2, 5  ;;  %v2822_v63 = vpack.c.b16 %v2805_v54, %v2804_v4  ;;  %v2329_v40 = vshll.u32 %v10583_v50, 16  ;;  %v10856_v4 = vld [vmem:[%s12164_s10 + $0x18] sm:$0xf]  ;;  %v10663_v54 = vrot.slane %v10647_v28, 9 }
 0x18b   : > { %v13047_v39 = vadd.f32 %v2496_v15, %v1879_v12  ;;  %v11580_v15 = vld [vmem:[%s12164_s10 + $0xb4] sm:$0xff]  ;;  %v2327_v27 = vrot.slane %v2326_v61, 4  ;;  %v2756_v36 = vrot.slane %v2754_v3, 4  ;;  %v3373_v37 = vshrl.u32 %v10856_v4, 16 }
 0x18c   : > { %v1333_v2 = vrot.slane %v1331_v35, 4  ;;  %v2331_v25 = vrot.slane %v2329_v40, 5  ;;  %v1332_v44 = vsel %vm12509_vm5, %v10343_v0, %v1331_v35  ;;  %v3386_v61 = vshrl.u32 %v13063_v14, 16 }
 0x18d   : > { %v1383_v0 = vunpack.c.l.b16 %v1332_v44 }
 0x18e   : > { %v1501_v38 = vpop.f32.mrf.mxu2 }
 0x18f   : > { %v1816_v52 = vpop.f32.mrf.mxu3  ;;  %v1565_v34 = vadd.f32 %v1501_v38, %v12752_v17  ;;  %v11921_v17 = vld [vmem:[%s12164_s10 + $0xbc] sm:$0x1]  ;;  %v2757_v38 = vrot.slane %v10583_v50, 5  ;;  %v2332_v50 = vsel %vm12201_vm2, %v2327_v27, %v2331_v25 }
 0x190   : > { %v2501_v8 = vpop.f32.mrf.mxu0  ;;  %v1334_v31 = vrot.slane %v11921_v17, 5  ;;  %v2381_v28 = vunpack.c.l.b16 %v2332_v50 }
 0x191   : > { %v1880_v12 = vadd.f32 %v1816_v52, %v1565_v34 }
 0x192   : > { %v13054_v9 = vpop.f32.mrf.mxu1 }
 0x193   : > { %1543 = vmatmul.bf16.gmra.mxu2 %v1399_v62  ;;  %v13059_v58 = vadd.f32 %v2498_v6, %v1880_v12  ;;  %2540 = vmatmul.bf16.gmra.mxu0 %v2396_v49  ;;  %v1335_v6 = vsel %vm12509_vm5, %v1333_v2, %v1334_v31  ;;  %v3376_v49 = vshll.u32 %v10856_v4, 16 }
 0x194   : > { %1858 = vmatmul.bf16.gmra.mxu3 %v11580_v15  ;;  %v2322_v15 = vsel %vm12201_vm2, %v2317_v21, %v2321_v47  ;;  %v2758_v47 = vsel %vm12509_vm5, %v2756_v36, %v2757_v38  ;;  %v1384_v2 = vunpack.c.l.b16 %v1335_v6  ;;  %v3375_v21 = vrot.slane %v3373_v37, 4  ;;  %v11581_v38 = vld [vmem:[%s12164_s10 + $0xc0] sm:$0xff] }
 0x195   : > { %2966 = vmatmul.bf16.gmra.mxu1 %v2822_v63  ;;  %v3382_v63 = vshll.u32 %v13063_v14, 16  ;;  %v2380_v17 = vunpack.c.l.b16 %v2322_v15  ;;  %v3378_v27 = vrot.slane %v3376_v49, 5  ;;  %v2807_v4 = vunpack.c.l.b16 %v2758_v47 }
 0x196   : > { %v1504_v52 = vpop.f32.mrf.mxu2  ;;  %v1400_v36 = vpack.c.b16 %v1384_v2, %v1383_v0  ;;  %v10859_v0 = vld [vmem:[%s12164_s10 + $0x24] sm:$0xf] }
 0x197   : > { %v1819_v34 = vpop.f32.mrf.mxu3  ;;  %v1566_v62 = vadd.f32 %v1504_v52, %v12762_v56  ;;  %v2755_v56 = vsel %vm12509_vm5, %v10663_v54, %v2754_v3  ;;  %v3384_v52 = vrot.slane %v3382_v63, 5  ;;  %v3379_v44 = vor.u32 %v3378_v27, %v3375_v21  ;;  %v13095_v21 = vld [vmem:[%s12164_s10 + $0x28] sm:$0xf] }
 0x198   : > { %v2503_v35 = vpop.f32.mrf.mxu0  ;;  %v2806_v25 = vunpack.c.l.b16 %v2755_v56  ;;  %v2397_v6 = vpack.c.b16 %v2381_v28, %v2380_v17  ;;  %v4072_v63 = vrot.slane %v13063_v14, 5 }
 0x199   : > { %v1881_v40 = vadd.f32 %v1819_v34, %v1566_v62  ;;  %v3388_v34 = vrot.slane %v3386_v61, 4  ;;  %v10858_v62 = vld [vmem:[%s12164_s10 + $0x20] sm:$0x1]  ;;  %v10952_v61 = vld [vmem:[%s12164_s10 + $0x18] sm:$0xe] }
 0x19a   : > { %v13076_v12 = vpop.f32.mrf.mxu1  ;;  %v2823_v15 = vpack.c.b16 %v2807_v4, %v2806_v25  ;;  %v3392_v50 = vshll.u32 %v10858_v62, 16  ;;  %v10968_v2 = vrot.slane %v10952_v61, 9  ;;  %v4074_v17 = vrot.slane %v4072_v63, 4 }
 0x19b   : > { %15991 = vst [vmem:[#allocation11_spill] sm:$0xff] %v13076_v12  ;;  %v13082_v31 = vadd.f32 %v2501_v8, %v1881_v40  ;;  %v3389_v8 = vor.u32 %v3388_v34, %v3384_v52  ;;  %v4075_v28 = vrot.slane %v10858_v62, 5  ;;  %v3400_v34 = vshll.u32 %v10859_v0, 16 }
 0x19c   : > { %v3394_v47 = vrot.slane %v3392_v50, 5 }
 0x19e   : > { %v1506_v12 = vpop.f32.mrf.mxu2 }
 0x19f   : > { %v1821_v3 = vpop.f32.mrf.mxu3  ;;  %v1567_v54 = vadd.f32 %v1506_v12, %v12791_v19  ;;  %v3380_v19 = vrot.slane %v3379_v44, 4  ;;  %v3390_v12 = vrot.slane %v3389_v8, 4 }
 0x1a0   : > { %v2506_v49 = vpop.f32.mrf.mxu0 }
 0x1a1   : > { %v1882_v37 = vadd.f32 %v1821_v3, %v1567_v54  ;;  %v3385_v4 = vsel %vm12201_vm2, %v3380_v19, %v3384_v52  ;;  %v3395_v3 = vsel %vm12201_vm2, %v3390_v12, %v3394_v47  ;;  %v3406_v54 = vshll.u32 %v13095_v21, 16 }
 0x1a2   : > { %v13087_v40 = vpop.f32.mrf.mxu1  ;;  %v4076_v52 = vsel %vm12509_vm5, %v4074_v17, %v4075_v28  ;;  %v3774_v8 = vunpack.c.l.b16 %v3395_v3  ;;  %v4079_v3 = vrot.slane %v13095_v21, 5 }
 0x1a3   : > { %1548 = vmatmul.bf16.gmra.mxu2 %v1400_v36  ;;  %v13091_v56 = vadd.f32 %v2503_v35, %v1882_v37  ;;  %2545 = vmatmul.bf16.gmra.mxu0 %v2397_v6  ;;  %v3397_v35 = vshrl.u32 %v10859_v0, 16  ;;  %v3410_v36 = vshrl.u32 %v13095_v21, 16  ;;  %v3773_v6 = vunpack.c.l.b16 %v3385_v4  ;;  %v10861_v0 = vld [vmem:[%s12164_s10 + $0x2c] sm:$0x1] }
 0x1a4   : > { %1863 = vmatmul.bf16.gmra.mxu3 %v11581_v38  ;;  %v3402_v37 = vrot.slane %v3400_v34, 5  ;;  %v4200_v19 = vunpack.c.l.b16 %v4076_v52  ;;  %v3408_v12 = vrot.slane %v3406_v54, 5  ;;  %v3416_v28 = vshll.u32 %v10861_v0, 16  ;;  %v10953_v54 = vld [vmem:[%s12164_s10 + $0x24] sm:$0xe] }
 0x1a5   : > { %2971 = vmatmul.bf16.gmra.mxu1 %v2823_v15  ;;  %v3399_v50 = vrot.slane %v3397_v35, 4  ;;  %v3412_v47 = vrot.slane %v3410_v36, 4  ;;  %v10862_v52 = vld [vmem:[%s12164_s10 + $0x30] sm:$0xf] }
 0x1a6   : > { %v1509_v27 = vpop.f32.mrf.mxu2 }
 0x1a7   : > { %v1824_v25 = vpop.f32.mrf.mxu3  ;;  %v1568_v14 = vadd.f32 %v1509_v27, %v12803_v5  ;;  %v4073_v5 = vsel %vm12509_vm5, %v10968_v2, %v4072_v63  ;;  %v11606_v63 = vld [vmem:[%s12164_s10 + $0x18] sm:$0xff]  ;;  %v3805_v2 = vpack.c.b16 %v3774_v8, %v3773_v6  ;;  %v10969_v6 = vrot.slane %v10953_v54, 9 }
 0x1a8   : > { %v2508_v38 = vpop.f32.mrf.mxu0  ;;  %v4199_v61 = vunpack.c.l.b16 %v4073_v5  ;;  %v3418_v5 = vrot.slane %v3416_v28, 5  ;;  %v4081_v8 = vrot.slane %v4079_v3, 4 }
 0x1a9   : > { %v1883_v62 = vadd.f32 %v1824_v25, %v1568_v14 }
 0x1aa   : > { %v13104_v44 = vpop.f32.mrf.mxu1  ;;  %v4231_v17 = vpack.c.b16 %v4200_v19, %v4199_v61 }
 0x1ab   : > { %15992 = vst [vmem:[#allocation12_spill] sm:$0xff] %v13104_v44  ;;  %v13110_v15 = vadd.f32 %v2506_v49, %v1883_v62  ;;  %v3403_v44 = vor.u32 %v3402_v37, %v3399_v50  ;;  %v3413_v49 = vor.u32 %v3412_v47, %v3408_v12  ;;  %v4082_v50 = vrot.slane %v10861_v0, 5  ;;  %v13123_v37 = vld [vmem:[%s12164_s10 + $0x34] sm:$0xf] }
 0x1ad   : > { %v3414_v62 = vrot.slane %v3413_v49, 4 }
 0x1ae   : > { %v1511_v27 = vpop.f32.mrf.mxu2 }
 0x1af   : > { %v1826_v25 = vpop.f32.mrf.mxu3  ;;  %v1569_v14 = vadd.f32 %v1511_v27, %v12827_v59  ;;  %v3404_v59 = vrot.slane %v3403_v44, 4  ;;  %v3424_v27 = vshll.u32 %v10862_v52, 16  ;;  %v3419_v44 = vsel %vm12201_vm2, %v3414_v62, %v3418_v5 }
 0x1b0   : > { %v2511_v35 = vpop.f32.mrf.mxu0  ;;  %v3776_v28 = vunpack.c.l.b16 %v3419_v44 }
 0x1b1   : > { %v1884_v4 = vadd.f32 %v1826_v25, %v1569_v14  ;;  %v3409_v47 = vsel %vm12201_vm2, %v3404_v59, %v3408_v12  ;;  %v3430_v25 = vshll.u32 %v13123_v37, 16  ;;  %v3434_v14 = vshrl.u32 %v13123_v37, 16 }
 0x1b2   : > { %v13115_v34 = vpop.f32.mrf.mxu1  ;;  %v4083_v12 = vsel %vm12509_vm5, %v4081_v8, %v4082_v50  ;;  %v3426_v54 = vrot.slane %v3424_v27, 5  ;;  %v11607_v50 = vld [vmem:[%s12164_s10 + $0x24] sm:$0xff] }
 0x1b3   : > { %3211 = vmatmul.bf16.vlgmr.msra.gmra.mxu2 %v11606_v63  ;;  %v13119_v36 = vadd.f32 %v2508_v38, %v1884_v4  ;;  %4319 = vmatmul.bf16.vlgmr.msra.gmra.mxu0 %v4231_v17  ;;  %v3421_v38 = vshrl.u32 %v10862_v52, 16  ;;  %v3775_v17 = vunpack.c.l.b16 %v3409_v47  ;;  %v4202_v62 = vunpack.c.l.b16 %v4083_v12 }
 0x1b4   : > { %3893 = vmatmul.bf16.vlgmr.msra.gmra.mxu3 %v3805_v2  ;;  %v3432_v5 = vrot.slane %v3430_v25, 5  ;;  %v3436_v52 = vrot.slane %v3434_v14, 4 }
 0x1b5   : > { %v3423_v4 = vrot.slane %v3421_v38, 4 }
 0x1b6   : > { %v1514_v61 = vpop.f32.mrf.mxu2  ;;  %v3437_v38 = vor.u32 %v3436_v52, %v3432_v5  ;;  %v13159_v52 = vld [vmem:[%s12164_s10 + $0x40] sm:$0xf] }
 0x1b7   : > { %v1829_v19 = vpop.f32.mrf.mxu3  ;;  %v1570_v21 = vadd.f32 %v1514_v61, %v12554_v11  ;;  %v4080_v11 = vsel %vm12509_vm5, %v10969_v6, %v4079_v3  ;;  %v10864_v3 = vld [vmem:[%s12164_s10 + $0x38] sm:$0x1]  ;;  %v3806_v61 = vpack.c.b16 %v3776_v28, %v3775_v17 }
 0x1b8   : > { %v2513_v63 = vpop.f32.mrf.mxu0  ;;  %v4201_v59 = vunpack.c.l.b16 %v4080_v11  ;;  %v3440_v27 = vshll.u32 %v10864_v3, 16  ;;  %v10954_v11 = vld [vmem:[%s12164_s10 + $0x30] sm:$0xe]  ;;  %v3438_v17 = vrot.slane %v3437_v38, 4 }
 0x1b9   : > { %v1885_v0 = vadd.f32 %v1829_v19, %v1570_v21  ;;  %v3427_v19 = vor.u32 %v3426_v54, %v3423_v4  ;;  %v4628_v21 = vld [vmem:[%s13144_s16] sm:$0xff]  ;;  %v10865_v4 = vld [vmem:[%s12164_s10 + $0x3c] sm:$0xf]  ;;  %v10970_v54 = vrot.slane %v10954_v11, 9 }
 0x1ba   : > { %v13132_v2 = vpop.f32.mrf.mxu1  ;;  %v4232_v47 = vpack.c.b16 %v4202_v62, %v4201_v59  ;;  %4692 = vrot.lane.b32.xlu0 %v4628_v21, %s12049_s17  ;;  %v3442_v28 = vrot.slane %v3440_v27, 5  ;;  %v4089_v62 = vrot.slane %v10864_v3, 5  ;;  %v3454_v21 = vshll.u32 %v13159_v52, 16 }
 0x1bb   : > { %15993 = vst [vmem:[#allocation13_spill] sm:$0xff] %v13132_v2  ;;  %v13139_v49 = vadd.f32 %v2511_v35, %v1885_v0  ;;  %v4086_v0 = vrot.slane %v13123_v37, 5  ;;  %v3428_v12 = vrot.slane %v3427_v19, 4 }
 0x1bc   : > { %v3443_v19 = vsel %vm12201_vm2, %v3438_v17, %v3442_v28 }
 0x1bd   : > { %v4088_v59 = vrot.slane %v4086_v0, 4 }
 0x1be   : > { %v1516_v6 = vpop.f32.mrf.mxu2 }
 0x1bf   : > { %v1831_v8 = vpop.f32.mrf.mxu3  ;;  %v1571_v35 = vadd.f32 %v1516_v6, %v12572_v46 }
 0x1c0   : > { %v2516_v25 = vpop.f32.mrf.mxu0 }
 0x1c1   : > { %v1886_v44 = vadd.f32 %v1831_v8, %v1571_v35  ;;  %v3433_v35 = vsel %vm12201_vm2, %v3428_v12, %v3432_v5  ;;  %v4090_v5 = vsel %vm12509_vm5, %v4088_v59, %v4089_v62  ;;  %v3778_v12 = vunpack.c.l.b16 %v3443_v19  ;;  %v4630_v62 = vld [vmem:[%s13144_s16 + $0x10] sm:$0xff] }
 0x1c2   : > { %v13151_v14 = vpop.f32.mrf.mxu1  ;;  %4696 = vrot.lane.b32.xlu1 %v4630_v62, %s12049_s17 }
 0x1c3   : > { %15994 = vst [vmem:[#allocation14_spill] sm:$0xff] %v13151_v14  ;;  %3216 = vmatmul.bf16.gmra.mxu2 %v11607_v50  ;;  %v13155_v46 = vadd.f32 %v2513_v63, %v1886_v44  ;;  %4324 = vmatmul.bf16.gmra.mxu0 %v4232_v47  ;;  %v3445_v63 = vshrl.u32 %v10865_v4, 16  ;;  %v3448_v50 = vshll.u32 %v10865_v4, 16  ;;  %v3458_v47 = vshrl.u32 %v13159_v52, 16 }
 0x1c4   : > { %3898 = vmatmul.bf16.gmra.mxu3 %v3806_v61  ;;  %v4629_v61 = vld [vmem:[%s13144_s16 + $0x8] sm:$0xff]  ;;  %v3777_v44 = vunpack.c.l.b16 %v3433_v35 }
 0x1c5   : > { %4694 = vrot.lane.b32.xlu0 %v4629_v61, %s12049_s17  ;;  %v3447_v17 = vrot.slane %v3445_v63, 4  ;;  %v3450_v28 = vrot.slane %v3448_v50, 5  ;;  %v10867_v61 = vld [vmem:[%s12164_s10 + $0x44] sm:$0x1] }
 0x1c6   : > { %v1519_v6 = vpop.f32.mrf.mxu2  ;;  %v3807_v2 = vpack.c.b16 %v3778_v12, %v3777_v44  ;;  %v3464_v19 = vshll.u32 %v10867_v61, 16  ;;  %v10868_v44 = vld [vmem:[%s12164_s10 + $0x48] sm:$0xf] }
 0x1c7   : > { %v1834_v8 = vpop.f32.mrf.mxu3  ;;  %v1572_v37 = vadd.f32 %v1519_v6, %v12586_v18  ;;  %v4087_v18 = vsel %vm12509_vm5, %v10970_v54, %v4086_v0  ;;  %v4204_v6 = vunpack.c.l.b16 %v4090_v5  ;;  %v11608_v54 = vld [vmem:[%s12164_s10 + $0x30] sm:$0xff]  ;;  %v3451_v59 = vor.u32 %v3450_v28, %v3447_v17  ;;  %v13191_v28 = vld [vmem:[%s12164_s10 + $0x4c] sm:$0xf] }
 0x1c8   : > { %v2518_v38 = vpop.f32.mrf.mxu0  ;;  %v4203_v4 = vunpack.c.l.b16 %v4087_v18  ;;  %v3466_v5 = vrot.slane %v3464_v19, 5  ;;  %v3482_v62 = vshrl.u32 %v13191_v28, 16 }
 0x1c9   : > { %v1887_v3 = vadd.f32 %v1834_v8, %v1572_v37  ;;  %v3456_v8 = vrot.slane %v3454_v21, 5  ;;  %v3460_v37 = vrot.slane %v3458_v47, 4  ;;  %v4093_v47 = vrot.slane %v13159_v52, 5 }
 0x1ca   : > { %v13170_v27 = vpop.f32.mrf.mxu1  ;;  %v4233_v35 = vpack.c.b16 %v4204_v6, %v4203_v4 }
 0x1cb   : > { %15995 = vst [vmem:[#allocation15_spill] sm:$0xff] %v13170_v27  ;;  %v13176_v11 = vadd.f32 %v2516_v25, %v1887_v3  ;;  %v3461_v25 = vor.u32 %v3460_v37, %v3456_v8  ;;  %v10955_v3 = vld [vmem:[%s12164_s10 + $0x3c] sm:$0xe]  ;;  %v4095_v17 = vrot.slane %v4093_v47, 4  ;;  %v3469_v37 = vshrl.u32 %v10868_v44, 16 }
 0x1cc   : > { %v10971_v12 = vrot.slane %v10955_v3, 9 }
 0x1cd   : > { %15996 = vst [vmem:[#allocation16_spill] sm:$0xff] %v13176_v11  ;;  %v3462_v18 = vrot.slane %v3461_v25, 4  ;;  %v4868_v11 = vld [vmem:[#allocation2 + $0x18] sm:$0x1] }
 0x1ce   : > { %v1521_v27 = vpop.f32.mrf.mxu2 }
 0x1cf   : > { %v1836_v14 = vpop.f32.mrf.mxu3  ;;  %v1573_v0 = vadd.f32 %v1521_v27, %v12605_v57  ;;  %v3452_v27 = vrot.slane %v3451_v59, 4  ;;  %v3478_v59 = vshll.u32 %v13191_v28, 16 }
 0x1d0   : > { %v2521_v50 = vpop.f32.mrf.mxu0 }
 0x1d1   : > { %v1888_v63 = vadd.f32 %v1836_v14, %v1573_v0  ;;  %v4096_v14 = vrot.slane %v10867_v61, 5  ;;  %v4631_v0 = vld [vmem:[%s13144_s16 + $0x18] sm:$0xff] }
 0x1d2   : > { %v13183_v21 = vpop.f32.mrf.mxu1  ;;  %4698 = vrot.lane.b32.xlu1 %v4631_v0, %s12049_s17 }
 0x1d3   : > { %15997 = vst [vmem:[#allocation17_spill] sm:$0xff] %v13183_v21  ;;  %3221 = vmatmul.bf16.gmra.mxu2 %v11608_v54  ;;  %v13187_v57 = vadd.f32 %v2518_v38, %v1888_v63  ;;  %4329 = vmatmul.bf16.gmra.mxu0 %v4233_v35  ;;  %v3457_v38 = vsel %vm12201_vm2, %v3452_v27, %v3456_v8  ;;  %v3471_v27 = vrot.slane %v3469_v37, 4 }
 0x1d4   : > { %3903 = vmatmul.bf16.gmra.mxu3 %v3807_v2  ;;  %v3472_v2 = vshll.u32 %v10868_v44, 16  ;;  %v3467_v54 = vsel %vm12201_vm2, %v3462_v18, %v3466_v5  ;;  %v4097_v8 = vsel %vm12509_vm5, %v4095_v17, %v4096_v14  ;;  %v3779_v19 = vunpack.c.l.b16 %v3457_v38 }
 0x1d5   : > { %15998 = vst [vmem:[#allocation18_spill] sm:$0xff] %v13187_v57  ;;  %v3780_v3 = vunpack.c.l.b16 %v3467_v54  ;;  %v4206_v44 = vunpack.c.l.b16 %v4097_v8  ;;  %v4100_v54 = vrot.slane %v13191_v28, 5  ;;  %v10871_v8 = vld [vmem:[%s12164_s10 + $0x54] sm:$0xf] }
 0x1d6   : > { %v1524_v4 = vpop.f32.mrf.mxu2  ;;  %v3474_v18 = vrot.slane %v3472_v2, 5 }
 0x1d7   : > { %v1839_v6 = vpop.f32.mrf.mxu3  ;;  %v1574_v52 = vadd.f32 %v1524_v4, %v12625_v32  ;;  %v4094_v32 = vsel %vm12509_vm5, %v10971_v12, %v4093_v47  ;;  %v3480_v4 = vrot.slane %v3478_v59, 5  ;;  %v11609_v47 = vld [vmem:[%s12164_s10 + $0x3c] sm:$0xff]  ;;  %v3808_v12 = vpack.c.b16 %v3780_v3, %v3779_v19  ;;  %v10956_v59 = vld [vmem:[%s12164_s10 + $0x48] sm:$0xe] }
 0x1d8   : > { %v2523_v35 = vpop.f32.mrf.mxu0  ;;  %v4205_v5 = vunpack.c.l.b16 %v4094_v32  ;;  %v3475_v57 = vor.u32 %v3474_v18, %v3471_v27  ;;  %v10972_v19 = vrot.slane %v10956_v59, 9  ;;  %v4102_v3 = vrot.slane %v4100_v54, 4 }
 0x1d9   : > { %v1889_v61 = vadd.f32 %v1839_v6, %v1574_v52  ;;  %v3484_v6 = vrot.slane %v3482_v62, 4  ;;  %v10870_v52 = vld [vmem:[%s12164_s10 + $0x50] sm:$0x1] }
 0x1da   : > { %v13202_v25 = vpop.f32.mrf.mxu1  ;;  %v4234_v17 = vpack.c.b16 %v4206_v44, %v4205_v5  ;;  %v3488_v14 = vshll.u32 %v10870_v52, 16  ;;  %v4103_v27 = vrot.slane %v10870_v52, 5  ;;  %v3496_v44 = vshll.u32 %v10871_v8, 16 }
 0x1db   : > { %15999 = vst [vmem:[#allocation19_spill] sm:$0xff] %v13202_v25  ;;  %v13208_v63 = vadd.f32 %v2521_v50, %v1889_v61  ;;  %v3485_v50 = vor.u32 %v3484_v6, %v3480_v4 }
 0x1dc   : > { %v3490_v32 = vrot.slane %v3488_v14, 5  ;;  %v3498_v59 = vrot.slane %v3496_v44, 5 }
 0x1dd   : > { %16000 = vst [vmem:[#allocation20_spill] sm:$0xff] %v13208_v63  ;;  %v3486_v61 = vrot.slane %v3485_v50, 4 }
 0x1de   : > { %v1526_v0 = vpop.f32.mrf.mxu2 }
 0x1df   : > { %v1841_v25 = vpop.f32.mrf.mxu3  ;;  %v1575_v21 = vadd.f32 %v1526_v0, %v12649_v10  ;;  %v3476_v10 = vrot.slane %v3475_v57, 4  ;;  %v3491_v57 = vsel %vm12201_vm2, %v3486_v61, %v3490_v32 }
 0x1e0   : > { %v2526_v37 = vpop.f32.mrf.mxu0  ;;  %v3782_v14 = vunpack.c.l.b16 %v3491_v57 }
 0x1e1   : > { %v1890_v38 = vadd.f32 %v1841_v25, %v1575_v21  ;;  %v13221_v21 = vld [vmem:[%s12164_s10 + $0x58] sm:$0xf]  ;;  %v3481_v28 = vsel %vm12201_vm2, %v3476_v10, %v3480_v4  ;;  %v4104_v4 = vsel %vm12509_vm5, %v4102_v3, %v4103_v27  ;;  %v4634_v27 = vld [vmem:[%s13144_s16 + $0x30] sm:$0xff] }
 0x1e2   : > { %v13213_v2 = vpop.f32.mrf.mxu1  ;;  %v3502_v6 = vshll.u32 %v13221_v21, 16  ;;  %v3506_v0 = vshrl.u32 %v13221_v21, 16  ;;  %v4208_v61 = vunpack.c.l.b16 %v4104_v4  ;;  %4704 = vrot.lane.b32.xlu0 %v4634_v27, %s12049_s17 }
 0x1e3   : > { %16001 = vst [vmem:[#allocation21_spill] sm:$0xff] %v13213_v2  ;;  %3226 = vmatmul.bf16.gmra.mxu2 %v11609_v47  ;;  %v13217_v62 = vadd.f32 %v2523_v35, %v1890_v38  ;;  %4334 = vmatmul.bf16.gmra.mxu0 %v4234_v17  ;;  %v3493_v35 = vshrl.u32 %v10871_v8, 16  ;;  %v3781_v17 = vunpack.c.l.b16 %v3481_v28 }
 0x1e4   : > { %3908 = vmatmul.bf16.gmra.mxu3 %v3808_v12  ;;  %v3504_v32 = vrot.slane %v3502_v6, 5  ;;  %v3508_v8 = vrot.slane %v3506_v0, 4  ;;  %v4107_v0 = vrot.slane %v13221_v21, 5 }
 0x1e5   : > { %16002 = vst [vmem:[#allocation22_spill] sm:$0xff] %v13217_v62  ;;  %v3495_v38 = vrot.slane %v3493_v35, 4  ;;  %v3809_v2 = vpack.c.b16 %v3782_v14, %v3781_v17  ;;  %v10874_v14 = vld [vmem:[%s12164_s10 + $0x60] sm:$0xf] }
 0x1e6   : > { %v1529_v25 = vpop.f32.mrf.mxu2 }
 0x1e7   : > { %v1844_v18 = vpop.f32.mrf.mxu3  ;;  %v1576_v5 = vadd.f32 %v1529_v25, %v12667_v45  ;;  %v4101_v45 = vsel %vm12509_vm5, %v10972_v19, %v4100_v54  ;;  %v10873_v25 = vld [vmem:[%s12164_s10 + $0x5c] sm:$0x1]  ;;  %v11610_v19 = vld [vmem:[%s12164_s10 + $0x48] sm:$0xff]  ;;  %v3499_v3 = vor.u32 %v3498_v59, %v3495_v38  ;;  %v4109_v59 = vrot.slane %v4107_v0, 4 }
 0x1e8   : > { %v2528_v47 = vpop.f32.mrf.mxu0  ;;  %v4207_v10 = vunpack.c.l.b16 %v4101_v45  ;;  %v3512_v57 = vshll.u32 %v10873_v25, 16 }
 0x1e9   : > { %v1891_v52 = vadd.f32 %v1844_v18, %v1576_v5  ;;  %v3500_v45 = vrot.slane %v3499_v3, 4 }
 0x1ea   : > { %v13230_v12 = vpop.f32.mrf.mxu1  ;;  %v4235_v28 = vpack.c.b16 %v4208_v61, %v4207_v10  ;;  %v3514_v17 = vrot.slane %v3512_v57, 5  ;;  %v4110_v10 = vrot.slane %v10873_v25, 5  ;;  %v13251_v61 = vld [vmem:[%s12164_s10 + $0x64] sm:$0xf] }
 0x1eb   : > { %16003 = vst [vmem:[#allocation23_spill] sm:$0xff] %v13230_v12  ;;  %v13236_v50 = vadd.f32 %v2526_v37, %v1891_v52  ;;  %v3509_v37 = vor.u32 %v3508_v8, %v3504_v32  ;;  %v10957_v52 = vld [vmem:[%s12164_s10 + $0x54] sm:$0xe]  ;;  %v3526_v27 = vshll.u32 %v13251_v61, 16  ;;  %v3530_v25 = vshrl.u32 %v13251_v61, 16 }
 0x1ec   : > { %v10973_v38 = vrot.slane %v10957_v52, 9  ;;  %v4111_v57 = vsel %vm12509_vm5, %v4109_v59, %v4110_v10  ;;  %v4633_v10 = vld [vmem:[%s13144_s16 + $0x28] sm:$0xff] }
 0x1ed   : > { %16004 = vst [vmem:[#allocation24_spill] sm:$0xff] %v13236_v50  ;;  %v3510_v4 = vrot.slane %v3509_v37, 4  ;;  %v13423_v50 = vld [vmem:[%s12164_s10 + $0xac] sm:$0xf] }
 0x1ee   : > { %v1531_v18 = vpop.f32.mrf.mxu2 }
 0x1ef   : > { %v1846_v5 = vpop.f32.mrf.mxu3  ;;  %v1577_v54 = vadd.f32 %v1531_v18, %v12680_v16  ;;  %v3515_v3 = vsel %vm12201_vm2, %v3510_v4, %v3514_v17 }
 0x1f0   : > { %v2531_v44 = vpop.f32.mrf.mxu0 }
 0x1f1   : > { %v1892_v35 = vadd.f32 %v1846_v5, %v1577_v54  ;;  %v3520_v5 = vshll.u32 %v10874_v14, 16  ;;  %v4632_v54 = vld [vmem:[%s13144_s16 + $0x20] sm:$0xff] }
 0x1f2   : > { %v13243_v6 = vpop.f32.mrf.mxu1  ;;  %4700 = vrot.lane.b32.xlu2 %v4632_v54, %s12049_s17  ;;  %v10876_v54 = vld [vmem:[%s12164_s10 + $0x68] sm:$0x1] }
 0x1f3   : > { %16005 = vst [vmem:[#allocation25_spill] sm:$0xff] %v13243_v6  ;;  %3231 = vmatmul.bf16.gmra.mxu2 %v11610_v19  ;;  %v13247_v16 = vadd.f32 %v2528_v47, %v1892_v35  ;;  %4339 = vmatmul.bf16.gmra.mxu0 %v4235_v28  ;;  %v3505_v47 = vsel %vm12201_vm2, %v3500_v45, %v3504_v32  ;;  %v4635_v19 = vld [vmem:[%s13144_s16 + $0x38] sm:$0xff]  ;;  %v3784_v45 = vunpack.c.l.b16 %v3515_v3  ;;  %v3522_v17 = vrot.slane %v3520_v5, 5 }
 0x1f4   : > { %3913 = vmatmul.bf16.gmra.mxu3 %v3809_v2  ;;  %v3517_v2 = vshrl.u32 %v10874_v14, 16  ;;  %4706 = vrot.lane.b32.xlu1 %v4635_v19, %s12049_s17  ;;  %v4108_v32 = vsel %vm12509_vm5, %v10973_v38, %v4107_v0  ;;  %v3783_v35 = vunpack.c.l.b16 %v3505_v47  ;;  %v11611_v38 = vld [vmem:[%s12164_s10 + $0x54] sm:$0xff]  ;;  %v3536_v3 = vshll.u32 %v10876_v54, 16 }
 0x1f5   : > { %16006 = vst [vmem:[#allocation26_spill] sm:$0xff] %v13247_v16  ;;  %v4209_v14 = vunpack.c.l.b16 %v4108_v32 }
 0x1f6   : > { %v1534_v8 = vpop.f32.mrf.mxu2  ;;  %v3519_v4 = vrot.slane %v3517_v2, 4  ;;  %v3810_v6 = vpack.c.b16 %v3784_v45, %v3783_v35  ;;  %v3538_v35 = vrot.slane %v3536_v3, 5  ;;  %v10877_v45 = vld [vmem:[%s12164_s10 + $0x6c] sm:$0xf] }
 0x1f7   : > { %v1849_v18 = vpop.f32.mrf.mxu3  ;;  %v1578_v21 = vadd.f32 %v1534_v8, %v12700_v60  ;;  %v4210_v8 = vunpack.c.l.b16 %v4111_v57 }
 0x1f8   : > { %v2533_v28 = vpop.f32.mrf.mxu0  ;;  %v3523_v59 = vor.u32 %v3522_v17, %v3519_v4 }
 0x1f9   : > { %v1893_v60 = vadd.f32 %v1849_v18, %v1578_v21  ;;  %v3528_v18 = vrot.slane %v3526_v27, 5  ;;  %v3532_v21 = vrot.slane %v3530_v25, 4  ;;  %v4236_v47 = vpack.c.b16 %v4210_v8, %v4209_v14 }
 0x1fa   : > { %v13264_v37 = vpop.f32.mrf.mxu1  ;;  %4702 = vrot.lane.b32.xlu2 %v4633_v10, %s12049_s17  ;;  %v4114_v25 = vrot.slane %v13251_v61, 5  ;;  %v3524_v32 = vrot.slane %v3523_v59, 4  ;;  %v4117_v14 = vrot.slane %v10876_v54, 5 }
 0x1fb   : > { %16007 = vst [vmem:[#allocation27_spill] sm:$0xff] %v13264_v37  ;;  %v13270_v52 = vadd.f32 %v2531_v44, %v1893_v60  ;;  %v3533_v44 = vor.u32 %v3532_v21, %v3528_v18  ;;  %v10958_v60 = vld [vmem:[%s12164_s10 + $0x60] sm:$0xe] }
 0x1fc   : > { %v10974_v4 = vrot.slane %v10958_v60, 9  ;;  %v4116_v17 = vrot.slane %v4114_v25, 4  ;;  %v3529_v61 = vsel %vm12201_vm2, %v3524_v32, %v3528_v18 }
 0x1fd   : > { %16008 = vst [vmem:[#allocation28_spill] sm:$0xff] %v13270_v52  ;;  %v3534_v57 = vrot.slane %v3533_v44, 4  ;;  %v3785_v18 = vunpack.c.l.b16 %v3529_v61 }
 0x1fe   : > { %v1536_v19 = vpop.f32.mrf.mxu2 }
 0x1ff   : > { %v1851_v37 = vpop.f32.mrf.mxu3  ;;  %v1579_v0 = vadd.f32 %v1536_v19, %v12722_v43 }
 0x200   : > { %v2536_v5 = vpop.f32.mrf.mxu0 }
 0x201   : > { %v1894_v2 = vadd.f32 %v1851_v37, %v1579_v0  ;;  %v13285_v37 = vld [vmem:[%s12164_s10 + $0x70] sm:$0xf]  ;;  %v3544_v0 = vshll.u32 %v10877_v45, 16 }
 0x202   : > { %v13277_v27 = vpop.f32.mrf.mxu1  ;;  %v3554_v59 = vshrl.u32 %v13285_v37, 16 }
 0x203   : > { %16009 = vst [vmem:[#allocation29_spill] sm:$0xff] %v13277_v27  ;;  %3236 = vmatmul.bf16.gmra.mxu2 %v11611_v38  ;;  %v13281_v43 = vadd.f32 %v2533_v28, %v1894_v2  ;;  %4344 = vmatmul.bf16.gmra.mxu0 %v4236_v47  ;;  %v3541_v28 = vshrl.u32 %v10877_v45, 16  ;;  %v3550_v38 = vshll.u32 %v13285_v37, 16  ;;  %v4115_v47 = vsel %vm12509_vm5, %v10974_v4, %v4114_v25  ;;  %v11612_v27 = vld [vmem:[%s12164_s10 + $0x60] sm:$0xff] }
 0x204   : > { %3918 = vmatmul.bf16.gmra.mxu3 %v3810_v6  ;;  %v3539_v6 = vsel %vm12201_vm2, %v3534_v57, %v3538_v35  ;;  %v3546_v32 = vrot.slane %v3544_v0, 5  ;;  %v4211_v57 = vunpack.c.l.b16 %v4115_v47  ;;  %v4121_v0 = vrot.slane %v13285_v37, 5  ;;  %v10959_v47 = vld [vmem:[%s12164_s10 + $0x6c] sm:$0xe] }
 0x205   : > { %16010 = vst [vmem:[#allocation30_spill] sm:$0xff] %v13281_v43  ;;  %v3786_v2 = vunpack.c.l.b16 %v3539_v6  ;;  %v3543_v60 = vrot.slane %v3541_v28, 4  ;;  %v3552_v45 = vrot.slane %v3550_v38, 5 }
 0x206   : > { %v1539_v8 = vpop.f32.mrf.mxu2 }
 0x207   : > { %v1854_v21 = vpop.f32.mrf.mxu3  ;;  %v1580_v19 = vadd.f32 %v1539_v8, %v12736_v26  ;;  %v4118_v26 = vsel %vm12509_vm5, %v4116_v17, %v4117_v14  ;;  %v3556_v8 = vrot.slane %v3554_v59, 4  ;;  %v3811_v17 = vpack.c.b16 %v3786_v2, %v3785_v18  ;;  %v10880_v18 = vld [vmem:[%s12164_s10 + $0x78] sm:$0xf] }
 0x208   : > { %v2538_v10 = vpop.f32.mrf.mxu0  ;;  %v4212_v35 = vunpack.c.l.b16 %v4118_v26 }
 0x209   : > { %v1895_v54 = vadd.f32 %v1854_v21, %v1580_v19  ;;  %v10879_v21 = vld [vmem:[%s12164_s10 + $0x74] sm:$0x1]  ;;  %v3557_v61 = vor.u32 %v3556_v8, %v3552_v45 }
 0x20a   : > { %v13300_v3 = vpop.f32.mrf.mxu1  ;;  %v4237_v14 = vpack.c.b16 %v4212_v35, %v4211_v57  ;;  %v4124_v57 = vrot.slane %v10879_v21, 5  ;;  %v13313_v35 = vld [vmem:[%s12164_s10 + $0x7c] sm:$0xf] }
 0x20b   : > { %v13298_v44 = vadd.f32 %v2536_v5, %v1895_v54  ;;  %16012 = vst [vmem:[#allocation32_spill] sm:$0xff] %v13300_v3  ;;  %v3547_v5 = vor.u32 %v3546_v32, %v3543_v60  ;;  %v3560_v54 = vshll.u32 %v10879_v21, 16  ;;  %v10975_v60 = vrot.slane %v10959_v47, 9 }
 0x20c   : > { %v4123_v32 = vrot.slane %v4121_v0, 4 }
 0x20d   : > { %16011 = vst [vmem:[#allocation31_spill] sm:$0xff] %v13298_v44  ;;  %v3548_v59 = vrot.slane %v3547_v5, 4  ;;  %v3562_v26 = vrot.slane %v3560_v54, 5  ;;  %v3578_v5 = vshrl.u32 %v13313_v35, 16 }
 0x20e   : > { %v1541_v19 = vpop.f32.mrf.mxu2 }
 0x20f   : > { %v1856_v25 = vpop.f32.mrf.mxu3  ;;  %v1581_v4 = vadd.f32 %v1541_v19, %v12757_v7  ;;  %v3558_v7 = vrot.slane %v3557_v61, 4  ;;  %v4122_v61 = vsel %vm12509_vm5, %v10975_v60, %v4121_v0  ;;  %v11613_v0 = vld [vmem:[%s12164_s10 + $0x6c] sm:$0xff] }
 0x210   : > { %v2541_v28 = vpop.f32.mrf.mxu0 }
 0x211   : > { %v1896_v6 = vadd.f32 %v1856_v25, %v1581_v4  ;;  %v3568_v25 = vshll.u32 %v10880_v18, 16  ;;  %v3563_v4 = vsel %vm12201_vm2, %v3558_v7, %v3562_v26  ;;  %v4213_v7 = vunpack.c.l.b16 %v4122_v61 }
 0x212   : > { %v13310_v2 = vpop.f32.mrf.mxu1 }
 0x213   : > { %3241 = vmatmul.bf16.gmra.mxu2 %v11612_v27  ;;  %v13307_v38 = vadd.f32 %v2538_v10, %v1896_v6  ;;  %4349 = vmatmul.bf16.gmra.mxu0 %v4237_v14  ;;  %16014 = vst [vmem:[#allocation34_spill] sm:$0xff] %v13310_v2  ;;  %v3553_v27 = vsel %vm12201_vm2, %v3548_v59, %v3552_v45  ;;  %v3565_v10 = vshrl.u32 %v10880_v18, 16  ;;  %v3788_v6 = vunpack.c.l.b16 %v3563_v4 }
 0x214   : > { %3923 = vmatmul.bf16.gmra.mxu3 %v3811_v17  ;;  %v3574_v17 = vshll.u32 %v13313_v35, 16  ;;  %v3787_v45 = vunpack.c.l.b16 %v3553_v27  ;;  %v3570_v59 = vrot.slane %v3568_v25, 5  ;;  %v4128_v4 = vrot.slane %v13313_v35, 5 }
 0x215   : > { %16013 = vst [vmem:[#allocation33_spill] sm:$0xff] %v13307_v38  ;;  %v3567_v47 = vrot.slane %v3565_v10, 4 }
 0x216   : > { %v1544_v8 = vpop.f32.mrf.mxu2  ;;  %v3576_v18 = vrot.slane %v3574_v17, 5  ;;  %v3812_v60 = vpack.c.b16 %v3788_v6, %v3787_v45  ;;  %v10960_v17 = vld [vmem:[%s12164_s10 + $0x78] sm:$0xe]  ;;  %v4130_v6 = vrot.slane %v4128_v4, 4 }
 0x217   : > { %v1859_v19 = vpop.f32.mrf.mxu3  ;;  %v1582_v37 = vadd.f32 %v1544_v8, %v12781_v51  ;;  %v4125_v51 = vsel %vm12509_vm5, %v4123_v32, %v4124_v57  ;;  %v3580_v8 = vrot.slane %v3578_v5, 4  ;;  %v3571_v38 = vor.u32 %v3570_v59, %v3567_v47  ;;  %v13339_v59 = vld [vmem:[%s12164_s10 + $0x88] sm:$0xf] }
 0x218   : > { %v2543_v14 = vpop.f32.mrf.mxu0  ;;  %v4214_v26 = vunpack.c.l.b16 %v4125_v51  ;;  %v10883_v51 = vld [vmem:[%s12164_s10 + $0x84] sm:$0xf]  ;;  %v10976_v45 = vrot.slane %v10960_v17, 9 }
 0x219   : > { %v1897_v21 = vadd.f32 %v1859_v19, %v1582_v37  ;;  %v10882_v19 = vld [vmem:[%s12164_s10 + $0x80] sm:$0x1]  ;;  %v3581_v57 = vor.u32 %v3580_v8, %v3576_v18  ;;  %v3592_v8 = vshll.u32 %v10883_v51, 16 }
 0x21a   : > { %v13331_v32 = vpop.f32.mrf.mxu1  ;;  %v3584_v27 = vshll.u32 %v10882_v19, 16  ;;  %v4131_v47 = vrot.slane %v10882_v19, 5 }
 0x21b   : > { %v13326_v54 = vadd.f32 %v2541_v28, %v1897_v21  ;;  %16016 = vst [vmem:[#allocation36_spill] sm:$0xff] %v13331_v32  ;;  %v4238_v28 = vpack.c.b16 %v4214_v26, %v4213_v7  ;;  %v3582_v21 = vrot.slane %v3581_v57, 4 }
 0x21c   : > { %v3586_v61 = vrot.slane %v3584_v27, 5  ;;  %v4132_v57 = vsel %vm12509_vm5, %v4130_v6, %v4131_v47  ;;  %v11614_v47 = vld [vmem:[%s12164_s10 + $0x78] sm:$0xff] }
 0x21d   : > { %16015 = vst [vmem:[#allocation35_spill] sm:$0xff] %v13326_v54 }
 0x21e   : > { %v1546_v37 = vpop.f32.mrf.mxu2 }
 0x21f   : > { %v1861_v2 = vpop.f32.mrf.mxu3  ;;  %v1583_v3 = vadd.f32 %v1546_v37, %v12797_v24  ;;  %v3572_v24 = vrot.slane %v3571_v38, 4  ;;  %v3587_v38 = vsel %vm12201_vm2, %v3582_v21, %v3586_v61  ;;  %v3598_v37 = vshll.u32 %v13339_v59, 16 }
 0x220   : > { %v2546_v25 = vpop.f32.mrf.mxu0  ;;  %v3790_v17 = vunpack.c.l.b16 %v3587_v38  ;;  %v3594_v21 = vrot.slane %v3592_v8, 5 }
 0x221   : > { %v1898_v10 = vadd.f32 %v1861_v2, %v1583_v3  ;;  %v16018_v2 = vld [vmem:[#allocation6_spill] sm:$0xff]  ;;  %v3577_v35 = vsel %vm12201_vm2, %v3572_v24, %v3576_v18 }
 0x222   : > { %v2972_v18 = vpop.f32.mrf.mxu1  ;;  %v3789_v27 = vunpack.c.l.b16 %v3577_v35 }
 0x223   : > { %3246 = vmatmul.bf16.gmra.mxu2 %v11613_v0  ;;  %v13335_v5 = vadd.f32 %v2543_v14, %v1898_v10  ;;  %4354 = vmatmul.bf16.gmra.mxu0 %v4238_v28  ;;  %v3589_v14 = vshrl.u32 %v10883_v51, 16  ;;  %v3602_v0 = vshrl.u32 %v13339_v59, 16  ;;  %v4129_v28 = vsel %vm12509_vm5, %v10976_v45, %v4128_v4  ;;  %v16020_v45 = vld [vmem:[#allocation7_spill] sm:$0xff] }
 0x224   : > { %3928 = vmatmul.bf16.gmra.mxu3 %v3812_v60  ;;  %v4215_v61 = vunpack.c.l.b16 %v4129_v28  ;;  %v4216_v51 = vunpack.c.l.b16 %v4132_v57  ;;  %v3813_v32 = vpack.c.b16 %v3790_v17, %v3789_v27  ;;  %v13363_v27 = vld [vmem:[%s12164_s10 + $0x94] sm:$0xf] }
 0x225   : > { %16017 = vst [vmem:[#allocation37_spill] sm:$0xff] %v13335_v5  ;;  %v3591_v24 = vrot.slane %v3589_v14, 4 }
 0x226   : > { %v1549_v7 = vpop.f32.mrf.mxu2 }
 0x227   : > { %v1864_v3 = vpop.f32.mrf.mxu3  ;;  %v1584_v26 = vadd.f32 %v1549_v7, %v16018_v2  ;;  %v3600_v7 = vrot.slane %v3598_v37, 5  ;;  %v3604_v2 = vrot.slane %v3602_v0, 4  ;;  %v3595_v35 = vor.u32 %v3594_v21, %v3591_v24  ;;  %v10961_v0 = vld [vmem:[%s12164_s10 + $0x84] sm:$0xe] }
 0x228   : > { %v2548_v60 = vpop.f32.mrf.mxu0  ;;  %v4135_v37 = vrot.slane %v13339_v59, 5  ;;  %v10977_v17 = vrot.slane %v10961_v0, 9  ;;  %v16022_v59 = vld [vmem:[#allocation8_spill] sm:$0xff] }
 0x229   : > { %v1899_v19 = vadd.f32 %v1864_v3, %v1584_v26  ;;  %v10885_v26 = vld [vmem:[%s12164_s10 + $0x8c] sm:$0x1]  ;;  %v3605_v14 = vor.u32 %v3604_v2, %v3600_v7  ;;  %v3596_v57 = vrot.slane %v3595_v35, 4 }
 0x22a   : > { %v3608_v8 = vshll.u32 %v10885_v26, 16  ;;  %v4137_v24 = vrot.slane %v4135_v37, 4  ;;  %v4138_v21 = vrot.slane %v10885_v26, 5  ;;  %v13375_v26 = vld [vmem:[%s15879_s3] ss:$0 sm:$0xff] }
 0x22b   : > { %v2581_v10 = vadd.f32 %v2546_v25, %v1899_v19  ;;  %v4239_v25 = vpack.c.b16 %v4216_v51, %v4215_v61 }
 0x22d   : > { %v13352_v3 = vadd.f32 %v2972_v18, %v2581_v10  ;;  %v10886_v18 = vld [vmem:[%s12164_s10 + $0x90] sm:$0xf]  ;;  %v3610_v10 = vrot.slane %v3608_v8, 5 }
 0x22e   : > { %v1551_v54 = vpop.f32.mrf.mxu2  ;;  %v3613_v2 = vshrl.u32 %v10886_v18, 16 }
 0x22f   : > { %16019 = vst [vmem:[#allocation6_spill] sm:$0xff] %v13352_v3  ;;  %v1866_v4 = vpop.f32.mrf.mxu3  ;;  %v1585_v6 = vadd.f32 %v1551_v54, %v16020_v45  ;;  %v3606_v54 = vrot.slane %v3605_v14, 4  ;;  %v4136_v14 = vsel %vm12509_vm5, %v10977_v17, %v4135_v37  ;;  %v16049_v3 = vld [vmem:[#allocation10_spill] sm:$0xff] }
 0x230   : > { %v4320_v19 = vpop.f32.mrf.mxu0 }
 0x231   : > { %v1900_v38 = vadd.f32 %v1866_v4, %v1585_v6  ;;  %v3616_v4 = vshll.u32 %v10886_v18, 16  ;;  %v3626_v6 = vshrl.u32 %v13363_v27, 16 }
 0x233   : > { %3251 = vmatmul.bf16.gmra.mxu2 %v11614_v47  ;;  %v13359_v28 = vadd.f32 %v2548_v60, %v1900_v38  ;;  %4359 = vmatmul.bf16.gmra.mxu0 %v4239_v25  ;;  %v3622_v60 = vshll.u32 %v13363_v27, 16  ;;  %v3611_v47 = vsel %vm12201_vm2, %v3606_v54, %v3610_v10  ;;  %v3615_v38 = vrot.slane %v3613_v2, 4  ;;  %v10888_v54 = vld [vmem:[%s12164_s10 + $0x98] sm:$0x1]  ;;  %v11615_v2 = vld [vmem:[%s12164_s10 + $0x84] sm:$0xff] }
 0x234   : > { %3933 = vmatmul.bf16.gmra.mxu3 %v3813_v32  ;;  %v3601_v32 = vsel %vm12201_vm2, %v3596_v57, %v3600_v7  ;;  %v4139_v7 = vsel %vm12509_vm5, %v4137_v24, %v4138_v21  ;;  %v3618_v0 = vrot.slane %v3616_v4, 5  ;;  %v3792_v18 = vunpack.c.l.b16 %v3611_v47 }
 0x235   : > { %16021 = vst [vmem:[#allocation7_spill] sm:$0xff] %v13359_v28  ;;  %v3791_v8 = vunpack.c.l.b16 %v3601_v32  ;;  %v3624_v10 = vrot.slane %v3622_v60, 5  ;;  %v3632_v24 = vshll.u32 %v10888_v54, 16  ;;  %v4142_v47 = vrot.slane %v13363_v27, 5 }
 0x236   : > { %v3212_v61 = vpop.f32.mrf.mxu2  ;;  %v3619_v28 = vor.u32 %v3618_v0, %v3615_v38  ;;  %v13392_v38 = vld [vmem:[%s12164_s10 + $0xa0] sm:$0xf] }
 0x237   : > { %v3894_v51 = vpop.f32.mrf.mxu3  ;;  %v3292_v45 = vadd.f32 %v3212_v61, %v16022_v59  ;;  %v3628_v61 = vrot.slane %v3626_v6, 4  ;;  %v4218_v59 = vunpack.c.l.b16 %v4139_v7  ;;  %v3814_v4 = vpack.c.b16 %v3792_v18, %v3791_v8  ;;  %v10962_v6 = vld [vmem:[%s12164_s10 + $0x90] sm:$0xe] }
 0x238   : > { %v4322_v25 = vpop.f32.mrf.mxu0  ;;  %v3620_v5 = vrot.slane %v3619_v28, 4  ;;  %v3634_v44 = vrot.slane %v3632_v24, 5  ;;  %v4144_v8 = vrot.slane %v4142_v47, 4  ;;  %v4145_v18 = vrot.slane %v10888_v54, 5 }
 0x239   : > { %v3974_v35 = vadd.f32 %v3894_v51, %v3292_v45  ;;  %v4217_v51 = vunpack.c.l.b16 %v4136_v14  ;;  %v3629_v32 = vor.u32 %v3628_v61, %v3624_v10  ;;  %v3650_v28 = vshrl.u32 %v13392_v38, 16 }
 0x23b   : > { %v4400_v57 = vadd.f32 %v4320_v19, %v3974_v35  ;;  %v4240_v60 = vpack.c.b16 %v4218_v59, %v4217_v51  ;;  %v3646_v59 = vshll.u32 %v13392_v38, 16 }
 0x23d   : > { %v13383_v45 = vadd.f32 %v13375_v26, %v4400_v57  ;;  %v10889_v57 = vld [vmem:[%s12164_s10 + $0x9c] sm:$0xf] }
 0x23e   : > { %v3214_v37 = vpop.f32.mrf.mxu2  ;;  %v3637_v61 = vshrl.u32 %v10889_v57, 16  ;;  %v3640_v51 = vshll.u32 %v10889_v57, 16 }
 0x23f   : > { %16023 = vst [vmem:[#allocation8_spill] sm:$0xff] %v13383_v45  ;;  %v3896_v17 = vpop.f32.mrf.mxu3  ;;  %v4468_v21 = vsub.f32 0.0, %v13383_v45  ;;  %v3293_v19 = vadd.f32 %v3214_v37, %v12877_v33  ;;  %v3630_v33 = vrot.slane %v3629_v32, 4  ;;  %v10978_v37 = vrot.slane %v10962_v6, 9 }
 0x240   : > { %v4325_v7 = vpop.f32.mrf.mxu0  ;;  %v4146_v32 = vsel %vm12509_vm5, %v4144_v8, %v4145_v18  ;;  %v3642_v6 = vrot.slane %v3640_v51, 5  ;;  %v10892_v8 = vld [vmem:[%s12164_s10 + $0xa8] sm:$0xf] }
 0x241   : > { %v4500_v35 = vmul.f32 1.442695, %v4468_v21  ;;  %v3975_v14 = vadd.f32 %v3896_v17, %v3293_v19  ;;  %v16025_v21 = vld [vmem:[#allocation9_spill] sm:$0xff]  ;;  %v3635_v54 = vsel %vm12201_vm2, %v3630_v33, %v3634_v44  ;;  %v4220_v18 = vunpack.c.l.b16 %v4146_v32 }
 0x242   : > { %v11616_v32 = vld [vmem:[%s12164_s10 + $0x90] sm:$0xff] }
 0x243   : > { %11777 = vpow2.f32 %v4500_v35  ;;  %v4401_v0 = vadd.f32 %v4322_v25, %v3975_v14  ;;  %3256 = vmatmul.bf16.gmra.mxu2 %v11615_v2  ;;  %4364 = vmatmul.bf16.gmra.mxu0 %v4240_v60  ;;  %v3625_v2 = vsel %vm12201_vm2, %v3620_v5, %v3624_v10  ;;  %v3639_v60 = vrot.slane %v3637_v61, 4 }
 0x244   : > { %3938 = vmatmul.bf16.gmra.mxu3 %v3814_v4  ;;  %v4143_v4 = vsel %vm12509_vm5, %v10978_v37, %v4142_v47  ;;  %v3652_v5 = vrot.slane %v3650_v28, 4  ;;  %v3793_v44 = vunpack.c.l.b16 %v3625_v2  ;;  %v3794_v47 = vunpack.c.l.b16 %v3635_v54 }
 0x245   : > { %v13395_v27 = vadd.f32 %v13375_v26, %v4401_v0  ;;  %v4219_v37 = vunpack.c.l.b16 %v4143_v4  ;;  %v3643_v61 = vor.u32 %v3642_v6, %v3639_v60  ;;  %v4149_v2 = vrot.slane %v13392_v38, 5 }
 0x246   : > { %v3217_v17 = vpop.f32.mrf.mxu2  ;;  %v3815_v60 = vpack.c.b16 %v3794_v47, %v3793_v44  ;;  %v3664_v6 = vshll.u32 %v10892_v8, 16 }
 0x247   : > { %16024 = vst [vmem:[#allocation38_spill] sm:$0xff] %v13395_v27  ;;  %v3899_v24 = vpop.f32.mrf.mxu3  ;;  %v4469_v25 = vsub.f32 0.0, %v13395_v27  ;;  %v3294_v19 = vadd.f32 %v3217_v17, %v16025_v21  ;;  %v10891_v17 = vld [vmem:[%s12164_s10 + $0xa4] sm:$0x1]  ;;  %v13410_v21 = vrot.slane %v3646_v59, 5 }
 0x248   : > { %v4327_v0 = vpop.f32.mrf.mxu0  ;;  %v3656_v51 = vshll.u32 %v10891_v17, 16  ;;  %v4152_v12 = vrot.slane %v10891_v17, 5 }
 0x249   : > { %v11778_v35 = vpop.eup %11777  ;;  %v4502_v14 = vmul.f32 1.442695, %v4469_v25  ;;  %v3976_v57 = vadd.f32 %v3899_v24, %v3294_v19  ;;  %v4693_v25 = vpop.permute.xlu0 %4692  ;;  %v3653_v59 = vor.u32 %v3652_v5, %v13410_v21 }
 0x24a   : > { %v4564_v10 = vadd.f32 1.0, %v11778_v35  ;;  %v10963_v35 = vld [vmem:[%s12164_s10 + $0x9c] sm:$0xe] }
 0x24b   : > { %11779 = vpow2.f32 %v4502_v14  ;;  %v4402_v33 = vadd.f32 %v4325_v7, %v3976_v57  ;;  %v3661_v7 = vshrl.u32 %v10892_v8, 16  ;;  %v4241_v14 = vpack.c.b16 %v4220_v18, %v4219_v37 }
 0x24c   : > { %11781 = vrcp.f32 %v4564_v10  ;;  %v3644_v57 = vrot.slane %v3643_v61, 4  ;;  %v3658_v10 = vrot.slane %v3656_v51, 5  ;;  %v3654_v43 = vrot.slane %v3653_v59, 4 }
 0x24d   : > { %v13414_v24 = vadd.f32 %v13375_v26, %v4402_v33  ;;  %v10979_v52 = vrot.slane %v10963_v35, 9  ;;  %v3666_v37 = vrot.slane %v3664_v6, 5  ;;  %v3670_v8 = vshll.u32 %v13423_v50, 16 }
 0x24e   : > { %v3219_v28 = vpop.f32.mrf.mxu2  ;;  %v3674_v18 = vshrl.u32 %v13423_v50, 16 }
 0x24f   : > { %16026 = vst [vmem:[#allocation9_spill] sm:$0xff] %v13414_v24  ;;  %v3901_v19 = vpop.f32.mrf.mxu3  ;;  %v4470_v54 = vsub.f32 0.0, %v13414_v24  ;;  %v3295_v4 = vadd.f32 %v3219_v28, %v12911_v55  ;;  %v4151_v24 = vrot.slane %v4149_v2, 4  ;;  %v3663_v55 = vrot.slane %v3661_v7, 4  ;;  %v13445_v7 = vld [vmem:[%s12164_s10 + $0xb0] sm:$0x1] }
 0x250   : > { %v4330_v45 = vpop.f32.mrf.mxu0 }
 0x251   : > { %v11780_v33 = vpop.eup %11779  ;;  %v4504_v27 = vmul.f32 1.442695, %v4470_v54  ;;  %v3977_v5 = vadd.f32 %v3901_v19, %v3295_v4  ;;  %v4153_v59 = vsel %vm12509_vm5, %v4151_v24, %v4152_v12  ;;  %v3667_v54 = vor.u32 %v3666_v37, %v3663_v55 }
 0x252   : > { %v13425_v38 = vpop.eup %11781  ;;  %v4565_v62 = vadd.f32 1.0, %v11780_v33  ;;  %v4222_v33 = vunpack.c.l.b16 %v4153_v59 }
 0x253   : > { %16027 = vst [vmem:[#allocation39_spill] sm:$0xff] %v13425_v38  ;;  %11783 = vpow2.f32 %v4504_v27  ;;  %v4403_v44 = vadd.f32 %v4327_v0, %v3977_v5  ;;  %v4788_v47 = vmul.f32 %v13425_v38, %v4693_v25  ;;  %3261 = vmatmul.bf16.gmra.mxu2 %v11616_v32  ;;  %4369 = vmatmul.bf16.gmra.mxu0 %v4241_v14  ;;  %v13451_v32 = vrot.slane %v3670_v8, 5 }
 0x254   : > { %3943 = vmatmul.bf16.gmra.mxu3 %v3815_v60  ;;  %11785 = vrcp.f32 %v4565_v62  ;;  %v3649_v27 = vsel %vm12201_vm2, %v3644_v57, %v13410_v21  ;;  %v3659_v0 = vsel %vm12201_vm2, %v3654_v43, %v3658_v10  ;;  %v4150_v62 = vsel %vm12509_vm5, %v10979_v52, %v4149_v2  ;;  %v4695_v21 = vpop.permute.xlu0 %4694 }
 0x255   : > { %v13431_v61 = vadd.f32 %v13375_v26, %v4403_v44  ;;  %v4820_v51 = vpack.c.bf16 %v4788_v47, %v4788_v47  ;;  %v13447_v4 = vunpack.c.l.b16 %v3649_v27  ;;  %v13449_v43 = vunpack.c.l.b16 %v3659_v0 }
 0x256   : > { %v3222_v17 = vpop.f32.mrf.mxu2  ;;  %v3676_v60 = vrot.slane %v3674_v18, 4  ;;  %v4221_v14 = vunpack.c.l.b16 %v4150_v62  ;;  %v3680_v5 = vshll.u32 %v13445_v7, 16  ;;  %v3668_v47 = vrot.slane %v3667_v54, 4  ;;  %v11617_v54 = vld [vmem:[%s12164_s10 + $0x9c] sm:$0xff] }
 0x257   : > { %16028 = vst [vmem:[#allocation40_spill] sm:$0xff] %v13431_v61  ;;  %v3904_v25 = vpop.f32.mrf.mxu3  ;;  %v4471_v28 = vsub.f32 0.0, %v13431_v61  ;;  %v4966_v19 = vshrl.u32 %v4820_v51, 16  ;;  %v3296_v35 = vadd.f32 %v3222_v17, %v12934_v20  ;;  %v4969_v10 = vshll.u32 %v4820_v51, 16  ;;  %v4697_v51 = vpop.permute.xlu1 %4696  ;;  %v10964_v17 = vld [vmem:[%s12164_s10 + $0xa8] sm:$0xe] }
 0x258   : > { %v4332_v24 = vpop.f32.mrf.mxu0  ;;  %v3677_v8 = vor.u32 %v3676_v60, %v13451_v32  ;;  %v4156_v18 = vrot.slane %v13423_v50, 5  ;;  %v3816_v62 = vpack.c.b16 %v13449_v43, %v13447_v4  ;;  %v4242_v59 = vpack.c.b16 %v4222_v33, %v4221_v14  ;;  %v10895_v60 = vld [vmem:[%s12164_s10 + $0xb4] sm:$0xf] }
 0x259   : > { %v11784_v52 = vpop.eup %11783  ;;  %v4506_v2 = vmul.f32 1.442695, %v4471_v28  ;;  %v13453_v6 = vrot.slane %v4966_v19, 7  ;;  %v3978_v12 = vadd.f32 %v3904_v25, %v3296_v35  ;;  %v3682_v50 = vrot.slane %v3680_v5, 5 }
 0x25a   : > { %v13455_v57 = vpop.eup %11785  ;;  %v4566_v20 = vadd.f32 1.0, %v11784_v52  ;;  %v3678_v52 = vrot.slane %v3677_v8, 4  ;;  %v4159_v4 = vrot.slane %v13445_v7, 5  ;;  %v3685_v7 = vshrl.u32 %v10895_v60, 16 }
 0x25b   : > { %16029 = vst [vmem:[#allocation41_spill] sm:$0xff] %v13455_v57  ;;  %11787 = vpow2.f32 %v4506_v2  ;;  %v4789_v55 = vmul.f32 %v13455_v57, %v4695_v21  ;;  %v4404_v44 = vadd.f32 %v4330_v45, %v3978_v12  ;;  %v4971_v37 = vor.u32 %v4969_v10, %v13453_v6 }
 0x25c   : > { %11789 = vrcp.f32 %v4566_v20  ;;  %v3673_v21 = vsel %vm12201_vm2, %v3668_v47, %v13451_v32  ;;  %v10980_v2 = vrot.slane %v10964_v17, 9  ;;  %v4158_v12 = vrot.slane %v4156_v18, 4 }
 0x25d   : > { %v4821_v27 = vpack.c.bf16 %v4789_v55, %v4789_v55  ;;  %v13463_v0 = vadd.f32 %v13375_v26, %v4404_v44  ;;  %5237 = vrot.lane.b32.xlu2 %v4971_v37, %s12050_s20  ;;  %v13478_v55 = vld [vmem:[%s12164_s10 + $0xb8] sm:$0xf]  ;;  %v4972_v32 = vrot.slane %v13453_v6, 4  ;;  %v3688_v37 = vshll.u32 %v10895_v60, 16 }
 0x25e   : > { %v3224_v45 = vpop.f32.mrf.mxu2  ;;  %v3694_v6 = vshll.u32 %v13478_v55, 16 }
 0x25f   : > { %16030 = vst [vmem:[#allocation42_spill] sm:$0xff] %v13463_v0  ;;  %v3906_v25 = vpop.f32.mrf.mxu3  ;;  %v4974_v28 = vshrl.u32 %v4821_v27, 16  ;;  %v4472_v19 = vsub.f32 0.0, %v13463_v0  ;;  %v3297_v35 = vadd.f32 %v3224_v45, %v12948_v53  ;;  %v4977_v20 = vshll.u32 %v4821_v27, 16  ;;  %v4636_v45 = vld [vmem:[%s13144_s16 + $0x40] sm:$0xff] }
 0x260   : > { %v4335_v5 = vpop.f32.mrf.mxu0 }
 0x261   : > { %v11788_v43 = vpop.eup %11787  ;;  %v4976_v14 = vrot.slane %v4974_v28, 7  ;;  %v4508_v10 = vmul.f32 1.442695, %v4472_v19  ;;  %v3979_v33 = vadd.f32 %v3906_v25, %v3297_v35  ;;  %v3698_v28 = vshrl.u32 %v13478_v55, 16 }
 0x262   : > { %v13480_v53 = vpop.eup %11789  ;;  %v4567_v44 = vadd.f32 1.0, %v11788_v43 }
 0x263   : > { %16031 = vst [vmem:[#allocation43_spill] sm:$0xff] %v13480_v53  ;;  %v4979_v8 = vor.u32 %v4977_v20, %v4976_v14  ;;  %11791 = vpow2.f32 %v4508_v10  ;;  %v4790_v27 = vmul.f32 %v13480_v53, %v4697_v51  ;;  %v4405_v17 = vadd.f32 %v4332_v24, %v3979_v33  ;;  %3266 = vmatmul.bf16.gmra.mxu2 %v11617_v54  ;;  %v4699_v33 = vpop.permute.xlu1 %4698 }
 0x264   : > { %3948 = vmatmul.bf16.gmra.mxu3 %v3816_v62  ;;  %11793 = vrcp.f32 %v4567_v44  ;;  %v4981_v25 = vrot.slane %v4976_v14, 4  ;;  %4374 = vmatmul.bf16.gmra.mxu0 %v4242_v59  ;;  %v3683_v62 = vsel %vm12201_vm2, %v3678_v52, %v3682_v50  ;;  %v13502_v59 = vunpack.c.l.b16 %v3673_v21  ;;  %v13512_v44 = vld [vmem:[%s12164_s10 + $0xbc] sm:$0x1] }
 0x265   : > { %v4822_v19 = vpack.c.bf16 %v4790_v27, %v4790_v27  ;;  %v13494_v35 = vadd.f32 %v13375_v26, %v4405_v17  ;;  %v4980_v60 = vsel %vm13485_vm8, %v4972_v32, %v4979_v8  ;;  %4708 = vrot.lane.b32.xlu2 %v4636_v45, %s12049_s17  ;;  %v4157_v54 = vsel %vm12509_vm5, %v10980_v2, %v4156_v18 }
 0x266   : > { %5241 = vrot.lane.b32.xlu1 %v4981_v25, %s12050_s20  ;;  %v3227_v24 = vpop.f32.mrf.mxu2  ;;  %5239 = vrot.lane.b32.xlu0 %v4980_v60, %s12050_s20  ;;  %v4160_v10 = vsel %vm12509_vm5, %v4158_v12, %v4159_v4  ;;  %v3687_v32 = vrot.slane %v3685_v7, 4  ;;  %v3690_v50 = vrot.slane %v3688_v37, 5  ;;  %v13514_v21 = vrot.slane %v3694_v6, 5 }
 0x267   : > { %16034 = vst [vmem:[#allocation44_spill] sm:$0xff] %v13494_v35  ;;  %v3909_v51 = vpop.f32.mrf.mxu3  ;;  %v4983_v43 = vshrl.u32 %v4822_v19, 16  ;;  %v4473_v14 = vsub.f32 0.0, %v13494_v35  ;;  %v3298_v20 = vadd.f32 %v3227_v24, %v12968_v30  ;;  %v3700_v52 = vrot.slane %v3698_v28, 4  ;;  %v4637_v24 = vld [vmem:[%s13144_s16 + $0x48] sm:$0xff] }
 0x268   : > { %v4337_v30 = vpop.f32.mrf.mxu0  ;;  %v3798_v17 = vunpack.c.l.b16 %v3683_v62  ;;  %v4986_v12 = vshll.u32 %v4822_v19, 16  ;;  %v4223_v4 = vunpack.c.l.b16 %v4157_v54  ;;  %v4224_v60 = vunpack.c.l.b16 %v4160_v10  ;;  %v4701_v54 = vpop.permute.xlu2 %4700 }
 0x269   : > { %v11792_v8 = vpop.eup %11791  ;;  %v13516_v18 = vrot.slane %v4983_v43, 7  ;;  %v4510_v2 = vmul.f32 1.442695, %v4473_v14  ;;  %v3980_v27 = vadd.f32 %v3909_v51, %v3298_v20  ;;  %v3704_v6 = vshll.u32 %v13512_v44, 16 }
 0x26a   : > { %v13518_v45 = vpop.eup %11793  ;;  %v4568_v25 = vadd.f32 1.0, %v11792_v8  ;;  %v3691_v51 = vor.u32 %v3690_v50, %v3687_v32  ;;  %v3701_v62 = vor.u32 %v3700_v52, %v13514_v21  ;;  %v4163_v20 = vrot.slane %v13478_v55, 5  ;;  %v11618_v32 = vld [vmem:[%s12164_s10 + $0xa8] sm:$0xff]  ;;  %v10965_v52 = vld [vmem:[%s12164_s10 + $0xb4] sm:$0xe] }
 0x26b   : > { %16035 = vst [vmem:[#allocation45_spill] sm:$0xff] %v13518_v45  ;;  %11795 = vpow2.f32 %v4510_v2  ;;  %v4791_v7 = vmul.f32 %v13518_v45, %v4699_v33  ;;  %v4406_v37 = vadd.f32 %v4335_v5, %v3980_v27  ;;  %v4988_v28 = vor.u32 %v4986_v12, %v13516_v18 }
 0x26c   : > { %11797 = vrcp.f32 %v4568_v25  ;;  %v3817_v50 = vpack.c.b16 %v3798_v17, %v13502_v59  ;;  %v4243_v2 = vpack.c.b16 %v4224_v60, %v4223_v4  ;;  %v3692_v27 = vrot.slane %v3691_v51, 4 }
 0x26d   : > { %v4823_v43 = vpack.c.bf16 %v4791_v7, %v4791_v7  ;;  %v13526_v19 = vadd.f32 %v13375_v26, %v4406_v37  ;;  %v3702_v25 = vrot.slane %v3701_v62, 4  ;;  %v3706_v12 = vrot.slane %v3704_v6, 5  ;;  %v4638_v62 = vld [vmem:[%s13144_s16 + $0x50] sm:$0xff] }
 0x26e   : > { %5243 = vrot.lane.b32.xlu1 %v4988_v28, %s12050_s20  ;;  %v3229_v14 = vpop.f32.mrf.mxu2  ;;  %4710 = vrot.lane.b32.xlu0 %v4637_v24, %s12049_s17  ;;  %v4989_v24 = vrot.slane %v13516_v18, 4  ;;  %v10981_v17 = vrot.slane %v10965_v52, 9  ;;  %v4165_v4 = vrot.slane %v4163_v20, 4 }
 0x26f   : > { %16036 = vst [vmem:[#allocation46_spill] sm:$0xff] %v13526_v19  ;;  %v3911_v5 = vpop.f32.mrf.mxu3  ;;  %v4991_v10 = vshrl.u32 %v4823_v43, 16  ;;  %v4474_v33 = vsub.f32 0.0, %v13526_v19  ;;  %v3299_v8 = vadd.f32 %v3229_v14, %v12984_v29  ;;  %v4994_v28 = vshll.u32 %v4823_v43, 16  ;;  %v10898_v29 = vld [vmem:[%s12164_s10 + $0xc0] sm:$0xf] }
 0x270   : > { %v13536_v53 = vpop.f32.mrf.mxu0  ;;  %v13545_v43 = vld [vmem:[%s12164_s10 + $0xc4] sm:$0xf] }
 0x271   : > { %v11796_v7 = vpop.eup %11795  ;;  %v4993_v37 = vrot.slane %v4991_v10, 7  ;;  %v4512_v55 = vmul.f32 1.442695, %v4474_v33  ;;  %v3981_v45 = vadd.f32 %v3911_v5, %v3299_v8  ;;  %v4166_v10 = vrot.slane %v13512_v44, 5 }
 0x272   : > { %v13539_v14 = vpop.eup %11797  ;;  %v4569_v59 = vadd.f32 1.0, %v11796_v7  ;;  %v3709_v33 = vshrl.u32 %v10898_v29, 16  ;;  %v3722_v44 = vshrl.u32 %v13545_v43, 16  ;;  %v4703_v7 = vpop.permute.xlu2 %4702 }
 0x273   : > { %16037 = vst [vmem:[#allocation47_spill] sm:$0xff] %v13539_v14  ;;  %v4996_v60 = vor.u32 %v4994_v28, %v4993_v37  ;;  %11799 = vpow2.f32 %v4512_v55  ;;  %v4792_v6 = vmul.f32 %v13539_v14, %v4701_v54  ;;  %v4407_v51 = vadd.f32 %v4337_v30, %v3981_v45  ;;  %3271 = vmatmul.bf16.gmra.mxu2 %v11618_v32 }
 0x274   : > { %3953 = vmatmul.bf16.gmra.mxu3 %v3817_v50  ;;  %11801 = vrcp.f32 %v4569_v59  ;;  %v4998_v5 = vrot.slane %v4993_v37, 4  ;;  %4379 = vmatmul.bf16.gmra.mxu0 %v4243_v2  ;;  %v3712_v54 = vshll.u32 %v10898_v29, 16  ;;  %v3718_v32 = vshll.u32 %v13545_v43, 16 }
 0x275   : > { %v4824_v18 = vpack.c.bf16 %v4792_v6, %v4792_v6  ;;  %v13549_v8 = vadd.f32 %v13375_v26, %v4407_v51  ;;  %v4997_v52 = vsel %vm13485_vm8, %v4989_v24, %v4996_v60  ;;  %v3697_v37 = vsel %vm12201_vm2, %v3692_v27, %v13514_v21 }
 0x276   : > { %4712 = vrot.lane.b32.xlu1 %v4638_v62, %s12049_s17  ;;  %v13554_v30 = vpop.f32.mrf.mxu2  ;;  %5245 = vrot.lane.b32.xlu2 %v4997_v52, %s12050_s20  ;;  %v3707_v28 = vsel %vm12201_vm2, %v3702_v25, %v3706_v12  ;;  %v4164_v55 = vsel %vm12509_vm5, %v10981_v17, %v4163_v20  ;;  %v4167_v29 = vsel %vm12509_vm5, %v4165_v4, %v4166_v10  ;;  %v3711_v51 = vrot.slane %v3709_v33, 4  ;;  %v4639_v17 = vld [vmem:[%s13144_s16 + $0x58] sm:$0xff]  ;;  %v10900_v52 = vld [vmem:[%s12164_s10 + $0xc8] sm:$0x1] }
 0x277   : > { %16038 = vst [vmem:[#allocation48_spill] sm:$0xff] %v13549_v8  ;;  %v13557_v45 = vpop.f32.mrf.mxu3  ;;  %v5000_v50 = vshrl.u32 %v4824_v18, 16  ;;  %v4475_v2 = vsub.f32 0.0, %v13549_v8  ;;  %5247 = vrot.lane.b32.xlu0 %v4998_v5, %s12050_s20  ;;  %v3714_v62 = vrot.slane %v3712_v54, 5  ;;  %v5003_v27 = vshll.u32 %v4824_v18, 16 }
 0x278   : > { %v13572_v6 = vpop.f32.mrf.mxu0  ;;  %v13576_v25 = vrot.slane %v3718_v32, 5  ;;  %v3724_v12 = vrot.slane %v3722_v44, 4  ;;  %v3799_v4 = vunpack.c.l.b16 %v3697_v37  ;;  %v3800_v10 = vunpack.c.l.b16 %v3707_v28  ;;  %v11619_v28 = vld [vmem:[%s12164_s10 + $0xb4] sm:$0xff]  ;;  %v10901_v8 = vld [vmem:[%s12164_s10 + $0xcc] sm:$0xf] }
 0x279   : > { %v11800_v24 = vpop.eup %11799  ;;  %v5002_v59 = vrot.slane %v5000_v50, 7  ;;  %v4514_v60 = vmul.f32 1.442695, %v4475_v2  ;;  %v4225_v33 = vunpack.c.l.b16 %v4164_v55  ;;  %v4226_v54 = vunpack.c.l.b16 %v4167_v29  ;;  %v10966_v55 = vld [vmem:[%s12164_s10 + $0xc0] sm:$0xe] }
 0x27a   : > { %v13574_v5 = vpop.eup %11801  ;;  %v4570_v21 = vadd.f32 1.0, %v11800_v24  ;;  %v3715_v32 = vor.u32 %v3714_v62, %v3711_v51  ;;  %v3725_v44 = vor.u32 %v3724_v12, %v13576_v25  ;;  %v3818_v24 = vpack.c.b16 %v3800_v10, %v3799_v4 }
 0x27b   : > { %16039 = vst [vmem:[#allocation49_spill] sm:$0xff] %v13574_v5  ;;  %11803 = vpow2.f32 %v4514_v60  ;;  %v4793_v20 = vmul.f32 %v13574_v5, %v4703_v7  ;;  %v5005_v50 = vor.u32 %v5003_v27, %v5002_v59  ;;  %v3728_v7 = vshll.u32 %v10900_v52, 16  ;;  %v4705_v60 = vpop.permute.xlu0 %4704 }
 0x27c   : > { %11805 = vrcp.f32 %v4570_v21  ;;  %v4244_v21 = vpack.c.b16 %v4226_v54, %v4225_v33  ;;  %v4170_v29 = vrot.slane %v13545_v43, 5  ;;  %v3716_v12 = vrot.slane %v3715_v32, 4  ;;  %v4640_v54 = vld [vmem:[%s13144_s16 + $0x60] sm:$0xff] }
 0x27d   : > { %v4825_v2 = vpack.c.bf16 %v4793_v20, %v4793_v20  ;;  %v3726_v38 = vrot.slane %v3725_v44, 4  ;;  %v5006_v4 = vrot.slane %v5002_v59, 4  ;;  %v10982_v43 = vrot.slane %v10966_v55, 9  ;;  %v13601_v44 = vld [vmem:[%s12164_s10 + $0xd0] sm:$0xf]  ;;  %v4707_v55 = vpop.permute.xlu1 %4706 }
 0x27e   : > { %v13581_v14 = vpop.f32.mrf.mxu2  ;;  %4714 = vrot.lane.b32.xlu2 %v4639_v17, %s12049_s17  ;;  %v4173_v57 = vrot.slane %v10900_v52, 5 }
 0x27f   : > { %v13584_v18 = vpop.f32.mrf.mxu3  ;;  %v5008_v37 = vshrl.u32 %v4825_v2, 16  ;;  %5249 = vrot.lane.b32.xlu0 %v5005_v50, %s12050_s20  ;;  %v5011_v17 = vshll.u32 %v4825_v2, 16  ;;  %v3730_v50 = vrot.slane %v3728_v7, 5 }
 0x280   : > { %v13591_v5 = vpop.f32.mrf.mxu0 }
 0x281   : > { %v11804_v27 = vpop.eup %11803  ;;  %v5010_v20 = vrot.slane %v5008_v37, 7  ;;  %v4172_v37 = vrot.slane %v4170_v29, 4 }
 0x282   : > { %v13593_v51 = vpop.eup %11805  ;;  %v4571_v62 = vadd.f32 1.0, %v11804_v27 }
 0x283   : > { %16040 = vst [vmem:[#allocation50_spill] sm:$0xff] %v13593_v51  ;;  %v5013_v10 = vor.u32 %v5011_v17, %v5010_v20  ;;  %v4794_v33 = vmul.f32 %v13593_v51, %v4705_v60  ;;  %3276 = vmatmul.bf16.gmra.mxu2 %v11619_v28  ;;  %v5015_v2 = vrot.slane %v5010_v20, 4  ;;  %v3721_v28 = vsel %vm12201_vm2, %v3716_v12, %v13576_v25 }
 0x284   : > { %3958 = vmatmul.bf16.gmra.mxu3 %v3818_v24  ;;  %11807 = vrcp.f32 %v4571_v62  ;;  %4384 = vmatmul.bf16.gmra.mxu0 %v4244_v21  ;;  %v3731_v24 = vsel %vm12201_vm2, %v3726_v38, %v3730_v50  ;;  %v4171_v60 = vsel %vm12509_vm5, %v10982_v43, %v4170_v29  ;;  %v3733_v21 = vshrl.u32 %v10901_v8, 16  ;;  %v4641_v43 = vld [vmem:[%s13144_s16 + $0x68] sm:$0xff] }
 0x285   : > { %v4826_v27 = vpack.c.bf16 %v4794_v33, %v4794_v33  ;;  %v5014_v32 = vsel %vm13485_vm8, %v5006_v4, %v5013_v10  ;;  %v4174_v20 = vsel %vm12509_vm5, %v4172_v37, %v4173_v57  ;;  %v3736_v17 = vshll.u32 %v10901_v8, 16  ;;  %v10903_v37 = vld [vmem:[%s12164_s10 + $0xd4] sm:$0x1] }
 0x286   : > { %v13603_v59 = vpop.f32.mrf.mxu2  ;;  %5253 = vrot.lane.b32.xlu2 %v5015_v2, %s12050_s20  ;;  %5251 = vrot.lane.b32.xlu1 %v5014_v32, %s12050_s20  ;;  %v3742_v62 = vshll.u32 %v13601_v44, 16  ;;  %v3746_v25 = vshrl.u32 %v13601_v44, 16  ;;  %v3801_v50 = vunpack.c.l.b16 %v3721_v28  ;;  %v3802_v33 = vunpack.c.l.b16 %v3731_v24  ;;  %v11620_v24 = vld [vmem:[%s12164_s10 + $0xc0] sm:$0xff] }
 0x287   : > { %v13607_v7 = vpop.f32.mrf.mxu3  ;;  %v5017_v52 = vshrl.u32 %v4826_v27, 16  ;;  %4716 = vrot.lane.b32.xlu0 %v4640_v54, %s12049_s17  ;;  %v5020_v38 = vshll.u32 %v4826_v27, 16  ;;  %v4227_v54 = vunpack.c.l.b16 %v4171_v60  ;;  %v4228_v57 = vunpack.c.l.b16 %v4174_v20  ;;  %v4865_v20 = vld [vmem:[#allocation2 + $0xc] sm:$0x1] }
 0x288   : > { %v13621_v4 = vpop.f32.mrf.mxu0  ;;  %v3735_v2 = vrot.slane %v3733_v21, 4  ;;  %v3738_v32 = vrot.slane %v3736_v17, 5  ;;  %v3744_v51 = vrot.slane %v3742_v62, 5  ;;  %v3748_v19 = vrot.slane %v3746_v25, 4 }
 0x289   : > { %v5019_v12 = vrot.slane %v5017_v52, 7  ;;  %v3819_v60 = vpack.c.b16 %v3802_v33, %v3801_v50  ;;  %v3752_v21 = vshll.u32 %v10903_v37, 16  ;;  %v4245_v17 = vpack.c.b16 %v4228_v57, %v4227_v54  ;;  %v4642_v54 = vld [vmem:[%s13144_s16 + $0x70] sm:$0xff] }
 0x28a   : > { %v13623_v10 = vpop.eup %11807  ;;  %v3739_v62 = vor.u32 %v3738_v32, %v3735_v2  ;;  %v3749_v25 = vor.u32 %v3748_v19, %v3744_v51  ;;  %v4177_v50 = vrot.slane %v13601_v44, 5  ;;  %v2985_v33 = vadd.f32 %v12975_v48, %v13009_v13  ;;  %v11665_v44 = vld [vmem:[%s15880_s4 + $0x18] sm:$0xff] }
 0x28b   : > { %16041 = vst [vmem:[#allocation51_spill] sm:$0xff] %v13623_v10  ;;  %v4795_v29 = vmul.f32 %v13623_v10, %v4707_v55  ;;  %v5022_v8 = vor.u32 %v5020_v38, %v5019_v12  ;;  %v4866_v38 = vsel %vm13637_vm10, 0, %v4865_v20  ;;  %v10967_v10 = vld [vmem:[%s12164_s10 + $0xcc] sm:$0xe]  ;;  %v5023_v0 = vrot.slane %v5019_v12, 4  ;;  %6051 = vmatpush.bf16.msra.mxu1 %v11665_v44 }
 0x28c   : > { %4867 = vst [vmem:[#allocation2 + $0xc] sm:$0x1] %v4866_v38  ;;  %v3300_v57 = vadd.f32 %v13554_v30, %v2985_v33  ;;  %v3740_v2 = vrot.slane %v3739_v62, 4  ;;  %v3750_v32 = vrot.slane %v3749_v25, 4  ;;  %v10983_v13 = vrot.slane %v10967_v10, 9  ;;  %v4643_v25 = vld [vmem:[%s13144_s16 + $0x78] sm:$0xff] }
 0x28d   : > { %v4827_v52 = vpack.c.bf16 %v4795_v29, %v4795_v29  ;;  %v4179_v12 = vrot.slane %v4177_v50, 4  ;;  %v12051_v44 = vmov 0  }
 0x28e   : > { %v13628_v35 = vpop.f32.mrf.mxu2  ;;  %4718 = vrot.lane.b32.xlu1 %v4641_v43, %s12049_s17  ;;  %5255 = vrot.lane.b32.xlu2 %v5022_v8, %s12050_s20  ;;  %4853 = vst.msk [vmem:[#allocation2] sm:$0xf] %vm4852_vm11, %v12051_v44 }
 0x28f   : > { %v13632_v27 = vpop.f32.mrf.mxu3  ;;  %v5025_v28 = vshrl.u32 %v4827_v52, 16  ;;  %v5028_v43 = vshll.u32 %v4827_v52, 16  ;;  %v3754_v52 = vrot.slane %v3752_v21, 5  ;;  %4854 = vst.msk [vmem:[#allocation2 + $0x4] sm:$0xf] %vm4852_vm11, %v12051_v44 }
 0x290   : > { %v13643_v8 = vpop.f32.mrf.mxu0  ;;  %4856 = vst.msk [vmem:[#allocation2 + $0x8] sm:$0x1] %vm4855_vm9, %v12051_v44 }
 0x291   : > { %v5027_v29 = vrot.slane %v5025_v28, 7  ;;  %v4180_v28 = vrot.slane %v10903_v37, 5  ;;  %v4178_v37 = vsel %vm12509_vm5, %v10983_v13, %v4177_v50  ;;  %4858 = vst.msk [vmem:[#allocation2 + $0xcc] sm:$0xf] %vm4852_vm11, %v12051_v44 }
 0x292   : > { %4859 = vst.msk [vmem:[#allocation2 + $0xd0] sm:$0xf] %vm4852_vm11, %v12051_v44 }
 0x293   : > { %v5030_v61 = vor.u32 %v5028_v43, %v5027_v29  ;;  %3281 = vmatmul.bf16.gmra.mxu2 %v11620_v24  ;;  %v5032_v19 = vrot.slane %v5027_v29, 4  ;;  %v4181_v21 = vsel %vm12509_vm5, %v4179_v12, %v4180_v28  ;;  %v11621_v43 = vld [vmem:[%s12164_s10 + $0xcc] sm:$0xff]  ;;  %v11662_v12 = vld [vmem:[%s15880_s4] sm:$0xff]  ;;  %4860 = vst.msk [vmem:[#allocation2 + $0xd4] sm:$0x1] %vm4855_vm9, %v12051_v44 }
 0x294   : > { %3963 = vmatmul.bf16.gmra.mxu3 %v3819_v60  ;;  %4389 = vmatmul.bf16.gmra.mxu0 %v4245_v17  ;;  %v3982_v60 = vadd.f32 %v13557_v45, %v3300_v57  ;;  %v4229_v45 = vunpack.c.l.b16 %v4178_v37  ;;  %v4230_v38 = vunpack.c.l.b16 %v4181_v21 }
 0x295   : > { %v5031_v48 = vsel %vm13485_vm8, %v5023_v0, %v5030_v61  ;;  %v3745_v61 = vsel %vm12201_vm2, %v3740_v2, %v3744_v51  ;;  %v3755_v0 = vsel %vm12201_vm2, %v3750_v32, %v3754_v52 }
 0x296   : > { %v13656_v24 = vpop.f32.mrf.mxu2  ;;  %4720 = vrot.lane.b32.xlu2 %v4642_v54, %s12049_s17  ;;  %5259 = vrot.lane.b32.xlu1 %v5032_v19, %s12050_s20  ;;  %v3803_v20 = vunpack.c.l.b16 %v3745_v61  ;;  %v3804_v17 = vunpack.c.l.b16 %v3755_v0  ;;  %v4408_v62 = vadd.f32 %v13536_v53, %v3982_v60  ;;  %v4246_v54 = vpack.c.b16 %v4230_v38, %v4229_v45  ;;  %v4915_v60 = vld [vmem:[#allocation2 + $0x14] sm:$0x1]  ;;  %v5496_v45 = vld [vmem:[#allocation2 + $0x4] sm:$0xf]  ;;  %v5495_v38 = vld [vmem:[#allocation2] sm:$0xf] }
 0x297   : > { %v13660_v30 = vpop.f32.mrf.mxu3  ;;  %5257 = vrot.lane.b32.xlu0 %v5031_v48, %s12050_s20  ;;  %v4916_v61 = vsel %vm13712_vm13, 0, %v4915_v60  ;;  %v2988_v0 = vadd.f32 %v13041_v22, %v13059_v58  ;;  %v5531_v22 = vld [vmem:[#allocation2 + $0x8] sm:$0x1]  ;;  %v6363_v58 = vld [vmem:[#allocation2] sm:$0xe] }
 0x298   : > { %v13668_v10 = vpop.f32.mrf.mxu0  ;;  %v3820_v33 = vpack.c.b16 %v3804_v17, %v3803_v20  ;;  %v13683_v50 = vadd.f32 %v13375_v26, %v4408_v62  ;;  %v11663_v26 = vld [vmem:[%s15880_s4 + $0x8] sm:$0xff]  ;;  %4917 = vst [vmem:[#allocation2 + $0x14] sm:$0x1] %v4916_v61  ;;  %v2986_v20 = vadd.f32 %v13003_v23, %v13024_v41  ;;  %v11646_v17 = vld [vmem:[#allocation2] sm:$0xff] }
 0x299   : > { %6280 = vmatpush.bf16.msrb.mxu2 %v11663_v26  ;;  %v11667_v62 = vld [vmem:[%s15880_s4 + $0x28] sm:$0xff]  ;;  %v5551_v26 = vshll.u32 %v5495_v38, 16 }
 0x29a   : > { %16044 = vst [vmem:[#allocation52_spill] sm:$0xff] %v13683_v50  ;;  %v4476_v53 = vsub.f32 0.0, %v13683_v50  ;;  %6642 = vmatpush.bf16.msrb.mxu3 %v11667_v62  ;;  %v5383_v41 = vld [vmem:[#allocation2 + $0xc] sm:$0xf] }
 0x29b   : > { %v5553_v62 = vrot.slane %v5551_v26, 5 }
 0x29c   : > { %v4516_v32 = vmul.f32 1.442695, %v4476_v53  ;;  %v11148_v53 = vrot.slane %v6363_v58, 9 }
 0x29d   : > { %6281 = vmatpush.bf16.msrb.mxu2 %v11662_v12  ;;  %v11666_v12 = vld [vmem:[%s15880_s4 + $0x20] sm:$0xff] }
 0x29e   : > { %v13676_v29 = vpop.f32.mrf.mxu2  ;;  %11809 = vpow2.f32 %v4516_v32  ;;  %v6416_v32 = vrot.slane %v5531_v22, 5  ;;  %6643 = vmatpush.bf16.msrb.mxu3 %v11666_v12  ;;  %v4921_v12 = vld [vmem:[#allocation2 + $0x2c] sm:$0x1] }
 0x29f   : > { %v13678_v51 = vpop.f32.mrf.mxu3  ;;  %4722 = vrot.lane.b32.xlu0 %v4643_v25, %s12049_s17  ;;  %v3303_v25 = vadd.f32 %v13628_v35, %v2988_v0  ;;  %v5557_v0 = vshll.u32 %v5496_v45, 16 }
 0x2a0   : > { %v13685_v19 = vpop.f32.mrf.mxu0 }
 0x2a1   : > { %v5559_v16 = vrot.slane %v5557_v0, 5 }
 0x2a3   : > { %3286 = vmatmul.bf16.gmra.mxu2 %v11621_v43  ;;  %v3301_v43 = vadd.f32 %v13581_v14, %v2986_v20  ;;  %v3985_v20 = vadd.f32 %v13632_v27, %v3303_v25 }
 0x2a4   : > { %3968 = vmatmul.bf16.gmra.mxu3 %v3820_v33  ;;  %4394 = vmatmul.bf16.gmra.mxu0 %v4246_v54  ;;  %v11810_v21 = vpop.eup %11809  ;;  %v6413_v33 = vrot.slane %v5496_v45, 5  ;;  %v5548_v54 = vshrl.u32 %v5495_v38, 16 }
 0x2a5   : > { %v4572_v23 = vadd.f32 1.0, %v11810_v21  ;;  %v5561_v21 = vshrl.u32 %v5496_v45, 16  ;;  %v3983_v45 = vadd.f32 %v13584_v18, %v3301_v43  ;;  %v4869_v18 = vsel %vm13637_vm10, 0, %v4868_v11 }
 0x2a6   : > { %v13688_v57 = vpop.f32.mrf.mxu2  ;;  %v6415_v60 = vrot.slane %v6413_v33, 4  ;;  %v5550_v61 = vrot.slane %v5548_v54, 4  ;;  %v2987_v54 = vadd.f32 %v16049_v3, %v13047_v39  ;;  %v11664_v39 = vld [vmem:[%s15880_s4 + $0x10] sm:$0xff]  ;;  %v11685_v3 = vld [vmem:[%s15880_s4 + $0x38] sm:$0xff]  ;;  %4870 = vst [vmem:[#allocation2 + $0x18] sm:$0x1] %v4869_v18 }
 0x2a7   : > { %v13690_v2 = vpop.f32.mrf.mxu3  ;;  %v5563_v63 = vrot.slane %v5561_v21, 4  ;;  %11811 = vrcp.f32 %v4572_v23  ;;  %6052 = vmatpush.bf16.msra.mxu1 %v11664_v39  ;;  %6940 = vmatpush.bf16.msrb.mxu0 %v11685_v3 }
 0x2a8   : > { %v13692_v52 = vpop.f32.mrf.mxu0  ;;  %v6417_v58 = vsel %vm12509_vm5, %v6415_v60, %v6416_v32  ;;  %v5567_v32 = vshll.u32 %v5531_v22, 16  ;;  %v4411_v60 = vadd.f32 %v13621_v4, %v3985_v20  ;;  %v3302_v43 = vadd.f32 %v13603_v59, %v2987_v54 }
 0x2a9   : > { %v5564_v26 = vor.u32 %v5563_v63, %v5559_v16  ;;  %v4409_v4 = vadd.f32 %v13572_v6, %v3983_v45  ;;  %v13780_v6 = vld [vmem:[%s15879_s3] ss:$0 sm:$0xff]  ;;  %v2989_v54 = vadd.f32 %v13054_v9, %v13082_v31 }
 0x2aa   : > { %v5569_v22 = vrot.slane %v5567_v32, 5  ;;  %v13783_v21 = vadd.f32 %v13780_v6, %v4411_v60  ;;  %v4874_v32 = vld [vmem:[#allocation2 + $0x30] sm:$0x1] }
 0x2ab   : > { %v5565_v63 = vrot.slane %v5564_v26, 4  ;;  %v13794_v45 = vadd.f32 %v13780_v6, %v4409_v4  ;;  %v4918_v26 = vld [vmem:[#allocation2 + $0x20] sm:$0x1]  ;;  %v3304_v9 = vadd.f32 %v13656_v24, %v2989_v54  ;;  %v2991_v54 = vadd.f32 %v13087_v40, %v13110_v15 }
 0x2ac   : > { %16050 = vst [vmem:[#allocation10_spill] sm:$0xff] %v13783_v21  ;;  %v4479_v60 = vsub.f32 0.0, %v13783_v21 }
 0x2ad   : > { %v5570_v59 = vsel %vm12201_vm2, %v5565_v63, %v5569_v22  ;;  %16052 = vst [vmem:[#allocation54_spill] sm:$0xff] %v13794_v45  ;;  %v4477_v39 = vsub.f32 0.0, %v13794_v45  ;;  %v3986_v63 = vadd.f32 %v13660_v30, %v3304_v9 }
 0x2ae   : > { %v13701_v48 = vpop.f32.mrf.mxu2 }
 0x2af   : > { %v13703_v13 = vpop.f32.mrf.mxu3 }
 0x2b0   : > { %v13720_v37 = vpop.f32.mrf.mxu0 }
 0x2b3   : > { %11132 = vmatmul.msk.bf16.vlgmr.msrb.gmra.mxu2 %vm5996_vm14, %v11646_v17  ;;  %v6414_v17 = vsel %vm12509_vm5, %v11148_v53, %v6413_v33  ;;  %v6529_v33 = vunpack.c.l.b16 %v6417_v58  ;;  %v5554_v53 = vor.u32 %v5553_v62, %v5550_v61  ;;  %v11684_v62 = vld [vmem:[%s15880_s4 + $0x30] sm:$0xff] }
 0x2b4   : > { %v6528_v50 = vunpack.c.l.b16 %v6414_v17  ;;  %v5937_v17 = vunpack.c.l.b16 %v5570_v59  ;;  %6941 = vmatpush.bf16.msrb.mxu0 %v11684_v62  ;;  %v16054_v59 = vld [vmem:[#allocation11_spill] sm:$0xff] }
 0x2b5   : > { %v5555_v23 = vrot.slane %v5554_v53, 4 }
 0x2b6   : > { %v13730_v44 = vpop.f32.mrf.mxu2  ;;  %v6560_v0 = vpack.c.b16 %v6529_v33, %v6528_v50  ;;  %v4922_v50 = vsel %vm13712_vm13, 0, %v4921_v12  ;;  %v4919_v12 = vsel %vm13712_vm13, 0, %v4918_v26 }
 0x2b7   : > { %v13738_v14 = vpop.f32.mrf.mxu3  ;;  %v5238_v38 = vpop.permute.xlu2 %5237  ;;  %v5560_v11 = vsel %vm12201_vm2, %v5555_v23, %v5559_v16  ;;  %4923 = vst [vmem:[#allocation2 + $0x2c] sm:$0x1] %v4922_v50  ;;  %v3984_v16 = vadd.f32 %v13607_v7, %v3302_v43  ;;  %v4875_v7 = vsel %vm13637_vm10, 0, %v4874_v32  ;;  %v4522_v23 = vmul.f32 1.442695, %v4479_v60  ;;  %v4644_v32 = vld [vmem:[%s13144_s16 + $0x80] sm:$0xff] }
 0x2b8   : > { %v5384_v27 = vsel %vm13734_vm15, %v5238_v38, %v5383_v41  ;;  %v13753_v25 = vpop.f32.mrf.mxu0  ;;  %11176 = vmatmul.msk.bf16.vlgmr.msrb.gmra.mxu3 %vm5996_vm14, %v6560_v0  ;;  %v5936_v20 = vunpack.c.l.b16 %v5560_v11  ;;  %v13788_v38 = vpop.eup %11811  ;;  %4920 = vst [vmem:[#allocation2 + $0x20] sm:$0x1] %v4919_v12  ;;  %v4518_v50 = vmul.f32 1.442695, %v4477_v39 }
 0x2b9   : > { %5385 = vst [vmem:[#allocation2 + $0xc] sm:$0xf] %v5384_v27  ;;  %v4410_v0 = vadd.f32 %v13591_v5, %v3984_v16  ;;  %11813 = vpow2.f32 %v4522_v23 }
 0x2ba   : > { %16051 = vst [vmem:[#allocation53_spill] sm:$0xff] %v13788_v38  ;;  %v5968_v53 = vpack.c.b16 %v5937_v17, %v5936_v20  ;;  %v2990_v20 = vadd.f32 %v16054_v59, %v13091_v56  ;;  %v4412_v17 = vadd.f32 %v13643_v8, %v3986_v63  ;;  %11815 = vpow2.f32 %v4518_v50  ;;  %v4871_v56 = vld [vmem:[#allocation2 + $0x24] sm:$0x1] }
 0x2bb   : > { %4876 = vst [vmem:[#allocation2 + $0x30] sm:$0x1] %v4875_v7  ;;  %v13816_v4 = vadd.f32 %v13780_v6, %v4410_v0  ;;  %v3306_v7 = vadd.f32 %v13688_v57, %v2991_v54  ;;  %v5387_v57 = vld [vmem:[#allocation2 + $0x14] sm:$0x1] }
 0x2bc   : > { %11044 = vmatmul.msk.bf16.vlgmr.msra.gmra.mxu1 %vm5996_vm14, %v5968_v53  ;;  %v3305_v62 = vadd.f32 %v13676_v29, %v2990_v20  ;;  %v4872_v29 = vsel %vm13637_vm10, 0, %v4871_v56 }
 0x2bd   : > { %16053 = vst [vmem:[#allocation55_spill] sm:$0xff] %v13816_v4  ;;  %v4478_v30 = vsub.f32 0.0, %v13816_v4 }
 0x2be   : > { %v13769_v41 = vpop.f32.mrf.mxu2  ;;  %v3987_v8 = vadd.f32 %v13678_v51, %v3305_v62  ;;  %4873 = vst [vmem:[#allocation2 + $0x24] sm:$0x1] %v4872_v29  ;;  %v16060_v29 = vld [vmem:[#allocation12_spill] sm:$0xff] }
 0x2bf   : > { %v13771_v61 = vpop.f32.mrf.mxu3  ;;  %v4709_v58 = vpop.permute.xlu2 %4708  ;;  %v4520_v53 = vmul.f32 1.442695, %v4478_v30 }
 0x2c0   : > { %v4796_v27 = vmul.f32 %v13788_v38, %v4709_v58  ;;  %v13797_v33 = vpop.f32.mrf.mxu0  ;;  %v11814_v12 = vpop.eup %11813  ;;  %v4413_v9 = vadd.f32 %v13668_v10, %v3987_v8 }
 0x2c1   : > { %v11816_v40 = vpop.eup %11815  ;;  %11817 = vpow2.f32 %v4520_v53  ;;  %v4575_v51 = vadd.f32 1.0, %v11814_v12  ;;  %v5390_v53 = vld [vmem:[#allocation2 + $0x18] sm:$0xf]  ;;  %v2992_v12 = vadd.f32 %v16060_v29, %v13119_v36  ;;  %v6364_v36 = vld [vmem:[#allocation2 + $0xc] sm:$0xe] }
 0x2c2   : > { %v4828_v31 = vpack.c.bf16 %v4796_v27, %v4796_v27  ;;  %v13834_v27 = vadd.f32 %v13780_v6, %v4412_v17  ;;  %v4573_v0 = vadd.f32 1.0, %v11816_v40  ;;  %v13853_v63 = vadd.f32 %v13780_v6, %v4413_v9  ;;  %v5497_v17 = vld [vmem:[#allocation2 + $0xc] sm:$0xf] }
 0x2c3   : > { %11819 = vrcp.f32 %v4575_v51  ;;  %v5401_v40 = vld [vmem:[#allocation2 + $0x2c] sm:$0x1] }
 0x2c4   : > { %v5034_v3 = vshrl.u32 %v4828_v31, 16  ;;  %v5037_v24 = vshll.u32 %v4828_v31, 16  ;;  %16055 = vst [vmem:[#allocation11_spill] sm:$0xff] %v13834_v27  ;;  %v4480_v15 = vsub.f32 0.0, %v13834_v27  ;;  %v3988_v31 = vadd.f32 %v13690_v2, %v3306_v7 }
 0x2c5   : > { %16056 = vst [vmem:[#allocation56_spill] sm:$0xff] %v13853_v63  ;;  %11821 = vrcp.f32 %v4573_v0  ;;  %v4481_v30 = vsub.f32 0.0, %v13853_v63 }
 0x2c6   : > { %v13808_v18 = vpop.f32.mrf.mxu2  ;;  %v13813_v22 = vrot.slane %v5034_v3, 7  ;;  %v4524_v23 = vmul.f32 1.442695, %v4480_v15 }
 0x2c7   : > { %v13810_v43 = vpop.f32.mrf.mxu3  ;;  %v11818_v20 = vpop.eup %11817  ;;  %v4526_v51 = vmul.f32 1.442695, %v4481_v30 }
 0x2c8   : > { %v5039_v5 = vor.u32 %v5037_v24, %v13813_v22  ;;  %v13819_v11 = vpop.f32.mrf.mxu0  ;;  %11823 = vpow2.f32 %v4524_v23  ;;  %v4574_v62 = vadd.f32 1.0, %v11818_v20  ;;  %v3307_v23 = vadd.f32 %v13701_v48, %v2992_v12 }
 0x2ca   : > { %5261 = vrot.lane.b32.xlu1 %v5039_v5, %s12050_s20  ;;  %v4414_v5 = vadd.f32 %v13685_v19, %v3988_v31  ;;  %v13865_v19 = vpop.eup %11819  ;;  %11825 = vrcp.f32 %v4574_v62 }
 0x2cb   : > { %16059 = vst [vmem:[#allocation59_spill] sm:$0xff] %v13865_v19  ;;  %v13874_v15 = vpop.eup %11821  ;;  %11827 = vpow2.f32 %v4526_v51 }
 0x2cc   : > { %v13863_v54 = vadd.f32 %v13780_v6, %v4414_v5  ;;  %16061 = vst [vmem:[#allocation12_spill] sm:$0xff] %v13874_v15 }
 0x2ce   : > { %v13827_v16 = vpop.f32.mrf.mxu2  ;;  %16058 = vst [vmem:[#allocation58_spill] sm:$0xff] %v13863_v54  ;;  %v11824_v0 = vpop.eup %11823 }
 0x2cf   : > { %v13829_v58 = vpop.f32.mrf.mxu3 }
 0x2d0   : > { %v5246_v26 = vpop.permute.xlu2 %5245  ;;  %v13842_v60 = vpop.f32.mrf.mxu0 }
 0x2d1   : > { %5393 = vst.msk [vmem:[#allocation2 + $0x1c] sm:$0xf] %vm4852_vm11, %v5246_v26  ;;  %v5572_v26 = vshrl.u32 %v5497_v17, 16 }
 0x2d2   : > { %4724 = vrot.lane.b32.xlu1 %v4644_v32, %s12049_s17  ;;  %v5575_v32 = vshll.u32 %v5497_v17, 16 }
 0x2d3   : > { %v5574_v30 = vrot.slane %v5572_v26, 4  ;;  %v3989_v26 = vadd.f32 %v13703_v13, %v3307_v23 }
 0x2d4   : > { %v5577_v62 = vrot.slane %v5575_v32, 5 }
 0x2d6   : > { %v13848_v39 = vpop.f32.mrf.mxu2 }
 0x2d7   : > { %v13850_v3 = vpop.f32.mrf.mxu3 }
 0x2d8   : > { %v5242_v24 = vpop.permute.xlu1 %5241  ;;  %v4715_v50 = vpop.permute.xlu2 %4714 }
 0x2d9   : > { %v5388_v10 = vsel %vm13637_vm10, %v5242_v24, %v5387_v57  ;;  %v5240_v59 = vpop.permute.xlu0 %5239  ;;  %v13858_v2 = vpop.f32.mrf.mxu0  ;;  %v4799_v7 = vmul.f32 %v13865_v19, %v4715_v50  ;;  %v4482_v57 = vsub.f32 0.0, %v13863_v54  ;;  %v11149_v19 = vrot.slane %v6364_v36, 9 }
 0x2da   : > { %16057 = vst [vmem:[#allocation57_spill] sm:$0xff] %v13858_v2 }
 0x2db   : > { %5389 = vst [vmem:[#allocation2 + $0x14] sm:$0x1] %v5388_v10  ;;  %v13885_v29 = vpack.c.bf16 %v4799_v7, %v4799_v7 }
 0x2dc   : > { %5386 = vst.msk [vmem:[#allocation2 + $0x10] sm:$0xf] %vm4852_vm11, %v5240_v59 }
 0x2de   : > { %v13867_v56 = vpop.f32.mrf.mxu2 }
 0x2df   : > { %v13869_v8 = vpop.f32.mrf.mxu3 }
 0x2e0   : > { %v5244_v9 = vpop.permute.xlu1 %5243  ;;  %v5254_v31 = vpop.permute.xlu2 %5253 }
 0x2e1   : > { %v5391_v24 = vsel %vm13734_vm15, %v5244_v9, %v5390_v53  ;;  %v4711_v5 = vpop.permute.xlu0 %4710  ;;  %v13880_v10 = vpop.f32.mrf.mxu0  ;;  %v5402_v59 = vsel %vm13637_vm10, %v5254_v31, %v5401_v40  ;;  %v4576_v53 = vadd.f32 1.0, %v11824_v0 }
 0x2e2   : > { %16062 = vst [vmem:[#allocation60_spill] sm:$0xff] %v13880_v10  ;;  %v4797_v50 = vmul.f32 %v13874_v15, %v4711_v5  ;;  %v5532_v12 = vld [vmem:[#allocation2 + $0x14] sm:$0x1]  ;;  %v4528_v5 = vmul.f32 1.442695, %v4482_v57 }
 0x2e3   : > { %5392 = vst [vmem:[#allocation2 + $0x18] sm:$0xf] %v5391_v24  ;;  %v11647_v20 = vld [vmem:[#allocation2 + $0xc] sm:$0xff]  ;;  %v6423_v51 = vrot.slane %v5532_v12, 5  ;;  %v5394_v57 = vld [vmem:[#allocation2 + $0x20] sm:$0x1]  ;;  %11829 = vrcp.f32 %v4576_v53 }
 0x2e4   : > { %v11668_v17 = vld [vmem:[#allocation2 + $0xc] sm:$0xff]  ;;  %5403 = vst [vmem:[#allocation2 + $0x2c] sm:$0x1] %v5402_v59  ;;  %v4829_v9 = vpack.c.bf16 %v4797_v50, %v4797_v50  ;;  %11133 = vmatmul.msk.bf16.gmra.mxu2 %vm5996_vm14, %v11647_v20  ;;  %v13894_v50 = vpop.eup %11825  ;;  %v5040_v20 = vrot.slane %v13813_v22, 4  ;;  %v5591_v27 = vshll.u32 %v5532_v12, 16  ;;  %11831 = vpow2.f32 %v4528_v5 }
 0x2e5   : > { %v5498_v48 = vld [vmem:[#allocation2 + $0x10] sm:$0xf]  ;;  %11268 = vmatmul.msk.bf16.vlgmr.msrb.gmra.mxu0 %vm5996_vm14, %v11668_v17  ;;  %16063 = vst [vmem:[#allocation61_spill] sm:$0xff] %v13894_v50  ;;  %v5059_v17 = vshrl.u32 %v13885_v29, 16 }
 0x2e6   : > { %v6420_v24 = vrot.slane %v5498_v48, 5  ;;  %v5581_v40 = vshll.u32 %v5498_v48, 16  ;;  %v5585_v31 = vshrl.u32 %v5498_v48, 16  ;;  %v5042_v32 = vshrl.u32 %v4829_v9, 16  ;;  %v13890_v7 = vpop.f32.mrf.mxu2  ;;  %v5404_v15 = vld [vmem:[#allocation2 + $0x30] sm:$0xf] }
 0x2e7   : > { %v13892_v59 = vpop.f32.mrf.mxu3  ;;  %v5578_v48 = vor.u32 %v5577_v62, %v5574_v30  ;;  %v5045_v23 = vshll.u32 %v4829_v9, 16  ;;  %v5593_v53 = vrot.slane %v5591_v27, 5 }
 0x2e8   : > { %v6422_v0 = vrot.slane %v6420_v24, 4  ;;  %v6421_v36 = vsel %vm12509_vm5, %v11149_v19, %v6420_v24  ;;  %v5044_v13 = vrot.slane %v5042_v32, 7  ;;  %v4713_v38 = vpop.permute.xlu1 %4712  ;;  %v5256_v54 = vpop.permute.xlu2 %5255  ;;  %v5583_v45 = vrot.slane %v5581_v40, 5  ;;  %v5500_v32 = vld [vmem:[#allocation2 + $0x1c] sm:$0xf] }
 0x2e9   : > { %v4798_v21 = vmul.f32 %v13894_v50, %v4713_v38  ;;  %v5248_v4 = vpop.permute.xlu0 %5247  ;;  %v5405_v22 = vsel %vm13734_vm15, %v5256_v54, %v5404_v15  ;;  %v5587_v10 = vrot.slane %v5585_v31, 4  ;;  %v13905_v2 = vpop.f32.mrf.mxu0  ;;  %v6530_v9 = vunpack.c.l.b16 %v6421_v36 }
 0x2ea   : > { %v6424_v63 = vsel %vm12509_vm5, %v6422_v0, %v6423_v51  ;;  %v13907_v19 = vpop.eup %11827  ;;  %v5047_v30 = vor.u32 %v5045_v23, %v5044_v13  ;;  %v5395_v62 = vsel %vm13637_vm10, %v5248_v4, %v5394_v57  ;;  %5406 = vst [vmem:[#allocation2 + $0x30] sm:$0xf] %v5405_v22  ;;  %v5049_v38 = vrot.slane %v5044_v13, 4  ;;  %v5499_v0 = vld [vmem:[#allocation2 + $0x18] sm:$0xf] }
 0x2eb   : > { %v6531_v24 = vunpack.c.l.b16 %v6424_v63  ;;  %v4830_v12 = vpack.c.bf16 %v4798_v21, %v4798_v21  ;;  %5396 = vst [vmem:[#allocation2 + $0x20] sm:$0x1] %v5395_v62  ;;  %v4415_v54 = vadd.f32 %v13692_v52, %v3989_v26  ;;  %v13912_v15 = vrot.slane %v5059_v17, 7  ;;  %v6365_v17 = vld [vmem:[#allocation2 + $0x18] sm:$0xe]  ;;  %v13930_v27 = vpop.eup %11829 }
 0x2ec   : > { %v5048_v31 = vsel %vm13485_vm8, %v5040_v20, %v5047_v30  ;;  %5265 = vrot.lane.b32.xlu0 %v5049_v38, %s12050_s20  ;;  %v5579_v4 = vrot.slane %v5578_v48, 4  ;;  %v5588_v21 = vor.u32 %v5587_v10, %v5583_v45  ;;  %v5062_v63 = vshll.u32 %v13885_v29, 16  ;;  %v5397_v23 = vld [vmem:[#allocation2 + $0x24] sm:$0xf]  ;;  %16065 = vst [vmem:[#allocation63_spill] sm:$0xff] %v13930_v27 }
 0x2ed   : > { %v6561_v40 = vpack.c.b16 %v6531_v24, %v6530_v9  ;;  %v5051_v51 = vshrl.u32 %v4830_v12, 16  ;;  %5263 = vrot.lane.b32.xlu2 %v5048_v31, %s12050_s20  ;;  %v5605_v20 = vshll.u32 %v5500_v32, 16  ;;  %v5609_v57 = vshrl.u32 %v5500_v32, 16 }
 0x2ee   : > { %v13920_v52 = vpop.f32.mrf.mxu2  ;;  %v5584_v36 = vsel %vm12201_vm2, %v5579_v4, %v5583_v45  ;;  %v5589_v13 = vrot.slane %v5588_v21, 4  ;;  %v5596_v48 = vshrl.u32 %v5499_v0, 16  ;;  %v13927_v10 = vadd.f32 %v13780_v6, %v4415_v54  ;;  %v11648_v4 = vld [vmem:[#allocation2 + $0x18] sm:$0xff] }
 0x2ef   : > { %11177 = vmatmul.msk.bf16.gmra.mxu3 %vm5996_vm14, %v6561_v40  ;;  %v13922_v26 = vpop.f32.mrf.mxu3  ;;  %v5053_v5 = vrot.slane %v5051_v51, 7  ;;  %v5064_v29 = vor.u32 %v5062_v63, %v13912_v15  ;;  %v5054_v22 = vshll.u32 %v4830_v12, 16  ;;  %v6427_v30 = vrot.slane %v5500_v32, 5  ;;  %v11669_v21 = vld [vmem:[#allocation2 + $0x18] sm:$0xff]  ;;  %v11832_v63 = vpop.eup %11831 }
 0x2f0   : > { %16064 = vst [vmem:[#allocation62_spill] sm:$0xff] %v13927_v10  ;;  %v5594_v9 = vsel %vm12201_vm2, %v5589_v13, %v5593_v53  ;;  %v11150_v45 = vrot.slane %v6365_v17, 9  ;;  %v5599_v40 = vshll.u32 %v5499_v0, 16  ;;  %v5938_v31 = vunpack.c.l.b16 %v5584_v36  ;;  %v4924_v0 = vld [vmem:[#allocation2 + $0x38] sm:$0x1] }
 0x2f1   : > { %v5057_v62 = vrot.slane %v5053_v5, 4  ;;  %v5250_v24 = vpop.permute.xlu0 %5249  ;;  %v13934_v38 = vpop.f32.mrf.mxu0  ;;  %v5939_v51 = vunpack.c.l.b16 %v5594_v9  ;;  %v13938_v32 = vrot.slane %v5605_v20, 5  ;;  %v5056_v50 = vor.u32 %v5054_v22, %v5053_v5  ;;  %v4645_v5 = vld [vmem:[%s13144_s16 + $0x88] sm:$0xff] }
 0x2f2   : > { %16066 = vst [vmem:[#allocation64_spill] sm:$0xff] %v13934_v38  ;;  %v5398_v54 = vsel %vm13734_vm15, %v5250_v24, %v5397_v23  ;;  %v5533_v12 = vld [vmem:[#allocation2 + $0x20] sm:$0x1]  ;;  %v5598_v13 = vrot.slane %v5596_v48, 4  ;;  %v5611_v17 = vrot.slane %v5609_v57, 4  ;;  %v6429_v23 = vrot.slane %v6427_v30, 4 }
 0x2f3   : > { %5399 = vst [vmem:[#allocation2 + $0x24] sm:$0xf] %v5398_v54  ;;  %v5065_v53 = vsel %vm13485_vm8, %v5057_v62, %v5064_v29  ;;  %v5969_v36 = vpack.c.b16 %v5939_v51, %v5938_v31  ;;  %v6430_v9 = vrot.slane %v5533_v12, 5  ;;  %v4483_v20 = vsub.f32 0.0, %v13927_v10 }
 0x2f4   : > { %11134 = vmatmul.msk.bf16.gmra.mxu2 %vm5996_vm14, %v11648_v4  ;;  %5267 = vrot.lane.b32.xlu0 %v5056_v50, %s12050_s20  ;;  %v6428_v29 = vsel %vm12509_vm5, %v11150_v45, %v6427_v30  ;;  %v5601_v48 = vrot.slane %v5599_v40, 5  ;;  %v5615_v57 = vshll.u32 %v5533_v12, 16  ;;  %v4577_v22 = vadd.f32 1.0, %v13907_v19 }
 0x2f5   : > { %11269 = vmatmul.msk.bf16.gmra.mxu0 %vm5996_vm14, %v11669_v21  ;;  %5269 = vrot.lane.b32.xlu1 %v5065_v53, %s12050_s20  ;;  %v6431_v50 = vsel %vm12509_vm5, %v6429_v23, %v6430_v9  ;;  %v4925_v31 = vsel %vm13712_vm13, 0, %v4924_v0  ;;  %v4578_v51 = vadd.f32 1.0, %v11832_v63  ;;  %v5612_v40 = vor.u32 %v5611_v17, %v13938_v32  ;;  %v4646_v23 = vld [vmem:[%s13144_s16 + $0x90] sm:$0xff]  ;;  %v4647_v9 = vld [vmem:[%s13144_s16 + $0x98] sm:$0xff] }
 0x2f6   : > { %11045 = vmatmul.msk.bf16.gmra.mxu1 %vm5996_vm14, %v5969_v36  ;;  %4726 = vrot.lane.b32.xlu2 %v4645_v5, %s12049_s17  ;;  %v13953_v62 = vpop.f32.mrf.mxu2  ;;  %v6533_v30 = vunpack.c.l.b16 %v6431_v50  ;;  %v5602_v45 = vor.u32 %v5601_v48, %v5598_v13  ;;  %4926 = vst [vmem:[#allocation2 + $0x38] sm:$0x1] %v4925_v31  ;;  %v6532_v54 = vunpack.c.l.b16 %v6428_v29  ;;  %v4530_v4 = vmul.f32 1.442695, %v4483_v20  ;;  %v4721_v50 = vpop.permute.xlu2 %4720 }
 0x2f7   : > { %v13955_v24 = vpop.f32.mrf.mxu3  ;;  %v5617_v12 = vrot.slane %v5615_v57, 5  ;;  %11833 = vrcp.f32 %v4577_v22  ;;  %v5613_v36 = vrot.slane %v5612_v40, 4  ;;  %v5066_v5 = vrot.slane %v13912_v15, 4 }
 0x2f8   : > { %v5252_v19 = vpop.permute.xlu1 %5251  ;;  %v6562_v63 = vpack.c.b16 %v6533_v30, %v6532_v54  ;;  %11835 = vrcp.f32 %v4578_v51  ;;  %v5603_v13 = vrot.slane %v5602_v45, 4 }
 0x2f9   : > { %v4717_v21 = vpop.permute.xlu0 %4716  ;;  %5400 = vst.msk [vmem:[#allocation2 + $0x28] sm:$0xf] %vm4852_vm11, %v5252_v19  ;;  %v13963_v53 = vpop.f32.mrf.mxu0  ;;  %11837 = vpow2.f32 %v4530_v4  ;;  %v5618_v20 = vsel %vm12201_vm2, %v5613_v36, %v5617_v12 }
 0x2fa   : > { %16067 = vst [vmem:[#allocation65_spill] sm:$0xff] %v13963_v53  ;;  %v4800_v0 = vmul.f32 %v13930_v27, %v4717_v21  ;;  %v5501_v29 = vld [vmem:[#allocation2 + $0x24] sm:$0xf]  ;;  %v5608_v15 = vsel %vm12201_vm2, %v5603_v13, %v13938_v32  ;;  %v5941_v54 = vunpack.c.l.b16 %v5618_v20 }
 0x2fb   : > { %v6366_v31 = vld [vmem:[#allocation2 + $0x24] sm:$0xe]  ;;  %v5620_v51 = vshrl.u32 %v5501_v29, 16  ;;  %v5623_v30 = vshll.u32 %v5501_v29, 16 }
 0x2fc   : > { %v4832_v17 = vpack.c.bf16 %v4800_v0, %v4800_v0  ;;  %4728 = vrot.lane.b32.xlu0 %v4646_v23, %s12049_s17 }
 0x2fd   : > { %4730 = vrot.lane.b32.xlu1 %v4647_v9, %s12049_s17  ;;  %v13982_v45 = vpop.eup %11833  ;;  %v5534_v9 = vld [vmem:[#allocation2 + $0x2c] sm:$0x1]  ;;  %v5622_v20 = vrot.slane %v5620_v51, 4  ;;  %v5625_v10 = vrot.slane %v5623_v30, 5  ;;  %v5408_v30 = vld [vmem:[#allocation2 + $0x38] sm:$0x1] }
 0x2fe   : > { %v5068_v48 = vshrl.u32 %v4832_v17, 16  ;;  %5271 = vrot.lane.b32.xlu2 %v5066_v5, %s12050_s20  ;;  %v13975_v57 = vpop.f32.mrf.mxu2  ;;  %16070 = vst [vmem:[#allocation68_spill] sm:$0xff] %v13982_v45  ;;  %v5071_v19 = vshll.u32 %v4832_v17, 16  ;;  %v5940_v5 = vunpack.c.l.b16 %v5608_v15  ;;  %v11151_v17 = vrot.slane %v6366_v31, 9 }
 0x2ff   : > { %11178 = vmatmul.msk.bf16.gmra.mxu3 %vm5996_vm14, %v6562_v63  ;;  %16068 = vst [vmem:[#allocation66_spill] sm:$0xff] %v13975_v57  ;;  %v13977_v22 = vpop.f32.mrf.mxu3  ;;  %v13984_v63 = vpop.eup %11835 }
 0x300   : > { %16069 = vst [vmem:[#allocation67_spill] sm:$0xff] %v13977_v22  ;;  %v5070_v40 = vrot.slane %v5068_v48, 7  ;;  %v4719_v4 = vpop.permute.xlu1 %4718  ;;  %v11649_v21 = vld [vmem:[#allocation2 + $0x24] sm:$0xff]  ;;  %v4802_v13 = vmul.f32 %v13984_v63, %v4721_v50  ;;  %v11838_v27 = vpop.eup %11837  ;;  %v5970_v53 = vpack.c.b16 %v5941_v54, %v5940_v5 }
 0x301   : > { %v11670_v12 = vld [vmem:[#allocation2 + $0x24] sm:$0xff]  ;;  %16071 = vst [vmem:[#allocation69_spill] sm:$0xff] %v13984_v63  ;;  %v4801_v36 = vmul.f32 %v13982_v45, %v4719_v4  ;;  %v13987_v23 = vpop.f32.mrf.mxu0  ;;  %v6437_v4 = vrot.slane %v5534_v9, 5  ;;  %v4579_v50 = vadd.f32 1.0, %v11838_v27 }
 0x302   : > { %v5502_v0 = vld [vmem:[#allocation2 + $0x28] sm:$0xf]  ;;  %16072 = vst [vmem:[#allocation70_spill] sm:$0xff] %v13987_v23  ;;  %v5073_v29 = vor.u32 %v5071_v19, %v5070_v40  ;;  %v4834_v15 = vpack.c.bf16 %v4802_v13, %v4802_v13 }
 0x303   : > { %v6434_v32 = vrot.slane %v5502_v0, 5  ;;  %v4833_v48 = vpack.c.bf16 %v4801_v36, %v4801_v36  ;;  %v5629_v57 = vshll.u32 %v5502_v0, 16  ;;  %v5633_v54 = vshrl.u32 %v5502_v0, 16 }
 0x304   : > { %11135 = vmatmul.msk.bf16.gmra.mxu2 %vm5996_vm14, %v11649_v21  ;;  %11839 = vrcp.f32 %v4579_v50 }
 0x305   : > { %11270 = vmatmul.msk.bf16.gmra.mxu0 %vm5996_vm14, %v11670_v12  ;;  %v6436_v22 = vrot.slane %v6434_v32, 4  ;;  %v5076_v45 = vshrl.u32 %v4833_v48, 16  ;;  %v6435_v23 = vsel %vm12509_vm5, %v11151_v17, %v6434_v32  ;;  %v5079_v12 = vshll.u32 %v4833_v48, 16 }
 0x306   : > { %11046 = vmatmul.msk.bf16.gmra.mxu1 %vm5996_vm14, %v5970_v53  ;;  %5273 = vrot.lane.b32.xlu2 %v5073_v29, %s12050_s20  ;;  %v13996_v31 = vpop.f32.mrf.mxu2  ;;  %v5626_v32 = vor.u32 %v5625_v10, %v5622_v20  ;;  %v6534_v27 = vunpack.c.l.b16 %v6435_v23  ;;  %v5631_v13 = vrot.slane %v5629_v57, 5  ;;  %v5635_v17 = vrot.slane %v5633_v54, 4  ;;  %v5503_v23 = vld [vmem:[#allocation2 + $0x30] sm:$0xf] }
 0x307   : > { %16073 = vst [vmem:[#allocation71_spill] sm:$0xff] %v13996_v31  ;;  %v13998_v51 = vpop.f32.mrf.mxu3  ;;  %v6438_v19 = vsel %vm12509_vm5, %v6436_v22, %v6437_v4  ;;  %v5078_v21 = vrot.slane %v5076_v45, 7  ;;  %v5074_v53 = vrot.slane %v5070_v40, 4  ;;  %v5639_v31 = vshll.u32 %v5534_v9, 16  ;;  %v4648_v9 = vld [vmem:[%s13144_s16 + $0xa0] sm:$0xff] }
 0x308   : > { %16074 = vst [vmem:[#allocation72_spill] sm:$0xff] %v13998_v51  ;;  %v6535_v36 = vunpack.c.l.b16 %v6438_v19  ;;  %v5260_v5 = vpop.permute.xlu1 %5259  ;;  %v5085_v22 = vshrl.u32 %v4834_v15, 16  ;;  %v5627_v57 = vrot.slane %v5626_v32, 4  ;;  %v5636_v40 = vor.u32 %v5635_v17, %v5631_v13  ;;  %v6367_v19 = vld [vmem:[#allocation2 + $0x30] sm:$0xe] }
 0x309   : > { %v5081_v63 = vor.u32 %v5079_v12, %v5078_v21  ;;  %v5409_v29 = vsel %vm13637_vm10, %v5260_v5, %v5408_v30  ;;  %v5258_v51 = vpop.permute.xlu0 %5257  ;;  %v14004_v38 = vpop.f32.mrf.mxu0  ;;  %v5083_v0 = vrot.slane %v5078_v21, 4  ;;  %v5641_v4 = vrot.slane %v5639_v31, 5 }
 0x30a   : > { %16075 = vst [vmem:[#allocation73_spill] sm:$0xff] %v14004_v38  ;;  %v6563_v45 = vpack.c.b16 %v6535_v36, %v6534_v27  ;;  %v5632_v48 = vsel %vm12201_vm2, %v5627_v57, %v5631_v13  ;;  %v5637_v20 = vrot.slane %v5636_v40, 4  ;;  %v14014_v30 = vrot.slane %v5085_v22, 7  ;;  %v14024_v31 = vpop.eup %11839 }
 0x30b   : > { %5410 = vst [vmem:[#allocation2 + $0x38] sm:$0x1] %v5409_v29  ;;  %v5082_v10 = vsel %vm13485_vm8, %v5074_v53, %v5081_v63  ;;  %5277 = vrot.lane.b32.xlu1 %v5083_v0, %s12050_s20  ;;  %v5644_v54 = vshrl.u32 %v5503_v23, 16  ;;  %v5647_v21 = vshll.u32 %v5503_v23, 16  ;;  %v5088_v12 = vshll.u32 %v4834_v15, 16 }
 0x30c   : > { %5407 = vst.msk [vmem:[#allocation2 + $0x34] sm:$0xf] %vm4852_vm11, %v5258_v51  ;;  %5275 = vrot.lane.b32.xlu0 %v5082_v10, %s12050_s20  ;;  %v5642_v51 = vsel %vm12201_vm2, %v5637_v20, %v5641_v4  ;;  %v5942_v36 = vunpack.c.l.b16 %v5632_v48  ;;  %v11152_v0 = vrot.slane %v6367_v19, 9  ;;  %v4649_v48 = vld [vmem:[%s13144_s16 + $0xa8] sm:$0xff] }
 0x30d   : > { %v5943_v32 = vunpack.c.l.b16 %v5642_v51  ;;  %16076 = vst [vmem:[#allocation74_spill] sm:$0xff] %v14024_v31  ;;  %v5090_v29 = vor.u32 %v5088_v12, %v14014_v30  ;;  %v5646_v40 = vrot.slane %v5644_v54, 4  ;;  %v5649_v23 = vrot.slane %v5647_v21, 5 }
 0x30e   : > { %4732 = vrot.lane.b32.xlu2 %v4648_v9, %s12049_s17  ;;  %v14018_v63 = vpop.f32.mrf.mxu2  ;;  %v2993_v54 = vadd.f32 %v13115_v34, %v13139_v49 }
 0x30f   : > { %11179 = vmatmul.msk.bf16.gmra.mxu3 %vm5996_vm14, %v6563_v45  ;;  %v14020_v50 = vpop.f32.mrf.mxu3  ;;  %v5971_v13 = vpack.c.b16 %v5943_v32, %v5942_v36 }
 0x310   : > { %v3308_v34 = vadd.f32 %v13730_v44, %v2993_v54  ;;  %v16080_v54 = vld [vmem:[#allocation13_spill] sm:$0xff] }
 0x311   : > { %v4723_v5 = vpop.permute.xlu0 %4722  ;;  %v14028_v10 = vpop.f32.mrf.mxu0 }
 0x312   : > { %v5535_v27 = vld [vmem:[#allocation2 + $0x38] sm:$0x1]  ;;  %v4803_v17 = vmul.f32 %v14024_v31, %v4723_v5  ;;  %16077 = vst [vmem:[#allocation75_spill] sm:$0xff] %v14028_v10 }
 0x313   : > { %v11650_v53 = vld [vmem:[#allocation2 + $0x30] sm:$0xff]  ;;  %v6444_v15 = vrot.slane %v5535_v27, 5  ;;  %5279 = vrot.lane.b32.xlu1 %v5090_v29, %s12050_s20  ;;  %v5663_v29 = vshll.u32 %v5535_v27, 16 }
 0x314   : > { %v11671_v22 = vld [vmem:[#allocation2 + $0x30] sm:$0xff]  ;;  %v4835_v9 = vpack.c.bf16 %v4803_v17, %v4803_v17  ;;  %11136 = vmatmul.msk.bf16.gmra.mxu2 %vm5996_vm14, %v11650_v53  ;;  %4734 = vrot.lane.b32.xlu0 %v4649_v48, %s12049_s17  ;;  %v5650_v17 = vor.u32 %v5649_v23, %v5646_v40  ;;  %v3990_v40 = vadd.f32 %v13738_v14, %v3308_v34 }
 0x315   : > { %v5504_v45 = vld [vmem:[#allocation2 + $0x34] sm:$0xf]  ;;  %11271 = vmatmul.msk.bf16.gmra.mxu0 %vm5996_vm14, %v11671_v22  ;;  %v5665_v38 = vrot.slane %v5663_v29, 5 }
 0x316   : > { %v6441_v57 = vrot.slane %v5504_v45, 5  ;;  %v5653_v20 = vshll.u32 %v5504_v45, 16  ;;  %v5657_v4 = vshrl.u32 %v5504_v45, 16  ;;  %11047 = vmatmul.msk.bf16.gmra.mxu1 %vm5996_vm14, %v5971_v13  ;;  %v5093_v21 = vshrl.u32 %v4835_v9, 16  ;;  %v14040_v12 = vpop.f32.mrf.mxu2 }
 0x317   : > { %16078 = vst [vmem:[#allocation76_spill] sm:$0xff] %v14040_v12  ;;  %v14042_v36 = vpop.f32.mrf.mxu3  ;;  %v5096_v45 = vshll.u32 %v4835_v9, 16  ;;  %v5091_v13 = vrot.slane %v14014_v30, 4 }
 0x318   : > { %v6442_v51 = vsel %vm12509_vm5, %v11152_v0, %v6441_v57  ;;  %v6443_v19 = vrot.slane %v6441_v57, 4  ;;  %16079 = vst [vmem:[#allocation77_spill] sm:$0xff] %v14042_v36  ;;  %v5655_v32 = vrot.slane %v5653_v20, 5  ;;  %v5659_v53 = vrot.slane %v5657_v4, 4  ;;  %v4650_v36 = vld [vmem:[%s13144_s16 + $0xb0] sm:$0xff] }
 0x319   : > { %v5095_v22 = vrot.slane %v5093_v21, 7  ;;  %v6536_v0 = vunpack.c.l.b16 %v6442_v51  ;;  %v5651_v20 = vrot.slane %v5650_v17, 4  ;;  %v4416_v51 = vadd.f32 %v13720_v37, %v3990_v40 }
 0x31a   : > { %v6445_v5 = vsel %vm12509_vm5, %v6443_v19, %v6444_v15  ;;  %v5660_v49 = vor.u32 %v5659_v53, %v5655_v32  ;;  %v14058_v15 = vpop.f32.mrf.mxu0  ;;  %v2994_v21 = vadd.f32 %v16080_v54, %v13155_v46 }
 0x31b   : > { %v6537_v57 = vunpack.c.l.b16 %v6445_v5  ;;  %v5098_v48 = vor.u32 %v5096_v45, %v5095_v22  ;;  %v5100_v10 = vrot.slane %v5095_v22, 4  ;;  %4736 = vrot.lane.b32.xlu1 %v4650_v36, %s12049_s17  ;;  %v5656_v44 = vsel %vm12201_vm2, %v5651_v20, %v5655_v32  ;;  %v4651_v36 = vld [vmem:[%s13144_s16 + $0xb8] sm:$0xff] }
 0x31c   : > { %v5661_v12 = vrot.slane %v5660_v49, 4  ;;  %v16082_v5 = vld [vmem:[#allocation6_spill] sm:$0xff] }
 0x31d   : > { %v6564_v31 = vpack.c.b16 %v6537_v57, %v6536_v0  ;;  %v5099_v27 = vsel %vm13485_vm8, %v5091_v13, %v5098_v48  ;;  %5283 = vrot.lane.b32.xlu0 %v5100_v10, %s12050_s20  ;;  %v5944_v10 = vunpack.c.l.b16 %v5656_v44  ;;  %v14090_v48 = vpop.f32.mrf.mxu1 }
 0x31e   : > { %5281 = vrot.lane.b32.xlu2 %v5099_v27, %s12050_s20  ;;  %v5666_v30 = vsel %vm12201_vm2, %v5661_v12, %v5665_v38  ;;  %v14062_v23 = vpop.f32.mrf.mxu2  ;;  %v4877_v38 = vld [vmem:[#allocation2 + $0x3c] sm:$0x1]  ;;  %v3309_v12 = vadd.f32 %v13769_v41, %v2994_v21  ;;  %v4930_v27 = vld [vmem:[#allocation2 + $0x50] sm:$0x1]  ;;  %v4927_v21 = vld [vmem:[#allocation2 + $0x44] sm:$0x1] }
 0x31f   : > { %11180 = vmatmul.msk.bf16.gmra.mxu3 %vm5996_vm14, %v6564_v31  ;;  %v5945_v9 = vunpack.c.l.b16 %v5666_v30  ;;  %v14064_v4 = vpop.f32.mrf.mxu3  ;;  %v4878_v14 = vsel %vm13637_vm10, 0, %v4877_v38  ;;  %v14075_v31 = vadd.f32 %v13780_v6, %v4416_v51  ;;  %v4931_v44 = vsel %vm13712_vm13, 0, %v4930_v27  ;;  %v16085_v30 = vld [vmem:[#allocation14_spill] sm:$0xff] }
 0x320   : > { %4879 = vst [vmem:[#allocation2 + $0x3c] sm:$0x1] %v4878_v14  ;;  %v3991_v53 = vadd.f32 %v13771_v61, %v3309_v12  ;;  %v16086_v51 = vld [vmem:[#allocation18_spill] sm:$0xff]  ;;  %v4928_v12 = vsel %vm13712_vm13, 0, %v4927_v21  ;;  %v16088_v14 = vld [vmem:[#allocation20_spill] sm:$0xff] }
 0x321   : > { %v5972_v19 = vpack.c.b16 %v5945_v9, %v5944_v10  ;;  %16081 = vst [vmem:[#allocation13_spill] sm:$0xff] %v14075_v31  ;;  %v4484_v41 = vsub.f32 0.0, %v14075_v31  ;;  %v16093_v21 = vld [vmem:[#allocation26_spill] sm:$0xff] }
 0x322   : > { %v4395_v46 = vpop.f32.mrf.mxu0  ;;  %v4417_v45 = vadd.f32 %v13753_v25, %v3991_v53  ;;  %v16084_v25 = vld [vmem:[#allocation16_spill] sm:$0xff]  ;;  %4932 = vst [vmem:[#allocation2 + $0x50] sm:$0x1] %v4931_v44 }
 0x323   : > { %v4532_v0 = vmul.f32 1.442695, %v4484_v41  ;;  %v2995_v40 = vadd.f32 %v16085_v30, %v16084_v25  ;;  %4929 = vst [vmem:[#allocation2 + $0x44] sm:$0x1] %v4928_v12  ;;  %v4880_v44 = vld [vmem:[#allocation2 + $0x48] sm:$0x1] }
 0x324   : > { %v14085_v57 = vadd.f32 %v13780_v6, %v4417_v45 }
 0x325   : > { %11841 = vpow2.f32 %v4532_v0  ;;  %v4883_v0 = vld [vmem:[#allocation2 + $0x54] sm:$0x1] }
 0x326   : > { %4738 = vrot.lane.b32.xlu2 %v4651_v36, %s12049_s17  ;;  %11048 = vmatmul.msk.bf16.gmra.mxu1 %vm5996_vm14, %v5972_v19  ;;  %v3287_v32 = vpop.f32.mrf.mxu2  ;;  %16083 = vst [vmem:[#allocation6_spill] sm:$0xff] %v14085_v57  ;;  %v4485_v34 = vsub.f32 0.0, %v14085_v57  ;;  %v16087_v19 = vld [vmem:[#allocation15_spill] sm:$0xff]  ;;  %v3310_v36 = vadd.f32 %v13808_v18, %v2995_v40 }
 0x327   : > { %v3969_v37 = vpop.f32.mrf.mxu3  ;;  %v3322_v17 = vadd.f32 %v3287_v32, %v16082_v5  ;;  %v5411_v10 = vld [vmem:[#allocation2 + $0x3c] sm:$0xf]  ;;  %v2996_v54 = vadd.f32 %v16087_v19, %v16086_v51  ;;  %v16089_v32 = vld [vmem:[#allocation17_spill] sm:$0xff] }
 0x328   : > { %v4534_v20 = vmul.f32 1.442695, %v4485_v34  ;;  %v3992_v41 = vadd.f32 %v13810_v43, %v3310_v36  ;;  %v4881_v43 = vsel %vm13637_vm10, 0, %v4880_v44  ;;  %v16094_v36 = vld [vmem:[#allocation23_spill] sm:$0xff]  ;;  %v16100_v44 = vld [vmem:[#allocation21_spill] sm:$0xff] }
 0x329   : > { %v4004_v29 = vadd.f32 %v3969_v37, %v3322_v17  ;;  %v2997_v37 = vadd.f32 %v16089_v32, %v16088_v14  ;;  %v3311_v5 = vadd.f32 %v13827_v16, %v2996_v54  ;;  %v4884_v16 = vsel %vm13637_vm10, 0, %v4883_v0  ;;  %4882 = vst [vmem:[#allocation2 + $0x48] sm:$0x1] %v4881_v43  ;;  %v16098_v0 = vld [vmem:[#allocation19_spill] sm:$0xff] }
 0x32a   : > { %11843 = vpow2.f32 %v4534_v20  ;;  %4885 = vst [vmem:[#allocation2 + $0x54] sm:$0x1] %v4884_v16 }
 0x32b   : > { %v14081_v22 = vadd.f32 %v4395_v46, %v4004_v29  ;;  %v11842_v13 = vpop.eup %11841  ;;  %v3312_v53 = vadd.f32 %v13848_v39, %v2997_v37  ;;  %v3993_v34 = vadd.f32 %v13829_v58, %v3311_v5  ;;  %v4418_v39 = vadd.f32 %v13797_v33, %v3992_v41 }
 0x32c   : > { %v4580_v9 = vadd.f32 1.0, %v11842_v13 }
 0x32d   : > { %v3994_v27 = vadd.f32 %v13850_v3, %v3312_v53  ;;  %v4419_v58 = vadd.f32 %v13819_v11, %v3993_v34  ;;  %v14126_v3 = vadd.f32 %v13780_v6, %v4418_v39  ;;  %v3000_v11 = vadd.f32 %v16094_v36, %v16093_v21  ;;  %v4652_v36 = vld [vmem:[%s13144_s16 + $0xc0] sm:$0xff] }
 0x32e   : > { %v14088_v49 = vpop.f32.mrf.mxu2  ;;  %11845 = vrcp.f32 %v4580_v9 }
 0x32f   : > { %v14092_v61 = vpop.f32.mrf.mxu3  ;;  %v4420_v51 = vadd.f32 %v13842_v60, %v3994_v27  ;;  %16091 = vst [vmem:[#allocation14_spill] sm:$0xff] %v14126_v3  ;;  %v14129_v33 = vadd.f32 %v13780_v6, %v4419_v58  ;;  %v4486_v60 = vsub.f32 0.0, %v14126_v3  ;;  %v3315_v37 = vadd.f32 %v13920_v52, %v3000_v11  ;;  %v16099_v27 = vld [vmem:[#allocation24_spill] sm:$0xff]  ;;  %v9096_v58 = vld [vmem:[#allocation2 + $0x18] sm:$0xe] }
 0x330   : > { %v11844_v13 = vpop.eup %11843  ;;  %v2999_v39 = vadd.f32 %v16100_v44, %v16099_v27  ;;  %v11476_v11 = vrot.slane %v9096_v58, 9  ;;  %v5415_v44 = vld [vmem:[#allocation2 + $0x44] sm:$0x1]  ;;  %v16103_v58 = vld [vmem:[#allocation60_spill] sm:$0xff] }
 0x331   : > { %v4581_v40 = vadd.f32 1.0, %v11844_v13  ;;  %16092 = vst [vmem:[#allocation18_spill] sm:$0xff] %v14129_v33  ;;  %v4487_v32 = vsub.f32 0.0, %v14129_v33  ;;  %v3997_v16 = vadd.f32 %v13922_v26, %v3315_v37  ;;  %v14157_v37 = vpop.f32.mrf.mxu0 }
 0x333   : > { %11847 = vrcp.f32 %v4581_v40  ;;  %v4538_v34 = vmul.f32 1.442695, %v4487_v32  ;;  %v8431_v40 = vld [vmem:[#allocation2 + $0x1c] sm:$0xf] }
 0x334   : > { %v14116_v25 = vpop.eup %11845 }
 0x335   : > { %16090 = vst [vmem:[#allocation16_spill] sm:$0xff] %v14116_v25 }
 0x336   : > { %v6283_v46 = vpop.f32.mrf.mxu2 }
 0x339   : > { %v6054_v29 = vpop.f32.mrf.mxu1  ;;  %v14139_v53 = vpop.eup %11847 }
 0x33a   : > { %v6284_v45 = vadd.f32 %v6283_v46, %v6054_v29  ;;  %16096 = vst [vmem:[#allocation20_spill] sm:$0xff] %v14139_v53 }
 0x33b   : > { %v6645_v18 = vpop.f32.mrf.mxu3 }
 0x33c   : > { %v5262_v38 = vpop.permute.xlu1 %5261  ;;  %v14113_v20 = vadd.f32 %v6645_v18, %v6284_v45  ;;  %v16097_v45 = vld [vmem:[#allocation22_spill] sm:$0xff] }
 0x33d   : > { %v5412_v17 = vsel %vm13734_vm15, %v5262_v38, %v5411_v10  ;;  %v14134_v38 = vadd.f32 %v13780_v6, %v4420_v51  ;;  %v4536_v6 = vmul.f32 1.442695, %v4486_v60  ;;  %v2998_v52 = vadd.f32 %v16098_v0, %v16097_v45 }
 0x33e   : > { %5413 = vst [vmem:[#allocation2 + $0x3c] sm:$0xf] %v5412_v17  ;;  %v3314_v51 = vadd.f32 %v13890_v7, %v2999_v39  ;;  %v8434_v39 = vld [vmem:[#allocation2 + $0x28] sm:$0xf] }
 0x33f   : > { %16095 = vst [vmem:[#allocation15_spill] sm:$0xff] %v14134_v38  ;;  %v4488_v29 = vsub.f32 0.0, %v14134_v38  ;;  %v3313_v43 = vadd.f32 %v13867_v56, %v2998_v52  ;;  %11849 = vpow2.f32 %v4536_v6 }
 0x340   : > { %11851 = vpow2.f32 %v4538_v34 }
 0x341   : > { %v3995_v60 = vadd.f32 %v13869_v8, %v3313_v43 }
 0x344   : > { %v4725_v30 = vpop.permute.xlu1 %4724 }
 0x345   : > { %v4804_v9 = vmul.f32 %v14116_v25, %v4725_v30  ;;  %v4540_v30 = vmul.f32 1.442695, %v4488_v29  ;;  %v3996_v29 = vadd.f32 %v13892_v59, %v3314_v51  ;;  %v11850_v6 = vpop.eup %11849  ;;  %v5425_v51 = vld [vmem:[#allocation2 + $0x54] sm:$0xf] }
 0x346   : > { %v11852_v0 = vpop.eup %11851 }
 0x347   : > { %v5264_v10 = vpop.permute.xlu2 %5263  ;;  %v4836_v19 = vpack.c.bf16 %v4804_v9, %v4804_v9  ;;  %11853 = vpow2.f32 %v4540_v30 }
 0x348   : > { %5414 = vst.msk [vmem:[#allocation2 + $0x40] sm:$0xf] %vm4852_vm11, %v5264_v10  ;;  %v8432_v10 = vld [vmem:[#allocation2 + $0x20] sm:$0x1] }
 0x349   : > { %v5102_v54 = vshrl.u32 %v4836_v19, 16  ;;  %v5105_v14 = vshll.u32 %v4836_v19, 16  ;;  %v4423_v19 = vadd.f32 %v13905_v2, %v3997_v16  ;;  %v9165_v32 = vrot.slane %v8432_v10, 5  ;;  %v14182_v10 = vpop.f32.mrf.mxu2 }
 0x34b   : > { %v5104_v12 = vrot.slane %v5102_v54, 7  ;;  %v5422_v54 = vld [vmem:[#allocation2 + $0x50] sm:$0x1] }
 0x34d   : > { %v5107_v5 = vor.u32 %v5105_v14, %v5104_v12  ;;  %v9162_v14 = vrot.slane %v8431_v40, 5  ;;  %v11854_v40 = vpop.eup %11853 }
 0x34f   : > { %v11651_v17 = vld [vmem:[#allocation2 + $0x3c] sm:$0xff]  ;;  %5285 = vrot.lane.b32.xlu0 %v5107_v5, %s12050_s20  ;;  %v5108_v5 = vrot.slane %v5104_v12, 4  ;;  %v9164_v8 = vrot.slane %v9162_v14, 4 }
 0x350   : > { %v11672_v46 = vld [vmem:[#allocation2 + $0x3c] sm:$0xff]  ;;  %v4727_v18 = vpop.permute.xlu2 %4726  ;;  %11137 = vmatmul.msk.bf16.gmra.mxu2 %vm5996_vm14, %v11651_v17 }
 0x351   : > { %v4805_v41 = vmul.f32 %v14139_v53, %v4727_v18  ;;  %11272 = vmatmul.msk.bf16.gmra.mxu0 %vm5996_vm14, %v11672_v46  ;;  %v5505_v46 = vld [vmem:[#allocation2 + $0x3c] sm:$0xf]  ;;  %v9163_v18 = vsel %vm12509_vm5, %v11476_v11, %v9162_v14  ;;  %v14175_v59 = vld [vmem:[#allocation2 + $0x40] sm:$0xf]  ;;  %v9166_v16 = vsel %vm12509_vm5, %v9164_v8, %v9165_v32 }
 0x352   : > { %v5668_v52 = vshrl.u32 %v5505_v46, 16  ;;  %v5671_v34 = vshll.u32 %v5505_v46, 16  ;;  %v9277_v30 = vunpack.c.l.b16 %v9163_v18  ;;  %v9278_v43 = vunpack.c.l.b16 %v9166_v16  ;;  %v4653_v16 = vld [vmem:[%s13144_s16 + $0xc8] sm:$0xff] }
 0x353   : > { %v4837_v13 = vpack.c.bf16 %v4805_v41, %v4805_v41  ;;  %v14167_v41 = vld [vmem:[%s15879_s3] ss:$0 sm:$0xff]  ;;  %v5681_v11 = vshrl.u32 %v14175_v59, 16 }
 0x354   : > { %v14170_v12 = vadd.f32 %v14167_v41, %v4423_v19  ;;  %v5677_v19 = vshll.u32 %v14175_v59, 16  ;;  %v14187_v14 = vpack.c.b16 %v9278_v43, %v9277_v30  ;;  %v5670_v32 = vrot.slane %v5668_v52, 4  ;;  %v6368_v30 = vld [vmem:[#allocation2 + $0x3c] sm:$0xe] }
 0x355   : > { %v5110_v9 = vshrl.u32 %v4837_v13, 16  ;;  %v5113_v21 = vshll.u32 %v4837_v13, 16  ;;  %v16102_v13 = vld [vmem:[#allocation57_spill] sm:$0xff] }
 0x356   : > { %16101 = vst [vmem:[#allocation17_spill] sm:$0xff] %v14170_v12  ;;  %v4421_v27 = vadd.f32 %v16102_v13, %v3995_v60 }
 0x357   : > { %v5112_v26 = vrot.slane %v5110_v9, 7  ;;  %4740 = vrot.lane.b32.xlu0 %v4652_v36, %s12049_s17  ;;  %v4422_v9 = vadd.f32 %v16103_v58, %v3996_v29  ;;  %16104 = vst [vmem:[#allocation26_spill] sm:$0xff] %v14187_v14  ;;  %v6448_v58 = vrot.slane %v14175_v59, 5 }
 0x358   : > { %v5272_v56 = vpop.permute.xlu2 %5271  ;;  %v14192_v46 = vadd.f32 %v14167_v41, %v4421_v27 }
 0x359   : > { %v5115_v17 = vor.u32 %v5113_v21, %v5112_v26  ;;  %v5423_v2 = vsel %vm13637_vm10, %v5272_v56, %v5422_v54  ;;  %v5117_v7 = vrot.slane %v5112_v26, 4  ;;  %v9097_v54 = vld [vmem:[#allocation2 + $0x24] sm:$0xe]  ;;  %v4582_v26 = vadd.f32 1.0, %v11850_v6 }
 0x35a   : > { %5424 = vst [vmem:[#allocation2 + $0x50] sm:$0x1] %v5423_v2  ;;  %v4491_v21 = vsub.f32 0.0, %v14170_v12  ;;  %v9169_v2 = vrot.slane %v8434_v39, 5  ;;  %v11477_v8 = vrot.slane %v9097_v54, 9  ;;  %v4584_v6 = vadd.f32 1.0, %v11854_v40 }
 0x35b   : > { %5289 = vrot.lane.b32.xlu2 %v5117_v7, %s12050_s20  ;;  %v5116_v45 = vsel %vm13485_vm8, %v5108_v5, %v5115_v17  ;;  %v5673_v5 = vrot.slane %v5671_v34, 5  ;;  %v8435_v17 = vld [vmem:[#allocation2 + $0x2c] sm:$0x1]  ;;  %v4583_v7 = vadd.f32 1.0, %v11852_v0  ;;  %16105 = vst [vmem:[#allocation23_spill] sm:$0xff] %v14192_v46  ;;  %v5679_v34 = vrot.slane %v5677_v19, 5 }
 0x35c   : > { %5287 = vrot.lane.b32.xlu1 %v5116_v45, %s12050_s20  ;;  %v14197_v45 = vadd.f32 %v14167_v41, %v4422_v9  ;;  %v5683_v0 = vrot.slane %v5681_v11, 4  ;;  %v9170_v13 = vsel %vm12509_vm5, %v11477_v8, %v9169_v2  ;;  %v9171_v27 = vrot.slane %v9169_v2, 4  ;;  %v5418_v40 = vld [vmem:[#allocation2 + $0x48] sm:$0xf]  ;;  %v4933_v19 = vld [vmem:[#allocation2 + $0x5c] sm:$0x1] }
 0x35d   : > { %11855 = vrcp.f32 %v4582_v26  ;;  %v4546_v39 = vmul.f32 1.442695, %v4491_v21  ;;  %v5674_v43 = vor.u32 %v5673_v5, %v5670_v32  ;;  %v4489_v9 = vsub.f32 0.0, %v14192_v46  ;;  %v4936_v46 = vld [vmem:[#allocation2 + $0x68] sm:$0x1] }
 0x35e   : > { %v5266_v36 = vpop.permute.xlu0 %5265  ;;  %16106 = vst [vmem:[#allocation22_spill] sm:$0xff] %v14197_v45  ;;  %11857 = vrcp.f32 %v4583_v7  ;;  %v9279_v54 = vunpack.c.l.b16 %v9170_v13  ;;  %v4490_v21 = vsub.f32 0.0, %v14197_v45  ;;  %v4934_v59 = vsel %vm13712_vm13, 0, %v4933_v19 }
 0x35f   : > { %v5416_v60 = vsel %vm13637_vm10, %v5266_v36, %v5415_v44  ;;  %v9172_v44 = vrot.slane %v8435_v17, 5  ;;  %11859 = vrcp.f32 %v4584_v6  ;;  %v5675_v2 = vrot.slane %v5674_v43, 4  ;;  %4935 = vst [vmem:[#allocation2 + $0x5c] sm:$0x1] %v4934_v59 }
 0x360   : > { %v5274_v56 = vpop.permute.xlu2 %5273  ;;  %5417 = vst [vmem:[#allocation2 + $0x44] sm:$0x1] %v5416_v60  ;;  %v11153_v60 = vrot.slane %v6368_v30, 9  ;;  %11861 = vpow2.f32 %v4546_v39  ;;  %v6450_v6 = vrot.slane %v6448_v58, 4 }
 0x361   : > { %v5426_v29 = vsel %vm13734_vm15, %v5274_v56, %v5425_v51  ;;  %v14210_v51 = vpop.f32.mrf.mxu3  ;;  %v5684_v56 = vor.u32 %v5683_v0, %v5679_v34  ;;  %v5680_v43 = vsel %vm12201_vm2, %v5675_v2, %v5679_v34  ;;  %v14241_v2 = vld [vmem:[#allocation2 + $0x50] sm:$0x1] }
 0x362   : > { %v6943_v18 = vpop.f32.mrf.mxu0  ;;  %5427 = vst [vmem:[#allocation2 + $0x54] sm:$0xf] %v5426_v29  ;;  %v14222_v29 = vpop.f32.mrf.mxu1  ;;  %v6449_v8 = vsel %vm12509_vm5, %v11153_v60, %v6448_v58  ;;  %v5946_v59 = vunpack.c.l.b16 %v5680_v43 }
 0x363   : > { %v14200_v52 = vadd.f32 %v6943_v18, %v14113_v20  ;;  %v9173_v20 = vsel %vm12509_vm5, %v9171_v27, %v9172_v44  ;;  %v14228_v13 = vpop.eup %11855  ;;  %v4542_v27 = vmul.f32 1.442695, %v4489_v9  ;;  %v6538_v58 = vunpack.c.l.b16 %v6449_v8 }
 0x364   : > { %4742 = vrot.lane.b32.xlu1 %v4653_v16, %s12049_s17  ;;  %v9280_v26 = vunpack.c.l.b16 %v9173_v20  ;;  %16108 = vst [vmem:[#allocation24_spill] sm:$0xff] %v14228_v13  ;;  %v14230_v39 = vpop.eup %11857 }
 0x365   : > { %16109 = vst [vmem:[#allocation21_spill] sm:$0xff] %v14230_v39  ;;  %v14236_v19 = vpop.eup %11859  ;;  %11863 = vpow2.f32 %v4542_v27 }
 0x366   : > { %v5268_v36 = vpop.permute.xlu0 %5267  ;;  %v14220_v7 = vpack.c.b16 %v9280_v26, %v9279_v54  ;;  %16110 = vst [vmem:[#allocation57_spill] sm:$0xff] %v14236_v19  ;;  %v4544_v26 = vmul.f32 1.442695, %v4490_v21 }
 0x367   : > { %v5270_v11 = vpop.permute.xlu1 %5269  ;;  %v5419_v32 = vsel %vm13734_vm15, %v5268_v36, %v5418_v40  ;;  %v14218_v5 = vpop.f32.mrf.mxu2  ;;  %v5536_v17 = vld [vmem:[#allocation2 + $0x44] sm:$0x1]  ;;  %v5685_v40 = vrot.slane %v5684_v56, 4 }
 0x368   : > { %5421 = vst.msk [vmem:[#allocation2 + $0x4c] sm:$0xf] %vm4852_vm11, %v5270_v11  ;;  %v6451_v16 = vrot.slane %v5536_v17, 5  ;;  %v5687_v0 = vshll.u32 %v5536_v17, 16  ;;  %v4733_v44 = vpop.permute.xlu2 %4732  ;;  %v11862_v11 = vpop.eup %11861  ;;  %v4886_v17 = vld [vmem:[#allocation2 + $0x60] sm:$0x1]  ;;  %11865 = vpow2.f32 %v4544_v26 }
 0x369   : > { %16107 = vst [vmem:[#allocation19_spill] sm:$0xff] %v14220_v7  ;;  %v4808_v36 = vmul.f32 %v14236_v19, %v4733_v44  ;;  %v4887_v8 = vsel %vm13637_vm10, 0, %v4886_v17 }
 0x36a   : > { %5420 = vst [vmem:[#allocation2 + $0x48] sm:$0xf] %v5419_v32  ;;  %v14224_v18 = vpop.f32.mrf.mxu0  ;;  %v6452_v30 = vsel %vm12509_vm5, %v6450_v6, %v6451_v16  ;;  %v5689_v20 = vrot.slane %v5687_v0, 5 }
 0x36b   : > { %v6539_v54 = vunpack.c.l.b16 %v6452_v30  ;;  %4888 = vst [vmem:[#allocation2 + $0x60] sm:$0x1] %v4887_v8 }
 0x36c   : > { %v5690_v9 = vsel %vm12201_vm2, %v5685_v40, %v5689_v20  ;;  %v14250_v20 = vadd.f32 1.0, %v11862_v11 }
 0x36d   : > { %v6565_v60 = vpack.c.b16 %v6539_v54, %v6538_v58  ;;  %v5947_v32 = vunpack.c.l.b16 %v5690_v9  ;;  %v14252_v58 = vpack.c.bf16 %v4808_v36, %v4808_v36 }
 0x36e   : > { %v4729_v6 = vpop.permute.xlu0 %4728  ;;  %11867 = vrcp.f32 %v14250_v20 }
 0x36f   : > { %v4731_v34 = vpop.permute.xlu1 %4730  ;;  %v5508_v56 = vld [vmem:[#allocation2 + $0x4c] sm:$0xf]  ;;  %v4806_v21 = vmul.f32 %v14228_v13, %v4729_v6  ;;  %v14247_v0 = vpop.f32.mrf.mxu2  ;;  %11181 = vmatmul.msk.bf16.gmra.mxu3 %vm5996_vm14, %v6565_v60  ;;  %v5973_v44 = vpack.c.b16 %v5947_v32, %v5946_v59  ;;  %v6458_v60 = vrot.slane %v14241_v2, 5 }
 0x370   : > { %v4807_v16 = vmul.f32 %v14230_v39, %v4731_v34  ;;  %v6455_v40 = vrot.slane %v5508_v56, 5  ;;  %v5701_v11 = vshll.u32 %v5508_v56, 16  ;;  %v5705_v53 = vshrl.u32 %v5508_v56, 16 }
 0x371   : > { %v11652_v30 = vld [vmem:[#allocation2 + $0x48] sm:$0xff]  ;;  %v4838_v19 = vpack.c.bf16 %v4806_v21, %v4806_v21  ;;  %11049 = vmatmul.msk.bf16.gmra.mxu1 %vm5996_vm14, %v5973_v44  ;;  %v11864_v44 = vpop.eup %11863 }
 0x372   : > { %v11673_v43 = vld [vmem:[#allocation2 + $0x48] sm:$0xff]  ;;  %v6650_v54 = vpop.f32.mrf.mxu3  ;;  %v6948_v9 = vpop.f32.mrf.mxu0  ;;  %v4839_v34 = vpack.c.bf16 %v4807_v16, %v4807_v16  ;;  %11138 = vmatmul.msk.bf16.gmra.mxu2 %vm5996_vm14, %v11652_v30  ;;  %v6457_v26 = vrot.slane %v6455_v40, 4  ;;  %v5711_v16 = vshll.u32 %v14241_v2, 16  ;;  %v5136_v30 = vshrl.u32 %v14252_v58, 16 }
 0x373   : > { %v6369_v27 = vld [vmem:[#allocation2 + $0x48] sm:$0xe]  ;;  %v6059_v32 = vpop.f32.mrf.mxu1  ;;  %11273 = vmatmul.msk.bf16.gmra.mxu0 %vm5996_vm14, %v11673_v43  ;;  %v5119_v39 = vshrl.u32 %v4838_v19, 16  ;;  %v5122_v13 = vshll.u32 %v4838_v19, 16  ;;  %v11866_v38 = vpop.eup %11865  ;;  %v5703_v33 = vrot.slane %v5701_v11, 5  ;;  %v5707_v2 = vrot.slane %v5705_v53, 4 }
 0x374   : > { %v11154_v17 = vrot.slane %v6369_v27, 9  ;;  %v5507_v6 = vld [vmem:[#allocation2 + $0x48] sm:$0xf]  ;;  %v6289_v27 = vadd.f32 %v14218_v5, %v6059_v32  ;;  %v5127_v21 = vshrl.u32 %v4839_v34, 16  ;;  %v6459_v5 = vsel %vm12509_vm5, %v6457_v26, %v6458_v60 }
 0x375   : > { %v5692_v59 = vshrl.u32 %v5507_v6, 16  ;;  %v5695_v36 = vshll.u32 %v5507_v6, 16  ;;  %v5121_v43 = vrot.slane %v5119_v39, 7  ;;  %v5130_v6 = vshll.u32 %v4839_v34, 16 }
 0x376   : > { %v6456_v8 = vsel %vm12509_vm5, %v11154_v17, %v6455_v40  ;;  %v6727_v12 = vadd.f32 %v6650_v54, %v6289_v27  ;;  %v5129_v45 = vrot.slane %v5127_v21, 7  ;;  %v6541_v26 = vunpack.c.l.b16 %v6459_v5 }
 0x377   : > { %v5694_v25 = vrot.slane %v5692_v59, 4  ;;  %v5697_v32 = vrot.slane %v5695_v36, 5  ;;  %v5125_v57 = vrot.slane %v5121_v43, 4  ;;  %v5124_v17 = vor.u32 %v5122_v13, %v5121_v43  ;;  %v6293_v27 = vpop.f32.mrf.mxu2 }
 0x378   : > { %v5282_v56 = vpop.permute.xlu2 %5281  ;;  %v5132_v31 = vor.u32 %v5130_v6, %v5129_v45  ;;  %v14265_v19 = vadd.f32 %v6948_v9, %v6727_v12  ;;  %v5134_v40 = vrot.slane %v5129_v45, 4  ;;  %v5708_v59 = vor.u32 %v5707_v2, %v5703_v33  ;;  %v5509_v9 = vld [vmem:[#allocation2 + $0x54] sm:$0xf] }
 0x379   : > { %5435 = vst.msk [vmem:[#allocation2 + $0x64] sm:$0xf] %vm4852_vm11, %v5282_v56  ;;  %v5698_v34 = vor.u32 %v5697_v32, %v5694_v25  ;;  %v6540_v60 = vunpack.c.l.b16 %v6456_v8  ;;  %v4937_v12 = vsel %vm13712_vm13, 0, %v4936_v46  ;;  %5291 = vrot.lane.b32.xlu2 %v5124_v17, %s12050_s20  ;;  %v5713_v36 = vrot.slane %v5711_v16, 5  ;;  %v14288_v6 = vld [vmem:[#allocation2 + $0x34] sm:$0xf] }
 0x37a   : > { %v14268_v54 = vpop.f32.mrf.mxu3  ;;  %v14270_v39 = vpop.f32.mrf.mxu0  ;;  %5295 = vrot.lane.b32.xlu1 %v5134_v40, %s12050_s20  ;;  %v5133_v53 = vsel %vm13485_vm8, %v5125_v57, %v5132_v31  ;;  %v5709_v13 = vrot.slane %v5708_v59, 4  ;;  %4938 = vst [vmem:[#allocation2 + $0x68] sm:$0x1] %v4937_v12  ;;  %v4585_v11 = vadd.f32 1.0, %v11864_v44  ;;  %v14282_v31 = vrot.slane %v5136_v30, 7  ;;  %v4655_v12 = vld [vmem:[%s13144_s16 + $0xd8] sm:$0xff] }
 0x37b   : > { %v14277_v45 = vpop.f32.mrf.mxu1  ;;  %5293 = vrot.lane.b32.xlu0 %v5133_v53, %s12050_s20  ;;  %v5699_v25 = vrot.slane %v5698_v34, 4  ;;  %v5429_v57 = vld [vmem:[#allocation2 + $0x5c] sm:$0x1]  ;;  %v5716_v8 = vshrl.u32 %v5509_v9, 16  ;;  %v5719_v43 = vshll.u32 %v5509_v9, 16  ;;  %v5139_v56 = vshll.u32 %v14252_v58, 16 }
 0x37c   : > { %v5714_v21 = vsel %vm12201_vm2, %v5709_v13, %v5713_v36  ;;  %v6566_v5 = vpack.c.b16 %v6541_v26, %v6540_v60  ;;  %v15948_v17 = vrot.slane %v14288_v6, 5  ;;  %11869 = vrcp.f32 %v4585_v11  ;;  %v14297_v60 = vpop.eup %11867  ;;  %v4654_v26 = vld [vmem:[%s13144_s16 + $0xd0] sm:$0xff] }
 0x37d   : > { %v5704_v46 = vsel %vm12201_vm2, %v5699_v25, %v5703_v33  ;;  %v5278_v16 = vpop.permute.xlu1 %5277  ;;  %v5949_v20 = vunpack.c.l.b16 %v5714_v21  ;;  %v8438_v33 = vld [vmem:[#allocation2 + $0x38] sm:$0x1]  ;;  %v5141_v58 = vor.u32 %v5139_v56, %v14282_v31  ;;  %v4586_v34 = vadd.f32 1.0, %v11866_v38  ;;  %16111 = vst [vmem:[#allocation60_spill] sm:$0xff] %v14297_v60  ;;  %v6370_v11 = vld [vmem:[#allocation2 + $0x54] sm:$0xe] }
 0x37e   : > { %v5276_v44 = vpop.permute.xlu0 %5275  ;;  %v5948_v32 = vunpack.c.l.b16 %v5704_v46  ;;  %v5430_v30 = vsel %vm13637_vm10, %v5278_v16, %v5429_v57  ;;  %v5718_v9 = vrot.slane %v5716_v8, 4  ;;  %v5721_v25 = vrot.slane %v5719_v43, 5  ;;  %v5432_v21 = vld [vmem:[#allocation2 + $0x60] sm:$0xf] }
 0x37f   : > { %5428 = vst.msk [vmem:[#allocation2 + $0x58] sm:$0xf] %vm4852_vm11, %v5276_v44  ;;  %11182 = vmatmul.msk.bf16.gmra.mxu3 %vm5996_vm14, %v6566_v5  ;;  %v9179_v13 = vrot.slane %v8438_v33, 5  ;;  %v14305_v57 = vpop.f32.mrf.mxu2  ;;  %v9178_v56 = vrot.slane %v15948_v17, 4  ;;  %11871 = vrcp.f32 %v4586_v34 }
 0x380   : > { %5431 = vst [vmem:[#allocation2 + $0x5c] sm:$0x1] %v5430_v30  ;;  %v4739_v2 = vpop.permute.xlu2 %4738  ;;  %v5974_v40 = vpack.c.b16 %v5949_v20, %v5948_v32  ;;  %v11155_v32 = vrot.slane %v6370_v11, 9  ;;  %v5722_v20 = vor.u32 %v5721_v25, %v5718_v9 }
 0x381   : > { %4744 = vrot.lane.b32.xlu2 %v4654_v26, %s12049_s17  ;;  %v4811_v46 = vmul.f32 %v14297_v60, %v4739_v2 }
 0x382   : > { %v6655_v59 = vpop.f32.mrf.mxu3  ;;  %v6953_v53 = vpop.f32.mrf.mxu0  ;;  %11050 = vmatmul.msk.bf16.gmra.mxu1 %vm5996_vm14, %v5974_v40  ;;  %5297 = vrot.lane.b32.xlu1 %v5141_v58, %s12050_s20 }
 0x383   : > { %v6064_v36 = vpop.f32.mrf.mxu1  ;;  %4746 = vrot.lane.b32.xlu0 %v4655_v12, %s12049_s17  ;;  %v14314_v30 = vpop.eup %11869  ;;  %v14318_v26 = vpack.c.bf16 %v4811_v46, %v4811_v46  ;;  %v14330_v46 = vld [vmem:[#allocation2 + $0x64] sm:$0xf] }
 0x384   : > { %v6294_v38 = vadd.f32 %v6293_v27, %v6064_v36  ;;  %v14312_v27 = vsel %vm12509_vm5, %v9178_v56, %v9179_v13  ;;  %16112 = vst [vmem:[#allocation78_spill] sm:$0xff] %v14314_v30  ;;  %v4656_v13 = vld [vmem:[%s13144_s16 + $0xe0] sm:$0xff]  ;;  %v5753_v60 = vshrl.u32 %v14330_v46, 16 }
 0x385   : > { %v5280_v8 = vpop.permute.xlu1 %5279 }
 0x386   : > { %v6729_v16 = vadd.f32 %v6655_v59, %v6294_v38  ;;  %v11653_v43 = vld [vmem:[#allocation2 + $0x54] sm:$0xff]  ;;  %v5433_v33 = vsel %vm13734_vm15, %v5280_v8, %v5432_v21  ;;  %v4735_v2 = vpop.permute.xlu0 %4734 }
 0x387   : > { %v11674_v5 = vld [vmem:[#allocation2 + $0x54] sm:$0xff]  ;;  %v5538_v40 = vld [vmem:[#allocation2 + $0x5c] sm:$0x1]  ;;  %5434 = vst [vmem:[#allocation2 + $0x60] sm:$0xf] %v5433_v33  ;;  %v4809_v9 = vmul.f32 %v14314_v30, %v4735_v2  ;;  %11139 = vmatmul.msk.bf16.gmra.mxu2 %vm5996_vm14, %v11653_v43  ;;  %v6298_v30 = vpop.f32.mrf.mxu2 }
 0x388   : > { %v5510_v44 = vld [vmem:[#allocation2 + $0x58] sm:$0xf]  ;;  %v14320_v12 = vadd.f32 %v6953_v53, %v6729_v16  ;;  %11274 = vmatmul.msk.bf16.gmra.mxu0 %vm5996_vm14, %v11674_v5  ;;  %v6465_v38 = vrot.slane %v5538_v40, 5  ;;  %v14333_v16 = vpop.eup %11871 }
 0x389   : > { %v6462_v58 = vrot.slane %v5510_v44, 5  ;;  %v5725_v34 = vshll.u32 %v5510_v44, 16  ;;  %v5729_v59 = vshrl.u32 %v5510_v44, 16  ;;  %v4841_v53 = vpack.c.bf16 %v4809_v9, %v4809_v9  ;;  %16115 = vst [vmem:[#allocation81_spill] sm:$0xff] %v14333_v16 }
 0x38a   : > { %16113 = vst [vmem:[#allocation79_spill] sm:$0xff] %v14320_v12  ;;  %v14325_v25 = vpop.f32.mrf.mxu3  ;;  %4748 = vrot.lane.b32.xlu1 %v4656_v13, %s12049_s17  ;;  %v14337_v43 = vpop.f32.mrf.mxu0  ;;  %v5723_v44 = vrot.slane %v5722_v20, 4  ;;  %v5142_v9 = vrot.slane %v14282_v31, 4  ;;  %v5436_v13 = vld [vmem:[#allocation2 + $0x68] sm:$0x1] }
 0x38b   : > { %16114 = vst [vmem:[#allocation80_spill] sm:$0xff] %v14325_v25  ;;  %v6463_v36 = vsel %vm12509_vm5, %v11155_v32, %v6462_v58  ;;  %v6464_v11 = vrot.slane %v6462_v58, 4  ;;  %v5727_v21 = vrot.slane %v5725_v34, 5  ;;  %v5731_v56 = vrot.slane %v5729_v59, 4  ;;  %v14335_v8 = vpop.f32.mrf.mxu1 }
 0x38c   : > { %16116 = vst [vmem:[#allocation82_spill] sm:$0xff] %v14337_v43  ;;  %v5735_v32 = vshll.u32 %v5538_v40, 16  ;;  %v5144_v33 = vshrl.u32 %v4841_v53, 16  ;;  %v6542_v2 = vunpack.c.l.b16 %v6463_v36  ;;  %v5749_v34 = vshll.u32 %v14330_v46, 16  ;;  %v11687_v40 = vld [vmem:[%s15880_s4 + $0x48] sm:$0xff] }
 0x38d   : > { %v6466_v5 = vsel %vm12509_vm5, %v6464_v11, %v6465_v38  ;;  %v5161_v59 = vshrl.u32 %v14318_v26, 16  ;;  %v5732_v17 = vor.u32 %v5731_v56, %v5727_v21  ;;  %v5147_v7 = vshll.u32 %v4841_v53, 16  ;;  %v4737_v14 = vpop.permute.xlu1 %4736  ;;  %v4939_v36 = vld [vmem:[#allocation2 + $0x74] sm:$0x1]  ;;  %7606 = vmatpush.bf16.msrb.mxu1 %v11687_v40 }
 0x38e   : > { %v6543_v58 = vunpack.c.l.b16 %v6466_v5  ;;  %v5146_v3 = vrot.slane %v5144_v33, 7  ;;  %v5728_v20 = vsel %vm12201_vm2, %v5723_v44, %v5727_v21  ;;  %v4810_v31 = vmul.f32 %v14333_v16, %v4737_v14  ;;  %v5511_v44 = vld [vmem:[#allocation2 + $0x60] sm:$0xf] }
 0x38f   : > { %v5284_v38 = vpop.permute.xlu0 %5283  ;;  %v5733_v5 = vrot.slane %v5732_v17, 4  ;;  %v5737_v56 = vrot.slane %v5735_v32, 5  ;;  %v4940_v43 = vsel %vm13712_vm13, 0, %v4939_v36  ;;  %v5740_v32 = vshrl.u32 %v5511_v44, 16  ;;  %v11675_v12 = vld [vmem:[#allocation2 + $0x60] sm:$0xff] }
 0x390   : > { %v6567_v11 = vpack.c.b16 %v6543_v58, %v6542_v2  ;;  %v5149_v33 = vor.u32 %v5147_v7, %v5146_v3  ;;  %v5437_v53 = vsel %vm13637_vm10, %v5284_v38, %v5436_v13  ;;  %v5151_v21 = vrot.slane %v5146_v3, 4  ;;  %v9098_v58 = vld [vmem:[#allocation2 + $0x30] sm:$0xe]  ;;  %4941 = vst [vmem:[#allocation2 + $0x74] sm:$0x1] %v4940_v43 }
 0x391   : > { %v14356_v2 = vrot.slane %v5749_v34, 5  ;;  %v4842_v14 = vpack.c.bf16 %v4810_v31, %v4810_v31  ;;  %5438 = vst [vmem:[#allocation2 + $0x68] sm:$0x1] %v5437_v53  ;;  %v5738_v17 = vsel %vm12201_vm2, %v5733_v5, %v5737_v56  ;;  %v5755_v36 = vrot.slane %v5753_v60, 4 }
 0x392   : > { %11183 = vmatmul.msk.bf16.gmra.mxu3 %vm5996_vm14, %v6567_v11  ;;  %v6660_v25 = vpop.f32.mrf.mxu3  ;;  %5301 = vrot.lane.b32.xlu0 %v5151_v21, %s12050_s20  ;;  %v5150_v7 = vsel %vm13485_vm8, %v5142_v9, %v5149_v33  ;;  %v5950_v13 = vunpack.c.l.b16 %v5728_v20  ;;  %v5951_v3 = vunpack.c.l.b16 %v5738_v17  ;;  %v6371_v11 = vld [vmem:[#allocation2 + $0x60] sm:$0xe]  ;;  %v5743_v34 = vshll.u32 %v5511_v44, 16  ;;  %v6958_v17 = vpop.f32.mrf.mxu0 }
 0x393   : > { %v14363_v40 = vrot.slane %v5161_v59, 7  ;;  %v6069_v38 = vpop.f32.mrf.mxu1  ;;  %v5153_v31 = vshrl.u32 %v4842_v14, 16  ;;  %5299 = vrot.lane.b32.xlu2 %v5150_v7, %s12050_s20  ;;  %v5742_v53 = vrot.slane %v5740_v32, 4  ;;  %v11478_v5 = vrot.slane %v9098_v58, 9  ;;  %v11654_v59 = vld [vmem:[#allocation2 + $0x60] sm:$0xff] }
 0x394   : > { %v6299_v56 = vadd.f32 %v6298_v30, %v6069_v38  ;;  %v5975_v60 = vpack.c.b16 %v5951_v3, %v5950_v13  ;;  %v6469_v21 = vrot.slane %v14330_v46, 5  ;;  %v5745_v16 = vrot.slane %v5743_v34, 5  ;;  %v14375_v3 = vpop.f32.mrf.mxu2 }
 0x395   : > { %v5164_v9 = vshll.u32 %v14318_v26, 16  ;;  %v5155_v20 = vrot.slane %v5153_v31, 7  ;;  %v5156_v33 = vshll.u32 %v4842_v14, 16  ;;  %v11156_v44 = vrot.slane %v6371_v11, 9  ;;  %v4889_v14 = vld [vmem:[#allocation2 + $0x6c] sm:$0x1] }
 0x396   : > { %v6731_v43 = vadd.f32 %v6660_v25, %v6299_v56  ;;  %11051 = vmatmul.msk.bf16.gmra.mxu1 %vm5996_vm14, %v5975_v60  ;;  %v5756_v7 = vor.u32 %v5755_v36, %v14356_v2  ;;  %v16117_v58 = vrot.slane %v14288_v6, 5  ;;  %v5746_v13 = vor.u32 %v5745_v16, %v5742_v53 }
 0x397   : > { %v5166_v46 = vor.u32 %v5164_v9, %v14363_v40  ;;  %v5159_v32 = vrot.slane %v5155_v20, 4  ;;  %v5158_v26 = vor.u32 %v5156_v33, %v5155_v20  ;;  %11140 = vmatmul.msk.bf16.gmra.mxu2 %vm5996_vm14, %v11654_v59  ;;  %v6471_v6 = vrot.slane %v6469_v21, 4 }
 0x398   : > { %v9177_v30 = vsel %vm12509_vm5, %v11478_v5, %v16117_v58  ;;  %v14377_v25 = vadd.f32 %v6958_v17, %v6731_v43  ;;  %11275 = vmatmul.msk.bf16.gmra.mxu0 %vm5996_vm14, %v11675_v12  ;;  %v5539_v36 = vld [vmem:[#allocation2 + $0x68] sm:$0x1]  ;;  %v4890_v11 = vsel %vm13637_vm10, 0, %v4889_v14  ;;  %v9282_v34 = vunpack.c.l.b16 %v14312_v27  ;;  %v16119_v43 = vld [vmem:[#allocation25_spill] sm:$0xff] }
 0x399   : > { %v5167_v16 = vsel %vm13485_vm8, %v5159_v32, %v5166_v46  ;;  %v6470_v31 = vsel %vm12509_vm5, %v11156_v44, %v6469_v21  ;;  %v6472_v53 = vrot.slane %v5539_v36, 5  ;;  %v5759_v5 = vshll.u32 %v5539_v36, 16  ;;  %4891 = vst [vmem:[#allocation2 + $0x6c] sm:$0x1] %v4890_v11  ;;  %v4657_v12 = vld [vmem:[%s13144_s16 + $0xe8] sm:$0xff] }
 0x39a   : > { %v14384_v38 = vpop.f32.mrf.mxu3  ;;  %5303 = vrot.lane.b32.xlu0 %v5158_v26, %s12050_s20  ;;  %5305 = vrot.lane.b32.xlu1 %v5167_v16, %s12050_s20  ;;  %v9281_v56 = vunpack.c.l.b16 %v9177_v30  ;;  %v5747_v9 = vrot.slane %v5746_v13, 4  ;;  %v5757_v20 = vrot.slane %v5756_v7, 4  ;;  %v6544_v21 = vunpack.c.l.b16 %v6470_v31  ;;  %v16118_v44 = vld [vmem:[#allocation28_spill] sm:$0xff] }
 0x39b   : > { %v14393_v60 = vpop.f32.mrf.mxu1  ;;  %4750 = vrot.lane.b32.xlu2 %v4657_v12, %s12049_s17  ;;  %v6473_v27 = vsel %vm12509_vm5, %v6471_v6, %v6472_v53  ;;  %v5761_v33 = vrot.slane %v5759_v5, 5  ;;  %v3001_v59 = vadd.f32 %v16119_v43, %v16118_v44  ;;  %v5168_v13 = vrot.slane %v14363_v40, 4  ;;  %v16121_v5 = vld [vmem:[#allocation30_spill] sm:$0xff]  ;;  %v16122_v12 = vld [vmem:[#allocation27_spill] sm:$0xff] }
 0x39c   : > { %v6545_v17 = vunpack.c.l.b16 %v6473_v27  ;;  %v14402_v46 = vpack.c.b16 %v9282_v34, %v9281_v56  ;;  %v5752_v26 = vsel %vm12201_vm2, %v5747_v9, %v14356_v2  ;;  %v6303_v14 = vpop.f32.mrf.mxu2  ;;  %v16120_v2 = vld [vmem:[#allocation64_spill] sm:$0xff]  ;;  %v3002_v56 = vadd.f32 %v16122_v12, %v16121_v5  ;;  %v16123_v40 = vld [vmem:[#allocation66_spill] sm:$0xff]  ;;  %v16128_v43 = vld [vmem:[#allocation71_spill] sm:$0xff] }
 0x39d   : > { %v5762_v58 = vsel %vm12201_vm2, %v5757_v20, %v5761_v33  ;;  %v3316_v32 = vadd.f32 %v13953_v62, %v3001_v59  ;;  %v5952_v36 = vunpack.c.l.b16 %v5752_v26  ;;  %v16126_v33 = vld [vmem:[#allocation31_spill] sm:$0xff]  ;;  %v5443_v26 = vld [vmem:[#allocation2 + $0x74] sm:$0x1] }
 0x39e   : > { %v6568_v30 = vpack.c.b16 %v6545_v17, %v6544_v21  ;;  %v5953_v7 = vunpack.c.l.b16 %v5762_v58  ;;  %v3317_v27 = vadd.f32 %v16123_v40, %v3002_v56  ;;  %v16127_v21 = vld [vmem:[#allocation29_spill] sm:$0xff] }
 0x39f   : > { %v3998_v6 = vadd.f32 %v13955_v24, %v3316_v32  ;;  %v16125_v24 = vld [vmem:[#allocation67_spill] sm:$0xff]  ;;  %v3003_v17 = vadd.f32 %v16127_v21, %v16126_v33  ;;  %v16129_v58 = vld [vmem:[#allocation65_spill] sm:$0xff] }
 0x3a0   : > { %v5976_v31 = vpack.c.b16 %v5953_v7, %v5952_v36  ;;  %v3999_v20 = vadd.f32 %v16125_v24, %v3317_v27  ;;  %v4892_v7 = vld [vmem:[#allocation2 + $0x78] sm:$0x1]  ;;  %v5439_v40 = vld [vmem:[#allocation2 + $0x6c] sm:$0xf]  ;;  %v16134_v27 = vld [vmem:[#allocation33_spill] sm:$0xff] }
 0x3a1   : > { %v4424_v53 = vadd.f32 %v16120_v2, %v3998_v6  ;;  %v3318_v59 = vadd.f32 %v16128_v43, %v3003_v17  ;;  %v16135_v24 = vld [vmem:[#allocation32_spill] sm:$0xff]  ;;  %v16136_v21 = vld [vmem:[#allocation37_spill] sm:$0xff] }
 0x3a2   : > { %11184 = vmatmul.msk.bf16.gmra.mxu3 %vm5996_vm14, %v6568_v30  ;;  %v6665_v16 = vpop.f32.mrf.mxu3  ;;  %v4425_v30 = vadd.f32 %v16129_v58, %v3999_v20  ;;  %v3004_v20 = vadd.f32 %v16135_v24, %v16134_v27  ;;  %v16137_v17 = vld [vmem:[#allocation36_spill] sm:$0xff]  ;;  %v16141_v27 = vld [vmem:[#allocation34_spill] sm:$0xff] }
 0x3a3   : > { %v6074_v11 = vpop.f32.mrf.mxu1  ;;  %5307 = vrot.lane.b32.xlu2 %v5168_v13, %s12050_s20  ;;  %v14420_v9 = vadd.f32 %v14167_v41, %v4424_v53  ;;  %v4893_v13 = vsel %vm13637_vm10, 0, %v4892_v7 }
 0x3a4   : > { %v6304_v34 = vadd.f32 %v6303_v14, %v6074_v11  ;;  %v16130_v14 = vld [vmem:[#allocation72_spill] sm:$0xff]  ;;  %4894 = vst [vmem:[#allocation2 + $0x78] sm:$0x1] %v4893_v13  ;;  %v14432_v11 = vadd.f32 %v14167_v41, %v4425_v30  ;;  %v8440_v13 = vld [vmem:[#allocation2 + $0x40] sm:$0xf] }
 0x3a5   : > { %16124 = vst [vmem:[#allocation28_spill] sm:$0xff] %v14420_v9  ;;  %v4492_v44 = vsub.f32 0.0, %v14420_v9  ;;  %v4000_v36 = vadd.f32 %v16130_v14, %v3318_v59  ;;  %v3319_v59 = vadd.f32 %v14018_v63, %v3004_v20 }
 0x3a6   : > { %v14412_v62 = vadd.f32 %v6665_v16, %v6304_v34  ;;  %11052 = vmatmul.msk.bf16.gmra.mxu1 %vm5996_vm14, %v5976_v31  ;;  %16131 = vst [vmem:[#allocation25_spill] sm:$0xff] %v14432_v11  ;;  %v16132_v34 = vld [vmem:[#allocation70_spill] sm:$0xff]  ;;  %v4493_v2 = vsub.f32 0.0, %v14432_v11 }
 0x3a7   : > { %v4548_v32 = vmul.f32 1.442695, %v4492_v44  ;;  %v4426_v31 = vadd.f32 %v16132_v34, %v4000_v36  ;;  %v3006_v44 = vadd.f32 %v16137_v17, %v16136_v21  ;;  %v4001_v7 = vadd.f32 %v14020_v50, %v3319_v59  ;;  %v16142_v17 = vld [vmem:[#allocation76_spill] sm:$0xff] }
 0x3a8   : > { %v4550_v12 = vmul.f32 1.442695, %v4493_v2 }
 0x3a9   : > { %11873 = vpow2.f32 %v4548_v32  ;;  %v14439_v5 = vadd.f32 %v14167_v41, %v4426_v31  ;;  %v3321_v30 = vadd.f32 %v14062_v23, %v3006_v44  ;;  %v9183_v23 = vrot.slane %v8440_v13, 5 }
 0x3aa   : > { %11875 = vpow2.f32 %v4550_v12 }
 0x3ab   : > { %16133 = vst [vmem:[#allocation64_spill] sm:$0xff] %v14439_v5  ;;  %v4494_v33 = vsub.f32 0.0, %v14439_v5  ;;  %v4003_v36 = vadd.f32 %v14064_v4, %v3321_v30  ;;  %v9185_v30 = vrot.slane %v9183_v23, 4 }
 0x3ad   : > { %v4552_v32 = vmul.f32 1.442695, %v4494_v33  ;;  %v4429_v24 = vadd.f32 %v14058_v15, %v4003_v36 }
 0x3af   : > { %v11874_v53 = vpop.eup %11873  ;;  %v14474_v36 = vadd.f32 %v14167_v41, %v4429_v24 }
 0x3b0   : > { %v4588_v56 = vadd.f32 1.0, %v11874_v53  ;;  %v11876_v14 = vpop.eup %11875  ;;  %v16139_v53 = vld [vmem:[#allocation73_spill] sm:$0xff] }
 0x3b1   : > { %v4589_v2 = vadd.f32 1.0, %v11876_v14  ;;  %v4427_v12 = vadd.f32 %v16139_v53, %v4001_v7  ;;  %16144 = vst [vmem:[#allocation66_spill] sm:$0xff] %v14474_v36 }
 0x3b2   : > { %11877 = vrcp.f32 %v4588_v56  ;;  %v8441_v56 = vld [vmem:[#allocation2 + $0x44] sm:$0x1] }
 0x3b3   : > { %11879 = vpow2.f32 %v4552_v32  ;;  %v9186_v32 = vrot.slane %v8441_v56, 5  ;;  %v14467_v13 = vadd.f32 %v14167_v41, %v4427_v12  ;;  %v16145_v56 = vld [vmem:[#allocation77_spill] sm:$0xff] }
 0x3b4   : > { %11881 = vrcp.f32 %v4589_v2  ;;  %v14480_v2 = vld [vmem:[#allocation2 + $0x4c] sm:$0xf] }
 0x3b5   : > { %v5290_v6 = vpop.permute.xlu2 %5289  ;;  %16143 = vst [vmem:[#allocation27_spill] sm:$0xff] %v14467_v13 }
 0x3b6   : > { %v5444_v16 = vsel %vm13637_vm10, %v5290_v6, %v5443_v26  ;;  %v14450_v26 = vpop.f32.mrf.mxu0  ;;  %v4942_v6 = vld [vmem:[#allocation2 + $0x80] sm:$0x1] }
 0x3b7   : > { %5445 = vst [vmem:[#allocation2 + $0x74] sm:$0x1] %v5444_v16  ;;  %v4943_v63 = vsel %vm13712_vm13, 0, %v4942_v6  ;;  %v9099_v16 = vld [vmem:[#allocation2 + $0x3c] sm:$0xe] }
 0x3b8   : > { %v14456_v34 = vpop.eup %11877  ;;  %4944 = vst [vmem:[#allocation2 + $0x80] sm:$0x1] %v4943_v63  ;;  %v11479_v20 = vrot.slane %v9099_v16, 9  ;;  %v9187_v16 = vsel %vm12509_vm5, %v9185_v30, %v9186_v32 }
 0x3b9   : > { %16138 = vst [vmem:[#allocation30_spill] sm:$0xff] %v14456_v34  ;;  %v11880_v7 = vpop.eup %11879  ;;  %v9284_v12 = vunpack.c.l.b16 %v9187_v16  ;;  %v9100_v16 = vld [vmem:[#allocation2 + $0x48] sm:$0xe] }
 0x3ba   : > { %v14488_v30 = vpop.eup %11881 }
 0x3bb   : > { %16147 = vst [vmem:[#allocation31_spill] sm:$0xff] %v14488_v30 }
 0x3c1   : > { %v5286_v43 = vpop.permute.xlu0 %5285 }
 0x3c2   : > { %v5440_v58 = vsel %vm13734_vm15, %v5286_v43, %v5439_v40  ;;  %v16140_v40 = vld [vmem:[#allocation35_spill] sm:$0xff] }
 0x3c3   : > { %5441 = vst [vmem:[#allocation2 + $0x6c] sm:$0xf] %v5440_v58  ;;  %v3005_v4 = vadd.f32 %v16141_v27, %v16140_v40  ;;  %v9184_v58 = vsel %vm12509_vm5, %v11479_v20, %v9183_v23  ;;  %v5446_v27 = vld [vmem:[#allocation2 + $0x78] sm:$0xf] }
 0x3c4   : > { %v9283_v53 = vunpack.c.l.b16 %v9184_v58  ;;  %v4497_v58 = vsub.f32 0.0, %v14474_v36 }
 0x3c5   : > { %v3320_v44 = vadd.f32 %v16142_v17, %v3005_v4 }
 0x3c6   : > { %v14484_v20 = vpack.c.b16 %v9284_v12, %v9283_v53 }
 0x3c7   : > { %v4002_v40 = vadd.f32 %v16145_v56, %v3320_v44 }
 0x3c8   : > { %16146 = vst [vmem:[#allocation67_spill] sm:$0xff] %v14484_v20 }
 0x3c9   : > { %v4741_v31 = vpop.permute.xlu0 %4740 }
 0x3ca   : > { %v4812_v50 = vmul.f32 %v14456_v34, %v4741_v31  ;;  %v5513_v21 = vld [vmem:[#allocation2 + $0x6c] sm:$0xf] }
 0x3cb   : > { %v5764_v6 = vshrl.u32 %v5513_v21, 16  ;;  %v5767_v63 = vshll.u32 %v5513_v21, 16  ;;  %v6372_v24 = vld [vmem:[#allocation2 + $0x6c] sm:$0xe]  ;;  %v4495_v21 = vsub.f32 0.0, %v14467_v13 }
 0x3cc   : > { %v4844_v33 = vpack.c.bf16 %v4812_v50, %v4812_v50  ;;  %v4590_v50 = vadd.f32 1.0, %v11880_v7  ;;  %v11157_v34 = vrot.slane %v6372_v24, 9 }
 0x3cd   : > { %v5766_v17 = vrot.slane %v5764_v6, 4  ;;  %v4554_v11 = vmul.f32 1.442695, %v4495_v21 }
 0x3ce   : > { %v5288_v43 = vpop.permute.xlu1 %5287  ;;  %v6963_v59 = vpop.f32.mrf.mxu0  ;;  %v5170_v14 = vshrl.u32 %v4844_v33, 16  ;;  %v5173_v23 = vshll.u32 %v4844_v33, 16  ;;  %v9190_v33 = vrot.slane %v14480_v2, 5  ;;  %11883 = vrcp.f32 %v4590_v50 }
 0x3cf   : > { %5442 = vst.msk [vmem:[#allocation2 + $0x70] sm:$0xf] %vm4852_vm11, %v5288_v43  ;;  %v14471_v15 = vadd.f32 %v6963_v59, %v14412_v62  ;;  %v5540_v62 = vld [vmem:[#allocation2 + $0x74] sm:$0x1]  ;;  %v5769_v43 = vrot.slane %v5767_v63, 5  ;;  %11885 = vpow2.f32 %v4554_v11 }
 0x3d0   : > { %v14478_v31 = vrot.slane %v5170_v14, 7  ;;  %v4895_v59 = vld [vmem:[#allocation2 + $0x84] sm:$0x1]  ;;  %v6479_v44 = vrot.slane %v5540_v62, 5  ;;  %v5783_v7 = vshll.u32 %v5540_v62, 16 }
 0x3d1   : > { %v4896_v14 = vsel %vm13637_vm10, 0, %v4895_v59  ;;  %v5770_v50 = vor.u32 %v5769_v43, %v5766_v17  ;;  %v8444_v59 = vld [vmem:[#allocation2 + $0x50] sm:$0x1] }
 0x3d2   : > { %v5175_v4 = vor.u32 %v5173_v23, %v14478_v31  ;;  %v16148_v23 = vld [vmem:[#allocation75_spill] sm:$0xff]  ;;  %4897 = vst [vmem:[#allocation2 + $0x84] sm:$0x1] %v4896_v14  ;;  %v5785_v43 = vrot.slane %v5783_v7, 5 }
 0x3d3   : > { %v5292_v32 = vpop.permute.xlu2 %5291  ;;  %v4428_v6 = vadd.f32 %v16148_v23, %v4002_v40  ;;  %v11480_v23 = vrot.slane %v9100_v16, 9  ;;  %v5771_v13 = vrot.slane %v5770_v50, 4 }
 0x3d4   : > { %5309 = vrot.lane.b32.xlu0 %v5175_v4, %s12050_s20  ;;  %v5447_v63 = vsel %vm13734_vm15, %v5292_v32, %v5446_v27  ;;  %v9192_v27 = vrot.slane %v9190_v33, 4  ;;  %v14507_v16 = vpop.eup %11883 }
 0x3d5   : > { %5448 = vst [vmem:[#allocation2 + $0x78] sm:$0xf] %v5447_v63  ;;  %v14503_v24 = vadd.f32 %v14167_v41, %v4428_v6  ;;  %v9191_v41 = vsel %vm12509_vm5, %v11480_v23, %v9190_v33 }
 0x3d6   : > { %v4743_v2 = vpop.permute.xlu1 %4742  ;;  %v11655_v53 = vld [vmem:[#allocation2 + $0x6c] sm:$0xff]  ;;  %16150 = vst [vmem:[#allocation71_spill] sm:$0xff] %v14507_v16 }
 0x3d7   : > { %v11676_v12 = vld [vmem:[#allocation2 + $0x6c] sm:$0xff]  ;;  %v4813_v4 = vmul.f32 %v14488_v30, %v4743_v2  ;;  %11141 = vmatmul.msk.bf16.gmra.mxu2 %vm5996_vm14, %v11655_v53  ;;  %16149 = vst [vmem:[#allocation29_spill] sm:$0xff] %v14503_v24  ;;  %v4558_v2 = vmul.f32 1.442695, %v4497_v58 }
 0x3d8   : > { %v5514_v56 = vld [vmem:[#allocation2 + $0x70] sm:$0xf]  ;;  %11276 = vmatmul.msk.bf16.gmra.mxu0 %vm5996_vm14, %v11676_v12  ;;  %v9193_v12 = vrot.slane %v8444_v59, 5  ;;  %v4496_v59 = vsub.f32 0.0, %v14503_v24 }
 0x3d9   : > { %v6476_v62 = vrot.slane %v5514_v56, 5  ;;  %v5773_v36 = vshll.u32 %v5514_v56, 16  ;;  %v5777_v40 = vshrl.u32 %v5514_v56, 16  ;;  %v4845_v32 = vpack.c.bf16 %v4813_v4, %v4813_v4 }
 0x3da   : > { %v9194_v58 = vsel %vm12509_vm5, %v9192_v27, %v9193_v12  ;;  %11887 = vpow2.f32 %v4558_v2 }
 0x3db   : > { %v6477_v5 = vsel %vm12509_vm5, %v11157_v34, %v6476_v62  ;;  %v6478_v14 = vrot.slane %v6476_v62, 4  ;;  %v5775_v63 = vrot.slane %v5773_v36, 5  ;;  %v5779_v30 = vrot.slane %v5777_v40, 4  ;;  %v4745_v21 = vpop.permute.xlu2 %4744 }
 0x3dc   : > { %v5178_v53 = vshrl.u32 %v4845_v32, 16  ;;  %v6546_v56 = vunpack.c.l.b16 %v6477_v5  ;;  %v5181_v36 = vshll.u32 %v4845_v32, 16  ;;  %v4814_v6 = vmul.f32 %v14507_v16, %v4745_v21  ;;  %v14535_v21 = vpop.f32.mrf.mxu1 }
 0x3dd   : > { %v6480_v17 = vsel %vm12509_vm5, %v6478_v14, %v6479_v44  ;;  %v5780_v34 = vor.u32 %v5779_v30, %v5775_v63  ;;  %v5776_v7 = vsel %vm12201_vm2, %v5771_v13, %v5775_v63  ;;  %v5176_v5 = vrot.slane %v14478_v31, 4  ;;  %v14524_v31 = vpop.f32.mrf.mxu2  ;;  %16153 = vst [vmem:[#allocation70_spill] sm:$0xff] %v14535_v21 }
 0x3de   : > { %v6547_v4 = vunpack.c.l.b16 %v6480_v17  ;;  %v5180_v62 = vrot.slane %v5178_v53, 7  ;;  %v4846_v32 = vpack.c.bf16 %v4814_v6, %v4814_v6  ;;  %v5954_v13 = vunpack.c.l.b16 %v5776_v7  ;;  %16151 = vst [vmem:[#allocation65_spill] sm:$0xff] %v14524_v31  ;;  %v8446_v6 = vld [vmem:[#allocation2 + $0x58] sm:$0xf] }
 0x3df   : > { %v5781_v40 = vrot.slane %v5780_v34, 4  ;;  %v9285_v14 = vunpack.c.l.b16 %v9191_v41  ;;  %v9286_v53 = vunpack.c.l.b16 %v9194_v58 }
 0x3e0   : > { %v6569_v44 = vpack.c.b16 %v6547_v4, %v6546_v56  ;;  %v5183_v50 = vor.u32 %v5181_v36, %v5180_v62  ;;  %v5185_v30 = vrot.slane %v5180_v62, 4  ;;  %v5187_v11 = vshrl.u32 %v4846_v32, 16  ;;  %v4948_v56 = vld [vmem:[#allocation2 + $0x98] sm:$0x1]  ;;  %v4945_v4 = vld [vmem:[#allocation2 + $0x8c] sm:$0x1]  ;;  %v11886_v62 = vpop.eup %11885 }
 0x3e1   : > { %v5786_v33 = vsel %vm12201_vm2, %v5781_v40, %v5785_v43  ;;  %v5190_v12 = vshll.u32 %v4846_v32, 16  ;;  %v4556_v43 = vmul.f32 1.442695, %v4496_v59  ;;  %v14530_v34 = vpack.c.b16 %v9286_v53, %v9285_v14  ;;  %v11888_v58 = vpop.eup %11887  ;;  %v5450_v40 = vld [vmem:[#allocation2 + $0x80] sm:$0x1]  ;;  %v14542_v59 = vpop.f32.mrf.mxu0 }
 0x3e2   : > { %11185 = vmatmul.msk.bf16.gmra.mxu3 %vm5996_vm14, %v6569_v44  ;;  %5313 = vrot.lane.b32.xlu2 %v5185_v30, %s12050_s20  ;;  %v5184_v23 = vsel %vm13485_vm8, %v5176_v5, %v5183_v50  ;;  %v5955_v27 = vunpack.c.l.b16 %v5786_v33  ;;  %v14527_v17 = vrot.slane %v5187_v11, 7  ;;  %v4949_v36 = vsel %vm13712_vm13, 0, %v4948_v56  ;;  %v9101_v44 = vld [vmem:[#allocation2 + $0x54] sm:$0xe]  ;;  %v14540_v30 = vpop.f32.mrf.mxu3  ;;  %16155 = vst [vmem:[#allocation32_spill] sm:$0xff] %v14542_v59 }
 0x3e3   : > { %5311 = vrot.lane.b32.xlu1 %v5184_v23, %s12050_s20  ;;  %16152 = vst [vmem:[#allocation72_spill] sm:$0xff] %v14530_v34  ;;  %v4946_v41 = vsel %vm13712_vm13, 0, %v4945_v4  ;;  %11889 = vpow2.f32 %v4556_v43  ;;  %v4591_v5 = vadd.f32 1.0, %v11886_v62  ;;  %v4593_v50 = vadd.f32 1.0, %v11888_v58  ;;  %v8447_v32 = vld [vmem:[#allocation2 + $0x5c] sm:$0x1] }
 0x3e4   : > { %v5977_v63 = vpack.c.b16 %v5955_v27, %v5954_v13  ;;  %v5192_v2 = vor.u32 %v5190_v12, %v14527_v17  ;;  %4950 = vst [vmem:[#allocation2 + $0x98] sm:$0x1] %v4949_v36  ;;  %v5515_v23 = vld [vmem:[#allocation2 + $0x78] sm:$0xf]  ;;  %v4898_v13 = vld [vmem:[#allocation2 + $0x90] sm:$0x1] }
 0x3e5   : > { %4947 = vst [vmem:[#allocation2 + $0x8c] sm:$0x1] %v4946_v41  ;;  %v6308_v7 = vpop.f32.mrf.mxu2  ;;  %v11481_v27 = vrot.slane %v9101_v44, 9  ;;  %v9197_v14 = vrot.slane %v8446_v6, 5  ;;  %v4899_v12 = vsel %vm13637_vm10, 0, %v4898_v13  ;;  %v9200_v4 = vrot.slane %v8447_v32, 5 }
 0x3e6   : > { %11053 = vmatmul.msk.bf16.gmra.mxu1 %vm5996_vm14, %v5977_v63  ;;  %5315 = vrot.lane.b32.xlu0 %v5192_v2, %s12050_s20  ;;  %16154 = vst [vmem:[#allocation33_spill] sm:$0xff] %v14540_v30  ;;  %11891 = vrcp.f32 %v4591_v5  ;;  %v5788_v36 = vshrl.u32 %v5515_v23, 16  ;;  %v5791_v41 = vshll.u32 %v5515_v23, 16  ;;  %v5453_v13 = vld [vmem:[#allocation2 + $0x84] sm:$0xf] }
 0x3e7   : > { %v9198_v43 = vsel %vm12509_vm5, %v11481_v27, %v9197_v14  ;;  %v9199_v56 = vrot.slane %v9197_v14, 4  ;;  %11893 = vrcp.f32 %v4593_v50  ;;  %4900 = vst [vmem:[#allocation2 + $0x90] sm:$0x1] %v4899_v12  ;;  %v6373_v32 = vld [vmem:[#allocation2 + $0x78] sm:$0xe] }
 0x3e8   : > { %v9287_v44 = vunpack.c.l.b16 %v9198_v43  ;;  %v5790_v14 = vrot.slane %v5788_v36, 4 }
 0x3e9   : > { %v11890_v62 = vpop.eup %11889  ;;  %v9201_v6 = vsel %vm12509_vm5, %v9199_v56, %v9200_v4  ;;  %v11158_v4 = vrot.slane %v6373_v32, 9 }
 0x3ec   : > { %v5296_v33 = vpop.permute.xlu1 %5295 }
 0x3ed   : > { %v5451_v11 = vsel %vm13637_vm10, %v5296_v33, %v5450_v40  ;;  %v5294_v63 = vpop.permute.xlu0 %5293  ;;  %v5300_v53 = vpop.permute.xlu2 %5299  ;;  %v9288_v40 = vunpack.c.l.b16 %v9201_v6  ;;  %v4592_v33 = vadd.f32 1.0, %v11890_v62 }
 0x3ee   : > { %5452 = vst [vmem:[#allocation2 + $0x80] sm:$0x1] %v5451_v11  ;;  %v6079_v2 = vpop.f32.mrf.mxu1  ;;  %v5793_v11 = vrot.slane %v5791_v41, 5  ;;  %v14558_v50 = vpop.f32.mrf.mxu2 }
 0x3ef   : > { %5449 = vst.msk [vmem:[#allocation2 + $0x7c] sm:$0xf] %vm4852_vm11, %v5294_v63  ;;  %v6309_v58 = vadd.f32 %v6308_v7, %v6079_v2  ;;  %v14556_v63 = vpack.c.b16 %v9288_v40, %v9287_v44  ;;  %11895 = vrcp.f32 %v4592_v33 }
 0x3f0   : > { %5456 = vst.msk [vmem:[#allocation2 + $0x88] sm:$0xf] %vm4852_vm11, %v5300_v53  ;;  %v14554_v27 = vpop.f32.mrf.mxu0  ;;  %v14562_v53 = vpop.eup %11891  ;;  %v5794_v16 = vor.u32 %v5793_v11, %v5790_v14 }
 0x3f1   : > { %16156 = vst [vmem:[#allocation37_spill] sm:$0xff] %v14556_v63  ;;  %v14566_v62 = vpop.eup %11893  ;;  %v9102_v63 = vld [vmem:[#allocation2 + $0x60] sm:$0xe] }
 0x3f2   : > { %v6670_v5 = vpop.f32.mrf.mxu3  ;;  %16157 = vst [vmem:[#allocation36_spill] sm:$0xff] %v14558_v50 }
 0x3f3   : > { %v14560_v23 = vadd.f32 %v6670_v5, %v6309_v58  ;;  %16158 = vst [vmem:[#allocation73_spill] sm:$0xff] %v14562_v53 }
 0x3f4   : > { %v5298_v7 = vpop.permute.xlu1 %5297  ;;  %16159 = vst [vmem:[#allocation35_spill] sm:$0xff] %v14566_v62 }
 0x3f5   : > { %v5454_v12 = vsel %vm13734_vm15, %v5298_v7, %v5453_v13  ;;  %v4747_v43 = vpop.permute.xlu0 %4746  ;;  %v5541_v56 = vld [vmem:[#allocation2 + $0x80] sm:$0x1]  ;;  %v4751_v36 = vpop.permute.xlu2 %4750  ;;  %v14572_v7 = vld [vmem:[#allocation2 + $0x64] sm:$0xf] }
 0x3f6   : > { %5455 = vst [vmem:[#allocation2 + $0x84] sm:$0xf] %v5454_v12  ;;  %v4815_v2 = vmul.f32 %v14562_v53, %v4747_v43  ;;  %v11656_v41 = vld [vmem:[#allocation2 + $0x78] sm:$0xff]  ;;  %v4817_v44 = vmul.f32 %v14566_v62, %v4751_v36  ;;  %v14570_v40 = vpop.f32.mrf.mxu1  ;;  %v6486_v33 = vrot.slane %v5541_v56, 5  ;;  %v5807_v43 = vshll.u32 %v5541_v56, 16 }
 0x3f7   : > { %v11677_v6 = vld [vmem:[#allocation2 + $0x78] sm:$0xff]  ;;  %16160 = vst [vmem:[#allocation34_spill] sm:$0xff] %v14570_v40  ;;  %11142 = vmatmul.msk.bf16.gmra.mxu2 %vm5996_vm14, %v11656_v41  ;;  %v5795_v56 = vrot.slane %v5794_v16, 4  ;;  %v6313_v40 = vpop.f32.mrf.mxu2 }
 0x3f8   : > { %v5516_v58 = vld [vmem:[#allocation2 + $0x7c] sm:$0xf]  ;;  %v4847_v32 = vpack.c.bf16 %v4815_v2, %v4815_v2  ;;  %11277 = vmatmul.msk.bf16.gmra.mxu0 %vm5996_vm14, %v11677_v6  ;;  %v14576_v53 = vpack.c.bf16 %v4817_v44, %v4817_v44  ;;  %v5193_v2 = vrot.slane %v14527_v17, 4  ;;  %v14589_v30 = vpop.f32.mrf.mxu0 }
 0x3f9   : > { %v6483_v5 = vrot.slane %v5516_v58, 5  ;;  %v5797_v13 = vshll.u32 %v5516_v58, 16  ;;  %v5801_v12 = vshrl.u32 %v5516_v58, 16  ;;  %v14586_v58 = vpop.eup %11895  ;;  %16163 = vst [vmem:[#allocation75_spill] sm:$0xff] %v14589_v30  ;;  %v16164_v30 = vrot.slane %v14572_v7, 5 }
 0x3fa   : > { %v5195_v9 = vshrl.u32 %v4847_v32, 16  ;;  %v5198_v50 = vshll.u32 %v4847_v32, 16  ;;  %v14582_v41 = vpop.f32.mrf.mxu3  ;;  %16162 = vst [vmem:[#allocation77_spill] sm:$0xff] %v14586_v58  ;;  %v5212_v11 = vshrl.u32 %v14576_v53, 16 }
 0x3fb   : > { %v6484_v36 = vsel %vm12509_vm5, %v11158_v4, %v6483_v5  ;;  %v6485_v62 = vrot.slane %v6483_v5, 4  ;;  %v5799_v24 = vrot.slane %v5797_v13, 5  ;;  %v5803_v14 = vrot.slane %v5801_v12, 4  ;;  %16161 = vst [vmem:[#allocation76_spill] sm:$0xff] %v14582_v41  ;;  %v5464_v5 = vld [vmem:[#allocation2 + $0x98] sm:$0x1] }
 0x3fc   : > { %v5197_v44 = vrot.slane %v5195_v9, 7  ;;  %v4749_v4 = vpop.permute.xlu1 %4748  ;;  %v6548_v13 = vunpack.c.l.b16 %v6484_v36  ;;  %v9206_v34 = vrot.slane %v16164_v30, 4  ;;  %v14605_v30 = vld [vmem:[#allocation2 + $0x88] sm:$0xf] }
 0x3fd   : > { %v6487_v6 = vsel %vm12509_vm5, %v6485_v62, %v6486_v33  ;;  %v5804_v12 = vor.u32 %v5803_v14, %v5799_v24  ;;  %v4816_v17 = vmul.f32 %v14586_v58, %v4749_v4  ;;  %v5800_v32 = vsel %vm12201_vm2, %v5795_v56, %v5799_v24  ;;  %v5308_v33 = vpop.permute.xlu2 %5307  ;;  %v4901_v58 = vld [vmem:[#allocation2 + $0x9c] sm:$0x1] }
 0x3fe   : > { %v6549_v59 = vunpack.c.l.b16 %v6487_v6  ;;  %v5809_v62 = vrot.slane %v5807_v43, 5  ;;  %v5200_v16 = vor.u32 %v5198_v50, %v5197_v44  ;;  %v5202_v9 = vrot.slane %v5197_v44, 4  ;;  %v5517_v6 = vld [vmem:[#allocation2 + $0x84] sm:$0xf]  ;;  %v8450_v50 = vld [vmem:[#allocation2 + $0x68] sm:$0x1] }
 0x3ff   : > { %v5805_v31 = vrot.slane %v5804_v12, 4  ;;  %v4848_v21 = vpack.c.bf16 %v4816_v17, %v4816_v17  ;;  %v5465_v36 = vsel %vm13637_vm10, %v5308_v33, %v5464_v5  ;;  %v6084_v14 = vpop.f32.mrf.mxu1  ;;  %v5214_v43 = vrot.slane %v5212_v11, 7 }
 0x400   : > { %v6570_v41 = vpack.c.b16 %v6549_v59, %v6548_v13  ;;  %5466 = vst [vmem:[#allocation2 + $0x98] sm:$0x1] %v5465_v36  ;;  %v6314_v4 = vadd.f32 %v6313_v40, %v6084_v14  ;;  %5319 = vrot.lane.b32.xlu2 %v5202_v9, %s12050_s20  ;;  %v5201_v24 = vsel %vm13485_vm8, %v5193_v2, %v5200_v16  ;;  %v5956_v44 = vunpack.c.l.b16 %v5800_v32 }
 0x401   : > { %v5810_v59 = vsel %vm12201_vm2, %v5805_v31, %v5809_v62  ;;  %v5204_v56 = vshrl.u32 %v4848_v21, 16  ;;  %5317 = vrot.lane.b32.xlu1 %v5201_v24, %s12050_s20  ;;  %v5215_v40 = vshll.u32 %v14576_v53, 16  ;;  %v5812_v13 = vshrl.u32 %v5517_v6, 16 }
 0x402   : > { %11186 = vmatmul.msk.bf16.gmra.mxu3 %vm5996_vm14, %v6570_v41  ;;  %v5957_v5 = vunpack.c.l.b16 %v5810_v59  ;;  %v5457_v41 = vld [vmem:[#allocation2 + $0x8c] sm:$0x1]  ;;  %v5815_v12 = vshll.u32 %v5517_v6, 16  ;;  %v11482_v17 = vrot.slane %v9102_v63, 9  ;;  %v5207_v2 = vshll.u32 %v4848_v21, 16  ;;  %v6675_v9 = vpop.f32.mrf.mxu3  ;;  %v14613_v21 = vpop.f32.mrf.mxu2 }
 0x403   : > { %v5206_v33 = vrot.slane %v5204_v56, 7  ;;  %v9207_v31 = vrot.slane %v8450_v50, 5  ;;  %v6737_v62 = vadd.f32 %v6675_v9, %v6314_v4  ;;  %v5814_v36 = vrot.slane %v5812_v13, 4  ;;  %16165 = vst [vmem:[#allocation83_spill] sm:$0xff] %v14613_v21  ;;  %v11657_v50 = vld [vmem:[#allocation2 + $0x84] sm:$0xff] }
 0x404   : > { %v5978_v16 = vpack.c.b16 %v5957_v5, %v5956_v44  ;;  %v5302_v11 = vpop.permute.xlu0 %5301  ;;  %v5821_v14 = vshll.u32 %v14605_v30, 16  ;;  %v5825_v32 = vshrl.u32 %v14605_v30, 16  ;;  %v5217_v24 = vor.u32 %v5215_v40, %v5214_v43  ;;  %v11678_v56 = vld [vmem:[#allocation2 + $0x84] sm:$0xff] }
 0x405   : > { %v5210_v59 = vrot.slane %v5206_v33, 4  ;;  %v5458_v53 = vsel %vm13637_vm10, %v5302_v11, %v5457_v41  ;;  %v5209_v63 = vor.u32 %v5207_v2, %v5206_v33  ;;  %v6973_v6 = vpop.f32.mrf.mxu0  ;;  %v5817_v44 = vrot.slane %v5815_v12, 5  ;;  %v6374_v13 = vld [vmem:[#allocation2 + $0x84] sm:$0xe] }
 0x406   : > { %11054 = vmatmul.msk.bf16.gmra.mxu1 %vm5996_vm14, %v5978_v16  ;;  %5459 = vst [vmem:[#allocation2 + $0x8c] sm:$0x1] %v5458_v53  ;;  %v14615_v4 = vadd.f32 %v6973_v6, %v6737_v62  ;;  %v5219_v5 = vrot.slane %v5214_v43, 4  ;;  %v11686_v41 = vld [vmem:[%s15880_s4 + $0x40] sm:$0xff]  ;;  %v16166_v33 = vrot.slane %v14572_v7, 5  ;;  %v9208_v16 = vsel %vm12509_vm5, %v9206_v34, %v9207_v31 }
 0x407   : > { %5321 = vrot.lane.b32.xlu0 %v5209_v63, %s12050_s20  ;;  %v5218_v40 = vsel %vm13485_vm8, %v5210_v59, %v5217_v24  ;;  %11143 = vmatmul.msk.bf16.gmra.mxu2 %vm5996_vm14, %v11657_v50  ;;  %v5818_v43 = vor.u32 %v5817_v44, %v5814_v36  ;;  %v5823_v12 = vrot.slane %v5821_v14, 5  ;;  %v5827_v9 = vrot.slane %v5825_v32, 4  ;;  %v5460_v62 = vld [vmem:[#allocation2 + $0x90] sm:$0xf]  ;;  %v14634_v34 = vpop.f32.mrf.mxu1 }
 0x408   : > { %v9205_v2 = vsel %vm12509_vm5, %v11482_v17, %v16166_v33  ;;  %11278 = vmatmul.msk.bf16.gmra.mxu0 %vm5996_vm14, %v11678_v56  ;;  %5325 = vrot.lane.b32.xlu2 %v5219_v5, %s12050_s20  ;;  %v6490_v7 = vrot.slane %v14605_v30, 5  ;;  %v11159_v11 = vrot.slane %v6374_v13, 9  ;;  %v9290_v24 = vunpack.c.l.b16 %v9208_v16  ;;  %16167 = vst [vmem:[#allocation84_spill] sm:$0xff] %v14634_v34  ;;  %v4658_v30 = vld [vmem:[%s13144_s16 + $0xf0] sm:$0xff] }
 0x409   : > { %5323 = vrot.lane.b32.xlu1 %v5218_v40, %s12050_s20  ;;  %7607 = vmatpush.bf16.msrb.mxu1 %v11686_v41  ;;  %v9289_v17 = vunpack.c.l.b16 %v9205_v2  ;;  %v5819_v14 = vrot.slane %v5818_v43, 4  ;;  %v5828_v32 = vor.u32 %v5827_v9, %v5823_v12  ;;  %v4951_v41 = vld [vmem:[#allocation2 + $0xa4] sm:$0x1]  ;;  %v4659_v2 = vld [vmem:[%s13144_s16 + $0xf8] sm:$0xff] }
 0x40a   : > { %v14636_v31 = vpop.f32.mrf.mxu3  ;;  %v6492_v56 = vrot.slane %v6490_v7, 4  ;;  %v6318_v44 = vpop.f32.mrf.mxu2  ;;  %v6491_v5 = vsel %vm12509_vm5, %v11159_v11, %v6490_v7  ;;  %v4952_v33 = vsel %vm13712_vm13, 0, %v4951_v41 }
 0x40b   : > { %16168 = vst [vmem:[#allocation85_spill] sm:$0xff] %v14636_v31  ;;  %v14638_v53 = vpack.c.b16 %v9290_v24, %v9289_v17  ;;  %v5824_v43 = vsel %vm12201_vm2, %v5819_v14, %v5823_v12  ;;  %v5829_v9 = vrot.slane %v5828_v32, 4  ;;  %v6550_v7 = vunpack.c.l.b16 %v6491_v5 }
 0x40c   : > { %v5304_v59 = vpop.permute.xlu0 %5303  ;;  %v5306_v36 = vpop.permute.xlu1 %5305  ;;  %4953 = vst [vmem:[#allocation2 + $0xa4] sm:$0x1] %v4952_v33 }
 0x40d   : > { %16169 = vst [vmem:[#allocation86_spill] sm:$0xff] %v14638_v53  ;;  %v5461_v63 = vsel %vm13734_vm15, %v5304_v59, %v5460_v62  ;;  %v14644_v6 = vpop.f32.mrf.mxu0  ;;  %v5542_v50 = vld [vmem:[#allocation2 + $0x8c] sm:$0x1] }
 0x40e   : > { %5463 = vst.msk [vmem:[#allocation2 + $0x94] sm:$0xf] %vm4852_vm11, %v5306_v36  ;;  %v6493_v40 = vrot.slane %v5542_v50, 5  ;;  %v5831_v13 = vshll.u32 %v5542_v50, 16 }
 0x40f   : > { %16170 = vst [vmem:[#allocation87_spill] sm:$0xff] %v14644_v6  ;;  %4752 = vrot.lane.b32.xlu0 %v4658_v30, %s12049_s17 }
 0x410   : > { %5462 = vst [vmem:[#allocation2 + $0x90] sm:$0xf] %v5461_v63  ;;  %v6494_v16 = vsel %vm12509_vm5, %v6492_v56, %v6493_v40  ;;  %v5833_v62 = vrot.slane %v5831_v13, 5  ;;  %v5958_v63 = vunpack.c.l.b16 %v5824_v43  ;;  %v5543_v40 = vld [vmem:[#allocation2 + $0x98] sm:$0x1] }
 0x411   : > { %4754 = vrot.lane.b32.xlu1 %v4659_v2, %s12049_s17  ;;  %v6551_v11 = vunpack.c.l.b16 %v6494_v16  ;;  %s10098_s17 = scalar_lea.hbm %s15882_s6, %s11712_s15 }
 0x412   : > { %v5834_v17 = vsel %vm12201_vm2, %v5829_v9, %v5833_v62  ;;  %s10101_s26 = sshll.u32 %s10098_s17, 4  ;;  %s10102_s26 = int_to_ptr.hbm [resolvable:$true] %s10101_s26 }
 0x413   : > { %v6089_v24 = vpop.f32.mrf.mxu1  ;;  %v6571_v36 = vpack.c.b16 %v6551_v11, %v6550_v7  ;;  %v5959_v30 = vunpack.c.l.b16 %v5834_v17  ;;  %v14661_v11 = vpop.f32.mrf.mxu2  ;;  %s11999_s28 = sshra.s32 %s10102_s26, 4  ;;  %s12000_s28 = int_to_ptr.hbm [resolvable:$true] %s11999_s28 }
 0x414   : > { %v6319_v50 = vadd.f32 %v6318_v44, %v6089_v24  ;;  %v5855_v44 = vshll.u32 %v5543_v40, 16  ;;  %16171 = vst [vmem:[#allocation88_spill] sm:$0xff] %v14661_v11  ;;  %v8455_v11 = vld [vmem:[#allocation2 + $0x7c] sm:$0xf]  ;;  %s12001_s10 = scalar_lea.hbm %s12000_s28, 256  ;;  %p12006_p0 = scmp.lt.s32.totalorder %s12000_s28, %s15882_s6 }
 0x415   : > { %v6680_v59 = vpop.f32.mrf.mxu3  ;;  %v5520_v56 = vld [vmem:[#allocation2 + $0x94] sm:$0xf]  ;;  %11187 = vmatmul.msk.bf16.gmra.mxu3 %vm5996_vm14, %v6571_v36  ;;  %v5979_v12 = vpack.c.b16 %v5959_v30, %v5958_v63  ;;  %v6978_v14 = vpop.f32.mrf.mxu0  ;;  %p12002_p11 = scmp.ne.s32.totalorder %s12000_s28, %s12001_s10 }
 0x416   : > { %v6497_v5 = vrot.slane %v5520_v56, 5  ;;  %v5845_v33 = vshll.u32 %v5520_v56, 16  ;;  %v6739_v2 = vadd.f32 %v6680_v59, %v6319_v50  ;;  %v5849_v9 = vshrl.u32 %v5520_v56, 16 }
 0x417   : > { %v11658_v32 = vld [vmem:[#allocation2 + $0x90] sm:$0xff]  ;;  %11055 = vmatmul.msk.bf16.gmra.mxu1 %vm5996_vm14, %v5979_v12  ;;  %v6500_v50 = vrot.slane %v5543_v40, 5  ;;  %v4902_v40 = vsel %vm13637_vm10, 0, %v4901_v58  ;;  %v4904_v58 = vld [vmem:[#allocation2 + $0xa8] sm:$0x1]  ;;  %p12003_p12 = pnand %p12002_p11, %p12128_p5 }
 0x418   : > { %v11679_v13 = vld [vmem:[#allocation2 + $0x90] sm:$0xff]  ;;  %v5847_v7 = vrot.slane %v5845_v33, 5  ;;  %v14663_v17 = vadd.f32 %v6978_v14, %v6739_v2  ;;  %11144 = vmatmul.msk.bf16.gmra.mxu2 %vm5996_vm14, %v11658_v32  ;;  %v6499_v36 = vrot.slane %v6497_v5, 4  ;;  %v5851_v63 = vrot.slane %v5849_v9, 4  ;;  %4903 = vst [vmem:[#allocation2 + $0x9c] sm:$0x1] %v4902_v40 }
 0x419   : > { %v6375_v41 = vld [vmem:[#allocation2 + $0x90] sm:$0xe]  ;;  %11279 = vmatmul.msk.bf16.gmra.mxu0 %vm5996_vm14, %v11679_v13  ;;  %v5857_v13 = vrot.slane %v5855_v44, 5  ;;  %p12004_p13 = pneg %p12003_p12 }
 0x41a   : > { %v5519_v16 = vld [vmem:[#allocation2 + $0x90] sm:$0xf]  ;;  %v11160_v24 = vrot.slane %v6375_v41, 9  ;;  %v5852_v56 = vor.u32 %v5851_v63, %v5847_v7  ;;  %v6501_v32 = vsel %vm12509_vm5, %v6499_v36, %v6500_v50 }
 0x41b   : > { %v5836_v62 = vshrl.u32 %v5519_v16, 16  ;;  %v5839_v43 = vshll.u32 %v5519_v16, 16  ;;  %v14667_v12 = vpop.f32.mrf.mxu1 }
 0x41c   : > { %16172 = vst [vmem:[#allocation89_spill] sm:$0xff] %v14667_v12  ;;  %v6498_v14 = vsel %vm12509_vm5, %v11160_v24, %v6497_v5  ;;  %v5853_v2 = vrot.slane %v5852_v56, 4 }
 0x41d   : > { %v5838_v59 = vrot.slane %v5836_v62, 4  ;;  %v5841_v30 = vrot.slane %v5839_v43, 5  ;;  %v14669_v16 = vpop.f32.mrf.mxu3  ;;  %v6552_v62 = vunpack.c.l.b16 %v6498_v14  ;;  %v6553_v43 = vunpack.c.l.b16 %v6501_v32  ;;  %v8452_v32 = vld [vmem:[#allocation2 + $0x70] sm:$0xf] }
 0x41e   : > { %16173 = vst [vmem:[#allocation90_spill] sm:$0xff] %v14669_v16  ;;  %v5858_v9 = vsel %vm12201_vm2, %v5853_v2, %v5857_v13  ;;  %v4905_v14 = vsel %vm13637_vm10, 0, %v4904_v58  ;;  %v8453_v2 = vld [vmem:[#allocation2 + $0x74] sm:$0x1]  ;;  %v9211_v13 = vrot.slane %v8452_v32, 5 }
 0x41f   : > { %v5842_v33 = vor.u32 %v5841_v30, %v5838_v59  ;;  %v5961_v24 = vunpack.c.l.b16 %v5858_v9  ;;  %v6323_v59 = vpop.f32.mrf.mxu2  ;;  %v6572_v44 = vpack.c.b16 %v6553_v43, %v6552_v62  ;;  %4906 = vst [vmem:[#allocation2 + $0xa8] sm:$0x1] %v4905_v14  ;;  %v9103_v9 = vld [vmem:[#allocation2 + $0x6c] sm:$0xe]  ;;  %v4954_v62 = vld [vmem:[#allocation2 + $0xb0] sm:$0x1] }
 0x420   : > { %v9213_v43 = vrot.slane %v9211_v13, 4  ;;  %v5467_v58 = vld [vmem:[#allocation2 + $0x9c] sm:$0xf] }
 0x421   : > { %v5843_v41 = vrot.slane %v5842_v33, 4 }
 0x423   : > { %v5848_v63 = vsel %vm12201_vm2, %v5843_v41, %v5847_v7  ;;  %v6094_v36 = vpop.f32.mrf.mxu1  ;;  %v5471_v7 = vld [vmem:[#allocation2 + $0xa4] sm:$0x1] }
 0x424   : > { %v5960_v5 = vunpack.c.l.b16 %v5848_v63  ;;  %v6324_v50 = vadd.f32 %v6323_v59, %v6094_v36  ;;  %v9214_v63 = vrot.slane %v8453_v2, 5  ;;  %v14699_v2 = vpop.f32.mrf.mxu0 }
 0x425   : > { %v6685_v30 = vpop.f32.mrf.mxu3  ;;  %11188 = vmatmul.msk.bf16.gmra.mxu3 %vm5996_vm14, %v6572_v44  ;;  %v4957_v44 = vld [vmem:[#allocation2 + $0xbc] sm:$0x1]  ;;  %16175 = vst [vmem:[#allocation92_spill] sm:$0xff] %v14699_v2 }
 0x426   : > { %v5980_v56 = vpack.c.b16 %v5961_v24, %v5960_v5  ;;  %v6741_v33 = vadd.f32 %v6685_v30, %v6324_v50  ;;  %v4955_v5 = vsel %vm13712_vm13, 0, %v4954_v62  ;;  %v11483_v24 = vrot.slane %v9103_v9, 9  ;;  %v16176_v9 = vld [vmem:[#allocation7_spill] sm:$0xff] }
 0x427   : > { %4956 = vst [vmem:[#allocation2 + $0xb0] sm:$0x1] %v4955_v5  ;;  %v9215_v59 = vsel %vm12509_vm5, %v9213_v43, %v9214_v63 }
 0x428   : > { %11056 = vmatmul.msk.bf16.gmra.mxu1 %vm5996_vm14, %v5980_v56  ;;  %v9212_v36 = vsel %vm12509_vm5, %v11483_v24, %v9211_v13  ;;  %v9292_v30 = vunpack.c.l.b16 %v9215_v59  ;;  %v4958_v56 = vsel %vm13712_vm13, 0, %v4957_v44  ;;  %v3008_v13 = vadd.f32 %v14090_v48, %v16176_v9  ;;  %v4907_v59 = vld [vmem:[#allocation2 + $0xb4] sm:$0x1] }
 0x429   : > { %v9291_v50 = vunpack.c.l.b16 %v9212_v36  ;;  %4959 = vst [vmem:[#allocation2 + $0xbc] sm:$0x1] %v4958_v56  ;;  %v5474_v36 = vld [vmem:[#allocation2 + $0xa8] sm:$0xf]  ;;  %v14709_v56 = vpop.f32.mrf.mxu2 }
 0x42a   : > { %v3323_v5 = vadd.f32 %v14088_v49, %v3008_v13  ;;  %16177 = vst [vmem:[#allocation7_spill] sm:$0xff] %v14709_v56 }
 0x42b   : > { %v14695_v14 = vpack.c.b16 %v9292_v30, %v9291_v50  ;;  %v4908_v30 = vsel %vm13637_vm10, 0, %v4907_v59  ;;  %v14711_v48 = vpop.f32.mrf.mxu1 }
 0x42c   : > { %4909 = vst [vmem:[#allocation2 + $0xb4] sm:$0x1] %v4908_v30 }
 0x42d   : > { %16174 = vst [vmem:[#allocation91_spill] sm:$0xff] %v14695_v14 }
 0x42e   : > { %v5478_v44 = vld [vmem:[#allocation2 + $0xb0] sm:$0x1]  ;;  %16178 = vst [vmem:[#allocation93_spill] sm:$0xff] %v14711_v48 }
 0x43c   : > { %v5314_v41 = vpop.permute.xlu2 %5313 }
 0x43d   : > { %v5472_v40 = vsel %vm13637_vm10, %v5314_v41, %v5471_v7 }
 0x43e   : > { %5473 = vst [vmem:[#allocation2 + $0xa4] sm:$0x1] %v5472_v40 }
 0x446   : > { %v5310_v32 = vpop.permute.xlu0 %5309 }
 0x447   : > { %v5468_v7 = vsel %vm13734_vm15, %v5310_v32, %v5467_v58 }
 0x448   : > { %5469 = vst [vmem:[#allocation2 + $0x9c] sm:$0xf] %v5468_v7  ;;  %v4005_v7 = vadd.f32 %v14092_v61, %v3323_v5 }
 0x44a   : > { %v4431_v48 = vadd.f32 %v14157_v37, %v4005_v7  ;;  %v5485_v37 = vld [vmem:[#allocation2 + $0xbc] sm:$0x1] }
 0x44f   : > { %v5521_v41 = vld [vmem:[#allocation2 + $0x9c] sm:$0xf] }
 0x450   : > { %v5860_v43 = vshrl.u32 %v5521_v41, 16  ;;  %v5863_v63 = vshll.u32 %v5521_v41, 16  ;;  %v6376_v50 = vld [vmem:[#allocation2 + $0x9c] sm:$0xe] }
 0x452   : > { %v5862_v58 = vrot.slane %v5860_v43, 4  ;;  %v5865_v32 = vrot.slane %v5863_v63, 5 }
 0x454   : > { %v5866_v63 = vor.u32 %v5865_v32, %v5862_v58  ;;  %v11924_v58 = vld [vmem:[%s15879_s3] ss:$0 sm:$0xff] }
 0x455   : > { %v5312_v40 = vpop.permute.xlu1 %5311  ;;  %v6983_v62 = vpop.f32.mrf.mxu0 }
 0x456   : > { %5470 = vst.msk [vmem:[#allocation2 + $0xa0] sm:$0xf] %vm4852_vm11, %v5312_v40  ;;  %v14705_v24 = vadd.f32 %v6983_v62, %v6741_v33  ;;  %v14714_v33 = vpop.f32.mrf.mxu3  ;;  %v5544_v40 = vld [vmem:[#allocation2 + $0xa4] sm:$0x1]  ;;  %v11161_v62 = vrot.slane %v6376_v50, 9  ;;  %v5867_v7 = vrot.slane %v5866_v63, 4 }
 0x457   : > { %16179 = vst [vmem:[#allocation94_spill] sm:$0xff] %v14714_v33 }
 0x458   : > { %v5316_v41 = vpop.permute.xlu0 %5315 }
 0x459   : > { %v5475_v9 = vsel %vm13734_vm15, %v5316_v41, %v5474_v36  ;;  %v6507_v36 = vrot.slane %v5544_v40, 5  ;;  %v5879_v41 = vshll.u32 %v5544_v40, 16  ;;  %v14733_v40 = vadd.f32 %v11924_v58, %v4431_v48 }
 0x45a   : > { %v5320_v49 = vpop.permute.xlu2 %5319  ;;  %5476 = vst [vmem:[#allocation2 + $0xa8] sm:$0xf] %v5475_v9 }
 0x45b   : > { %v5479_v13 = vsel %vm13637_vm10, %v5320_v49, %v5478_v44  ;;  %16181 = vst [vmem:[#allocation96_spill] sm:$0xff] %v14733_v40  ;;  %v5881_v16 = vrot.slane %v5879_v41, 5  ;;  %v9218_v41 = vrot.slane %v8455_v11, 5 }
 0x45c   : > { %5480 = vst [vmem:[#allocation2 + $0xb0] sm:$0x1] %v5479_v13 }
 0x45d   : > { %v11659_v59 = vld [vmem:[#allocation2 + $0x9c] sm:$0xff] }
 0x45e   : > { %v11680_v30 = vld [vmem:[#allocation2 + $0x9c] sm:$0xff]  ;;  %11145 = vmatmul.msk.bf16.gmra.mxu2 %vm5996_vm14, %v11659_v59  ;;  %v6328_v59 = vpop.f32.mrf.mxu2 }
 0x45f   : > { %v5522_v56 = vld [vmem:[#allocation2 + $0xa0] sm:$0xf]  ;;  %11280 = vmatmul.msk.bf16.gmra.mxu0 %vm5996_vm14, %v11680_v30 }
 0x460   : > { %v6504_v43 = vrot.slane %v5522_v56, 5  ;;  %v5869_v61 = vshll.u32 %v5522_v56, 16  ;;  %v5873_v5 = vshrl.u32 %v5522_v56, 16  ;;  %v14729_v56 = vadd.f32 %v11924_v58, %v14081_v22 }
 0x462   : > { %v6505_v44 = vsel %vm12509_vm5, %v11161_v62, %v6504_v43  ;;  %v6506_v50 = vrot.slane %v6504_v43, 4  ;;  %v5871_v49 = vrot.slane %v5869_v61, 5  ;;  %v5875_v9 = vrot.slane %v5873_v5, 4  ;;  %16180 = vst [vmem:[#allocation95_spill] sm:$0xff] %v14729_v56  ;;  %v5326_v5 = vpop.permute.xlu2 %5325 }
 0x463   : > { %v6099_v62 = vpop.f32.mrf.mxu1  ;;  %v6554_v30 = vunpack.c.l.b16 %v6505_v44  ;;  %v4498_v48 = vsub.f32 0.0, %v14729_v56  ;;  %v9106_v56 = vld [vmem:[#allocation2 + $0x90] sm:$0xe] }
 0x464   : > { %v6508_v32 = vsel %vm12509_vm5, %v6506_v50, %v6507_v36  ;;  %v5876_v13 = vor.u32 %v5875_v9, %v5871_v49  ;;  %v6329_v61 = vadd.f32 %v6328_v59, %v6099_v62  ;;  %v5872_v2 = vsel %vm12201_vm2, %v5867_v7, %v5871_v49  ;;  %v8456_v7 = vld [vmem:[#allocation2 + $0x80] sm:$0x1] }
 0x465   : > { %v6555_v43 = vunpack.c.l.b16 %v6508_v32  ;;  %v6690_v33 = vpop.f32.mrf.mxu3  ;;  %v5486_v36 = vsel %vm13637_vm10, %v5326_v5, %v5485_v37  ;;  %v4499_v9 = vsub.f32 0.0, %v14733_v40  ;;  %v5962_v58 = vunpack.c.l.b16 %v5872_v2  ;;  %v9104_v32 = vld [vmem:[#allocation2 + $0x78] sm:$0xe]  ;;  %v9105_v2 = vld [vmem:[#allocation2 + $0x84] sm:$0xe]  ;;  %v14749_v5 = vpop.f32.mrf.mxu0 }
 0x466   : > { %v5877_v22 = vrot.slane %v5876_v13, 4  ;;  %5487 = vst [vmem:[#allocation2 + $0xbc] sm:$0x1] %v5486_v36  ;;  %v6743_v50 = vadd.f32 %v6690_v33, %v6329_v61  ;;  %v4560_v59 = vmul.f32 1.442695, %v4498_v48  ;;  %v11484_v37 = vrot.slane %v9104_v32, 9 }
 0x467   : > { %v6573_v63 = vpack.c.b16 %v6555_v43, %v6554_v30  ;;  %v4562_v62 = vmul.f32 1.442695, %v4499_v9  ;;  %v9220_v30 = vrot.slane %v9218_v41, 4  ;;  %v9221_v33 = vrot.slane %v8456_v7, 5  ;;  %v8458_v43 = vld [vmem:[#allocation2 + $0x88] sm:$0xf] }
 0x468   : > { %v5882_v44 = vsel %vm12201_vm2, %v5877_v22, %v5881_v16  ;;  %v9219_v16 = vsel %vm12509_vm5, %v11484_v37, %v9218_v41  ;;  %11897 = vpow2.f32 %v4560_v59  ;;  %16182 = vst [vmem:[#allocation97_spill] sm:$0xff] %v14749_v5  ;;  %v9225_v36 = vrot.slane %v8458_v43, 5  ;;  %v5523_v9 = vld [vmem:[#allocation2 + $0xa8] sm:$0xf]  ;;  %v14755_v59 = vpop.f32.mrf.mxu2  ;;  %v11689_v43 = vld [vmem:[%s15880_s4 + $0x58] sm:$0xff] }
 0x469   : > { %11189 = vmatmul.msk.bf16.gmra.mxu3 %vm5996_vm14, %v6573_v63  ;;  %v5963_v49 = vunpack.c.l.b16 %v5882_v44  ;;  %v9222_v61 = vsel %vm12509_vm5, %v9220_v30, %v9221_v33  ;;  %11899 = vpow2.f32 %v4562_v62  ;;  %v9293_v11 = vunpack.c.l.b16 %v9219_v16  ;;  %v8459_v63 = vld [vmem:[#allocation2 + $0x8c] sm:$0x1]  ;;  %16184 = vst [vmem:[#allocation99_spill] sm:$0xff] %v14755_v59  ;;  %8016 = vmatpush.bf16.msra.mxu2 %v11689_v43 }
 0x46a   : > { %v9294_v22 = vunpack.c.l.b16 %v9222_v61  ;;  %v11485_v48 = vrot.slane %v9105_v2, 9  ;;  %v9228_v32 = vrot.slane %v8459_v63, 5  ;;  %v5884_v30 = vshrl.u32 %v5523_v9, 16  ;;  %v5481_v63 = vld [vmem:[#allocation2 + $0xb4] sm:$0xf] }
 0x46b   : > { %v5981_v13 = vpack.c.b16 %v5963_v49, %v5962_v58  ;;  %v9227_v49 = vrot.slane %v9225_v36, 4  ;;  %v5887_v33 = vshll.u32 %v5523_v9, 16  ;;  %v14767_v5 = vpop.f32.mrf.mxu1 }
 0x46c   : > { %v14751_v44 = vpack.c.b16 %v9294_v22, %v9293_v11  ;;  %v9226_v58 = vsel %vm12509_vm5, %v11485_v48, %v9225_v36  ;;  %v8461_v22 = vld [vmem:[#allocation2 + $0x94] sm:$0xf]  ;;  %v6377_v48 = vld [vmem:[#allocation2 + $0xa8] sm:$0xe]  ;;  %v5886_v40 = vrot.slane %v5884_v30, 4  ;;  %16186 = vst [vmem:[#allocation101_spill] sm:$0xff] %v14767_v5 }
 0x46d   : > { %11057 = vmatmul.msk.bf16.gmra.mxu1 %vm5996_vm14, %v5981_v13  ;;  %v9229_v37 = vsel %vm12509_vm5, %v9227_v49, %v9228_v32  ;;  %v9295_v16 = vunpack.c.l.b16 %v9226_v58  ;;  %v5545_v49 = vld [vmem:[#allocation2 + $0xb0] sm:$0x1]  ;;  %v5889_v9 = vrot.slane %v5887_v33, 5  ;;  %v9232_v59 = vrot.slane %v8461_v22, 5 }
 0x46e   : > { %16183 = vst [vmem:[#allocation98_spill] sm:$0xff] %v14751_v44  ;;  %v11898_v41 = vpop.eup %11897  ;;  %v9296_v61 = vunpack.c.l.b16 %v9229_v37  ;;  %v11162_v58 = vrot.slane %v6377_v48, 9  ;;  %v11486_v37 = vrot.slane %v9106_v56, 9  ;;  %v6514_v22 = vrot.slane %v5545_v49, 5 }
 0x46f   : > { %v11900_v13 = vpop.eup %11899  ;;  %v4594_v2 = vadd.f32 1.0, %v11898_v41  ;;  %v11688_v41 = vld [vmem:[%s15880_s4 + $0x50] sm:$0xff]  ;;  %v5890_v56 = vor.u32 %v5889_v9, %v5886_v40 }
 0x470   : > { %v4595_v36 = vadd.f32 1.0, %v11900_v13  ;;  %v8462_v13 = vld [vmem:[#allocation2 + $0x98] sm:$0x1]  ;;  %8017 = vmatpush.bf16.msra.mxu2 %v11688_v41 }
 0x471   : > { %11901 = vrcp.f32 %v4594_v2 }
 0x472   : > { %11903 = vrcp.f32 %v4595_v36  ;;  %v11707_v36 = vld [vmem:[%s15880_s4 + $0x68] sm:$0xff] }
 0x473   : > { %v5318_v7 = vpop.permute.xlu1 %5317  ;;  %8315 = vmatpush.bf16.msra.mxu3 %v11707_v36 }
 0x474   : > { %5477 = vst.msk [vmem:[#allocation2 + $0xac] sm:$0xf] %vm4852_vm11, %v5318_v7  ;;  %v14765_v7 = vpack.c.b16 %v9296_v61, %v9295_v16 }
 0x475   : > { %v6988_v62 = vpop.f32.mrf.mxu0 }
 0x476   : > { %v14763_v11 = vadd.f32 %v6988_v62, %v6743_v50  ;;  %16185 = vst [vmem:[#allocation100_spill] sm:$0xff] %v14765_v7  ;;  %v14774_v62 = vpop.f32.mrf.mxu3 }
 0x477   : > { %16187 = vst [vmem:[#allocation102_spill] sm:$0xff] %v14774_v62  ;;  %v9235_v62 = vrot.slane %v8462_v13, 5  ;;  %v14790_v9 = vpop.eup %11901 }
 0x478   : > { %16189 = vst [vmem:[#allocation104_spill] sm:$0xff] %v14790_v9 }
 0x479   : > { %v5322_v32 = vpop.permute.xlu0 %5321 }
 0x47a   : > { %v5482_v50 = vsel %vm13734_vm15, %v5322_v32, %v5481_v63  ;;  %v6333_v61 = vpop.f32.mrf.mxu2 }
 0x47b   : > { %5483 = vst [vmem:[#allocation2 + $0xb4] sm:$0xf] %v5482_v50  ;;  %v5324_v30 = vpop.permute.xlu1 %5323  ;;  %v11660_v33 = vld [vmem:[#allocation2 + $0xa8] sm:$0xff]  ;;  %v9233_v50 = vsel %vm12509_vm5, %v11486_v37, %v9232_v59 }
 0x47c   : > { %v11681_v43 = vld [vmem:[#allocation2 + $0xa8] sm:$0xff]  ;;  %5484 = vst.msk [vmem:[#allocation2 + $0xb8] sm:$0xf] %vm4852_vm11, %v5324_v30  ;;  %11146 = vmatmul.msk.bf16.gmra.mxu2 %vm5996_vm14, %v11660_v33  ;;  %v9234_v30 = vrot.slane %v9232_v59, 4  ;;  %v14794_v59 = vpop.eup %11903 }
 0x47d   : > { %v5524_v16 = vld [vmem:[#allocation2 + $0xac] sm:$0xf]  ;;  %v14777_v32 = vpop.f32.mrf.mxu0  ;;  %11281 = vmatmul.msk.bf16.gmra.mxu0 %vm5996_vm14, %v11681_v43  ;;  %v9297_v43 = vunpack.c.l.b16 %v9233_v50  ;;  %16190 = vst [vmem:[#allocation105_spill] sm:$0xff] %v14794_v59 }
 0x47e   : > { %v6511_v2 = vrot.slane %v5524_v16, 5  ;;  %v5893_v63 = vshll.u32 %v5524_v16, 16  ;;  %v5897_v48 = vshrl.u32 %v5524_v16, 16  ;;  %16188 = vst [vmem:[#allocation103_spill] sm:$0xff] %v14777_v32  ;;  %v5903_v32 = vshll.u32 %v5545_v49, 16  ;;  %v11706_v49 = vld [vmem:[%s15880_s4 + $0x60] sm:$0xff] }
 0x47f   : > { %v9236_v40 = vsel %vm12509_vm5, %v9234_v30, %v9235_v62  ;;  %8316 = vmatpush.bf16.msra.mxu3 %v11706_v49 }
 0x480   : > { %v6512_v16 = vsel %vm12509_vm5, %v11162_v58, %v6511_v2  ;;  %v6513_v41 = vrot.slane %v6511_v2, 4  ;;  %v5895_v5 = vrot.slane %v5893_v63, 5  ;;  %v5899_v12 = vrot.slane %v5897_v48, 4 }
 0x481   : > { %v9298_v37 = vunpack.c.l.b16 %v9236_v40  ;;  %v4753_v13 = vpop.permute.xlu0 %4752  ;;  %v6556_v6 = vunpack.c.l.b16 %v6512_v16  ;;  %v5891_v2 = vrot.slane %v5890_v56, 4  ;;  %v5905_v36 = vrot.slane %v5903_v32, 5 }
 0x482   : > { %v6515_v33 = vsel %vm12509_vm5, %v6513_v41, %v6514_v22  ;;  %v5900_v63 = vor.u32 %v5899_v12, %v5895_v5  ;;  %v4818_v62 = vmul.f32 %v14790_v9, %v4753_v13  ;;  %v5525_v30 = vld [vmem:[#allocation2 + $0xb4] sm:$0xf] }
 0x483   : > { %v6557_v58 = vunpack.c.l.b16 %v6515_v33  ;;  %v6104_v48 = vpop.f32.mrf.mxu1  ;;  %v14800_v31 = vpack.c.b16 %v9298_v37, %v9297_v43  ;;  %v5896_v16 = vsel %vm12201_vm2, %v5891_v2, %v5895_v5  ;;  %v5526_v56 = vld [vmem:[#allocation2 + $0xb8] sm:$0xf]  ;;  %v4755_v33 = vpop.permute.xlu1 %4754  ;;  %v5908_v34 = vshrl.u32 %v5525_v30, 16 }
 0x484   : > { %v6334_v22 = vadd.f32 %v6333_v61, %v6104_v48  ;;  %v5901_v40 = vrot.slane %v5900_v63, 4  ;;  %v4850_v12 = vpack.c.bf16 %v4818_v62, %v4818_v62  ;;  %v6518_v21 = vrot.slane %v5526_v56, 5  ;;  %v11709_v5 = vld [vmem:[%s15880_s4 + $0x78] sm:$0xff]  ;;  %v14811_v37 = vpop.f32.mrf.mxu2 }
 0x485   : > { %16191 = vst [vmem:[#allocation106_spill] sm:$0xff] %v14800_v31  ;;  %v6695_v50 = vpop.f32.mrf.mxu3  ;;  %v6574_v41 = vpack.c.b16 %v6557_v58, %v6556_v6  ;;  %v5911_v7 = vshll.u32 %v5525_v30, 16  ;;  %v4819_v32 = vmul.f32 %v14794_v59, %v4755_v33  ;;  %v6993_v43 = vpop.f32.mrf.mxu0  ;;  %v5964_v13 = vunpack.c.l.b16 %v5896_v16  ;;  %v5546_v62 = vld [vmem:[#allocation2 + $0xbc] sm:$0x1]  ;;  %v6378_v30 = vld [vmem:[#allocation2 + $0xb4] sm:$0xe]  ;;  %8981 = vmatpush.bf16.msra.mxu0 %v11709_v5 }
 0x486   : > { %v6745_v44 = vadd.f32 %v6695_v50, %v6334_v22  ;;  %v5906_v6 = vsel %vm12201_vm2, %v5901_v40, %v5905_v36  ;;  %v5221_v61 = vshrl.u32 %v4850_v12, 16  ;;  %16192 = vst [vmem:[#allocation107_spill] sm:$0xff] %v14811_v37  ;;  %v5917_v2 = vshll.u32 %v5526_v56, 16  ;;  %v7056_v59 = vld [vmem:[#allocation2 + $0x10] sm:$0xf]  ;;  %v11682_v5 = vld [vmem:[#allocation2 + $0xb4] sm:$0xff] }
 0x487   : > { %11190 = vmatmul.msk.bf16.gmra.mxu3 %vm5996_vm14, %v6574_v41  ;;  %v5965_v58 = vunpack.c.l.b16 %v5906_v6  ;;  %v5224_v63 = vshll.u32 %v4850_v12, 16  ;;  %v4851_v49 = vpack.c.bf16 %v4819_v32, %v4819_v32  ;;  %v6520_v22 = vrot.slane %v6518_v21, 4 }
 0x488   : > { %v14813_v48 = vadd.f32 %v6993_v43, %v6745_v44  ;;  %v5223_v50 = vrot.slane %v5221_v61, 7  ;;  %v5910_v41 = vrot.slane %v5908_v34, 4  ;;  %v5913_v40 = vrot.slane %v5911_v7, 5  ;;  %v11711_v44 = vld [vmem:[%s15880_s4 + $0x88] sm:$0xff]  ;;  %v11661_v43 = vld [vmem:[#allocation2 + $0xb4] sm:$0xff] }
 0x489   : > { %v5982_v36 = vpack.c.b16 %v5965_v58, %v5964_v13  ;;  %v5229_v33 = vshrl.u32 %v4851_v49, 16  ;;  %v11163_v16 = vrot.slane %v6378_v30, 9  ;;  %v6521_v6 = vrot.slane %v5546_v62, 5  ;;  %9391 = vmatpush.bf16.msra.mxu1 %v11711_v44 }
 0x48a   : > { %v5226_v9 = vor.u32 %v5224_v63, %v5223_v50  ;;  %v5914_v37 = vor.u32 %v5913_v40, %v5910_v41  ;;  %v5232_v32 = vshll.u32 %v4851_v49, 16  ;;  %v5919_v61 = vrot.slane %v5917_v2, 5  ;;  %v7721_v40 = vld [vmem:[#allocation2 + $0xc] sm:$0xe] }
 0x48b   : > { %11058 = vmatmul.msk.bf16.gmra.mxu1 %vm5996_vm14, %v5982_v36  ;;  %v5231_v12 = vrot.slane %v5229_v33, 7  ;;  %v5921_v13 = vshrl.u32 %v5526_v56, 16  ;;  %v5227_v34 = vrot.slane %v5223_v50, 4  ;;  %v14819_v7 = vpop.f32.mrf.mxu1  ;;  %v6522_v58 = vsel %vm12509_vm5, %v6520_v22, %v6521_v6  ;;  %v7057_v50 = vld [vmem:[#allocation2 + $0x14] sm:$0x1] }
 0x48c   : > { %16193 = vst [vmem:[#allocation108_spill] sm:$0xff] %v14819_v7  ;;  %5327 = vrot.lane.b32.xlu2 %v5226_v9, %s12050_s20  ;;  %v5927_v63 = vshll.u32 %v5546_v62, 16  ;;  %v7787_v30 = vrot.slane %v7056_v59, 5  ;;  %11147 = vmatmul.msk.bf16.gmra.mxu2 %vm5996_vm14, %v11661_v43  ;;  %v5915_v41 = vrot.slane %v5914_v37, 4  ;;  %v6519_v56 = vsel %vm12509_vm5, %v11163_v16, %v6518_v21  ;;  %v6338_v6 = vpop.f32.mrf.mxu2  ;;  %v7055_v37 = vld [vmem:[#allocation2 + $0xc] sm:$0xf] }
 0x48d   : > { %v5234_v36 = vor.u32 %v5232_v32, %v5231_v12  ;;  %11282 = vmatmul.msk.bf16.gmra.mxu0 %vm5996_vm14, %v11682_v5  ;;  %v5236_v49 = vrot.slane %v5231_v12, 4  ;;  %v5923_v2 = vrot.slane %v5921_v13, 4  ;;  %v6559_v22 = vunpack.c.l.b16 %v6522_v58  ;;  %v14831_v33 = vpop.f32.mrf.mxu3  ;;  %v7059_v7 = vld [vmem:[#allocation2 + $0x1c] sm:$0xf] }
 0x48e   : > { %16194 = vst [vmem:[#allocation109_spill] sm:$0xff] %v14831_v33  ;;  %v7789_v44 = vrot.slane %v7787_v30, 4  ;;  %v7113_v12 = vshll.u32 %v7056_v59, 16  ;;  %v7117_v32 = vshrl.u32 %v7056_v59, 16  ;;  %v6558_v43 = vunpack.c.l.b16 %v6519_v56 }
 0x48f   : > { %5331 = vrot.lane.b32.xlu1 %v5236_v49, %s12050_s20  ;;  %v5235_v9 = vsel %vm13485_vm8, %v5227_v34, %v5234_v36  ;;  %v5924_v62 = vor.u32 %v5923_v2, %v5919_v61  ;;  %v5920_v21 = vsel %vm12201_vm2, %v5915_v41, %v5919_v61  ;;  %v5929_v47 = vrot.slane %v5927_v63, 5 }
 0x490   : > { %5329 = vrot.lane.b32.xlu0 %v5235_v9, %s12050_s20  ;;  %v7790_v5 = vrot.slane %v7057_v50, 5  ;;  %v6575_v13 = vpack.c.b16 %v6559_v22, %v6558_v43  ;;  %v11312_v58 = vrot.slane %v7721_v40, 9  ;;  %v7104_v36 = vshrl.u32 %v7055_v37, 16  ;;  %s10099_s20 = sshll.u32 %s15637_s14, 4  ;;  %s10100_s20 = int_to_ptr.vmem [resolvable:$true] %s10099_s20 }
 0x491   : > { %v5925_v16 = vrot.slane %v5924_v62, 4  ;;  %v5966_v2 = vunpack.c.l.b16 %v5920_v21  ;;  %v7107_v59 = vshll.u32 %v7055_v37, 16  ;;  %v7115_v61 = vrot.slane %v7113_v12, 5  ;;  %v7060_v12 = vld [vmem:[#allocation2 + $0x20] sm:$0x1] }
 0x492   : > { %v7791_v33 = vsel %vm12509_vm5, %v7789_v44, %v7790_v5  ;;  %v7119_v41 = vrot.slane %v7117_v32, 4  ;;  %v7788_v63 = vsel %vm12509_vm5, %v11312_v58, %v7787_v30  ;;  %v7106_v40 = vrot.slane %v7104_v36, 4  ;;  %v7722_v36 = vld [vmem:[#allocation2 + $0x18] sm:$0xe] }
 0x493   : > { %v5930_v34 = vsel %vm12201_vm2, %v5925_v16, %v5929_v47  ;;  %v7903_v22 = vunpack.c.l.b16 %v7791_v33  ;;  %v7109_v16 = vrot.slane %v7107_v59, 5  ;;  %v7902_v21 = vunpack.c.l.b16 %v7788_v63  ;;  %v7058_v59 = vld [vmem:[#allocation2 + $0x18] sm:$0xf] }
 0x494   : > { %v6109_v49 = vpop.f32.mrf.mxu1  ;;  %v5967_v9 = vunpack.c.l.b16 %v5930_v34  ;;  %v7120_v34 = vor.u32 %v7119_v41, %v7115_v61  ;;  %v14845_v44 = vpop.f32.mrf.mxu2  ;;  %v7123_v37 = vshll.u32 %v7057_v50, 16  ;;  %v7794_v33 = vrot.slane %v7059_v7, 5 }
 0x495   : > { %v6339_v56 = vadd.f32 %v6338_v6, %v6109_v49  ;;  %16195 = vst [vmem:[#allocation110_spill] sm:$0xff] %v14845_v44  ;;  %v7934_v6 = vpack.c.b16 %v7903_v22, %v7902_v21  ;;  %v7110_v30 = vor.u32 %v7109_v16, %v7106_v40  ;;  %v11313_v41 = vrot.slane %v7722_v36, 9  ;;  %v11690_v22 = vld [vmem:[#allocation2 + $0x18] sm:$0xff] }
 0x496   : > { %v5983_v62 = vpack.c.b16 %v5967_v9, %v5966_v2  ;;  %v7121_v5 = vrot.slane %v7120_v34, 4  ;;  %v7125_v58 = vrot.slane %v7123_v37, 5  ;;  %v7796_v9 = vrot.slane %v7794_v33, 4 }
 0x497   : > { %11191 = vmatmul.msk.bf16.gmra.mxu3 %vm5996_vm14, %v6575_v13  ;;  %v7797_v13 = vrot.slane %v7060_v12, 5  ;;  %v7111_v2 = vrot.slane %v7110_v30, 4  ;;  %v7137_v40 = vshll.u32 %v7059_v7, 16  ;;  %v7141_v16 = vshrl.u32 %v7059_v7, 16 }
 0x498   : > { %v6700_v43 = vpop.f32.mrf.mxu3  ;;  %v7147_v44 = vshll.u32 %v7060_v12, 16  ;;  %v7723_v12 = vld [vmem:[#allocation2 + $0x24] sm:$0xe] }
 0x499   : > { %v14843_v47 = vadd.f32 %v6700_v43, %v6339_v56  ;;  %v7126_v56 = vsel %vm12201_vm2, %v7121_v5, %v7125_v58  ;;  %v7116_v50 = vsel %vm12201_vm2, %v7111_v2, %v7115_v61  ;;  %v7798_v63 = vsel %vm12509_vm5, %v7796_v9, %v7797_v13 }
 0x49a   : > { %v7131_v43 = vshll.u32 %v7058_v59, 16  ;;  %v7492_v30 = vunpack.c.l.b16 %v7116_v50  ;;  %v7795_v5 = vsel %vm12509_vm5, %v11313_v41, %v7794_v33  ;;  %v7905_v61 = vunpack.c.l.b16 %v7798_v63 }
 0x49b   : > { %11059 = vmatmul.msk.bf16.gmra.mxu1 %vm5996_vm14, %v5983_v62  ;;  %v7128_v62 = vshrl.u32 %v7058_v59, 16  ;;  %v7139_v2 = vrot.slane %v7137_v40, 5  ;;  %v7143_v13 = vrot.slane %v7141_v16, 4  ;;  %v7904_v7 = vunpack.c.l.b16 %v7795_v5 }
 0x49c   : > { %v14848_v32 = vpop.f32.mrf.mxu1  ;;  %11340 = vmatmul.msk.bf16.vlgmr.msra.gmra.mxu2 %vm5996_vm14, %v7934_v6  ;;  %v6343_v21 = vpop.f32.mrf.mxu2  ;;  %v7493_v6 = vunpack.c.l.b16 %v7126_v56  ;;  %v7133_v36 = vrot.slane %v7131_v43, 5  ;;  %v7149_v33 = vrot.slane %v7147_v44, 5  ;;  %v11314_v44 = vrot.slane %v7723_v12, 9 }
 0x49d   : > { %16196 = vst [vmem:[#allocation111_spill] sm:$0xff] %v14848_v32  ;;  %v7130_v58 = vrot.slane %v7128_v62, 4  ;;  %v7062_v32 = vld [vmem:[#allocation2 + $0x28] sm:$0xf]  ;;  %v7935_v56 = vpack.c.b16 %v7905_v61, %v7904_v7  ;;  %v7144_v50 = vor.u32 %v7143_v13, %v7139_v2  ;;  %v7063_v62 = vld [vmem:[#allocation2 + $0x2c] sm:$0x1] }
 0x49e   : > { %v7161_v43 = vshll.u32 %v7062_v32, 16  ;;  %v7165_v40 = vshrl.u32 %v7062_v32, 16 }
 0x49f   : > { %v7145_v63 = vrot.slane %v7144_v50, 4 }
 0x4a0   : > { %v14851_v49 = vpop.f32.mrf.mxu3  ;;  %v7163_v5 = vrot.slane %v7161_v43, 5  ;;  %v7167_v61 = vrot.slane %v7165_v40, 4  ;;  %v7065_v43 = vld [vmem:[#allocation2 + $0x34] sm:$0xf] }
 0x4a1   : > { %16197 = vst [vmem:[#allocation112_spill] sm:$0xff] %v14851_v49  ;;  %v7524_v49 = vpack.c.b16 %v7493_v6, %v7492_v30  ;;  %v7804_v6 = vrot.slane %v7063_v62, 5 }
 0x4a5   : > { %v6114_v34 = vpop.f32.mrf.mxu1 }
 0x4a6   : > { %v6344_v37 = vadd.f32 %v6343_v21, %v6114_v34  ;;  %v7801_v21 = vrot.slane %v7062_v32, 5  ;;  %v7150_v34 = vsel %vm12201_vm2, %v7145_v63, %v7149_v33  ;;  %v7171_v63 = vshll.u32 %v7063_v62, 16  ;;  %v7724_v62 = vld [vmem:[#allocation2 + $0x30] sm:$0xe] }
 0x4a7   : > { %11432 = vmatmul.msk.bf16.vlgmr.msra.gmra.mxu3 %vm5996_vm14, %v11690_v22  ;;  %v7134_v22 = vor.u32 %v7133_v36, %v7130_v58  ;;  %v7495_v58 = vunpack.c.l.b16 %v7150_v34  ;;  %v7808_v34 = vrot.slane %v7065_v43, 5 }
 0x4a8   : > { %v6705_v9 = vpop.f32.mrf.mxu3  ;;  %v7803_v16 = vrot.slane %v7801_v21, 4  ;;  %v7802_v7 = vsel %vm12509_vm5, %v11314_v44, %v7801_v21 }
 0x4a9   : > { %v14862_v59 = vadd.f32 %v6705_v9, %v6344_v37  ;;  %v7135_v41 = vrot.slane %v7134_v22, 4  ;;  %v7061_v37 = vld [vmem:[#allocation2 + $0x24] sm:$0xf]  ;;  %v7168_v22 = vor.u32 %v7167_v61, %v7163_v5  ;;  %v7906_v33 = vunpack.c.l.b16 %v7802_v7  ;;  %v8464_v61 = vld [vmem:[#allocation2 + $0xa0] sm:$0xf] }
 0x4aa   : > { %v7805_v36 = vsel %vm12509_vm5, %v7803_v16, %v7804_v6  ;;  %v7152_v32 = vshrl.u32 %v7061_v37, 16  ;;  %v7155_v13 = vshll.u32 %v7061_v37, 16  ;;  %v7173_v6 = vrot.slane %v7171_v63, 5  ;;  %v7066_v37 = vld [vmem:[#allocation2 + $0x38] sm:$0x1] }
 0x4ab   : > { %11296 = vmatmul.msk.bf16.vlgmr.msrb.gmra.mxu1 %vm5996_vm14, %v7524_v49  ;;  %v11691_v49 = vld [vmem:[#allocation2 + $0x24] sm:$0xff]  ;;  %v7140_v30 = vsel %vm12201_vm2, %v7135_v41, %v7139_v2  ;;  %v7169_v16 = vrot.slane %v7168_v22, 4  ;;  %v7810_v44 = vrot.slane %v7808_v34, 4  ;;  %v9107_v7 = vld [vmem:[#allocation2 + $0x9c] sm:$0xe]  ;;  %v11315_v63 = vrot.slane %v7724_v62, 9 }
 0x4ac   : > { %11341 = vmatmul.msk.bf16.gmra.mxu2 %vm5996_vm14, %v7935_v56  ;;  %v7494_v9 = vunpack.c.l.b16 %v7140_v30  ;;  %v7907_v56 = vunpack.c.l.b16 %v7805_v36  ;;  %v7154_v2 = vrot.slane %v7152_v32, 4  ;;  %v7157_v41 = vrot.slane %v7155_v13, 5 }
 0x4ad   : > { %v7174_v21 = vsel %vm12201_vm2, %v7169_v16, %v7173_v6  ;;  %v7185_v30 = vshll.u32 %v7065_v43, 16  ;;  %v7811_v36 = vrot.slane %v7066_v37, 5  ;;  %v7189_v32 = vshrl.u32 %v7065_v43, 16 }
 0x4ae   : > { %v7525_v50 = vpack.c.b16 %v7495_v58, %v7494_v9  ;;  %v7936_v40 = vpack.c.b16 %v7907_v56, %v7906_v33  ;;  %v7158_v12 = vor.u32 %v7157_v41, %v7154_v2  ;;  %v8465_v58 = vld [vmem:[#allocation2 + $0xa4] sm:$0x1]  ;;  %v9239_v13 = vrot.slane %v8464_v61, 5  ;;  %v7064_v56 = vld [vmem:[#allocation2 + $0x30] sm:$0xf] }
 0x4af   : > { %v11692_v33 = vld [vmem:[#allocation2 + $0x30] sm:$0xff]  ;;  %v7497_v41 = vunpack.c.l.b16 %v7174_v21  ;;  %v7812_v16 = vsel %vm12509_vm5, %v7810_v44, %v7811_v36  ;;  %v7191_v6 = vrot.slane %v7189_v32, 4  ;;  %v7179_v61 = vshll.u32 %v7064_v56, 16 }
 0x4b0   : > { %v7159_v9 = vrot.slane %v7158_v12, 4  ;;  %v9241_v22 = vrot.slane %v9239_v13, 4  ;;  %v7176_v12 = vshrl.u32 %v7064_v56, 16  ;;  %v7909_v62 = vunpack.c.l.b16 %v7812_v16  ;;  %v7067_v16 = vld [vmem:[#allocation2 + $0x3c] sm:$0xf] }
 0x4b2   : > { %v7164_v2 = vsel %vm12201_vm2, %v7159_v9, %v7163_v5  ;;  %v7809_v5 = vsel %vm12509_vm5, %v11315_v63, %v7808_v34  ;;  %v7178_v56 = vrot.slane %v7176_v12, 4  ;;  %v7195_v34 = vshll.u32 %v7066_v37, 16  ;;  %v7725_v37 = vld [vmem:[#allocation2 + $0x3c] sm:$0xe] }
 0x4b3   : > { %v7496_v31 = vunpack.c.l.b16 %v7164_v2  ;;  %v7068_v2 = vld [vmem:[#allocation2 + $0x40] sm:$0xf] }
 0x4b4   : > { %v7209_v12 = vshll.u32 %v7068_v2, 16 }
 0x4b5   : > { %v7526_v36 = vpack.c.b16 %v7497_v41, %v7496_v31  ;;  %v7197_v31 = vrot.slane %v7195_v34, 5  ;;  %v7815_v41 = vrot.slane %v7068_v2, 5 }
 0x4b7   : > { %11433 = vmatmul.msk.bf16.gmra.mxu3 %vm5996_vm14, %v11691_v49  ;;  %v14877_v49 = vpop.f32.mrf.mxu0 }
 0x4b8   : > { %16198 = vst [vmem:[#allocation113_spill] sm:$0xff] %v14877_v49  ;;  %v11487_v49 = vrot.slane %v9107_v7, 9  ;;  %v7908_v7 = vunpack.c.l.b16 %v7809_v5 }
 0x4bb   : > { %11297 = vmatmul.msk.bf16.gmra.mxu1 %vm5996_vm14, %v7525_v50  ;;  %v9242_v50 = vrot.slane %v8465_v58, 5  ;;  %v4910_v58 = vld [vmem:[#allocation2 + $0xc0] sm:$0x1] }
 0x4bc   : > { %11342 = vmatmul.msk.bf16.gmra.mxu2 %vm5996_vm14, %v7936_v40  ;;  %v7187_v40 = vrot.slane %v7185_v30, 5  ;;  %v4911_v21 = vsel %vm13637_vm10, 0, %v4910_v58  ;;  %v9240_v30 = vsel %vm12509_vm5, %v11487_v49, %v9239_v13  ;;  %v7069_v13 = vld [vmem:[#allocation2 + $0x44] sm:$0x1] }
 0x4bd   : > { %v9243_v43 = vsel %vm12509_vm5, %v9241_v22, %v9242_v50  ;;  %4912 = vst [vmem:[#allocation2 + $0xc0] sm:$0x1] %v4911_v21  ;;  %v7181_v22 = vrot.slane %v7179_v61, 5  ;;  %v9299_v50 = vunpack.c.l.b16 %v9240_v30  ;;  %v7213_v61 = vshrl.u32 %v7068_v2, 16 }
 0x4be   : > { %v9300_v44 = vunpack.c.l.b16 %v9243_v43  ;;  %v7192_v32 = vor.u32 %v7191_v6, %v7187_v40  ;;  %v7818_v43 = vrot.slane %v7069_v13, 5  ;;  %v7817_v21 = vrot.slane %v7815_v41, 4 }
 0x4bf   : > { %v14894_v9 = vpop.f32.mrf.mxu0  ;;  %v7182_v49 = vor.u32 %v7181_v22, %v7178_v56  ;;  %v7200_v30 = vshrl.u32 %v7067_v16, 16  ;;  %v11316_v56 = vrot.slane %v7725_v37, 9  ;;  %v7215_v34 = vrot.slane %v7213_v61, 4 }
 0x4c0   : > { %16199 = vst [vmem:[#allocation114_spill] sm:$0xff] %v14894_v9  ;;  %v14897_v63 = vpack.c.b16 %v9300_v44, %v9299_v50  ;;  %v7193_v58 = vrot.slane %v7192_v32, 4  ;;  %v7819_v22 = vsel %vm12509_vm5, %v7817_v21, %v7818_v43  ;;  %v14908_v50 = vrot.slane %v7209_v12, 5  ;;  %v7083_v9 = vld [vmem:[#allocation2 + $0x7c] sm:$0xf] }
 0x4c1   : > { %v7183_v5 = vrot.slane %v7182_v49, 4  ;;  %v7816_v2 = vsel %vm12509_vm5, %v11316_v56, %v7815_v41  ;;  %v7726_v41 = vld [vmem:[#allocation2 + $0x48] sm:$0xe] }
 0x4c2   : > { %16200 = vst [vmem:[#allocation115_spill] sm:$0xff] %v14897_v63  ;;  %v7198_v6 = vsel %vm12201_vm2, %v7193_v58, %v7197_v31  ;;  %v7202_v58 = vrot.slane %v7200_v30, 4  ;;  %v7911_v31 = vunpack.c.l.b16 %v7819_v22  ;;  %v8467_v22 = vld [vmem:[#allocation2 + $0xac] sm:$0xf] }
 0x4c3   : > { %v7188_v32 = vsel %vm12201_vm2, %v7183_v5, %v7187_v40  ;;  %v7216_v40 = vor.u32 %v7215_v34, %v14908_v50  ;;  %v7071_v5 = vld [vmem:[#allocation2 + $0x4c] sm:$0xf]  ;;  %v8468_v34 = vld [vmem:[#allocation2 + $0xb0] sm:$0x1] }
 0x4c4   : > { %v7822_v30 = vrot.slane %v7071_v5, 5  ;;  %v7237_v28 = vshrl.u32 %v7071_v5, 16  ;;  %v11694_v63 = vld [vmem:[#allocation2 + $0x48] sm:$0xff] }
 0x4c7   : > { %11434 = vmatmul.msk.bf16.gmra.mxu3 %vm5996_vm14, %v11692_v33  ;;  %v7937_v33 = vpack.c.b16 %v7909_v62, %v7908_v7  ;;  %v7203_v62 = vshll.u32 %v7067_v16, 16  ;;  %v14902_v44 = vpop.f32.mrf.mxu0  ;;  %v7499_v7 = vunpack.c.l.b16 %v7198_v6  ;;  %v7219_v16 = vshll.u32 %v7069_v13, 16  ;;  %v14919_v13 = vld [vmem:[#allocation2 + $0x50] sm:$0x1] }
 0x4c8   : > { %16201 = vst [vmem:[#allocation116_spill] sm:$0xff] %v14902_v44  ;;  %v7910_v6 = vunpack.c.l.b16 %v7816_v2 }
 0x4c9   : > { %v7205_v49 = vrot.slane %v7203_v62, 5  ;;  %v7221_v37 = vrot.slane %v7219_v16, 5  ;;  %v9108_v62 = vld [vmem:[#allocation2 + $0xa8] sm:$0xe]  ;;  %v7824_v16 = vrot.slane %v7822_v30, 4 }
 0x4ca   : > { %v7938_v61 = vpack.c.b16 %v7911_v31, %v7910_v6  ;;  %v9246_v31 = vrot.slane %v8467_v22, 5 }
 0x4cb   : > { %11298 = vmatmul.msk.bf16.gmra.mxu1 %vm5996_vm14, %v7526_v36  ;;  %v11693_v36 = vld [vmem:[#allocation2 + $0x3c] sm:$0xff]  ;;  %v7206_v43 = vor.u32 %v7205_v49, %v7202_v58  ;;  %v11317_v58 = vrot.slane %v7726_v41, 9  ;;  %v11488_v49 = vrot.slane %v9108_v62, 9 }
 0x4cc   : > { %11343 = vmatmul.msk.bf16.gmra.mxu2 %vm5996_vm14, %v7937_v33  ;;  %v7498_v33 = vunpack.c.l.b16 %v7188_v32  ;;  %v7070_v32 = vld [vmem:[#allocation2 + $0x48] sm:$0xf]  ;;  %v5488_v62 = vld [vmem:[#allocation2 + $0xc0] sm:$0xf] }
 0x4cd   : > { %v7207_v56 = vrot.slane %v7206_v43, 4  ;;  %v7227_v6 = vshll.u32 %v7070_v32, 16  ;;  %v7233_v43 = vshll.u32 %v7071_v5, 16  ;;  %v7823_v5 = vsel %vm12509_vm5, %v11317_v58, %v7822_v30 }
 0x4ce   : > { %v7527_v44 = vpack.c.b16 %v7499_v7, %v7498_v33  ;;  %v4960_v7 = vld [vmem:[#allocation2 + $0xc8] sm:$0x1]  ;;  %v14923_v33 = vpop.f32.mrf.mxu2 }
 0x4cf   : > { %16203 = vst [vmem:[#allocation118_spill] sm:$0xff] %v14923_v33  ;;  %v9249_v33 = vrot.slane %v8468_v34, 5 }
 0x4d7   : > { %11435 = vmatmul.msk.bf16.gmra.mxu3 %vm5996_vm14, %v11693_v36  ;;  %v7217_v36 = vrot.slane %v7216_v40, 4  ;;  %v7224_v40 = vshrl.u32 %v7070_v32, 16 }
 0x4d9   : > { %v7222_v2 = vsel %vm12201_vm2, %v7217_v36, %v7221_v37  ;;  %v7212_v37 = vsel %vm12201_vm2, %v7207_v56, %v14908_v50  ;;  %v7226_v34 = vrot.slane %v7224_v40, 4  ;;  %v8471_v40 = vld [vmem:[#allocation2 + $0xbc] sm:$0x1] }
 0x4da   : > { %v7501_v36 = vunpack.c.l.b16 %v7222_v2  ;;  %v7500_v56 = vunpack.c.l.b16 %v7212_v37  ;;  %v8470_v2 = vld [vmem:[#allocation2 + $0xb8] sm:$0xf] }
 0x4db   : > { %11299 = vmatmul.msk.bf16.gmra.mxu1 %vm5996_vm14, %v7527_v44  ;;  %v4961_v44 = vsel %vm13712_vm13, 0, %v4960_v7  ;;  %v9248_v7 = vrot.slane %v9246_v31, 4  ;;  %v9253_v53 = vrot.slane %v8470_v2, 5 }
 0x4dc   : > { %v7003_v12 = vpop.f32.mrf.mxu0  ;;  %11344 = vmatmul.msk.bf16.gmra.mxu2 %vm5996_vm14, %v7938_v61  ;;  %4962 = vst [vmem:[#allocation2 + $0xc8] sm:$0x1] %v4961_v44  ;;  %v9247_v61 = vsel %vm12509_vm5, %v11488_v49, %v9246_v31  ;;  %v7229_v49 = vrot.slane %v7227_v6, 5  ;;  %v7235_v31 = vrot.slane %v7233_v43, 5 }
 0x4dd   : > { %v14916_v21 = vadd.f32 %v7003_v12, %v14862_v59  ;;  %v14925_v59 = vpop.f32.mrf.mxu1  ;;  %v14929_v12 = vpop.f32.mrf.mxu3  ;;  %v9250_v41 = vsel %vm12509_vm5, %v9248_v7, %v9249_v33  ;;  %v9301_v44 = vunpack.c.l.b16 %v9247_v61  ;;  %v9109_v33 = vld [vmem:[#allocation2 + $0xb4] sm:$0xe] }
 0x4de   : > { %16204 = vst [vmem:[#allocation119_spill] sm:$0xff] %v14925_v59  ;;  %v7825_v59 = vrot.slane %v14919_v13, 5  ;;  %v9302_v22 = vunpack.c.l.b16 %v9250_v41  ;;  %v7230_v43 = vor.u32 %v7229_v49, %v7226_v34  ;;  %v7074_v41 = vld [vmem:[#allocation2 + $0x58] sm:$0xf]  ;;  %v11489_v37 = vrot.slane %v9109_v33, 9 }
 0x4df   : > { %16202 = vst [vmem:[#allocation117_spill] sm:$0xff] %v14916_v21  ;;  %v7075_v33 = vld [vmem:[#allocation2 + $0x5c] sm:$0x1] }
 0x4e0   : > { %16205 = vst [vmem:[#allocation120_spill] sm:$0xff] %v14929_v12  ;;  %v7826_v32 = vsel %vm12509_vm5, %v7824_v16, %v7825_v59  ;;  %v7239_v12 = vrot.slane %v7237_v28, 4  ;;  %v14944_v14 = vpack.c.b16 %v9302_v22, %v9301_v44  ;;  %v7912_v59 = vunpack.c.l.b16 %v7823_v5 }
 0x4e1   : > { %v6348_v7 = vpop.f32.mrf.mxu2  ;;  %v7913_v16 = vunpack.c.l.b16 %v7826_v32  ;;  %v7243_v22 = vshll.u32 %v14919_v13, 16  ;;  %v9255_v5 = vrot.slane %v9253_v53, 4  ;;  %v9256_v32 = vrot.slane %v8471_v40, 5  ;;  %v7073_v40 = vld [vmem:[#allocation2 + $0x54] sm:$0xf] }
 0x4e2   : > { %16206 = vst [vmem:[#allocation121_spill] sm:$0xff] %v14944_v14  ;;  %v7240_v28 = vor.u32 %v7239_v12, %v7235_v31 }
 0x4e3   : > { %v7939_v35 = vpack.c.b16 %v7913_v16, %v7912_v59  ;;  %v9257_v12 = vsel %vm12509_vm5, %v9255_v5, %v9256_v32  ;;  %v7245_v2 = vrot.slane %v7243_v22, 5  ;;  %v7257_v59 = vshll.u32 %v7074_v41, 16 }
 0x4e4   : > { %v7241_v34 = vrot.slane %v7240_v28, 4  ;;  %v7261_v16 = vshrl.u32 %v7074_v41, 16 }
 0x4e6   : > { %v5328_v50 = vpop.permute.xlu2 %5327  ;;  %v7263_v5 = vrot.slane %v7261_v16, 4 }
 0x4e7   : > { %11436 = vmatmul.msk.bf16.gmra.mxu3 %vm5996_vm14, %v11694_v63  ;;  %v5489_v30 = vsel %vm13734_vm15, %v5328_v50, %v5488_v62  ;;  %v7528_v63 = vpack.c.b16 %v7501_v36, %v7500_v56  ;;  %v9254_v62 = vsel %vm12509_vm5, %v11489_v37, %v9253_v53  ;;  %v7829_v50 = vrot.slane %v7074_v41, 5 }
 0x4e8   : > { %5490 = vst [vmem:[#allocation2 + $0xc0] sm:$0xf] %v5489_v30  ;;  %v7231_v36 = vrot.slane %v7230_v43, 4  ;;  %v9303_v49 = vunpack.c.l.b16 %v9254_v62  ;;  %v9304_v56 = vunpack.c.l.b16 %v9257_v12  ;;  %v7246_v53 = vsel %vm12201_vm2, %v7241_v34, %v7245_v2 }
 0x4e9   : > { %v7503_v28 = vunpack.c.l.b16 %v7246_v53  ;;  %v7259_v62 = vrot.slane %v7257_v59, 5  ;;  %v7267_v59 = vshll.u32 %v7075_v33, 16 }
 0x4ea   : > { %v6119_v58 = vpop.f32.mrf.mxu1  ;;  %v14955_v13 = vpack.c.b16 %v9304_v56, %v9303_v49  ;;  %v7236_v30 = vsel %vm12201_vm2, %v7231_v36, %v7235_v31  ;;  %v7248_v31 = vshrl.u32 %v7073_v40, 16  ;;  %v14968_v36 = vpop.f32.mrf.mxu2 }
 0x4eb   : > { %v6349_v61 = vadd.f32 %v6348_v7, %v6119_v58  ;;  %11300 = vmatmul.msk.bf16.gmra.mxu1 %vm5996_vm14, %v7528_v63  ;;  %v7831_v7 = vrot.slane %v7829_v50, 4  ;;  %v7727_v58 = vld [vmem:[#allocation2 + $0x54] sm:$0xe]  ;;  %v7832_v63 = vrot.slane %v7075_v33, 5  ;;  %v7502_v43 = vunpack.c.l.b16 %v7236_v30  ;;  %16209 = vst [vmem:[#allocation124_spill] sm:$0xff] %v14968_v36 }
 0x4ec   : > { %v6710_v6 = vpop.f32.mrf.mxu3  ;;  %11345 = vmatmul.msk.bf16.gmra.mxu2 %vm5996_vm14, %v7939_v35  ;;  %16207 = vst [vmem:[#allocation122_spill] sm:$0xff] %v14955_v13  ;;  %v11318_v37 = vrot.slane %v7727_v58, 9  ;;  %v7251_v35 = vshll.u32 %v7073_v40, 16  ;;  %v7250_v49 = vrot.slane %v7248_v31, 4  ;;  %v7264_v2 = vor.u32 %v7263_v5, %v7259_v62  ;;  %v11708_v30 = vld [vmem:[%s15880_s4 + $0x70] sm:$0xff] }
 0x4ed   : > { %v6751_v44 = vadd.f32 %v6710_v6, %v6349_v61  ;;  %v14961_v61 = vpop.f32.mrf.mxu0  ;;  %v11695_v6 = vld [vmem:[#allocation2 + $0x54] sm:$0xff]  ;;  %v7833_v22 = vsel %vm12509_vm5, %v7831_v7, %v7832_v63  ;;  %v7529_v34 = vpack.c.b16 %v7503_v28, %v7502_v43  ;;  %8982 = vmatpush.bf16.msra.mxu0 %v11708_v30  ;;  %v14977_v40 = vld [vmem:[#allocation2 + $0x68] sm:$0x1]  ;;  %v7728_v31 = vld [vmem:[#allocation2 + $0x60] sm:$0xe] }
 0x4ee   : > { %16208 = vst [vmem:[#allocation123_spill] sm:$0xff] %v14961_v61  ;;  %v7830_v41 = vsel %vm12509_vm5, %v11318_v37, %v7829_v50  ;;  %v7915_v32 = vunpack.c.l.b16 %v7833_v22  ;;  %v7253_v56 = vrot.slane %v7251_v35, 5  ;;  %v7077_v50 = vld [vmem:[#allocation2 + $0x64] sm:$0xf]  ;;  %v7265_v63 = vrot.slane %v7264_v2, 4 }
 0x4ef   : > { %v7914_v12 = vunpack.c.l.b16 %v7830_v41  ;;  %v8430_v43 = vld [vmem:[#allocation2 + $0x18] sm:$0xf]  ;;  %v5492_v37 = vld [vmem:[#allocation2 + $0xc8] sm:$0x1]  ;;  %v7269_v22 = vrot.slane %v7267_v59, 5  ;;  %v7839_v33 = vrot.slane %v14977_v40, 5 }
 0x4f0   : > { %v7254_v16 = vor.u32 %v7253_v56, %v7250_v49  ;;  %v7076_v5 = vld [vmem:[#allocation2 + $0x60] sm:$0xf]  ;;  %v8482_v49 = vshll.u32 %v8430_v43, 16  ;;  %v11319_v30 = vrot.slane %v7728_v31, 9  ;;  %v7281_v59 = vshll.u32 %v7077_v50, 16 }
 0x4f1   : > { %v7940_v58 = vpack.c.b16 %v7915_v32, %v7914_v12  ;;  %v8479_v12 = vshrl.u32 %v8430_v43, 16  ;;  %v11696_v61 = vld [vmem:[#allocation2 + $0x60] sm:$0xff]  ;;  %v7275_v14 = vshll.u32 %v7076_v5, 16  ;;  %v7291_v36 = vshll.u32 %v14977_v40, 16 }
 0x4f2   : > { %v14979_v28 = vpop.f32.mrf.mxu1  ;;  %v7255_v32 = vrot.slane %v7254_v16, 4  ;;  %v7272_v16 = vshrl.u32 %v7076_v5, 16  ;;  %v8484_v5 = vrot.slane %v8482_v49, 5  ;;  %v11710_v40 = vld [vmem:[%s15880_s4 + $0x80] sm:$0xff] }
 0x4f3   : > { %16211 = vst [vmem:[#allocation126_spill] sm:$0xff] %v14979_v28  ;;  %v8481_v43 = vrot.slane %v8479_v12, 4  ;;  %v7080_v28 = vld [vmem:[#allocation2 + $0x70] sm:$0xf]  ;;  %9392 = vmatpush.bf16.msra.mxu1 %v11710_v40  ;;  %v11927_v40 = vld [vmem:[#allocation2 + $0x28] sm:$0xf] }
 0x4f4   : > { %v14981_v35 = vpop.f32.mrf.mxu3  ;;  %v7260_v13 = vsel %vm12201_vm2, %v7255_v32, %v7259_v62  ;;  %v14998_v62 = vrot.slane %v7281_v59, 5 }
 0x4f5   : > { %16212 = vst [vmem:[#allocation127_spill] sm:$0xff] %v14981_v35  ;;  %v7285_v35 = vshrl.u32 %v7077_v50, 16  ;;  %v8485_v49 = vor.u32 %v8484_v5, %v8481_v43 }
 0x4f7   : > { %11437 = vmatmul.msk.bf16.gmra.mxu3 %vm5996_vm14, %v11695_v6  ;;  %v7836_v6 = vrot.slane %v7077_v50, 5 }
 0x4fa   : > { %v7008_v7 = vpop.f32.mrf.mxu0 }
 0x4fb   : > { %11301 = vmatmul.msk.bf16.gmra.mxu1 %vm5996_vm14, %v7529_v34  ;;  %v14974_v53 = vadd.f32 %v7008_v7, %v6751_v44  ;;  %v7270_v34 = vsel %vm12201_vm2, %v7265_v63, %v7269_v22 }
 0x4fc   : > { %11346 = vmatmul.msk.bf16.gmra.mxu2 %vm5996_vm14, %v7940_v58  ;;  %v7838_v58 = vrot.slane %v7836_v6, 4  ;;  %v7505_v63 = vunpack.c.l.b16 %v7270_v34  ;;  %v7277_v34 = vrot.slane %v7275_v14, 5 }
 0x4fd   : > { %16210 = vst [vmem:[#allocation125_spill] sm:$0xff] %v14974_v53 }
 0x4fe   : > { %v7840_v55 = vsel %vm12509_vm5, %v7838_v58, %v7839_v33 }
 0x4ff   : > { %v6353_v44 = vpop.f32.mrf.mxu2  ;;  %v7917_v32 = vunpack.c.l.b16 %v7840_v55 }
 0x501   : > { %v5332_v41 = vpop.permute.xlu1 %5331 }
 0x502   : > { %v5493_v56 = vsel %vm13637_vm10, %v5332_v41, %v5492_v37  ;;  %v5330_v2 = vpop.permute.xlu0 %5329  ;;  %v14988_v7 = vpop.f32.mrf.mxu0  ;;  %v11925_v37 = vld [vmem:[#allocation2 + $0x1c] sm:$0xf]  ;;  %v7504_v41 = vunpack.c.l.b16 %v7260_v13 }
 0x503   : > { %16213 = vst [vmem:[#allocation128_spill] sm:$0xff] %v14988_v7  ;;  %v8488_v22 = vshll.u32 %v11925_v37, 16  ;;  %v8492_v31 = vshrl.u32 %v11925_v37, 16  ;;  %v7287_v7 = vrot.slane %v7285_v35, 4  ;;  %v11926_v35 = vld [vmem:[#allocation2 + $0x20] sm:$0x1] }
 0x504   : > { %5494 = vst [vmem:[#allocation2 + $0xc8] sm:$0x1] %v5493_v56  ;;  %v7837_v56 = vsel %vm12509_vm5, %v11319_v30, %v7836_v6 }
 0x505   : > { %5491 = vst.msk [vmem:[#allocation2 + $0xc4] sm:$0xf] %vm4852_vm11, %v5330_v2  ;;  %v7274_v2 = vrot.slane %v7272_v16, 4  ;;  %v7916_v12 = vunpack.c.l.b16 %v7837_v56  ;;  %v8490_v37 = vrot.slane %v8488_v22, 5  ;;  %v8494_v13 = vrot.slane %v8492_v31, 4 }
 0x506   : > { %v7288_v14 = vor.u32 %v7287_v7, %v14998_v62  ;;  %v8433_v22 = vld [vmem:[#allocation2 + $0x24] sm:$0xf]  ;;  %v8486_v56 = vrot.slane %v8485_v49, 4 }
 0x507   : > { %11438 = vmatmul.msk.bf16.gmra.mxu3 %vm5996_vm14, %v11696_v61  ;;  %v6355_v58 = vpop.f32.mrf.mxu2  ;;  %v7530_v61 = vpack.c.b16 %v7505_v63, %v7504_v41  ;;  %v7941_v59 = vpack.c.b16 %v7917_v32, %v7916_v12  ;;  %v7278_v16 = vor.u32 %v7277_v34, %v7274_v2  ;;  %v7843_v63 = vrot.slane %v7080_v28, 5  ;;  %v7729_v12 = vld [vmem:[#allocation2 + $0x6c] sm:$0xe] }
 0x508   : > { %v6124_v50 = vpop.f32.mrf.mxu1  ;;  %v8495_v43 = vor.u32 %v8494_v13, %v8490_v37  ;;  %v7289_v7 = vrot.slane %v7288_v14, 4  ;;  %v7309_v13 = vshrl.u32 %v7080_v28, 16  ;;  %v8503_v49 = vshrl.u32 %v8433_v22, 16  ;;  %v11697_v14 = vld [vmem:[#allocation2 + $0x6c] sm:$0xff] }
 0x509   : > { %v6354_v53 = vadd.f32 %v6353_v44, %v6124_v50  ;;  %v8498_v44 = vshll.u32 %v11926_v35, 16  ;;  %v7279_v41 = vrot.slane %v7278_v16, 4  ;;  %v7845_v34 = vrot.slane %v7843_v63, 4 }
 0x50a   : > { %v6715_v33 = vpop.f32.mrf.mxu3  ;;  %v7013_v6 = vpop.f32.mrf.mxu0  ;;  %v8506_v16 = vshll.u32 %v8433_v22, 16  ;;  %v8491_v35 = vsel %vm12201_vm2, %v8486_v56, %v8490_v37  ;;  %v8505_v56 = vrot.slane %v8503_v49, 4 }
 0x50b   : > { %v6753_v21 = vadd.f32 %v6715_v33, %v6354_v53  ;;  %11302 = vmatmul.msk.bf16.gmra.mxu1 %vm5996_vm14, %v7530_v61  ;;  %v7293_v53 = vrot.slane %v7291_v36, 5  ;;  %v8500_v5 = vrot.slane %v8498_v44, 5  ;;  %v8496_v61 = vrot.slane %v8495_v43, 4 }
 0x50c   : > { %v11683_v30 = vld [vmem:[#allocation2 + $0xc0] sm:$0xff]  ;;  %11347 = vmatmul.msk.bf16.gmra.mxu2 %vm5996_vm14, %v7941_v59  ;;  %v7305_v36 = vshll.u32 %v7080_v28, 16  ;;  %v7079_v59 = vld [vmem:[#allocation2 + $0x6c] sm:$0xf]  ;;  %v8512_v28 = vshll.u32 %v11927_v40, 16  ;;  %v11320_v43 = vrot.slane %v7729_v12, 9 }
 0x50d   : > { %v15003_v55 = vadd.f32 %v7013_v6, %v6753_v21  ;;  %11283 = vmatmul.msk.bf16.gmra.mxu0 %vm5996_vm14, %v11683_v30  ;;  %v15010_v21 = vld [vmem:[#allocation2 + $0x74] sm:$0x1]  ;;  %v7294_v33 = vsel %vm12201_vm2, %v7289_v7, %v7293_v53  ;;  %v8501_v44 = vsel %vm12201_vm2, %v8496_v61, %v8500_v5  ;;  %v8516_v7 = vshrl.u32 %v11927_v40, 16 }
 0x50e   : > { %v7846_v30 = vrot.slane %v15010_v21, 5  ;;  %v7507_v53 = vunpack.c.l.b16 %v7294_v33  ;;  %v7296_v22 = vshrl.u32 %v7079_v59, 16  ;;  %v7844_v37 = vsel %vm12509_vm5, %v11320_v43, %v7843_v63 }
 0x50f   : > { %16214 = vst [vmem:[#allocation129_spill] sm:$0xff] %v15003_v55  ;;  %v6358_v2 = vpop.f32.mrf.mxu2  ;;  %v8508_v5 = vrot.slane %v8506_v16, 5  ;;  %v8867_v33 = vunpack.c.l.b16 %v8491_v35  ;;  %v8868_v12 = vunpack.c.l.b16 %v8501_v44  ;;  %v8436_v44 = vld [vmem:[#allocation2 + $0x30] sm:$0xf] }
 0x510   : > { %v6126_v31 = vpop.f32.mrf.mxu1  ;;  %v7298_v20 = vrot.slane %v7296_v22, 4 }
 0x511   : > { %v6356_v50 = vadd.f32 %v6355_v58, %v6126_v31  ;;  %v7284_v58 = vsel %vm12201_vm2, %v7279_v41, %v14998_v62  ;;  %v7847_v31 = vsel %vm12509_vm5, %v7845_v34, %v7846_v30  ;;  %v7311_v62 = vrot.slane %v7309_v13, 4 }
 0x512   : > { %v6717_v32 = vpop.f32.mrf.mxu3  ;;  %v7506_v41 = vunpack.c.l.b16 %v7284_v58  ;;  %v8509_v49 = vor.u32 %v8508_v5, %v8505_v56  ;;  %v8899_v16 = vpack.c.b16 %v8868_v12, %v8867_v33 }
 0x513   : > { %v15014_v6 = vadd.f32 %v6717_v32, %v6356_v50  ;;  %v7299_v50 = vshll.u32 %v7079_v59, 16  ;;  %v15027_v32 = vrot.slane %v7305_v36, 5  ;;  %v8518_v59 = vrot.slane %v8516_v7, 4 }
 0x514   : > { %v7531_v40 = vpack.c.b16 %v7507_v53, %v7506_v41  ;;  %v7918_v36 = vunpack.c.l.b16 %v7844_v37  ;;  %v11928_v53 = vld [vmem:[#allocation2 + $0x2c] sm:$0x1]  ;;  %v8510_v22 = vrot.slane %v8509_v49, 4  ;;  %v15041_v37 = vld [vmem:[#allocation2 + $0x80] sm:$0x1]  ;;  %v7333_v49 = vshrl.u32 %v7083_v9, 16 }
 0x515   : > { %16215 = vst [vmem:[#allocation130_spill] sm:$0xff] %v15014_v6  ;;  %v7919_v6 = vunpack.c.l.b16 %v7847_v31  ;;  %v7301_v13 = vrot.slane %v7299_v50, 5  ;;  %v7312_v58 = vor.u32 %v7311_v62, %v15027_v32  ;;  %v8522_v43 = vshll.u32 %v11928_v53, 16 }
 0x516   : > { %v7850_v31 = vrot.slane %v7083_v9, 5  ;;  %v8527_v50 = vshrl.u32 %v8436_v44, 16 }
 0x517   : > { %11439 = vmatmul.msk.bf16.gmra.mxu3 %vm5996_vm14, %v11697_v14  ;;  %v6360_v30 = vpop.f32.mrf.mxu2  ;;  %v15031_v14 = vrot.slane %v8512_v28, 5  ;;  %v7942_v35 = vpack.c.b16 %v7919_v6, %v7918_v36  ;;  %v7302_v7 = vor.u32 %v7301_v13, %v7298_v20  ;;  %v8530_v6 = vshll.u32 %v8436_v44, 16  ;;  %v7730_v13 = vld [vmem:[#allocation2 + $0x78] sm:$0xe] }
 0x518   : > { %v6129_v61 = vpop.f32.mrf.mxu1  ;;  %v8529_v44 = vrot.slane %v8527_v50, 4 }
 0x519   : > { %v6359_v55 = vadd.f32 %v6358_v2, %v6129_v61  ;;  %v7315_v2 = vshll.u32 %v15010_v21, 16  ;;  %v8519_v28 = vor.u32 %v8518_v59, %v15031_v14  ;;  %v11929_v21 = vld [vmem:[#allocation2 + $0x34] sm:$0xf]  ;;  %v7852_v59 = vrot.slane %v7850_v31, 4 }
 0x51a   : > { %v6720_v34 = vpop.f32.mrf.mxu3  ;;  %v8536_v56 = vshll.u32 %v11929_v21, 16  ;;  %v8540_v5 = vshrl.u32 %v11929_v21, 16  ;;  %v7303_v36 = vrot.slane %v7302_v7, 4 }
 0x51b   : > { %v15034_v63 = vadd.f32 %v6720_v34, %v6359_v55  ;;  %11303 = vmatmul.msk.bf16.gmra.mxu1 %vm5996_vm14, %v7531_v40  ;;  %v7313_v55 = vrot.slane %v7312_v58, 4  ;;  %v7317_v41 = vrot.slane %v7315_v2, 5  ;;  %v8520_v34 = vrot.slane %v8519_v28, 4  ;;  %v7082_v2 = vld [vmem:[#allocation2 + $0x78] sm:$0xf] }
 0x51c   : > { %11348 = vmatmul.msk.bf16.gmra.mxu2 %vm5996_vm14, %v7942_v35  ;;  %v8524_v40 = vrot.slane %v8522_v43, 5  ;;  %v7329_v58 = vshll.u32 %v7083_v9, 16  ;;  %v8515_v35 = vsel %vm12201_vm2, %v8510_v22, %v15031_v14  ;;  %v11698_v28 = vld [vmem:[#allocation2 + $0x78] sm:$0xff]  ;;  %v7308_v53 = vsel %vm12201_vm2, %v7303_v36, %v15027_v32 }
 0x51d   : > { %11460 = vmatmul.msk.bf16.vlgmr.msra.gmra.mxu0 %vm5996_vm14, %v8899_v16  ;;  %v7318_v20 = vsel %vm12201_vm2, %v7313_v55, %v7317_v41  ;;  %v8532_v43 = vrot.slane %v8530_v6, 5  ;;  %v15054_v7 = vrot.slane %v8536_v56, 5  ;;  %v8542_v55 = vrot.slane %v8540_v5, 4 }
 0x51e   : > { %v7509_v9 = vunpack.c.l.b16 %v7318_v20  ;;  %v11321_v41 = vrot.slane %v7730_v13, 9  ;;  %v7320_v22 = vshrl.u32 %v7082_v2, 16  ;;  %v7323_v50 = vshll.u32 %v7082_v2, 16 }
 0x51f   : > { %v8019_v12 = vpop.f32.mrf.mxu2  ;;  %v15061_v21 = vrot.slane %v7329_v58, 5  ;;  %v6286_v32 = vadd.f32 %v14182_v10, %v14222_v29  ;;  %v7508_v6 = vunpack.c.l.b16 %v7308_v53 }
 0x520   : > { %v6131_v62 = vpop.f32.mrf.mxu1  ;;  %v7851_v56 = vsel %vm12509_vm5, %v11321_v41, %v7850_v31  ;;  %v7322_v10 = vrot.slane %v7320_v22, 4  ;;  %v7325_v29 = vrot.slane %v7323_v50, 5 }
 0x521   : > { %v6361_v61 = vadd.f32 %v6360_v30, %v6131_v62  ;;  %v7853_v30 = vrot.slane %v15041_v37, 5  ;;  %v8525_v62 = vsel %vm12201_vm2, %v8520_v34, %v8524_v40  ;;  %v7532_v13 = vpack.c.b16 %v7509_v9, %v7508_v6  ;;  %v7086_v9 = vld [vmem:[#allocation2 + $0x88] sm:$0xf] }
 0x522   : > { %v6722_v33 = vpop.f32.mrf.mxu3  ;;  %v8870_v34 = vunpack.c.l.b16 %v8525_v62  ;;  %v6726_v31 = vadd.f32 %v14210_v51, %v6286_v32  ;;  %v7857_v32 = vrot.slane %v7086_v9, 5 }
 0x523   : > { %v15045_v16 = vadd.f32 %v6722_v33, %v6361_v61  ;;  %v7854_v14 = vsel %vm12509_vm5, %v7852_v59, %v7853_v30  ;;  %v7335_v61 = vrot.slane %v7333_v49, 4  ;;  %v8869_v33 = vunpack.c.l.b16 %v8515_v35  ;;  %v11930_v49 = vld [vmem:[#allocation2 + $0x38] sm:$0x1] }
 0x524   : > { %v7921_v40 = vunpack.c.l.b16 %v7854_v14  ;;  %v8543_v59 = vor.u32 %v8542_v55, %v15054_v7  ;;  %v8533_v30 = vor.u32 %v8532_v43, %v8529_v44  ;;  %v8546_v2 = vshll.u32 %v11930_v49, 16  ;;  %v8439_v44 = vld [vmem:[#allocation2 + $0x3c] sm:$0xf] }
 0x525   : > { %v7336_v53 = vor.u32 %v7335_v61, %v15061_v21  ;;  %v8900_v62 = vpack.c.b16 %v8870_v34, %v8869_v33  ;;  %v7326_v43 = vor.u32 %v7325_v29, %v7322_v10  ;;  %v7024_v61 = vadd.f32 %v14224_v18, %v6726_v31  ;;  %v7731_v33 = vld [vmem:[#allocation2 + $0x84] sm:$0xe]  ;;  %v11931_v18 = vld [vmem:[#allocation2 + $0x40] sm:$0xf] }
 0x526   : > { %v8544_v41 = vrot.slane %v8543_v59, 4  ;;  %v8534_v50 = vrot.slane %v8533_v30, 4  ;;  %v8548_v51 = vrot.slane %v8546_v2, 5  ;;  %v8551_v34 = vshrl.u32 %v8439_v44, 16 }
 0x527   : > { %11440 = vmatmul.msk.bf16.gmra.mxu3 %vm5996_vm14, %v11698_v28  ;;  %v8021_v58 = vpop.f32.mrf.mxu2  ;;  %v7920_v28 = vunpack.c.l.b16 %v7851_v56  ;;  %v7337_v22 = vrot.slane %v7336_v53, 4  ;;  %v8554_v30 = vshll.u32 %v8439_v44, 16  ;;  %v8560_v49 = vshll.u32 %v11931_v18, 16 }
 0x528   : > { %v7609_v5 = vpop.f32.mrf.mxu1  ;;  %v8539_v56 = vsel %vm12201_vm2, %v8534_v50, %v15054_v7  ;;  %v7327_v2 = vrot.slane %v7326_v43, 4  ;;  %v7353_v10 = vshll.u32 %v7086_v9, 16  ;;  %v7357_v7 = vshrl.u32 %v7086_v9, 16 }
 0x529   : > { %v7689_v36 = vadd.f32 %v7609_v5, %v14200_v52  ;;  %v7943_v55 = vpack.c.b16 %v7921_v40, %v7920_v28  ;;  %v7339_v52 = vshll.u32 %v15041_v37, 16  ;;  %v8549_v5 = vsel %vm12201_vm2, %v8544_v41, %v8548_v51 }
 0x52a   : > { %v8318_v20 = vpop.f32.mrf.mxu3  ;;  %v11322_v53 = vrot.slane %v7731_v33, 9  ;;  %v7859_v31 = vrot.slane %v7857_v32, 4  ;;  %v6291_v43 = vadd.f32 %v14247_v0, %v14277_v45  ;;  %v15098_v9 = vrot.slane %v7353_v10, 5 }
 0x52b   : > { %v8099_v35 = vadd.f32 %v8019_v12, %v7689_v36  ;;  %11304 = vmatmul.msk.bf16.gmra.mxu1 %vm5996_vm14, %v7532_v13  ;;  %v15077_v12 = vld [vmem:[#allocation2 + $0x8c] sm:$0x1]  ;;  %v7341_v37 = vrot.slane %v7339_v52, 5  ;;  %v7085_v13 = vld [vmem:[#allocation2 + $0x84] sm:$0xf]  ;;  %v8872_v52 = vunpack.c.l.b16 %v8549_v5  ;;  %v7359_v51 = vrot.slane %v7357_v7, 4 }
 0x52c   : > { %11349 = vmatmul.msk.bf16.gmra.mxu2 %vm5996_vm14, %v7943_v55  ;;  %v7332_v55 = vsel %vm12201_vm2, %v7327_v2, %v15061_v21  ;;  %v7344_v41 = vshrl.u32 %v7085_v13, 16  ;;  %v7347_v44 = vshll.u32 %v7085_v13, 16  ;;  %v15102_v5 = vrot.slane %v8560_v49, 5  ;;  %v11932_v7 = vld [vmem:[#allocation2 + $0x44] sm:$0x1] }
 0x52d   : > { %v15073_v14 = vadd.f32 %v8318_v20, %v8099_v35  ;;  %11461 = vmatmul.msk.bf16.gmra.mxu0 %vm5996_vm14, %v8900_v62  ;;  %v7860_v20 = vrot.slane %v15077_v12, 5  ;;  %v7342_v28 = vsel %vm12201_vm2, %v7337_v22, %v7341_v37  ;;  %v8564_v35 = vshrl.u32 %v11931_v18, 16  ;;  %v11699_v62 = vld [vmem:[#allocation2 + $0x84] sm:$0xff]  ;;  %v7089_v49 = vld [vmem:[#allocation2 + $0x94] sm:$0xf] }
 0x52e   : > { %v7511_v22 = vunpack.c.l.b16 %v7342_v28  ;;  %v7510_v21 = vunpack.c.l.b16 %v7332_v55  ;;  %v7858_v37 = vsel %vm12509_vm5, %v11322_v53, %v7857_v32  ;;  %v7360_v10 = vor.u32 %v7359_v51, %v15098_v9 }
 0x52f   : > { %v8024_v36 = vpop.f32.mrf.mxu2  ;;  %v8566_v0 = vrot.slane %v8564_v35, 4  ;;  %v8570_v32 = vshll.u32 %v11932_v7, 16 }
 0x530   : > { %v7611_v6 = vpop.f32.mrf.mxu1  ;;  %v7533_v2 = vpack.c.b16 %v7511_v22, %v7510_v21  ;;  %v7361_v22 = vrot.slane %v7360_v10, 4  ;;  %v15117_v21 = vld [vmem:[#allocation2 + $0x98] sm:$0x1] }
 0x531   : > { %v7690_v40 = vadd.f32 %v7611_v6, %v7024_v61  ;;  %v8553_v61 = vrot.slane %v8551_v34, 4  ;;  %v8556_v6 = vrot.slane %v8554_v30, 5  ;;  %v8871_v34 = vunpack.c.l.b16 %v8539_v56  ;;  %v7732_v56 = vld [vmem:[#allocation2 + $0x90] sm:$0xe] }
 0x532   : > { %v8320_v59 = vpop.f32.mrf.mxu3  ;;  %v7922_v30 = vunpack.c.l.b16 %v7858_v37  ;;  %v11323_v37 = vrot.slane %v7732_v56, 9  ;;  %v7867_v10 = vrot.slane %v15117_v21, 5  ;;  %v6296_v56 = vadd.f32 %v14305_v57, %v14335_v8 }
 0x533   : > { %v8100_v29 = vadd.f32 %v8021_v58, %v7690_v40  ;;  %v7861_v58 = vsel %vm12509_vm5, %v7859_v31, %v7860_v20  ;;  %v7346_v40 = vrot.slane %v7344_v41, 4  ;;  %v7363_v20 = vshll.u32 %v15077_v12, 16 }
 0x534   : > { %v7923_v33 = vunpack.c.l.b16 %v7861_v58  ;;  %v8557_v31 = vor.u32 %v8556_v6, %v8553_v61  ;;  %v8567_v12 = vor.u32 %v8566_v0, %v15102_v5  ;;  %v8901_v35 = vpack.c.b16 %v8872_v52, %v8871_v34  ;;  %v8442_v0 = vld [vmem:[#allocation2 + $0x48] sm:$0xf] }
 0x535   : > { %v15093_v50 = vadd.f32 %v8320_v59, %v8100_v29  ;;  %v7349_v59 = vrot.slane %v7347_v44, 5  ;;  %v6728_v29 = vadd.f32 %v14268_v54, %v6291_v43  ;;  %v7365_v55 = vrot.slane %v7363_v20, 5 }
 0x536   : > { %v7864_v44 = vrot.slane %v7089_v49, 5  ;;  %v8572_v54 = vrot.slane %v8570_v32, 5  ;;  %v8558_v58 = vrot.slane %v8557_v31, 4  ;;  %v8568_v51 = vrot.slane %v8567_v12, 4 }
 0x537   : > { %11441 = vmatmul.msk.bf16.gmra.mxu3 %vm5996_vm14, %v11699_v62  ;;  %v8026_v28 = vpop.f32.mrf.mxu2  ;;  %v7350_v62 = vor.u32 %v7349_v59, %v7346_v40  ;;  %v7026_v43 = vadd.f32 %v14270_v39, %v6728_v29  ;;  %v7366_v6 = vsel %vm12201_vm2, %v7361_v22, %v7365_v55  ;;  %v7377_v39 = vshll.u32 %v7089_v49, 16 }
 0x538   : > { %v7614_v45 = vpop.f32.mrf.mxu1  ;;  %v7866_v40 = vrot.slane %v7864_v44, 4  ;;  %v8575_v7 = vshrl.u32 %v8442_v0, 16  ;;  %v8578_v32 = vshll.u32 %v8442_v0, 16  ;;  %v7513_v12 = vunpack.c.l.b16 %v7366_v6 }
 0x539   : > { %v7691_v13 = vadd.f32 %v7614_v45, %v14265_v19  ;;  %v7944_v19 = vpack.c.b16 %v7923_v33, %v7922_v30  ;;  %v7351_v52 = vrot.slane %v7350_v62, 4  ;;  %v7379_v22 = vrot.slane %v7377_v39, 5 }
 0x53a   : > { %v8323_v18 = vpop.f32.mrf.mxu3 }
 0x53b   : > { %v8101_v53 = vadd.f32 %v8024_v36, %v7691_v13  ;;  %11305 = vmatmul.msk.bf16.gmra.mxu1 %vm5996_vm14, %v7533_v2  ;;  %v7088_v36 = vld [vmem:[#allocation2 + $0x90] sm:$0xf]  ;;  %v8573_v13 = vsel %vm12201_vm2, %v8568_v51, %v8572_v54  ;;  %v11933_v2 = vld [vmem:[#allocation2 + $0x4c] sm:$0xf]  ;;  %v7356_v31 = vsel %vm12201_vm2, %v7351_v52, %v15098_v9  ;;  %v8563_v9 = vsel %vm12201_vm2, %v8558_v58, %v15102_v5  ;;  %v7092_v5 = vld [vmem:[#allocation2 + $0xa0] sm:$0xf] }
 0x53c   : > { %11350 = vmatmul.msk.bf16.gmra.mxu2 %vm5996_vm14, %v7944_v19  ;;  %v7368_v59 = vshrl.u32 %v7088_v36, 16  ;;  %v7371_v20 = vshll.u32 %v7088_v36, 16  ;;  %v8584_v34 = vshll.u32 %v11933_v2, 16  ;;  %v8588_v19 = vshrl.u32 %v11933_v2, 16  ;;  %v16217_v58 = vld [vmem:[#allocation80_spill] sm:$0xff] }
 0x53d   : > { %v15110_v41 = vadd.f32 %v8323_v18, %v8101_v53  ;;  %11462 = vmatmul.msk.bf16.gmra.mxu0 %vm5996_vm14, %v8901_v35  ;;  %v7381_v18 = vshrl.u32 %v7089_v49, 16  ;;  %v11700_v53 = vld [vmem:[#allocation2 + $0x90] sm:$0xff]  ;;  %v7865_v35 = vsel %vm12509_vm5, %v11323_v37, %v7864_v44  ;;  %v7512_v44 = vunpack.c.l.b16 %v7356_v31 }
 0x53e   : > { %v7370_v49 = vrot.slane %v7368_v59, 4  ;;  %v7373_v55 = vrot.slane %v7371_v20, 5  ;;  %v8874_v36 = vunpack.c.l.b16 %v8573_v13  ;;  %v8580_v51 = vrot.slane %v8578_v32, 5 }
 0x53f   : > { %v8029_v29 = vpop.f32.mrf.mxu2  ;;  %v7383_v54 = vrot.slane %v7381_v18, 4  ;;  %v7924_v52 = vunpack.c.l.b16 %v7865_v35  ;;  %v15137_v37 = vrot.slane %v8584_v34, 5  ;;  %v8590_v0 = vrot.slane %v8588_v19, 4  ;;  %v16218_v19 = vld [vmem:[#allocation82_spill] sm:$0xff] }
 0x540   : > { %v7616_v61 = vpop.f32.mrf.mxu1  ;;  %v8873_v59 = vunpack.c.l.b16 %v8563_v9  ;;  %v6730_v39 = vadd.f32 %v16217_v58, %v6296_v56  ;;  %v7387_v34 = vshll.u32 %v15117_v21, 16 }
 0x541   : > { %v7692_v45 = vadd.f32 %v7616_v61, %v7026_v43  ;;  %v8577_v43 = vrot.slane %v8575_v7, 4  ;;  %v7384_v20 = vor.u32 %v7383_v54, %v7379_v22  ;;  %v15149_v54 = vld [vmem:[#allocation2 + $0xa4] sm:$0x1] }
 0x542   : > { %v8325_v33 = vpop.f32.mrf.mxu3  ;;  %v8902_v2 = vpack.c.b16 %v8874_v36, %v8873_v59  ;;  %v7389_v21 = vrot.slane %v7387_v34, 5  ;;  %v7874_v58 = vrot.slane %v15149_v54, 5 }
 0x543   : > { %v8102_v30 = vadd.f32 %v8026_v28, %v7692_v45  ;;  %v7868_v28 = vsel %vm12509_vm5, %v7866_v40, %v7867_v10  ;;  %v16216_v45 = vld [vmem:[#allocation79_spill] sm:$0xff]  ;;  %v7374_v40 = vor.u32 %v7373_v55, %v7370_v49  ;;  %v8581_v13 = vor.u32 %v8580_v51, %v8577_v43  ;;  %v8445_v55 = vld [vmem:[#allocation2 + $0x54] sm:$0xf] }
 0x544   : > { %v7925_v6 = vunpack.c.l.b16 %v7868_v28  ;;  %v8591_v10 = vor.u32 %v8590_v0, %v15137_v37  ;;  %v7028_v28 = vadd.f32 %v16218_v19, %v6730_v39  ;;  %v7091_v39 = vld [vmem:[#allocation2 + $0x9c] sm:$0xf]  ;;  %v6301_v19 = vadd.f32 %v14375_v3, %v14393_v60  ;;  %v7095_v60 = vld [vmem:[#allocation2 + $0xac] sm:$0xf] }
 0x545   : > { %v15127_v62 = vadd.f32 %v8325_v33, %v8102_v30  ;;  %v7534_v33 = vpack.c.b16 %v7513_v12, %v7512_v44  ;;  %v7375_v32 = vrot.slane %v7374_v40, 4  ;;  %v7871_v12 = vrot.slane %v7092_v5, 5  ;;  %v11935_v44 = vld [vmem:[#allocation2 + $0x58] sm:$0xf] }
 0x546   : > { %v7945_v30 = vpack.c.b16 %v7925_v6, %v7924_v52  ;;  %v8582_v49 = vrot.slane %v8581_v13, 4  ;;  %v8592_v9 = vrot.slane %v8591_v10, 4  ;;  %v8608_v36 = vshll.u32 %v11935_v44, 16  ;;  %v11701_v13 = vld [vmem:[#allocation2 + $0x9c] sm:$0xff] }
 0x547   : > { %11442 = vmatmul.msk.bf16.gmra.mxu3 %vm5996_vm14, %v11700_v53  ;;  %v11934_v53 = vld [vmem:[#allocation2 + $0x50] sm:$0x1]  ;;  %v8031_v35 = vpop.f32.mrf.mxu2  ;;  %v8612_v43 = vshrl.u32 %v11935_v44, 16  ;;  %v7380_v52 = vsel %vm12201_vm2, %v7375_v32, %v7379_v22  ;;  %v7873_v0 = vrot.slane %v7871_v12, 4  ;;  %v8599_v40 = vshrl.u32 %v8445_v55, 16 }
 0x548   : > { %v7619_v61 = vpop.f32.mrf.mxu1  ;;  %v8594_v31 = vshll.u32 %v11934_v53, 16  ;;  %v7514_v22 = vunpack.c.l.b16 %v7380_v52 }
 0x549   : > { %v7693_v57 = vadd.f32 %v7619_v61, %v16216_v45  ;;  %v8614_v34 = vrot.slane %v8612_v43, 4  ;;  %v7875_v53 = vsel %vm12509_vm5, %v7873_v0, %v7874_v58 }
 0x54a   : > { %v8328_v8 = vpop.f32.mrf.mxu3  ;;  %v8596_v6 = vrot.slane %v8594_v31, 5  ;;  %v7395_v31 = vshll.u32 %v7091_v39, 16 }
 0x54b   : > { %v8103_v18 = vadd.f32 %v8029_v29, %v7693_v57  ;;  %11306 = vmatmul.msk.bf16.gmra.mxu1 %vm5996_vm14, %v7534_v33  ;;  %v7385_v29 = vrot.slane %v7384_v20, 4  ;;  %v7733_v57 = vld [vmem:[#allocation2 + $0x9c] sm:$0xe]  ;;  %v7405_v33 = vshrl.u32 %v7092_v5, 16  ;;  %v8587_v20 = vsel %vm12201_vm2, %v8582_v49, %v15137_v37 }
 0x54c   : > { %11351 = vmatmul.msk.bf16.gmra.mxu2 %vm5996_vm14, %v7945_v30  ;;  %v15161_v30 = vrot.slane %v8608_v36, 5  ;;  %v11324_v32 = vrot.slane %v7733_v57, 9  ;;  %v7392_v37 = vshrl.u32 %v7091_v39, 16  ;;  %v8601_v49 = vrot.slane %v8599_v40, 4 }
 0x54d   : > { %v15144_v7 = vadd.f32 %v8328_v8, %v8103_v18  ;;  %11463 = vmatmul.msk.bf16.gmra.mxu0 %vm5996_vm14, %v8902_v2  ;;  %v7390_v45 = vsel %vm12201_vm2, %v7385_v29, %v7389_v21  ;;  %v7401_v8 = vshll.u32 %v7092_v5, 16  ;;  %v8602_v18 = vshll.u32 %v8445_v55, 16 }
 0x54e   : > { %v8597_v2 = vsel %vm12201_vm2, %v8592_v9, %v8596_v6  ;;  %v7515_v5 = vunpack.c.l.b16 %v7390_v45  ;;  %v7407_v29 = vrot.slane %v7405_v33, 4  ;;  %v8875_v9 = vunpack.c.l.b16 %v8587_v20  ;;  %v11936_v33 = vld [vmem:[#allocation2 + $0x5c] sm:$0x1] }
 0x54f   : > { %v8604_v55 = vrot.slane %v8602_v18, 5  ;;  %v8876_v44 = vunpack.c.l.b16 %v8597_v2  ;;  %v7927_v36 = vunpack.c.l.b16 %v7875_v53  ;;  %v7394_v0 = vrot.slane %v7392_v37, 4 }
 0x550   : > { %v7621_v56 = vpop.f32.mrf.mxu1  ;;  %v7397_v45 = vrot.slane %v7395_v31, 5  ;;  %v8618_v40 = vshll.u32 %v11936_v33, 16  ;;  %v7411_v20 = vshll.u32 %v15149_v54, 16  ;;  %v7878_v18 = vrot.slane %v7095_v60, 5  ;;  %v15185_v31 = vld [vmem:[#allocation2 + $0xb0] sm:$0x1] }
 0x551   : > { %v7694_v51 = vadd.f32 %v7621_v56, %v7028_v28  ;;  %v7872_v28 = vsel %vm12509_vm5, %v11324_v32, %v7871_v12  ;;  %v8034_v56 = vpop.f32.mrf.mxu2  ;;  %v6732_v12 = vadd.f32 %v14384_v38, %v6301_v19  ;;  %v8448_v54 = vld [vmem:[#allocation2 + $0x60] sm:$0xf] }
 0x552   : > { %v8330_v61 = vpop.f32.mrf.mxu3  ;;  %v7926_v6 = vunpack.c.l.b16 %v7872_v28  ;;  %v7398_v38 = vor.u32 %v7397_v45, %v7394_v0  ;;  %v8620_v32 = vrot.slane %v8618_v40, 5  ;;  %v7413_v37 = vrot.slane %v7411_v20, 5  ;;  %v11702_v45 = vld [vmem:[#allocation2 + $0xa8] sm:$0xff] }
 0x553   : > { %v8104_v59 = vadd.f32 %v8031_v35, %v7694_v51  ;;  %v15168_v35 = vrot.slane %v7401_v8, 5  ;;  %v7535_v51 = vpack.c.b16 %v7515_v5, %v7514_v22  ;;  %v8605_v8 = vor.u32 %v8604_v55, %v8601_v49  ;;  %v7094_v55 = vld [vmem:[#allocation2 + $0xa8] sm:$0xf] }
 0x554   : > { %v7880_v49 = vrot.slane %v7878_v18, 4 }
 0x555   : > { %v15163_v10 = vadd.f32 %v8330_v61, %v8104_v59  ;;  %v8615_v61 = vor.u32 %v8614_v34, %v15161_v30  ;;  %v7408_v3 = vor.u32 %v7407_v29, %v15168_v35  ;;  %v8903_v59 = vpack.c.b16 %v8876_v44, %v8875_v9  ;;  %v7734_v44 = vld [vmem:[#allocation2 + $0xa8] sm:$0xe] }
 0x556   : > { %v7030_v34 = vadd.f32 %v14450_v26, %v6732_v12  ;;  %v8606_v5 = vrot.slane %v8605_v8, 4  ;;  %v7399_v9 = vrot.slane %v7398_v38, 4  ;;  %v7416_v12 = vshrl.u32 %v7094_v55, 16 }
 0x557   : > { %11443 = vmatmul.msk.bf16.gmra.mxu3 %vm5996_vm14, %v11701_v13  ;;  %v8616_v39 = vrot.slane %v8615_v61, 4  ;;  %v11937_v13 = vld [vmem:[#allocation2 + $0x64] sm:$0xf]  ;;  %v7409_v2 = vrot.slane %v7408_v3, 4  ;;  %v7881_v61 = vrot.slane %v15185_v31, 5 }
 0x558   : > { %v7624_v21 = vpop.f32.mrf.mxu1  ;;  %v8632_v22 = vshll.u32 %v11937_v13, 16  ;;  %v8636_v29 = vshrl.u32 %v11937_v13, 16  ;;  %v7404_v3 = vsel %vm12201_vm2, %v7399_v9, %v15168_v35 }
 0x559   : > { %v7695_v43 = vadd.f32 %v7624_v21, %v14377_v25  ;;  %v7946_v25 = vpack.c.b16 %v7927_v36, %v7926_v6  ;;  %v8621_v28 = vsel %vm12201_vm2, %v8616_v39, %v8620_v32  ;;  %v8036_v21 = vpop.f32.mrf.mxu2  ;;  %v7414_v26 = vsel %vm12201_vm2, %v7409_v2, %v7413_v37 }
 0x55a   : > { %v8333_v52 = vpop.f32.mrf.mxu3  ;;  %v7425_v36 = vshll.u32 %v7095_v60, 16  ;;  %v8626_v6 = vshll.u32 %v8448_v54, 16  ;;  %v8638_v8 = vrot.slane %v8636_v29, 4  ;;  %v7517_v40 = vunpack.c.l.b16 %v7414_v26 }
 0x55b   : > { %v8105_v57 = vadd.f32 %v8034_v56, %v7695_v43  ;;  %11307 = vmatmul.msk.bf16.gmra.mxu1 %vm5996_vm14, %v7535_v51  ;;  %v15189_v56 = vrot.slane %v8632_v22, 5  ;;  %v7429_v43 = vshrl.u32 %v7095_v60, 16  ;;  %v7882_v60 = vsel %vm12509_vm5, %v7880_v49, %v7881_v61 }
 0x55c   : > { %11352 = vmatmul.msk.bf16.gmra.mxu2 %vm5996_vm14, %v7946_v25  ;;  %v8611_v25 = vsel %vm12201_vm2, %v8606_v5, %v15161_v30  ;;  %v8878_v20 = vunpack.c.l.b16 %v8621_v28  ;;  %v15205_v39 = vrot.slane %v7425_v36, 5  ;;  %v7516_v13 = vunpack.c.l.b16 %v7404_v3  ;;  %v15220_v3 = vld [vmem:[#allocation2 + $0xc8] sm:$0x1] }
 0x55d   : > { %v15180_v58 = vadd.f32 %v8333_v52, %v8105_v57  ;;  %11464 = vmatmul.msk.bf16.gmra.mxu0 %vm5996_vm14, %v8903_v59  ;;  %v8623_v52 = vshrl.u32 %v8448_v54, 16  ;;  %v7419_v57 = vshll.u32 %v7094_v55, 16  ;;  %v11325_v59 = vrot.slane %v7734_v44, 9  ;;  %v11938_v54 = vld [vmem:[#allocation2 + $0x68] sm:$0x1] }
 0x55e   : > { %v7431_v35 = vrot.slane %v7429_v43, 4  ;;  %v8628_v2 = vrot.slane %v8626_v6, 5  ;;  %v7929_v32 = vunpack.c.l.b16 %v7882_v60  ;;  %v8642_v29 = vshll.u32 %v11938_v54, 16  ;;  %v15216_v6 = vld [vmem:[#allocation2 + $0xc4] sm:$0xf] }
 0x55f   : > { %v7879_v22 = vsel %vm12509_vm5, %v11325_v59, %v7878_v18  ;;  %v8625_v38 = vrot.slane %v8623_v52, 4  ;;  %v7421_v37 = vrot.slane %v7419_v57, 5  ;;  %v7536_v30 = vpack.c.b16 %v7517_v40, %v7516_v13  ;;  %v7097_v52 = vld [vmem:[#allocation2 + $0xb4] sm:$0xf] }
 0x560   : > { %v7626_v53 = vpop.f32.mrf.mxu1  ;;  %v8877_v5 = vunpack.c.l.b16 %v8611_v25  ;;  %v7928_v28 = vunpack.c.l.b16 %v7879_v22  ;;  %v7432_v49 = vor.u32 %v7431_v35, %v15205_v39  ;;  %v8639_v55 = vor.u32 %v8638_v8, %v15189_v56  ;;  %v7735_v35 = vld [vmem:[#allocation2 + $0xb4] sm:$0xe] }
 0x561   : > { %v7696_v19 = vadd.f32 %v7626_v53, %v7030_v34  ;;  %v7418_v53 = vrot.slane %v7416_v12, 4  ;;  %v7435_v18 = vshll.u32 %v15185_v31, 16  ;;  %v8629_v9 = vor.u32 %v8628_v2, %v8625_v38 }
 0x562   : > { %v8335_v0 = vpop.f32.mrf.mxu3  ;;  %v8904_v26 = vpack.c.b16 %v8878_v20, %v8877_v5  ;;  %v7947_v44 = vpack.c.b16 %v7929_v32, %v7928_v28  ;;  %v8644_v43 = vrot.slane %v8642_v29, 5  ;;  %v9260_v31 = vrot.slane %v15216_v6, 5  ;;  %v7099_v20 = vld [vmem:[#allocation2 + $0xbc] sm:$0x1]  ;;  %v11939_v5 = vld [vmem:[#allocation2 + $0x70] sm:$0xf] }
 0x563   : > { %v8106_v51 = vadd.f32 %v8036_v21, %v7696_v19  ;;  %v7098_v21 = vld [vmem:[#allocation2 + $0xb8] sm:$0xf]  ;;  %v7422_v36 = vor.u32 %v7421_v37, %v7418_v53  ;;  %v7437_v12 = vrot.slane %v7435_v18, 5  ;;  %v8630_v57 = vrot.slane %v8629_v9, 4 }
 0x564   : > { %v7885_v61 = vrot.slane %v7098_v21, 5  ;;  %v7440_v13 = vshrl.u32 %v7097_v52, 16  ;;  %v9262_v2 = vrot.slane %v9260_v31, 4  ;;  %v7443_v53 = vshll.u32 %v7097_v52, 16 }
 0x565   : > { %v15197_v33 = vadd.f32 %v8335_v0, %v8106_v51  ;;  %v8451_v51 = vld [vmem:[#allocation2 + $0x6c] sm:$0xf]  ;;  %v7433_v0 = vrot.slane %v7432_v49, 4  ;;  %v7423_v60 = vrot.slane %v7422_v36, 4  ;;  %v7449_v37 = vshll.u32 %v7098_v21, 16 }
 0x566   : > { %v8647_v8 = vshrl.u32 %v8451_v51, 16  ;;  %v7887_v22 = vrot.slane %v7885_v61, 4  ;;  %v7453_v54 = vshrl.u32 %v7098_v21, 16  ;;  %v11326_v29 = vrot.slane %v7735_v35, 9 }
 0x567   : > { %11444 = vmatmul.msk.bf16.gmra.mxu3 %vm5996_vm14, %v11702_v45  ;;  %v8640_v45 = vrot.slane %v8639_v55, 4  ;;  %v7438_v32 = vsel %vm12201_vm2, %v7433_v0, %v7437_v12  ;;  %v8656_v28 = vshll.u32 %v11939_v5, 16  ;;  %v11703_v55 = vld [vmem:[#allocation2 + $0xb4] sm:$0xff]  ;;  %v7428_v18 = vsel %vm12201_vm2, %v7423_v60, %v15205_v39 }
 0x568   : > { %v7629_v34 = vpop.f32.mrf.mxu1  ;;  %v8660_v9 = vshrl.u32 %v11939_v5, 16  ;;  %v7519_v36 = vunpack.c.l.b16 %v7438_v32  ;;  %v7442_v21 = vrot.slane %v7440_v13, 4  ;;  %v7445_v52 = vrot.slane %v7443_v53, 5  ;;  %v11940_v5 = vld [vmem:[#allocation2 + $0x74] sm:$0x1] }
 0x569   : > { %v15210_v19 = vadd.f32 %v7629_v34, %v14471_v15  ;;  %v9110_v15 = vld [vmem:[#allocation2 + $0xc0] sm:$0xe]  ;;  %v8645_v25 = vsel %vm12201_vm2, %v8640_v45, %v8644_v43  ;;  %v9263_v34 = vrot.slane %v15220_v3, 5  ;;  %v7451_v0 = vrot.slane %v7449_v37, 5 }
 0x56a   : > { %v11490_v40 = vrot.slane %v9110_v15, 9  ;;  %v8650_v15 = vshll.u32 %v8451_v51, 16  ;;  %v7455_v45 = vrot.slane %v7453_v54, 4  ;;  %v7033_v12 = vadd.f32 %v14554_v27, %v14560_v23 }
 0x56b   : > { %11308 = vmatmul.msk.bf16.gmra.mxu1 %vm5996_vm14, %v7536_v30  ;;  %v7888_v30 = vrot.slane %v7099_v20, 5  ;;  %v9264_v49 = vsel %vm12509_vm5, %v9262_v2, %v9263_v34  ;;  %v7518_v39 = vunpack.c.l.b16 %v7428_v18  ;;  %v7886_v60 = vsel %vm12509_vm5, %v11326_v29, %v7885_v61 }
 0x56c   : > { %11353 = vmatmul.msk.bf16.gmra.mxu2 %vm5996_vm14, %v7947_v44  ;;  %v9261_v38 = vsel %vm12509_vm5, %v11490_v40, %v9260_v31  ;;  %v9306_v44 = vunpack.c.l.b16 %v9264_v49  ;;  %v8635_v40 = vsel %vm12201_vm2, %v8630_v57, %v15189_v56  ;;  %v8880_v51 = vunpack.c.l.b16 %v8645_v25 }
 0x56d   : > { %11465 = vmatmul.msk.bf16.gmra.mxu0 %vm5996_vm14, %v8904_v26  ;;  %v9305_v26 = vunpack.c.l.b16 %v9261_v38  ;;  %v7889_v43 = vsel %vm12509_vm5, %v7887_v22, %v7888_v30  ;;  %v8658_v22 = vrot.slane %v8656_v28, 5  ;;  %v8662_v38 = vrot.slane %v8660_v9, 4  ;;  %v7101_v30 = vld [vmem:[#allocation2 + $0xc4] sm:$0xf] }
 0x56e   : > { %v7931_v13 = vunpack.c.l.b16 %v7889_v43  ;;  %v7537_v34 = vpack.c.b16 %v7519_v36, %v7518_v39  ;;  %v8649_v32 = vrot.slane %v8647_v8, 4  ;;  %v8652_v53 = vrot.slane %v8650_v15, 5  ;;  %v15260_v39 = vpop.f32.mrf.mxu0 }
 0x56f   : > { %v15240_v31 = vpack.c.b16 %v9306_v44, %v9305_v26  ;;  %v8879_v37 = vunpack.c.l.b16 %v8635_v40  ;;  %v7930_v27 = vunpack.c.l.b16 %v7886_v60  ;;  %v7446_v23 = vor.u32 %v7445_v52, %v7442_v21  ;;  %v7102_v44 = vld [vmem:[#allocation2 + $0xc8] sm:$0x1]  ;;  %v7736_v52 = vld [vmem:[#allocation2 + $0xc0] sm:$0xe] }
 0x570   : > { %v15223_v59 = vpop.f32.mrf.mxu1  ;;  %v7456_v54 = vor.u32 %v7455_v45, %v7451_v0  ;;  %v7459_v61 = vshll.u32 %v7099_v20, 16  ;;  %v8663_v29 = vor.u32 %v8662_v38, %v8658_v22  ;;  %v8653_v25 = vor.u32 %v8652_v53, %v8649_v32  ;;  %v7100_v60 = vld [vmem:[#allocation2 + $0xc0] sm:$0xf]  ;;  %v8454_v38 = vld [vmem:[#allocation2 + $0x78] sm:$0xf] }
 0x571   : > { %v8905_v56 = vpack.c.b16 %v8880_v51, %v8879_v37  ;;  %v7948_v57 = vpack.c.b16 %v7931_v13, %v7930_v27  ;;  %v8666_v28 = vshll.u32 %v11940_v5, 16  ;;  %v7892_v49 = vrot.slane %v7101_v30, 5 }
 0x572   : > { %v7447_v8 = vrot.slane %v7446_v23, 4  ;;  %v7461_v9 = vrot.slane %v7459_v61, 5  ;;  %v8664_v26 = vrot.slane %v8663_v29, 4  ;;  %v8654_v36 = vrot.slane %v8653_v25, 4 }
 0x573   : > { %v8668_v43 = vrot.slane %v8666_v28, 5  ;;  %v7894_v21 = vrot.slane %v7892_v49, 4  ;;  %v7473_v45 = vshll.u32 %v7101_v30, 16  ;;  %v7895_v40 = vrot.slane %v7102_v44, 5 }
 0x574   : > { %v7452_v20 = vsel %vm12201_vm2, %v7447_v8, %v7451_v0  ;;  %v8659_v51 = vsel %vm12201_vm2, %v8654_v36, %v8658_v22  ;;  %v11327_v27 = vrot.slane %v7736_v52, 9  ;;  %v8671_v61 = vshrl.u32 %v8454_v38, 16 }
 0x575   : > { %v8669_v13 = vsel %vm12201_vm2, %v8664_v26, %v8668_v43  ;;  %v7520_v53 = vunpack.c.l.b16 %v7452_v20  ;;  %v7896_v23 = vsel %vm12509_vm5, %v7894_v21, %v7895_v40  ;;  %v8674_v29 = vshll.u32 %v8454_v38, 16  ;;  %v11942_v38 = vld [vmem:[#allocation2 + $0x80] sm:$0x1] }
 0x576   : > { %v7893_v22 = vsel %vm12509_vm5, %v11327_v27, %v7892_v49  ;;  %v8881_v5 = vunpack.c.l.b16 %v8659_v51  ;;  %v8882_v28 = vunpack.c.l.b16 %v8669_v13  ;;  %v7933_v8 = vunpack.c.l.b16 %v7896_v23  ;;  %v11705_v27 = vld [vmem:[#allocation2 + $0xcc] sm:$0xff] }
 0x577   : > { %11445 = vmatmul.msk.bf16.gmra.mxu3 %vm5996_vm14, %v11703_v55  ;;  %v7457_v55 = vrot.slane %v7456_v54, 4  ;;  %v7464_v54 = vshrl.u32 %v7100_v60, 16  ;;  %v7932_v43 = vunpack.c.l.b16 %v7893_v22  ;;  %v8673_v49 = vrot.slane %v8671_v61, 4  ;;  %v8457_v61 = vld [vmem:[#allocation2 + $0x84] sm:$0xf] }
 0x578   : > { %v7634_v35 = vpop.f32.mrf.mxu1  ;;  %v8906_v40 = vpack.c.b16 %v8882_v28, %v8881_v5  ;;  %v11943_v28 = vld [vmem:[#allocation2 + $0x88] sm:$0xf] }
 0x579   : > { %v15249_v2 = vadd.f32 %v7634_v35, %v7033_v12  ;;  %v7462_v15 = vsel %vm12201_vm2, %v7457_v55, %v7461_v9  ;;  %v7477_v12 = vshrl.u32 %v7101_v30, 16  ;;  %v11704_v35 = vld [vmem:[#allocation2 + $0xc0] sm:$0xff]  ;;  %v7467_v30 = vshll.u32 %v7100_v60, 16 }
 0x57a   : > { %v7521_v37 = vunpack.c.l.b16 %v7462_v15  ;;  %v7466_v21 = vrot.slane %v7464_v54, 4  ;;  %v7949_v60 = vpack.c.b16 %v7933_v8, %v7932_v43  ;;  %v8704_v8 = vshll.u32 %v11943_v28, 16 }
 0x57b   : > { %11309 = vmatmul.msk.bf16.gmra.mxu1 %vm5996_vm14, %v7537_v34  ;;  %v11941_v34 = vld [vmem:[#allocation2 + $0x7c] sm:$0xf]  ;;  %v7469_v20 = vrot.slane %v7467_v30, 5  ;;  %v8708_v43 = vshrl.u32 %v11943_v28, 16 }
 0x57c   : > { %11354 = vmatmul.msk.bf16.gmra.mxu2 %vm5996_vm14, %v7948_v57  ;;  %v8680_v0 = vshll.u32 %v11941_v34, 16  ;;  %v8684_v32 = vshrl.u32 %v11941_v34, 16  ;;  %v7479_v57 = vrot.slane %v7477_v12, 4  ;;  %v7538_v9 = vpack.c.b16 %v7521_v37, %v7520_v53 }
 0x57d   : > { %11466 = vmatmul.msk.bf16.gmra.mxu0 %vm5996_vm14, %v8905_v56  ;;  %v7475_v56 = vrot.slane %v7473_v45, 5  ;;  %v8676_v45 = vrot.slane %v8674_v29, 5  ;;  %v7470_v51 = vor.u32 %v7469_v20, %v7466_v21  ;;  %v8690_v34 = vshll.u32 %v11942_v38, 16 }
 0x57e   : > { %v8682_v26 = vrot.slane %v8680_v0, 5  ;;  %v8686_v36 = vrot.slane %v8684_v32, 4 }
 0x57f   : > { %v7480_v15 = vor.u32 %v7479_v57, %v7475_v56  ;;  %v8677_v53 = vor.u32 %v8676_v45, %v8673_v49  ;;  %v8692_v54 = vrot.slane %v8690_v34, 5 }
 0x580   : > { %v15254_v18 = vpop.f32.mrf.mxu1 }
 0x581   : > { %v7481_v13 = vrot.slane %v7480_v15, 4  ;;  %v8678_v22 = vrot.slane %v8677_v53, 4  ;;  %v8460_v53 = vld [vmem:[#allocation2 + $0x90] sm:$0xf] }
 0x583   : > { %v8683_v5 = vsel %vm12201_vm2, %v8678_v22, %v8682_v26  ;;  %v8722_v22 = vshll.u32 %v8460_v53, 16 }
 0x587   : > { %11446 = vmatmul.msk.bf16.gmra.mxu3 %vm5996_vm14, %v11704_v35  ;;  %v7483_v35 = vshll.u32 %v7102_v44, 16 }
 0x588   : > { %v7639_v25 = vpop.f32.mrf.mxu1 }
 0x589   : > { %v15272_v55 = vadd.f32 %v7639_v25, %v14615_v4  ;;  %v8687_v4 = vor.u32 %v8686_v36, %v8682_v26  ;;  %v7485_v32 = vrot.slane %v7483_v35, 5  ;;  %v8695_v36 = vshrl.u32 %v8457_v61, 16 }
 0x58a   : > { %v7018_v52 = vpop.f32.mrf.mxu0  ;;  %v8710_v26 = vrot.slane %v8708_v43, 4 }
 0x58b   : > { %11310 = vmatmul.msk.bf16.gmra.mxu1 %vm5996_vm14, %v7538_v9  ;;  %v15276_v12 = vadd.f32 %v7018_v52, %v15034_v63  ;;  %v8688_v37 = vrot.slane %v8687_v4, 4  ;;  %v7471_v63 = vrot.slane %v7470_v51, 4  ;;  %v7486_v23 = vsel %vm12201_vm2, %v7481_v13, %v7485_v32  ;;  %v11944_v51 = vld [vmem:[#allocation2 + $0x8c] sm:$0x1] }
 0x58c   : > { %11355 = vmatmul.msk.bf16.gmra.mxu2 %vm5996_vm14, %v7949_v60  ;;  %v7523_v29 = vunpack.c.l.b16 %v7486_v23  ;;  %v8883_v52 = vunpack.c.l.b16 %v8683_v5  ;;  %v8697_v45 = vrot.slane %v8695_v36, 4  ;;  %v8706_v60 = vrot.slane %v8704_v8, 5 }
 0x58d   : > { %11467 = vmatmul.msk.bf16.gmra.mxu0 %vm5996_vm14, %v8906_v40  ;;  %v7476_v57 = vsel %vm12201_vm2, %v7471_v63, %v7475_v56  ;;  %v8693_v25 = vsel %vm12201_vm2, %v8688_v37, %v8692_v54  ;;  %v8714_v13 = vshll.u32 %v11944_v51, 16 }
 0x58e   : > { %v7522_v9 = vunpack.c.l.b16 %v7476_v57  ;;  %v8884_v20 = vunpack.c.l.b16 %v8693_v25  ;;  %v8719_v57 = vshrl.u32 %v8460_v53, 16 }
 0x58f   : > { %v8716_v32 = vrot.slane %v8714_v13, 5 }
 0x590   : > { %v15280_v0 = vpop.f32.mrf.mxu1  ;;  %v7539_v15 = vpack.c.b16 %v7523_v29, %v7522_v9  ;;  %v8907_v4 = vpack.c.b16 %v8884_v20, %v8883_v52  ;;  %v8721_v9 = vrot.slane %v8719_v57, 4 }
 0x592   : > { %v7020_v44 = vpop.f32.mrf.mxu0 }
 0x593   : > { %v15285_v30 = vadd.f32 %v7020_v44, %v15045_v16  ;;  %v8698_v16 = vshll.u32 %v8457_v61, 16  ;;  %v11945_v44 = vld [vmem:[#allocation2 + $0x94] sm:$0xf] }
 0x594   : > { %v8732_v61 = vshrl.u32 %v11945_v44, 16 }
 0x595   : > { %v8700_v40 = vrot.slane %v8698_v16, 5 }
 0x596   : > { %v8734_v36 = vrot.slane %v8732_v61, 4 }
 0x597   : > { %11447 = vmatmul.msk.bf16.gmra.mxu3 %vm5996_vm14, %v11705_v27  ;;  %v8701_v38 = vor.u32 %v8700_v40, %v8697_v45  ;;  %v11946_v45 = vld [vmem:[#allocation2 + $0x98] sm:$0x1] }
 0x598   : > { %v7644_v21 = vpop.f32.mrf.mxu1  ;;  %v8738_v40 = vshll.u32 %v11946_v45, 16 }
 0x599   : > { %v15295_v56 = vadd.f32 %v7644_v21, %v14663_v17  ;;  %v8711_v17 = vor.u32 %v8710_v26, %v8706_v60  ;;  %v8702_v27 = vrot.slane %v8701_v38, 4  ;;  %v16219_v21 = vld [vmem:[#allocation26_spill] sm:$0xff] }
 0x59a   : > { %v8984_v49 = vpop.f32.mrf.mxu0  ;;  %v8740_v51 = vrot.slane %v8738_v40, 5  ;;  %v8466_v40 = vld [vmem:[#allocation2 + $0xa8] sm:$0xf] }
 0x59b   : > { %11311 = vmatmul.msk.bf16.gmra.mxu1 %vm5996_vm14, %v7539_v15  ;;  %v15299_v35 = vadd.f32 %v8984_v49, %v15073_v14  ;;  %v8712_v63 = vrot.slane %v8711_v17, 4  ;;  %v8728_v14 = vshll.u32 %v11945_v44, 16  ;;  %v8707_v29 = vsel %vm12201_vm2, %v8702_v27, %v8706_v60  ;;  %v8463_v17 = vld [vmem:[#allocation2 + $0x9c] sm:$0xf] }
 0x59c   : > { %v8885_v16 = vunpack.c.l.b16 %v8707_v29  ;;  %v8746_v57 = vshll.u32 %v8463_v17, 16  ;;  %v16220_v29 = vld [vmem:[#allocation19_spill] sm:$0xff] }
 0x59d   : > { %11468 = vmatmul.msk.bf16.gmra.mxu0 %vm5996_vm14, %v8907_v4  ;;  %v8717_v54 = vsel %vm12201_vm2, %v8712_v63, %v8716_v32  ;;  %v8730_v28 = vrot.slane %v8728_v14, 5  ;;  %v11947_v32 = vld [vmem:[#allocation2 + $0xa0] sm:$0xf]  ;;  %v8743_v14 = vshrl.u32 %v8463_v17, 16  ;;  %v8767_v17 = vshrl.u32 %v8466_v40, 16 }
 0x59e   : > { %v8886_v5 = vunpack.c.l.b16 %v8717_v54  ;;  %v8752_v53 = vshll.u32 %v11947_v32, 16 }
 0x59f   : > { %v8735_v49 = vor.u32 %v8734_v36, %v8730_v28  ;;  %v11948_v36 = vld [vmem:[#allocation2 + $0xa4] sm:$0x1] }
 0x5a0   : > { %v15302_v34 = vpop.f32.mrf.mxu1  ;;  %v8908_v15 = vpack.c.b16 %v8886_v5, %v8885_v16  ;;  %v8762_v16 = vshll.u32 %v11948_v36, 16 }
 0x5a1   : > { %v8736_v26 = vrot.slane %v8735_v49, 4 }
 0x5a2   : > { %v8986_v37 = vpop.f32.mrf.mxu0 }
 0x5a3   : > { %v15305_v23 = vadd.f32 %v8986_v37, %v15093_v50  ;;  %v8724_v50 = vrot.slane %v8722_v22, 5  ;;  %v8741_v38 = vsel %vm12201_vm2, %v8736_v26, %v8740_v51  ;;  %v8756_v37 = vshrl.u32 %v11947_v32, 16 }
 0x5a4   : > { %v8888_v44 = vunpack.c.l.b16 %v8741_v38  ;;  %v8770_v32 = vshll.u32 %v8466_v40, 16 }
 0x5a5   : > { %v8725_v52 = vor.u32 %v8724_v50, %v8721_v9  ;;  %v8758_v22 = vrot.slane %v8756_v37, 4  ;;  %v8748_v9 = vrot.slane %v8746_v57, 5  ;;  %v8769_v57 = vrot.slane %v8767_v17, 4 }
 0x5a7   : > { %v8726_v60 = vrot.slane %v8725_v52, 4  ;;  %v8764_v52 = vrot.slane %v8762_v16, 5 }
 0x5a8   : > { %v7649_v25 = vpop.f32.mrf.mxu1 }
 0x5a9   : > { %v15312_v8 = vadd.f32 %v7649_v25, %v14705_v24 }
 0x5aa   : > { %v8989_v43 = vpop.f32.mrf.mxu0 }
 0x5ab   : > { %11504 = vmatmul.msk.bf16.vlgmr.msra.gmra.mxu1 %vm5996_vm14, %v16219_v21  ;;  %v15317_v20 = vadd.f32 %v8989_v43, %v15110_v41  ;;  %v8731_v41 = vsel %vm12201_vm2, %v8726_v60, %v8730_v28  ;;  %v8745_v28 = vrot.slane %v8743_v14, 4  ;;  %v11949_v60 = vld [vmem:[#allocation2 + $0xac] sm:$0xf] }
 0x5ac   : > { %v8887_v63 = vunpack.c.l.b16 %v8731_v41  ;;  %v8776_v26 = vshll.u32 %v11949_v60, 16 }
 0x5ad   : > { %11469 = vmatmul.msk.bf16.gmra.mxu0 %vm5996_vm14, %v8908_v15  ;;  %v8749_v43 = vor.u32 %v8748_v9, %v8745_v28  ;;  %v8469_v9 = vld [vmem:[#allocation2 + $0xb4] sm:$0xf] }
 0x5ae   : > { %v8909_v5 = vpack.c.b16 %v8888_v44, %v8887_v63  ;;  %v8791_v16 = vshrl.u32 %v8469_v9, 16 }
 0x5af   : > { %v8750_v45 = vrot.slane %v8749_v43, 4 }
 0x5b0   : > { %v15320_v24 = vpop.f32.mrf.mxu1 }
 0x5b2   : > { %v8991_v4 = vpop.f32.mrf.mxu0 }
 0x5b3   : > { %v15323_v13 = vadd.f32 %v8991_v4, %v15127_v62  ;;  %v8754_v62 = vrot.slane %v8752_v53, 5  ;;  %v8780_v4 = vshrl.u32 %v11949_v60, 16 }
 0x5b5   : > { %v8759_v50 = vor.u32 %v8758_v22, %v8754_v62  ;;  %v8755_v51 = vsel %vm12201_vm2, %v8750_v45, %v8754_v62  ;;  %v8782_v37 = vrot.slane %v8780_v4, 4  ;;  %v8772_v62 = vrot.slane %v8770_v32, 5 }
 0x5b7   : > { %v8760_v21 = vrot.slane %v8759_v50, 4 }
 0x5b8   : > { %v7654_v27 = vpop.f32.mrf.mxu1 }
 0x5b9   : > { %v15330_v54 = vadd.f32 %v7654_v27, %v14763_v11  ;;  %v8889_v27 = vunpack.c.l.b16 %v8755_v51  ;;  %v8793_v51 = vrot.slane %v8791_v16, 4 }
 0x5ba   : > { %v8994_v61 = vpop.f32.mrf.mxu0 }
 0x5bb   : > { %11505 = vmatmul.msk.bf16.gmra.mxu1 %vm5996_vm14, %v16220_v29  ;;  %v15335_v25 = vadd.f32 %v8994_v61, %v15144_v7  ;;  %v8765_v7 = vsel %vm12201_vm2, %v8760_v21, %v8764_v52  ;;  %v11950_v61 = vld [vmem:[#allocation2 + $0xb0] sm:$0x1]  ;;  %v8794_v21 = vshll.u32 %v8469_v9, 16  ;;  %v8824_v9 = vshll.u32 %v15216_v6, 16 }
 0x5bc   : > { %v8890_v38 = vunpack.c.l.b16 %v8765_v7  ;;  %v8786_v29 = vshll.u32 %v11950_v61, 16  ;;  %v16221_v7 = vld [vmem:[#allocation114_spill] sm:$0xff] }
 0x5bd   : > { %11470 = vmatmul.msk.bf16.gmra.mxu0 %vm5996_vm14, %v8909_v5  ;;  %v8773_v5 = vor.u32 %v8772_v62, %v8769_v57  ;;  %v7045_v40 = vadd.f32 %v16221_v7, %v14843_v47  ;;  %v11952_v47 = vld [vmem:[#allocation2 + $0xbc] sm:$0x1] }
 0x5be   : > { %v8910_v14 = vpack.c.b16 %v8890_v38, %v8889_v27  ;;  %v8788_v36 = vrot.slane %v8786_v29, 5  ;;  %v8810_v57 = vshll.u32 %v11952_v47, 16 }
 0x5c0   : > { %v15338_v11 = vpop.f32.mrf.mxu1  ;;  %v8812_v61 = vrot.slane %v8810_v57, 5 }
 0x5c2   : > { %v8996_v15 = vpop.f32.mrf.mxu0 }
 0x5c3   : > { %v15341_v49 = vadd.f32 %v8996_v15, %v15163_v10  ;;  %v8778_v10 = vrot.slane %v8776_v26, 5  ;;  %v11951_v15 = vld [vmem:[#allocation2 + $0xb8] sm:$0xf] }
 0x5c4   : > { %v8800_v52 = vshll.u32 %v11951_v15, 16  ;;  %v8804_v45 = vshrl.u32 %v11951_v15, 16  ;;  %v16223_v15 = vld [vmem:[#allocation117_spill] sm:$0xff] }
 0x5c5   : > { %v8783_v22 = vor.u32 %v8782_v37, %v8778_v10  ;;  %v16222_v37 = vld [vmem:[#allocation67_spill] sm:$0xff] }
 0x5c6   : > { %v8802_v38 = vrot.slane %v8800_v52, 5  ;;  %v8806_v17 = vrot.slane %v8804_v45, 4  ;;  %v8826_v45 = vrot.slane %v8824_v9, 5 }
 0x5c7   : > { %v8784_v28 = vrot.slane %v8783_v22, 4 }
 0x5c8   : > { %v7659_v41 = vpop.f32.mrf.mxu1 }
 0x5c9   : > { %v15348_v53 = vadd.f32 %v7659_v41, %v14813_v48  ;;  %v8789_v43 = vsel %vm12201_vm2, %v8784_v28, %v8788_v36  ;;  %v8796_v41 = vrot.slane %v8794_v21, 5  ;;  %v8472_v28 = vld [vmem:[#allocation2 + $0xc0] sm:$0xf] }
 0x5ca   : > { %v8999_v63 = vpop.f32.mrf.mxu0  ;;  %v8892_v4 = vunpack.c.l.b16 %v8789_v43  ;;  %v8815_v43 = vshrl.u32 %v8472_v28, 16  ;;  %v8818_v21 = vshll.u32 %v8472_v28, 16 }
 0x5cb   : > { %11506 = vmatmul.msk.bf16.gmra.mxu1 %vm5996_vm14, %v14402_v46  ;;  %v15353_v44 = vadd.f32 %v8999_v63, %v15180_v58  ;;  %v8774_v58 = vrot.slane %v8773_v5, 4  ;;  %v8797_v63 = vor.u32 %v8796_v41, %v8793_v51 }
 0x5cd   : > { %11471 = vmatmul.msk.bf16.gmra.mxu0 %vm5996_vm14, %v8910_v14  ;;  %v8779_v60 = vsel %vm12201_vm2, %v8774_v58, %v8778_v10  ;;  %v8807_v14 = vor.u32 %v8806_v17, %v8802_v38  ;;  %v8798_v62 = vrot.slane %v8797_v63, 4  ;;  %v8475_v17 = vld [vmem:[#allocation2 + $0xcc] sm:$0xf] }
 0x5ce   : > { %v8891_v32 = vunpack.c.l.b16 %v8779_v60  ;;  %v8839_v63 = vshrl.u32 %v8475_v17, 16 }
 0x5cf   : > { %v8808_v22 = vrot.slane %v8807_v14, 4  ;;  %v8803_v29 = vsel %vm12201_vm2, %v8798_v62, %v8802_v38  ;;  %v8842_v14 = vshll.u32 %v8475_v17, 16 }
 0x5d0   : > { %v15356_v48 = vpop.f32.mrf.mxu1  ;;  %v8911_v27 = vpack.c.b16 %v8892_v4, %v8891_v32  ;;  %v8893_v58 = vunpack.c.l.b16 %v8803_v29  ;;  %v8820_v4 = vrot.slane %v8818_v21, 5  ;;  %v15389_v32 = vld [vmem:[#allocation2 + $0xd0] sm:$0xf] }
 0x5d1   : > { %v8813_v5 = vsel %vm12201_vm2, %v8808_v22, %v8812_v61  ;;  %v8848_v47 = vshll.u32 %v15389_v32, 16  ;;  %v8852_v57 = vshrl.u32 %v15389_v32, 16  ;;  %v8841_v61 = vrot.slane %v8839_v63, 4  ;;  %v16227_v21 = vld [vmem:[#allocation125_spill] sm:$0xff] }
 0x5d2   : > { %v9001_v50 = vpop.f32.mrf.mxu0  ;;  %v8894_v16 = vunpack.c.l.b16 %v8813_v5  ;;  %v8844_v29 = vrot.slane %v8842_v14, 5 }
 0x5d3   : > { %v15359_v46 = vadd.f32 %v9001_v50, %v15197_v33  ;;  %v8828_v50 = vshrl.u32 %v15216_v6, 16  ;;  %v8834_v6 = vshll.u32 %v15220_v3, 16  ;;  %v8850_v5 = vrot.slane %v8848_v47, 5 }
 0x5d4   : > { %v8912_v60 = vpack.c.b16 %v8894_v16, %v8893_v58  ;;  %v8854_v28 = vrot.slane %v8852_v57, 4  ;;  %v16225_v58 = vld [vmem:[#allocation126_spill] sm:$0xff]  ;;  %v16226_v16 = vld [vmem:[#allocation124_spill] sm:$0xff] }
 0x5d5   : > { %v8830_v7 = vrot.slane %v8828_v50, 4 }
 0x5d7   : > { %v8831_v51 = vor.u32 %v8830_v7, %v8826_v45 }
 0x5d8   : > { %v7664_v26 = vpop.f32.mrf.mxu1 }
 0x5d9   : > { %v15367_v33 = vadd.f32 %v7664_v26, %v7045_v40  ;;  %v16224_v40 = vld [vmem:[#allocation72_spill] sm:$0xff]  ;;  %v8817_v26 = vrot.slane %v8815_v43, 4  ;;  %v6351_v43 = vadd.f32 %v16226_v16, %v16225_v58  ;;  %v16233_v58 = vld [vmem:[#allocation130_spill] sm:$0xff] }
 0x5da   : > { %v7052_v16 = vadd.f32 %v15260_v39, %v16233_v58 }
 0x5db   : > { %11507 = vmatmul.msk.bf16.gmra.mxu1 %vm5996_vm14, %v16222_v37  ;;  %v8821_v38 = vor.u32 %v8820_v4, %v8817_v26  ;;  %v8832_v37 = vrot.slane %v8831_v51, 4  ;;  %v16229_v51 = vld [vmem:[#allocation127_spill] sm:$0xff] }
 0x5dd   : > { %11472 = vmatmul.msk.bf16.gmra.mxu0 %vm5996_vm14, %v8911_v27  ;;  %v8836_v27 = vrot.slane %v8834_v6, 5  ;;  %v8822_v62 = vrot.slane %v8821_v38, 4  ;;  %v6752_v6 = vadd.f32 %v16229_v51, %v6351_v43  ;;  %v16230_v38 = vld [vmem:[#allocation128_spill] sm:$0xff]  ;;  %v16235_v51 = vld [vmem:[#allocation98_spill] sm:$0xff] }
 0x5df   : > { %v8837_v22 = vsel %vm12201_vm2, %v8832_v37, %v8836_v27  ;;  %v8827_v3 = vsel %vm12201_vm2, %v8822_v62, %v8826_v45  ;;  %v8855_v45 = vor.u32 %v8854_v28, %v8850_v5  ;;  %v7050_v17 = vadd.f32 %v16230_v38, %v6752_v6  ;;  %v8039_v6 = vpop.f32.mrf.mxu2 }
 0x5e0   : > { %v15372_v10 = vpop.f32.mrf.mxu1  ;;  %v8896_v50 = vunpack.c.l.b16 %v8837_v22  ;;  %v8895_v7 = vunpack.c.l.b16 %v8827_v3 }
 0x5e1   : > { %v8856_v27 = vrot.slane %v8855_v45, 4  ;;  %v15437_v45 = vld [vmem:[%s15881_s5] ss:$0 sm:$0xff] }
 0x5e2   : > { %v8913_v4 = vpack.c.b16 %v8896_v50, %v8895_v7  ;;  %v16232_v50 = vld [vmem:[#allocation86_spill] sm:$0xff]  ;;  %v16234_v7 = vld [vmem:[#allocation91_spill] sm:$0xff] }
 0x5e8   : > { %v7669_v36 = vpop.f32.mrf.mxu1 }
 0x5e9   : > { %v15381_v52 = vadd.f32 %v7669_v36, %v16223_v15  ;;  %v15397_v36 = vld [vmem:[#allocation2 + $0xd4] sm:$0x1] }
 0x5ea   : > { %v8858_v26 = vshll.u32 %v15397_v36, 16 }
 0x5eb   : > { %11508 = vmatmul.msk.bf16.gmra.mxu1 %vm5996_vm14, %v16224_v40  ;;  %v16228_v40 = vld [vmem:[#allocation37_spill] sm:$0xff] }
 0x5ec   : > { %v8860_v63 = vrot.slane %v8858_v26, 5 }
 0x5ed   : > { %11473 = vmatmul.msk.bf16.gmra.mxu0 %vm5996_vm14, %v8912_v60  ;;  %v8845_v60 = vor.u32 %v8844_v29, %v8841_v61  ;;  %v16231_v29 = vld [vmem:[#allocation129_spill] sm:$0xff] }
 0x5ee   : > { %v8861_v62 = vsel %vm12201_vm2, %v8856_v27, %v8860_v63 }
 0x5ef   : > { %v8846_v37 = vrot.slane %v8845_v60, 4  ;;  %v8898_v3 = vunpack.c.l.b16 %v8861_v62 }
 0x5f0   : > { %v15387_v41 = vpop.f32.mrf.mxu1 }
 0x5f1   : > { %v8851_v57 = vsel %vm12201_vm2, %v8846_v37, %v8850_v5  ;;  %v9004_v37 = vpop.f32.mrf.mxu0 }
 0x5f2   : > { %v8897_v22 = vunpack.c.l.b16 %v8851_v57  ;;  %v8041_v57 = vpop.f32.mrf.mxu2 }
 0x5f8   : > { %v7674_v9 = vpop.f32.mrf.mxu1 }
 0x5f9   : > { %v15402_v15 = vadd.f32 %v7674_v9, %v16227_v21  ;;  %v8914_v9 = vpack.c.b16 %v8898_v3, %v8897_v22 }
 0x5fb   : > { %11509 = vmatmul.msk.bf16.gmra.mxu1 %vm5996_vm14, %v16228_v40 }
 0x5fd   : > { %11474 = vmatmul.msk.bf16.gmra.mxu0 %vm5996_vm14, %v8913_v4 }
 0x600   : > { %v7676_v14 = vpop.f32.mrf.mxu1 }
 0x601   : > { %v15410_v47 = vadd.f32 %v7676_v14, %v7050_v17  ;;  %v8338_v17 = vpop.f32.mrf.mxu3  ;;  %v16236_v14 = vld [vmem:[#allocation100_spill] sm:$0xff] }
 0x608   : > { %v7679_v61 = vpop.f32.mrf.mxu1 }
 0x609   : > { %v15417_v28 = vadd.f32 %v7679_v61, %v16231_v29  ;;  %v8340_v62 = vpop.f32.mrf.mxu3  ;;  %v8044_v29 = vpop.f32.mrf.mxu2 }
 0x60b   : > { %11510 = vmatmul.msk.bf16.gmra.mxu1 %vm5996_vm14, %v16232_v50 }
 0x60d   : > { %11475 = vmatmul.msk.bf16.gmra.mxu0 %vm5996_vm14, %v8914_v9 }
 0x610   : > { %v7681_v43 = vpop.f32.mrf.mxu1 }
 0x611   : > { %v15424_v5 = vadd.f32 %v7681_v43, %v7052_v16  ;;  %v8343_v9 = vpop.f32.mrf.mxu3  ;;  %v16237_v43 = vld [vmem:[#allocation106_spill] sm:$0xff] }
 0x618   : > { %v7684_v42 = vpop.f32.mrf.mxu1 }
 0x619   : > { %v15427_v21 = vadd.f32 %v7684_v42, %v15276_v12  ;;  %v8046_v42 = vpop.f32.mrf.mxu2 }
 0x61b   : > { %11511 = vmatmul.msk.bf16.gmra.mxu1 %vm5996_vm14, %v16234_v7 }
 0x620   : > { %v7686_v40 = vpop.f32.mrf.mxu1 }
 0x621   : > { %v15432_v60 = vadd.f32 %v7686_v40, %v15285_v30  ;;  %v8345_v40 = vpop.f32.mrf.mxu3 }
 0x628   : > { %v9394_v39 = vpop.f32.mrf.mxu1 }
 0x629   : > { %v9474_v26 = vadd.f32 %v9394_v39, %v15299_v35 }
 0x62b   : > { %v9510_v4 = vadd.f32 %v15437_v45, %v9474_v26  ;;  %11512 = vmatmul.msk.bf16.gmra.mxu1 %vm5996_vm14, %v16235_v51  ;;  %v8049_v51 = vpop.f32.mrf.mxu2 }
 0x62d   : > { %9574 = vrot.lane.b32.xlu2 %v9510_v4, %s12052_s11 }
 0x630   : > { %v9396_v12 = vpop.f32.mrf.mxu1 }
 0x631   : > { %v9475_v30 = vadd.f32 %v9396_v12, %v15305_v23  ;;  %v9006_v23 = vpop.f32.mrf.mxu0 }
 0x633   : > { %v9511_v38 = vadd.f32 %v15437_v45, %v9475_v30  ;;  %v16238_v30 = vld [vmem:[#allocation115_spill] sm:$0xff] }
 0x635   : > { %9576 = vrot.lane.b32.xlu0 %v9511_v38, %s12052_s11  ;;  %v8348_v38 = vpop.f32.mrf.mxu3 }
 0x638   : > { %v9399_v27 = vpop.f32.mrf.mxu1 }
 0x639   : > { %v9476_v35 = vadd.f32 %v9399_v27, %v15317_v20  ;;  %v9009_v58 = vpop.f32.mrf.mxu0  ;;  %v16239_v27 = vld [vmem:[#allocation70_spill] sm:$0xff] }
 0x63b   : > { %v9512_v63 = vadd.f32 %v15437_v45, %v9476_v35  ;;  %11513 = vmatmul.msk.bf16.gmra.mxu1 %vm5996_vm14, %v16236_v14  ;;  %v16240_v35 = vld [vmem:[#allocation65_spill] sm:$0xff] }
 0x63d   : > { %9578 = vrot.lane.b32.xlu1 %v9512_v63, %s12052_s11  ;;  %v6306_v63 = vadd.f32 %v16240_v35, %v16239_v27  ;;  %v16245_v35 = vld [vmem:[#allocation36_spill] sm:$0xff] }
 0x640   : > { %v9401_v22 = vpop.f32.mrf.mxu1 }
 0x641   : > { %v9477_v3 = vadd.f32 %v9401_v22, %v15323_v13  ;;  %v9011_v26 = vpop.f32.mrf.mxu0  ;;  %v16241_v22 = vld [vmem:[#allocation33_spill] sm:$0xff] }
 0x643   : > { %v9513_v61 = vadd.f32 %v15437_v45, %v9477_v3  ;;  %v6734_v3 = vadd.f32 %v16241_v22, %v6306_v63 }
 0x645   : > { %9580 = vrot.lane.b32.xlu2 %v9513_v61, %s12052_s11  ;;  %v8107_v61 = vadd.f32 %v8039_v6, %v15210_v19  ;;  %v16244_v6 = vld [vmem:[#allocation34_spill] sm:$0xff] }
 0x646   : > { %v6311_v63 = vadd.f32 %v16245_v35, %v16244_v6 }
 0x648   : > { %v9404_v20 = vpop.f32.mrf.mxu1 }
 0x649   : > { %v9478_v50 = vadd.f32 %v9404_v20, %v15335_v25  ;;  %v16242_v20 = vld [vmem:[#allocation32_spill] sm:$0xff] }
 0x64b   : > { %v9514_v16 = vadd.f32 %v15437_v45, %v9478_v50  ;;  %11514 = vmatmul.msk.bf16.gmra.mxu1 %vm5996_vm14, %v16237_v43  ;;  %v7032_v50 = vadd.f32 %v16242_v20, %v6734_v3  ;;  %v8051_v43 = vpop.f32.mrf.mxu2 }
 0x64d   : > { %9582 = vrot.lane.b32.xlu0 %v9514_v16, %s12052_s11 }
 0x650   : > { %v9406_v7 = vpop.f32.mrf.mxu1 }
 0x651   : > { %v9479_v13 = vadd.f32 %v9406_v7, %v15341_v49  ;;  %v9014_v49 = vpop.f32.mrf.mxu0  ;;  %v8406_v7 = vadd.f32 %v8338_v17, %v8107_v61 }
 0x653   : > { %v9515_v39 = vadd.f32 %v15437_v45, %v9479_v13  ;;  %v7698_v13 = vadd.f32 %v15223_v59, %v7032_v50  ;;  %v8054_v59 = vpop.f32.mrf.mxu2  ;;  %v16247_v50 = vld [vmem:[#allocation75_spill] sm:$0xff] }
 0x655   : > { %9584 = vrot.lane.b32.xlu1 %v9515_v39, %s12052_s11  ;;  %v8350_v39 = vpop.f32.mrf.mxu3 }
 0x658   : > { %v9409_v4 = vpop.f32.mrf.mxu1 }
 0x659   : > { %v9480_v25 = vadd.f32 %v9409_v4, %v15353_v44  ;;  %v9072_v4 = vadd.f32 %v9004_v37, %v8406_v7 }
 0x65b   : > { %v9516_v12 = vadd.f32 %v15437_v45, %v9480_v25  ;;  %11515 = vmatmul.msk.bf16.gmra.mxu1 %vm5996_vm14, %v16238_v30  ;;  %v15477_v25 = vpop.f32.mrf.mxu0  ;;  %v8108_v30 = vadd.f32 %v8041_v57, %v7698_v13  ;;  %v8109_v57 = vadd.f32 %v8044_v29, %v15249_v2  ;;  %v16248_v29 = vld [vmem:[#allocation122_spill] sm:$0xff] }
 0x65d   : > { %9586 = vrot.lane.b32.xlu2 %v9516_v12, %s12052_s11  ;;  %v8407_v17 = vadd.f32 %v8340_v62, %v8108_v30  ;;  %v15486_v3 = vpop.f32.mrf.mxu3  ;;  %v8408_v13 = vadd.f32 %v8343_v9, %v8109_v57  ;;  %v16250_v9 = vld [vmem:[#allocation83_spill] sm:$0xff] }
 0x65f   : > { %v9073_v37 = vadd.f32 %v9006_v23, %v8407_v17  ;;  %v16251_v17 = vld [vmem:[#allocation85_spill] sm:$0xff] }
 0x660   : > { %v9411_v14 = vpop.f32.mrf.mxu1 }
 0x661   : > { %v9481_v44 = vadd.f32 %v9411_v14, %v15359_v46  ;;  %v16243_v46 = vld [vmem:[#allocation121_spill] sm:$0xff]  ;;  %v16246_v14 = vld [vmem:[#allocation76_spill] sm:$0xff] }
 0x662   : > { %v6736_v22 = vadd.f32 %v16246_v14, %v6311_v63  ;;  %v8111_v14 = vadd.f32 %v8049_v51, %v15272_v55 }
 0x663   : > { %v9517_v16 = vadd.f32 %v15437_v45, %v9481_v44  ;;  %v15489_v20 = vpop.f32.mrf.mxu0 }
 0x665   : > { %9588 = vrot.lane.b32.xlu0 %v9517_v16, %s12052_s11  ;;  %v7034_v16 = vadd.f32 %v16247_v50, %v6736_v22 }
 0x667   : > { %v7700_v62 = vadd.f32 %v15254_v18, %v7034_v16  ;;  %v16249_v18 = vld [vmem:[#allocation84_spill] sm:$0xff] }
 0x668   : > { %v9414_v12 = vpop.f32.mrf.mxu1  ;;  %v6316_v35 = vadd.f32 %v16250_v9, %v16249_v18 }
 0x669   : > { %v9482_v27 = vadd.f32 %v9414_v12, %v9072_v4  ;;  %v9074_v4 = vadd.f32 %v9009_v58, %v8408_v13  ;;  %v8056_v12 = vpop.f32.mrf.mxu2  ;;  %v8110_v30 = vadd.f32 %v8046_v42, %v7700_v62  ;;  %v9267_v62 = vrot.slane %v15389_v32, 5 }
 0x66a   : > { %v6738_v42 = vadd.f32 %v16251_v17, %v6316_v35  ;;  %v8113_v17 = vadd.f32 %v8054_v59, %v15295_v56 }
 0x66b   : > { %v9518_v19 = vadd.f32 %v15437_v45, %v9482_v27  ;;  %11516 = vmatmul.msk.bf16.gmra.mxu1 %vm5996_vm14, %v16243_v46  ;;  %v15500_v46 = vpop.f32.mrf.mxu0  ;;  %v8409_v6 = vadd.f32 %v8345_v40, %v8110_v30  ;;  %v8410_v40 = vadd.f32 %v8348_v38, %v8111_v14  ;;  %v16254_v30 = vld [vmem:[#allocation88_spill] sm:$0xff] }
 0x66d   : > { %9590 = vrot.lane.b32.xlu1 %v9518_v19, %s12052_s11  ;;  %v15495_v19 = vpop.f32.mrf.mxu3  ;;  %v9075_v58 = vadd.f32 %v9011_v26, %v8409_v6  ;;  %v9076_v26 = vadd.f32 %v9014_v49, %v8410_v40  ;;  %v9270_v6 = vrot.slane %v15397_v36, 5  ;;  %v16256_v36 = vld [vmem:[#allocation92_spill] sm:$0xff] }
 0x670   : > { %v9416_v61 = vpop.f32.mrf.mxu1 }
 0x671   : > { %v9483_v44 = vadd.f32 %v9416_v61, %v9073_v37  ;;  %v8059_v37 = vpop.f32.mrf.mxu2  ;;  %v16252_v61 = vld [vmem:[#allocation87_spill] sm:$0xff] }
 0x672   : > { %v7036_v57 = vadd.f32 %v16252_v61, %v6738_v42 }
 0x673   : > { %v9519_v7 = vadd.f32 %v15437_v45, %v9483_v44 }
 0x674   : > { %v7702_v16 = vadd.f32 %v15280_v0, %v7036_v57  ;;  %v8412_v57 = vadd.f32 %v15486_v3, %v8113_v17 }
 0x675   : > { %9592 = vrot.lane.b32.xlu2 %v9519_v7, %s12052_s11  ;;  %v15509_v50 = vpop.f32.mrf.mxu3  ;;  %v15513_v7 = vpop.f32.mrf.mxu0 }
 0x676   : > { %v8112_v55 = vadd.f32 %v8051_v43, %v7702_v16  ;;  %v16255_v43 = vld [vmem:[#allocation90_spill] sm:$0xff]  ;;  %v9078_v40 = vadd.f32 %v15489_v20, %v8412_v57 }
 0x678   : > { %v9419_v23 = vpop.f32.mrf.mxu1  ;;  %v8411_v49 = vadd.f32 %v8350_v39, %v8112_v55 }
 0x679   : > { %v9484_v27 = vadd.f32 %v9419_v23, %v9074_v4  ;;  %v9111_v4 = vld [vmem:[#allocation2 + $0xcc] sm:$0xe]  ;;  %v16253_v23 = vld [vmem:[#allocation89_spill] sm:$0xff]  ;;  %v8061_v0 = vpop.f32.mrf.mxu2 }
 0x67a   : > { %v11491_v38 = vrot.slane %v9111_v4, 9  ;;  %v9077_v9 = vadd.f32 %v15477_v25, %v8411_v49  ;;  %v16258_v4 = vld [vmem:[#allocation93_spill] sm:$0xff] }
 0x67b   : > { %v9520_v2 = vadd.f32 %v15437_v45, %v9484_v27  ;;  %11517 = vmatmul.msk.bf16.gmra.mxu1 %vm5996_vm14, %v16248_v29  ;;  %v6321_v27 = vadd.f32 %v16254_v30, %v16253_v23  ;;  %v9269_v29 = vrot.slane %v9267_v62, 4 }
 0x67d   : > { %9594 = vrot.lane.b32.xlu0 %v9520_v2, %s12052_s11  ;;  %v8360_v32 = vpop.f32.mrf.mxu3  ;;  %v6740_v18 = vadd.f32 %v16255_v43, %v6321_v27  ;;  %v9026_v35 = vpop.f32.mrf.mxu0 }
 0x67f   : > { %v7038_v39 = vadd.f32 %v16256_v36, %v6740_v18  ;;  %v16261_v18 = vld [vmem:[#allocation97_spill] sm:$0xff] }
 0x680   : > { %v9421_v63 = vpop.f32.mrf.mxu1 }
 0x681   : > { %v9485_v22 = vadd.f32 %v9421_v63, %v9075_v58  ;;  %v9268_v63 = vsel %vm12509_vm5, %v11491_v38, %v9267_v62  ;;  %v7704_v25 = vadd.f32 %v15302_v34, %v7038_v39  ;;  %v16259_v34 = vld [vmem:[#allocation7_spill] sm:$0xff]  ;;  %v16260_v38 = vld [vmem:[#allocation94_spill] sm:$0xff] }
 0x682   : > { %v6326_v23 = vadd.f32 %v16259_v34, %v16258_v4 }
 0x683   : > { %v9521_v44 = vadd.f32 %v15437_v45, %v9485_v22  ;;  %v9307_v22 = vunpack.c.l.b16 %v9268_v63  ;;  %v8114_v56 = vadd.f32 %v8056_v12, %v7704_v25 }
 0x685   : > { %9596 = vrot.lane.b32.xlu1 %v9521_v44, %s12052_s11  ;;  %v8064_v44 = vpop.f32.mrf.mxu2  ;;  %v8363_v16 = vpop.f32.mrf.mxu3  ;;  %v8413_v30 = vadd.f32 %v15495_v19, %v8114_v56 }
 0x686   : > { %v9029_v62 = vpop.f32.mrf.mxu0  ;;  %v8117_v4 = vadd.f32 %v8064_v44, %v15330_v54 }
 0x687   : > { %v9575_v59 = vpop.permute.xlu2 %9574  ;;  %v9079_v20 = vadd.f32 %v15500_v46, %v8413_v30 }
 0x688   : > { %v9424_v13 = vpop.f32.mrf.mxu1 }
 0x689   : > { %v9486_v51 = vadd.f32 %v9424_v13, %v9076_v26 }
 0x68b   : > { %v9522_v2 = vadd.f32 %v15437_v45, %v9486_v51  ;;  %11518 = vmatmul.msk.bf16.gmra.mxu1 %vm5996_vm14, %v15240_v31  ;;  %v9271_v31 = vsel %vm12509_vm5, %v9269_v29, %v9270_v6  ;;  %v16257_v51 = vld [vmem:[#allocation8_spill] sm:$0xff]  ;;  %v6742_v29 = vadd.f32 %v16260_v38, %v6326_v23  ;;  %v8115_v6 = vadd.f32 %v8059_v37, %v15312_v8  ;;  %v16262_v37 = vld [vmem:[#allocation38_spill] sm:$0xff] }
 0x68c   : > { %v9308_v61 = vunpack.c.l.b16 %v9271_v31  ;;  %v9670_v3 = vadd.f32 %v9575_v59, %v16257_v51  ;;  %v16266_v51 = vld [vmem:[#allocation102_spill] sm:$0xff]  ;;  %v16268_v38 = vld [vmem:[#allocation40_spill] sm:$0xff] }
 0x68d   : > { %9598 = vrot.lane.b32.xlu2 %v9522_v2, %s12052_s11  ;;  %v8066_v27 = vpop.f32.mrf.mxu2  ;;  %v8365_v43 = vpop.f32.mrf.mxu3  ;;  %v8414_v31 = vadd.f32 %v15509_v50, %v8115_v6  ;;  %v8416_v6 = vadd.f32 %v8363_v16, %v8117_v4 }
 0x68e   : > { %v9324_v1 = vpack.c.b16 %v9308_v61, %v9307_v22  ;;  %v9734_v12 = vmul.f32 0.2, %v9670_v3  ;;  %vm9702_vm0 = vcmp.ge.f32.partialorder %v9670_v3, 0.0  ;;  %v9031_v63 = vpop.f32.mrf.mxu0 }
 0x68f   : > { %v9080_v17 = vadd.f32 %v15513_v7, %v8414_v31  ;;  %v9082_v44 = vadd.f32 %v9029_v62, %v8416_v6  ;;  %v16277_v6 = vld [vmem:[#allocation110_spill] sm:$0xff] }
 0x690   : > { %v9426_v58 = vpop.f32.mrf.mxu1  ;;  %v9766_v19 = vsel %vm9702_vm0, %v9670_v3, %v9734_v12 }
 0x691   : > { %v9487_v42 = vadd.f32 %v9426_v58, %v9077_v9  ;;  %v7040_v9 = vadd.f32 %v16261_v18, %v6742_v29 }
 0x693   : > { %v9523_v14 = vadd.f32 %v15437_v45, %v9487_v42  ;;  %v7706_v46 = vadd.f32 %v15320_v24, %v7040_v9  ;;  %v16263_v24 = vld [vmem:[#allocation101_spill] sm:$0xff] }
 0x695   : > { %9600 = vrot.lane.b32.xlu0 %v9523_v14, %s12052_s11  ;;  %v8116_v39 = vadd.f32 %v8061_v0, %v7706_v46  ;;  %v8069_v22 = vpop.f32.mrf.mxu2  ;;  %v8368_v50 = vpop.f32.mrf.mxu3  ;;  %v16265_v0 = vld [vmem:[#allocation9_spill] sm:$0xff]  ;;  %v16269_v46 = vld [vmem:[#allocation108_spill] sm:$0xff] }
 0x696   : > { %v9034_v7 = vpop.f32.mrf.mxu0 }
 0x698   : > { %v9429_v26 = vpop.f32.mrf.mxu1 }
 0x699   : > { %v9488_v13 = vadd.f32 %v9429_v26, %v9078_v40  ;;  %v16264_v40 = vld [vmem:[#allocation99_spill] sm:$0xff]  ;;  %v8415_v26 = vadd.f32 %v8360_v32, %v8116_v39 }
 0x69b   : > { %v9524_v55 = vadd.f32 %v15437_v45, %v9488_v13  ;;  %11519 = vmatmul.msk.bf16.gmra.mxu1 %vm5996_vm14, %v9324_v1  ;;  %v6331_v1 = vadd.f32 %v16264_v40, %v16263_v24  ;;  %v9081_v56 = vadd.f32 %v9026_v35, %v8415_v26  ;;  %v8119_v24 = vadd.f32 %v8069_v22, %v15348_v53  ;;  %v16274_v53 = vld [vmem:[#allocation44_spill] sm:$0xff] }
 0x69d   : > { %9602 = vrot.lane.b32.xlu1 %v9524_v55, %s12052_s11  ;;  %v6744_v3 = vadd.f32 %v16266_v51, %v6331_v1  ;;  %v8370_v54 = vpop.f32.mrf.mxu3 }
 0x69e   : > { %v9036_v18 = vpop.f32.mrf.mxu0 }
 0x69f   : > { %v9581_v34 = vpop.permute.xlu2 %9580 }
 0x6a0   : > { %v9431_v2 = vpop.f32.mrf.mxu1  ;;  %v9673_v29 = vadd.f32 %v9581_v34, %v16268_v38 }
 0x6a1   : > { %v9489_v49 = vadd.f32 %v9431_v2, %v9079_v20  ;;  %v16267_v20 = vld [vmem:[#allocation103_spill] sm:$0xff]  ;;  %v8071_v2 = vpop.f32.mrf.mxu2 }
 0x6a2   : > { %v7042_v32 = vadd.f32 %v16267_v20, %v6744_v3  ;;  %v9737_v9 = vmul.f32 0.2, %v9673_v29  ;;  %vm9705_vm3 = vcmp.ge.f32.partialorder %v9673_v29, 0.0 }
 0x6a3   : > { %v9525_v58 = vadd.f32 %v15437_v45, %v9489_v49 }
 0x6a4   : > { %v7708_v49 = vadd.f32 %v15338_v11, %v7042_v32  ;;  %v9769_v16 = vsel %vm9705_vm3, %v9673_v29, %v9737_v9 }
 0x6a5   : > { %9894 = vrot.lane.b32.xlu1 %v9766_v19, %s12052_s11  ;;  %9604 = vrot.lane.b32.xlu2 %v9525_v58, %s12052_s11 }
 0x6a6   : > { %v8118_v19 = vadd.f32 %v8066_v27, %v7708_v49  ;;  %v16272_v27 = vld [vmem:[#allocation42_spill] sm:$0xff]  ;;  %v9039_v1 = vpop.f32.mrf.mxu0 }
 0x6a7   : > { %v9577_v8 = vpop.permute.xlu0 %9576 }
 0x6a8   : > { %v9671_v42 = vadd.f32 %v9577_v8, %v16262_v37  ;;  %v9434_v36 = vpop.f32.mrf.mxu1 }
 0x6a9   : > { %v9490_v14 = vadd.f32 %v9434_v36, %v9080_v17  ;;  %v16270_v17 = vld [vmem:[#allocation107_spill] sm:$0xff]  ;;  %v8074_v11 = vpop.f32.mrf.mxu2  ;;  %v16271_v36 = vld [vmem:[#allocation109_spill] sm:$0xff] }
 0x6aa   : > { %v9735_v61 = vmul.f32 0.2, %v9671_v42  ;;  %vm9703_vm1 = vcmp.ge.f32.partialorder %v9671_v42, 0.0  ;;  %v6336_v8 = vadd.f32 %v16270_v17, %v16269_v46 }
 0x6ab   : > { %v9526_v57 = vadd.f32 %v15437_v45, %v9490_v14 }
 0x6ac   : > { %v9767_v25 = vsel %vm9703_vm1, %v9671_v42, %v9735_v61  ;;  %v8417_v42 = vadd.f32 %v8365_v43, %v8118_v19  ;;  %v6746_v62 = vadd.f32 %v16271_v36, %v6336_v8  ;;  %v8373_v61 = vpop.f32.mrf.mxu3  ;;  %v16273_v43 = vld [vmem:[#allocation113_spill] sm:$0xff]  ;;  %v16279_v8 = vld [vmem:[#allocation116_spill] sm:$0xff] }
 0x6ad   : > { %9896 = vrot.lane.b32.xlu2 %v9767_v25, %s12052_s11  ;;  %9606 = vrot.lane.b32.xlu0 %v9526_v57, %s12052_s11 }
 0x6ae   : > { %v9083_v39 = vadd.f32 %v9031_v63, %v8417_v42 }
 0x6af   : > { %v9579_v59 = vpop.permute.xlu1 %9578 }
 0x6b0   : > { %v9672_v13 = vadd.f32 %v9579_v59, %v16265_v0  ;;  %v9436_v55 = vpop.f32.mrf.mxu1 }
 0x6b1   : > { %v9491_v23 = vadd.f32 %v9436_v55, %v9081_v56  ;;  %v7044_v56 = vadd.f32 %v16273_v43, %v6746_v62  ;;  %v8076_v3 = vpop.f32.mrf.mxu2 }
 0x6b2   : > { %v9736_v30 = vmul.f32 0.2, %v9672_v13  ;;  %vm9704_vm2 = vcmp.ge.f32.partialorder %v9672_v13, 0.0 }
 0x6b3   : > { %v9527_v12 = vadd.f32 %v15437_v45, %v9491_v23  ;;  %v7710_v55 = vadd.f32 %v15356_v48, %v7044_v56  ;;  %v16275_v48 = vld [vmem:[#allocation46_spill] sm:$0xff]  ;;  %v16281_v56 = vld [vmem:[#allocation119_spill] sm:$0xff] }
 0x6b4   : > { %v9768_v35 = vsel %vm9704_vm2, %v9672_v13, %v9736_v30  ;;  %v8418_v13 = vadd.f32 %v8368_v50, %v8119_v24  ;;  %v8375_v20 = vpop.f32.mrf.mxu3 }
 0x6b5   : > { %9898 = vrot.lane.b32.xlu0 %v9768_v35, %s12052_s11  ;;  %9608 = vrot.lane.b32.xlu1 %v9527_v12, %s12052_s11  ;;  %v8120_v34 = vadd.f32 %v8071_v2, %v7710_v55  ;;  %v9041_v12 = vpop.f32.mrf.mxu0  ;;  %v16276_v35 = vld [vmem:[#allocation111_spill] sm:$0xff]  ;;  %v16278_v2 = vld [vmem:[#allocation112_spill] sm:$0xff] }
 0x6b6   : > { %v9084_v63 = vadd.f32 %v9034_v7, %v8418_v13  ;;  %v6341_v7 = vadd.f32 %v16277_v6, %v16276_v35 }
 0x6b7   : > { %v9587_v23 = vpop.permute.xlu2 %9586  ;;  %v8419_v49 = vadd.f32 %v8370_v54, %v8120_v34 }
 0x6b8   : > { %v9439_v58 = vpop.f32.mrf.mxu1  ;;  %v9676_v38 = vadd.f32 %v9587_v23, %v16275_v48  ;;  %v16286_v48 = vld [vmem:[#allocation54_spill] sm:$0xff] }
 0x6b9   : > { %v9492_v31 = vadd.f32 %v9439_v58, %v9082_v44  ;;  %v6748_v44 = vadd.f32 %v16278_v2, %v6341_v7  ;;  %v9085_v9 = vadd.f32 %v9036_v18, %v8419_v49  ;;  %v8079_v17 = vpop.f32.mrf.mxu2 }
 0x6ba   : > { %v9740_v58 = vmul.f32 0.2, %v9676_v38  ;;  %vm9708_vm6 = vcmp.ge.f32.partialorder %v9676_v38, 0.0 }
 0x6bb   : > { %v9528_v37 = vadd.f32 %v15437_v45, %v9492_v31  ;;  %v8121_v31 = vadd.f32 %v8074_v11, %v15367_v33  ;;  %v16280_v33 = vld [vmem:[#allocation48_spill] sm:$0xff] }
 0x6bc   : > { %v8378_v42 = vpop.f32.mrf.mxu3  ;;  %v9772_v54 = vsel %vm9708_vm6, %v9676_v38, %v9740_v58 }
 0x6bd   : > { %9900 = vrot.lane.b32.xlu1 %v9769_v16, %s12052_s11  ;;  %9610 = vrot.lane.b32.xlu2 %v9528_v37, %s12052_s11  ;;  %v7046_v37 = vadd.f32 %v16279_v8, %v6748_v44  ;;  %v8420_v36 = vadd.f32 %v8373_v61, %v8121_v31  ;;  %v9044_v18 = vpop.f32.mrf.mxu0 }
 0x6bf   : > { %v9583_v14 = vpop.permute.xlu0 %9582  ;;  %v7712_v62 = vadd.f32 %v15372_v10, %v7046_v37  ;;  %v16287_v37 = vld [vmem:[#allocation55_spill] sm:$0xff] }
 0x6c0   : > { %v9674_v57 = vadd.f32 %v9583_v14, %v16272_v27  ;;  %v9441_v25 = vpop.f32.mrf.mxu1 }
 0x6c1   : > { %v9493_v40 = vadd.f32 %v9441_v25, %v9083_v39  ;;  %v9086_v39 = vadd.f32 %v9039_v1, %v8420_v36  ;;  %v16282_v1 = vld [vmem:[#allocation118_spill] sm:$0xff] }
 0x6c2   : > { %v9738_v26 = vmul.f32 0.2, %v9674_v57  ;;  %vm9706_vm4 = vcmp.ge.f32.partialorder %v9674_v57, 0.0 }
 0x6c3   : > { %v9529_v59 = vadd.f32 %v15437_v45, %v9493_v40 }
 0x6c4   : > { %v9770_v0 = vsel %vm9706_vm4, %v9674_v57, %v9738_v26  ;;  %v8122_v57 = vadd.f32 %v8076_v3, %v7712_v62  ;;  %v8081_v26 = vpop.f32.mrf.mxu2  ;;  %v8380_v10 = vpop.f32.mrf.mxu3 }
 0x6c5   : > { %9902 = vrot.lane.b32.xlu2 %v9770_v0, %s12052_s11  ;;  %9612 = vrot.lane.b32.xlu0 %v9529_v59, %s12052_s11  ;;  %v6346_v59 = vadd.f32 %v16282_v1, %v16281_v56  ;;  %v9046_v55 = vpop.f32.mrf.mxu0 }
 0x6c6   : > { %v8421_v43 = vadd.f32 %v8375_v20, %v8122_v57  ;;  %v16285_v20 = vld [vmem:[#allocation123_spill] sm:$0xff] }
 0x6c7   : > { %v9585_v51 = vpop.permute.xlu1 %9584 }
 0x6c8   : > { %v9675_v22 = vadd.f32 %v9585_v51, %v16274_v53  ;;  %v9444_v4 = vpop.f32.mrf.mxu1  ;;  %v9087_v0 = vadd.f32 %v9041_v12, %v8421_v43  ;;  %v16284_v53 = vld [vmem:[#allocation120_spill] sm:$0xff] }
 0x6c9   : > { %v9494_v30 = vadd.f32 %v9444_v4, %v9084_v63  ;;  %v16283_v63 = vld [vmem:[#allocation52_spill] sm:$0xff]  ;;  %v8123_v4 = vadd.f32 %v8079_v17, %v15381_v52 }
 0x6ca   : > { %v9739_v32 = vmul.f32 0.2, %v9675_v22  ;;  %vm9707_vm5 = vcmp.ge.f32.partialorder %v9675_v22, 0.0 }
 0x6cb   : > { %v9530_v50 = vadd.f32 %v15437_v45, %v9494_v30 }
 0x6cc   : > { %v9771_v29 = vsel %vm9707_vm5, %v9675_v22, %v9739_v32  ;;  %v6750_v22 = vadd.f32 %v16284_v53, %v6346_v59  ;;  %v8084_v6 = vpop.f32.mrf.mxu2  ;;  %v8383_v7 = vpop.f32.mrf.mxu3  ;;  %v16289_v59 = vld [vmem:[#allocation11_spill] sm:$0xff] }
 0x6cd   : > { %9904 = vrot.lane.b32.xlu0 %v9771_v29, %s12052_s11  ;;  %9614 = vrot.lane.b32.xlu1 %v9530_v50, %s12052_s11  ;;  %v8422_v29 = vadd.f32 %v8378_v42, %v8123_v4  ;;  %v9049_v58 = vpop.f32.mrf.mxu0 }
 0x6ce   : > { %v7048_v32 = vadd.f32 %v16285_v20, %v6750_v22  ;;  %v16290_v20 = vld [vmem:[#allocation41_spill] sm:$0xff] }
 0x6cf   : > { %v9593_v34 = vpop.permute.xlu2 %9592  ;;  %v9088_v52 = vadd.f32 %v9044_v18, %v8422_v29 }
 0x6d0   : > { %v9446_v19 = vpop.f32.mrf.mxu1  ;;  %v9679_v38 = vadd.f32 %v9593_v34, %v16286_v48  ;;  %v7714_v35 = vadd.f32 %v15387_v41, %v7048_v32  ;;  %v9799_v32 = vsub.f32 1.0, %v16290_v20 }
 0x6d1   : > { %v9495_v46 = vadd.f32 %v9446_v19, %v9085_v9 }
 0x6d2   : > { %v9743_v49 = vmul.f32 0.2, %v9679_v38  ;;  %v8124_v44 = vadd.f32 %v8081_v26, %v7714_v35  ;;  %vm9711_vm9 = vcmp.ge.f32.partialorder %v9679_v38, 0.0  ;;  %v16291_v35 = vld [vmem:[#allocation56_spill] sm:$0xff] }
 0x6d3   : > { %v9531_v16 = vadd.f32 %v15437_v45, %v9495_v46 }
 0x6d4   : > { %v9775_v31 = vsel %vm9711_vm9, %v9679_v38, %v9743_v49  ;;  %v8423_v46 = vadd.f32 %v8380_v10, %v8124_v44  ;;  %v8086_v8 = vpop.f32.mrf.mxu2  ;;  %v8385_v62 = vpop.f32.mrf.mxu3 }
 0x6d5   : > { %9906 = vrot.lane.b32.xlu1 %v9772_v54, %s12052_s11  ;;  %9616 = vrot.lane.b32.xlu2 %v9531_v16, %s12052_s11  ;;  %v8125_v54 = vadd.f32 %v8084_v6, %v15402_v15  ;;  %v8126_v15 = vadd.f32 %v8086_v8, %v15410_v47 }
 0x6d6   : > { %v9089_v41 = vadd.f32 %v9046_v55, %v8423_v46 }
 0x6d7   : > { %v9589_v14 = vpop.permute.xlu0 %9588  ;;  %v8425_v55 = vadd.f32 %v8385_v62, %v8126_v15 }
 0x6d8   : > { %v9677_v11 = vadd.f32 %v9589_v14, %v16280_v33  ;;  %v9449_v27 = vpop.f32.mrf.mxu1  ;;  %v9051_v14 = vpop.f32.mrf.mxu0 }
 0x6d9   : > { %v9496_v25 = vadd.f32 %v9449_v27, %v9086_v39 }
 0x6da   : > { %v9741_v24 = vmul.f32 0.2, %v9677_v11  ;;  %vm9709_vm7 = vcmp.ge.f32.partialorder %v9677_v11, 0.0 }
 0x6db   : > { %v9532_v40 = vadd.f32 %v15437_v45, %v9496_v25 }
 0x6dc   : > { %v9773_v61 = vsel %vm9709_vm7, %v9677_v11, %v9741_v24  ;;  %v8424_v11 = vadd.f32 %v8383_v7, %v8125_v54  ;;  %v16288_v24 = vld [vmem:[#allocation10_spill] sm:$0xff]  ;;  %v8089_v43 = vpop.f32.mrf.mxu2  ;;  %v8388_v1 = vpop.f32.mrf.mxu3 }
 0x6dd   : > { %9908 = vrot.lane.b32.xlu2 %v9773_v61, %s12052_s11  ;;  %9618 = vrot.lane.b32.xlu0 %v9532_v40, %s12052_s11  ;;  %v8127_v22 = vadd.f32 %v8089_v43, %v15417_v28 }
 0x6de   : > { %v9090_v27 = vadd.f32 %v9049_v58, %v8424_v11 }
 0x6df   : > { %v9591_v13 = vpop.permute.xlu1 %9590 }
 0x6e0   : > { %v9678_v51 = vadd.f32 %v9591_v13, %v16283_v63  ;;  %v9451_v3 = vpop.f32.mrf.mxu1  ;;  %v9054_v63 = vpop.f32.mrf.mxu0 }
 0x6e1   : > { %v9497_v23 = vadd.f32 %v9451_v3, %v9087_v0 }
 0x6e2   : > { %v9742_v30 = vmul.f32 0.2, %v9678_v51  ;;  %vm9710_vm8 = vcmp.ge.f32.partialorder %v9678_v51, 0.0 }
 0x6e3   : > { %v9533_v50 = vadd.f32 %v15437_v45, %v9497_v23 }
 0x6e4   : > { %v9774_v12 = vsel %vm9710_vm8, %v9678_v51, %v9742_v30  ;;  %v9091_v51 = vadd.f32 %v9051_v14, %v8425_v55  ;;  %v8091_v23 = vpop.f32.mrf.mxu2  ;;  %v8390_v48 = vpop.f32.mrf.mxu3  ;;  %v16293_v14 = vld [vmem:[#allocation39_spill] sm:$0xff] }
 0x6e5   : > { %9910 = vrot.lane.b32.xlu0 %v9774_v12, %s12052_s11  ;;  %9620 = vrot.lane.b32.xlu1 %v9533_v50, %s12052_s11  ;;  %v8426_v50 = vadd.f32 %v8388_v1, %v8127_v22  ;;  %v8128_v44 = vadd.f32 %v8091_v23, %v15424_v5 }
 0x6e7   : > { %v9599_v57 = vpop.permute.xlu2 %9598  ;;  %v9092_v38 = vadd.f32 %v9054_v63, %v8426_v50 }
 0x6e8   : > { %v9454_v2 = vpop.f32.mrf.mxu1  ;;  %v9682_v0 = vadd.f32 %v9599_v57, %v16289_v59  ;;  %v9056_v29 = vpop.f32.mrf.mxu0 }
 0x6e9   : > { %v9498_v9 = vadd.f32 %v9454_v2, %v9088_v52  ;;  %v11953_v52 = vld [vmem:[%s13144_s16 + $0x8] sm:$0xff] }
 0x6ea   : > { %v9746_v3 = vmul.f32 0.2, %v9682_v0  ;;  %vm9714_vm12 = vcmp.ge.f32.partialorder %v9682_v0, 0.0  ;;  %v9831_v7 = vmul.f32 %v11953_v52, %v9799_v32 }
 0x6eb   : > { %v9534_v19 = vadd.f32 %v15437_v45, %v9498_v9 }
 0x6ec   : > { %v9778_v30 = vsel %vm9714_vm12, %v9682_v0, %v9746_v3 }
 0x6ed   : > { %9912 = vrot.lane.b32.xlu1 %v9775_v31, %s12052_s11  ;;  %9622 = vrot.lane.b32.xlu2 %v9534_v19, %s12052_s11 }
 0x6ef   : > { %v9595_v17 = vpop.permute.xlu0 %9594 }
 0x6f0   : > { %v9680_v16 = vadd.f32 %v9595_v17, %v16287_v37  ;;  %v9456_v42 = vpop.f32.mrf.mxu1  ;;  %v8094_v17 = vpop.f32.mrf.mxu2 }
 0x6f1   : > { %v9499_v36 = vadd.f32 %v9456_v42, %v9089_v41  ;;  %v8427_v41 = vadd.f32 %v8390_v48, %v8128_v44  ;;  %v8393_v37 = vpop.f32.mrf.mxu3  ;;  %v8129_v42 = vadd.f32 %v8094_v17, %v15427_v21  ;;  %v16300_v17 = vld [vmem:[#allocation6_spill] sm:$0xff] }
 0x6f2   : > { %v9744_v18 = vmul.f32 0.2, %v9680_v16  ;;  %vm9712_vm10 = vcmp.ge.f32.partialorder %v9680_v16, 0.0 }
 0x6f3   : > { %v9535_v39 = vadd.f32 %v15437_v45, %v9499_v36  ;;  %v9093_v8 = vadd.f32 %v9056_v29, %v8427_v41  ;;  %v9059_v36 = vpop.f32.mrf.mxu0  ;;  %v8428_v11 = vadd.f32 %v8393_v37, %v8129_v42  ;;  %v11957_v42 = vld [vmem:[%s13144_s16 + $0x18] sm:$0xff] }
 0x6f4   : > { %v9776_v33 = vsel %vm9712_vm10, %v9680_v16, %v9744_v18  ;;  %v16292_v18 = vld [vmem:[#allocation62_spill] sm:$0xff] }
 0x6f5   : > { %9914 = vrot.lane.b32.xlu2 %v9776_v33, %s12052_s11  ;;  %9624 = vrot.lane.b32.xlu0 %v9535_v39, %s12052_s11  ;;  %v9798_v33 = vsub.f32 1.0, %v16293_v14 }
 0x6f7   : > { %v9597_v25 = vpop.permute.xlu1 %9596 }
 0x6f8   : > { %v9681_v40 = vadd.f32 %v9597_v25, %v16288_v24  ;;  %v9459_v26 = vpop.f32.mrf.mxu1  ;;  %v8096_v24 = vpop.f32.mrf.mxu2 }
 0x6f9   : > { %v9500_v61 = vadd.f32 %v9459_v26, %v9090_v27  ;;  %v9094_v27 = vadd.f32 %v9059_v36, %v8428_v11  ;;  %v11954_v26 = vld [vmem:[%s13144_s16] sm:$0xff]  ;;  %v8130_v43 = vadd.f32 %v8096_v24, %v15432_v60 }
 0x6fa   : > { %v9745_v10 = vmul.f32 0.2, %v9681_v40  ;;  %vm9713_vm11 = vcmp.ge.f32.partialorder %v9681_v40, 0.0  ;;  %v9830_v15 = vmul.f32 %v11954_v26, %v9798_v33  ;;  %v16303_v26 = vld [vmem:[#allocation18_spill] sm:$0xff] }
 0x6fb   : > { %v9536_v56 = vadd.f32 %v15437_v45, %v9500_v61  ;;  %v9061_v0 = vpop.f32.mrf.mxu0 }
 0x6fc   : > { %v9777_v13 = vsel %vm9713_vm11, %v9681_v40, %v9745_v10 }
 0x6fd   : > { %9916 = vrot.lane.b32.xlu0 %v9777_v13, %s12052_s11  ;;  %9626 = vrot.lane.b32.xlu1 %v9536_v56, %s12052_s11  ;;  %v8395_v56 = vpop.f32.mrf.mxu3  ;;  %v16294_v13 = vld [vmem:[#allocation14_spill] sm:$0xff] }
 0x6fe   : > { %v8429_v3 = vadd.f32 %v8395_v56, %v8130_v43 }
 0x6ff   : > { %v9605_v47 = vpop.permute.xlu2 %9604 }
 0x700   : > { %v9461_v53 = vpop.f32.mrf.mxu1  ;;  %v9685_v39 = vadd.f32 %v9605_v47, %v16292_v18  ;;  %v9095_v60 = vadd.f32 %v9061_v0, %v8429_v3  ;;  %v16305_v3 = vld [vmem:[#allocation15_spill] sm:$0xff] }
 0x701   : > { %v9501_v4 = vadd.f32 %v9461_v53, %v9091_v51  ;;  %v16295_v51 = vld [vmem:[#allocation47_spill] sm:$0xff] }
 0x702   : > { %v9749_v40 = vmul.f32 0.2, %v9685_v39  ;;  %vm9717_vm15 = vcmp.ge.f32.partialorder %v9685_v39, 0.0  ;;  %v9802_v47 = vsub.f32 1.0, %v16295_v51 }
 0x703   : > { %v9537_v34 = vadd.f32 %v15437_v45, %v9501_v4 }
 0x704   : > { %v9781_v63 = vsel %vm9717_vm15, %v9685_v39, %v9749_v40 }
 0x705   : > { %9918 = vrot.lane.b32.xlu1 %v9778_v30, %s12052_s11  ;;  %9628 = vrot.lane.b32.xlu2 %v9537_v34, %s12052_s11  ;;  %v16296_v34 = vld [vmem:[#allocation13_spill] sm:$0xff]  ;;  %v11955_v30 = vld [vmem:[%s13144_s16 + $0x20] sm:$0xff] }
 0x707   : > { %v9601_v28 = vpop.permute.xlu0 %9600  ;;  %v9897_v12 = vpop.permute.xlu2 %9896 }
 0x708   : > { %v9683_v6 = vadd.f32 %v9601_v28, %v16291_v35  ;;  %v9991_v49 = vmul.f32 %v16290_v20, %v9897_v12  ;;  %v9464_v2 = vpop.f32.mrf.mxu1  ;;  %v9834_v20 = vmul.f32 %v11955_v30, %v9802_v47 }
 0x709   : > { %v9502_v9 = vadd.f32 %v9464_v2, %v9092_v38 }
 0x70a   : > { %v9747_v58 = vmul.f32 0.2, %v9683_v6  ;;  %v10023_v19 = vadd.f32 %v9991_v49, %v9831_v7  ;;  %vm9715_vm13 = vcmp.ge.f32.partialorder %v9683_v6, 0.0  ;;  %v16298_v7 = vld [vmem:[#allocation58_spill] sm:$0xff] }
 0x70b   : > { %v9538_v31 = vadd.f32 %v15437_v45, %v9502_v9  ;;  %v11956_v9 = vld [vmem:[%s13144_s16 + $0x10] sm:$0xff] }
 0x70c   : > { %10055 = vst.msk [vmem:[%s15637_s14 + $0x8] sm:$0xff] %vm5996_vm14, %v10023_v19  ;;  %v9779_v46 = vsel %vm9715_vm13, %v9683_v6, %v9747_v58  ;;  %v16297_v6 = vld [vmem:[#allocation43_spill] sm:$0xff] }
 0x70d   : > { %9920 = vrot.lane.b32.xlu2 %v9779_v46, %s12052_s11  ;;  %9630 = vrot.lane.b32.xlu0 %v9538_v31, %s12052_s11  ;;  %v9800_v52 = vsub.f32 1.0, %v16297_v6  ;;  %v16299_v46 = vld [vmem:[#allocation45_spill] sm:$0xff] }
 0x70e   : > { %v9801_v41 = vsub.f32 1.0, %v16299_v46 }
 0x70f   : > { %v9603_v5 = vpop.permute.xlu1 %9602 }
 0x710   : > { %v9466_v16 = vpop.f32.mrf.mxu1  ;;  %v9684_v49 = vadd.f32 %v9603_v5, %v16298_v7 }
 0x711   : > { %v9503_v54 = vadd.f32 %v9466_v16, %v9093_v8 }
 0x712   : > { %v9748_v19 = vmul.f32 0.2, %v9684_v49  ;;  %vm9716_vm2 = vcmp.ge.f32.partialorder %v9684_v49, 0.0 }
 0x713   : > { %v9539_v62 = vadd.f32 %v15437_v45, %v9503_v54  ;;  %v9833_v54 = vmul.f32 %v11957_v42, %v9801_v41  ;;  %v16310_v41 = vld [vmem:[#allocation53_spill] sm:$0xff] }
 0x714   : > { %v9780_v5 = vsel %vm9716_vm2, %v9684_v49, %v9748_v19 }
 0x715   : > { %9632 = vrot.lane.b32.xlu1 %v9539_v62, %s12052_s11  ;;  %v16301_v62 = vld [vmem:[#allocation23_spill] sm:$0xff] }
 0x717   : > { %v9895_v57 = vpop.permute.xlu1 %9894  ;;  %v9611_v25 = vpop.permute.xlu2 %9610 }
 0x718   : > { %v9990_v21 = vmul.f32 %v16293_v14, %v9895_v57  ;;  %v9469_v61 = vpop.f32.mrf.mxu1  ;;  %v9688_v55 = vadd.f32 %v9611_v25, %v16294_v13 }
 0x719   : > { %v9504_v10 = vadd.f32 %v9469_v61, %v9094_v27  ;;  %v16302_v27 = vld [vmem:[#allocation51_spill] sm:$0xff] }
 0x71a   : > { %v10022_v1 = vadd.f32 %v9990_v21, %v9830_v15  ;;  %v9752_v4 = vmul.f32 0.2, %v9688_v55  ;;  %vm9720_vm0 = vcmp.ge.f32.partialorder %v9688_v55, 0.0  ;;  %v9805_v57 = vsub.f32 1.0, %v16302_v27  ;;  %v11958_v21 = vld [vmem:[%s13144_s16 + $0x38] sm:$0xff] }
 0x71b   : > { %v9540_v59 = vadd.f32 %v15437_v45, %v9504_v10 }
 0x71c   : > { %10054 = vst.msk [vmem:[%s15637_s14] sm:$0xff] %vm5996_vm14, %v10022_v1  ;;  %v9784_v29 = vsel %vm9720_vm0, %v9688_v55, %v9752_v4  ;;  %v9837_v61 = vmul.f32 %v11958_v21, %v9805_v57  ;;  %v11963_v57 = vld [vmem:[%s13144_s16 + $0x48] sm:$0xff] }
 0x71d   : > { %9924 = vrot.lane.b32.xlu1 %v9781_v63, %s12052_s11  ;;  %9634 = vrot.lane.b32.xlu2 %v9540_v59, %s12052_s11  ;;  %v16304_v59 = vld [vmem:[#allocation49_spill] sm:$0xff]  ;;  %v11959_v63 = vld [vmem:[%s13144_s16 + $0x28] sm:$0xff] }
 0x71e   : > { %v9803_v0 = vsub.f32 1.0, %v16304_v59 }
 0x71f   : > { %v9607_v53 = vpop.permute.xlu0 %9606  ;;  %v9903_v22 = vpop.permute.xlu2 %9902 }
 0x720   : > { %v9686_v23 = vadd.f32 %v9607_v53, %v16296_v34  ;;  %v9994_v32 = vmul.f32 %v16295_v51, %v9903_v22  ;;  %v9471_v50 = vpop.f32.mrf.mxu1  ;;  %v9835_v51 = vmul.f32 %v11959_v63, %v9803_v0  ;;  %v16306_v34 = vld [vmem:[#allocation50_spill] sm:$0xff] }
 0x721   : > { %v9505_v48 = vadd.f32 %v9471_v50, %v9095_v60 }
 0x722   : > { %v9750_v38 = vmul.f32 0.2, %v9686_v23  ;;  %v10026_v28 = vadd.f32 %v9994_v32, %v9834_v20  ;;  %vm9718_vm1 = vcmp.ge.f32.partialorder %v9686_v23, 0.0  ;;  %v11960_v32 = vld [vmem:[%s13144_s16 + $0x30] sm:$0xff] }
 0x723   : > { %v9541_v12 = vadd.f32 %v15437_v45, %v9505_v48  ;;  %v9832_v45 = vmul.f32 %v11956_v9, %v9800_v52  ;;  %v11961_v9 = vld [vmem:[%s13144_s16 + $0x50] sm:$0xff] }
 0x724   : > { %10058 = vst.msk [vmem:[%s15637_s14 + $0x20] sm:$0xff] %vm5996_vm14, %v10026_v28  ;;  %v9782_v35 = vsel %vm9718_vm1, %v9686_v23, %v9750_v38  ;;  %v9804_v23 = vsub.f32 1.0, %v16306_v34  ;;  %v16307_v38 = vld [vmem:[#allocation28_spill] sm:$0xff] }
 0x725   : > { %9930 = vrot.lane.b32.xlu1 %v9784_v29, %s12052_s11  ;;  %9926 = vrot.lane.b32.xlu2 %v9782_v35, %s12052_s11 }
 0x726   : > { %9636 = vrot.lane.b32.xlu0 %v9541_v12, %s12052_s11  ;;  %v9836_v50 = vmul.f32 %v11960_v32, %v9804_v23 }
 0x727   : > { %v9899_v2 = vpop.permute.xlu0 %9898  ;;  %v9609_v44 = vpop.permute.xlu1 %9608 }
 0x728   : > { %v9992_v58 = vmul.f32 %v16297_v6, %v9899_v2  ;;  %v9687_v8 = vadd.f32 %v9609_v44, %v16300_v17  ;;  %v16308_v6 = vld [vmem:[#allocation61_spill] sm:$0xff]  ;;  %v16309_v2 = vld [vmem:[#allocation22_spill] sm:$0xff]  ;;  %v9806_v17 = vsub.f32 1.0, %v16310_v41 }
 0x729   : > { %v9808_v52 = vsub.f32 1.0, %v16308_v6 }
 0x72a   : > { %v10024_v31 = vadd.f32 %v9992_v58, %v9832_v45  ;;  %v9751_v39 = vmul.f32 0.2, %v9687_v8  ;;  %vm9719_vm4 = vcmp.ge.f32.partialorder %v9687_v8, 0.0 }
 0x72b   : > { %v9840_v45 = vmul.f32 %v11961_v9, %v9808_v52 }
 0x72c   : > { %10056 = vst.msk [vmem:[%s15637_s14 + $0x10] sm:$0xff] %vm5996_vm14, %v10024_v31  ;;  %v9783_v25 = vsel %vm9719_vm4, %v9687_v8, %v9751_v39 }
 0x72e   : > { %9922 = vrot.lane.b32.xlu0 %v9780_v5, %s12052_s11 }
 0x72f   : > { %v9901_v37 = vpop.permute.xlu1 %9900  ;;  %v9617_v16 = vpop.permute.xlu2 %9616 }
 0x730   : > { %v9993_v36 = vmul.f32 %v16299_v46, %v9901_v37  ;;  %v9691_v18 = vadd.f32 %v9617_v16, %v16301_v62  ;;  %v11962_v37 = vld [vmem:[%s13144_s16 + $0x40] sm:$0xff] }
 0x731   : > { %v9838_v16 = vmul.f32 %v11962_v37, %v9806_v17 }
 0x732   : > { %v10025_v14 = vadd.f32 %v9993_v36, %v9833_v54  ;;  %v9755_v33 = vmul.f32 0.2, %v9691_v18  ;;  %vm9723_vm3 = vcmp.ge.f32.partialorder %v9691_v18, 0.0  ;;  %v16311_v54 = vld [vmem:[#allocation17_spill] sm:$0xff] }
 0x734   : > { %10057 = vst.msk [vmem:[%s15637_s14 + $0x18] sm:$0xff] %vm5996_vm14, %v10025_v14  ;;  %v9787_v11 = vsel %vm9723_vm3, %v9691_v18, %v9755_v33  ;;  %v16312_v14 = vld [vmem:[#allocation12_spill] sm:$0xff] }
 0x735   : > { %9936 = vrot.lane.b32.xlu1 %v9787_v11, %s12052_s11  ;;  %v9807_v33 = vsub.f32 1.0, %v16312_v14 }
 0x736   : > { %9928 = vrot.lane.b32.xlu0 %v9783_v25, %s12052_s11 }
 0x737   : > { %v9613_v24 = vpop.permute.xlu0 %9612  ;;  %v9909_v40 = vpop.permute.xlu2 %9908  ;;  %v9839_v25 = vmul.f32 %v11963_v57, %v9807_v33  ;;  %v16323_v33 = vld [vmem:[#allocation74_spill] sm:$0xff] }
 0x738   : > { %v9689_v15 = vadd.f32 %v9613_v24, %v16303_v26  ;;  %v9997_v43 = vmul.f32 %v16302_v27, %v9909_v40  ;;  %v16313_v40 = vld [vmem:[#allocation27_spill] sm:$0xff]  ;;  %v11968_v57 = vld [vmem:[%s13144_s16 + $0x78] sm:$0xff] }
 0x73a   : > { %v9753_v10 = vmul.f32 0.2, %v9689_v15  ;;  %v10029_v56 = vadd.f32 %v9997_v43, %v9837_v61  ;;  %vm9721_vm5 = vcmp.ge.f32.partialorder %v9689_v15, 0.0  ;;  %v16314_v43 = vld [vmem:[#allocation68_spill] sm:$0xff] }
 0x73c   : > { %10061 = vst.msk [vmem:[%s15637_s14 + $0x38] sm:$0xff] %vm5996_vm14, %v10029_v56  ;;  %v9785_v1 = vsel %vm9721_vm5, %v9689_v15, %v9753_v10  ;;  %v9811_v10 = vsub.f32 1.0, %v16314_v43 }
 0x73d   : > { %9932 = vrot.lane.b32.xlu2 %v9785_v1, %s12052_s11 }
 0x73f   : > { %v9905_v13 = vpop.permute.xlu0 %9904  ;;  %v9615_v55 = vpop.permute.xlu1 %9614 }
 0x740   : > { %v9995_v47 = vmul.f32 %v16304_v59, %v9905_v13  ;;  %v9690_v60 = vadd.f32 %v9615_v55, %v16305_v3  ;;  %v16315_v59 = vld [vmem:[#allocation25_spill] sm:$0xff]  ;;  %v11964_v13 = vld [vmem:[%s13144_s16 + $0x68] sm:$0xff] }
 0x741   : > { %v9843_v55 = vmul.f32 %v11964_v13, %v9811_v10 }
 0x742   : > { %v10027_v53 = vadd.f32 %v9995_v47, %v9835_v51  ;;  %v9754_v22 = vmul.f32 0.2, %v9690_v60  ;;  %vm9722_vm6 = vcmp.ge.f32.partialorder %v9690_v60, 0.0 }
 0x744   : > { %10059 = vst.msk [vmem:[%s15637_s14 + $0x28] sm:$0xff] %vm5996_vm14, %v10027_v53  ;;  %v9786_v4 = vsel %vm9722_vm6, %v9690_v60, %v9754_v22  ;;  %v16316_v60 = vld [vmem:[#allocation59_spill] sm:$0xff] }
 0x745   : > { %9934 = vrot.lane.b32.xlu0 %v9786_v4, %s12052_s11  ;;  %v9809_v53 = vsub.f32 1.0, %v16316_v60 }
 0x747   : > { %v9907_v30 = vpop.permute.xlu1 %9906  ;;  %v9623_v20 = vpop.permute.xlu2 %9622 }
 0x748   : > { %v9996_v48 = vmul.f32 %v16306_v34, %v9907_v30  ;;  %v9694_v28 = vadd.f32 %v9623_v20, %v16307_v38  ;;  %v11965_v34 = vld [vmem:[%s13144_s16 + $0x58] sm:$0xff]  ;;  %v16317_v20 = vld [vmem:[#allocation64_spill] sm:$0xff] }
 0x749   : > { %v9841_v23 = vmul.f32 %v11965_v34, %v9809_v53 }
 0x74a   : > { %v10028_v12 = vadd.f32 %v9996_v48, %v9836_v50  ;;  %v9758_v29 = vmul.f32 0.2, %v9694_v28  ;;  %vm9726_vm7 = vcmp.ge.f32.partialorder %v9694_v28, 0.0 }
 0x74c   : > { %10060 = vst.msk [vmem:[%s15637_s14 + $0x30] sm:$0xff] %vm5996_vm14, %v10028_v12  ;;  %v9790_v35 = vsel %vm9726_vm7, %v9694_v28, %v9758_v29  ;;  %v16318_v28 = vld [vmem:[#allocation63_spill] sm:$0xff] }
 0x74d   : > { %9942 = vrot.lane.b32.xlu1 %v9790_v35, %s12052_s11  ;;  %v9810_v12 = vsub.f32 1.0, %v16318_v28 }
 0x74f   : > { %v9619_v7 = vpop.permute.xlu0 %9618  ;;  %v9915_v49 = vpop.permute.xlu2 %9914 }
 0x750   : > { %v9692_v44 = vadd.f32 %v9619_v7, %v16309_v2  ;;  %v10000_v58 = vmul.f32 %v16308_v6, %v9915_v49  ;;  %v11966_v6 = vld [vmem:[%s13144_s16 + $0x60] sm:$0xff] }
 0x751   : > { %v9842_v52 = vmul.f32 %v11966_v6, %v9810_v12  ;;  %v16319_v49 = vld [vmem:[#allocation95_spill] sm:$0xff] }
 0x752   : > { %v9756_v19 = vmul.f32 0.2, %v9692_v44  ;;  %v10032_v31 = vadd.f32 %v10000_v58, %v9840_v45  ;;  %vm9724_vm8 = vcmp.ge.f32.partialorder %v9692_v44, 0.0  ;;  %v16320_v45 = vld [vmem:[#allocation16_spill] sm:$0xff] }
 0x753   : > { %v9814_v58 = vsub.f32 1.0, %v16320_v45 }
 0x754   : > { %10064 = vst.msk [vmem:[%s15637_s14 + $0x50] sm:$0xff] %vm5996_vm14, %v10032_v31  ;;  %v9788_v46 = vsel %vm9724_vm8, %v9692_v44, %v9756_v19 }
 0x755   : > { %9938 = vrot.lane.b32.xlu2 %v9788_v46, %s12052_s11 }
 0x757   : > { %v9911_v8 = vpop.permute.xlu0 %9910  ;;  %v9621_v5 = vpop.permute.xlu1 %9620 }
 0x758   : > { %v9998_v42 = vmul.f32 %v16310_v41, %v9911_v8  ;;  %v9693_v36 = vadd.f32 %v9621_v5, %v16311_v54  ;;  %v11967_v41 = vld [vmem:[%s13144_s16 + $0x80] sm:$0xff]  ;;  %v16321_v8 = vld [vmem:[#allocation29_spill] sm:$0xff] }
 0x759   : > { %v9846_v17 = vmul.f32 %v11967_v41, %v9814_v58  ;;  %v16330_v58 = vld [vmem:[#allocation81_spill] sm:$0xff] }
 0x75a   : > { %v10030_v62 = vadd.f32 %v9998_v42, %v9838_v16  ;;  %v9757_v18 = vmul.f32 0.2, %v9693_v36  ;;  %vm9725_vm9 = vcmp.ge.f32.partialorder %v9693_v36, 0.0 }
 0x75c   : > { %10062 = vst.msk [vmem:[%s15637_s14 + $0x40] sm:$0xff] %vm5996_vm14, %v10030_v62  ;;  %v9789_v39 = vsel %vm9725_vm9, %v9693_v36, %v9757_v18  ;;  %v16322_v62 = vld [vmem:[#allocation66_spill] sm:$0xff] }
 0x75d   : > { %9940 = vrot.lane.b32.xlu0 %v9789_v39, %s12052_s11 }
 0x75f   : > { %v9913_v11 = vpop.permute.xlu1 %9912  ;;  %v9629_v27 = vpop.permute.xlu2 %9628 }
 0x760   : > { %v9999_v24 = vmul.f32 %v16312_v14, %v9913_v11  ;;  %v9697_v26 = vadd.f32 %v9629_v27, %v16313_v40  ;;  %v9813_v11 = vsub.f32 1.0, %v16323_v33 }
 0x762   : > { %v10031_v15 = vadd.f32 %v9999_v24, %v9839_v25  ;;  %v9761_v21 = vmul.f32 0.2, %v9697_v26  ;;  %vm9729_vm10 = vcmp.ge.f32.partialorder %v9697_v26, 0.0  ;;  %v9845_v25 = vmul.f32 %v11968_v57, %v9813_v11 }
 0x764   : > { %10063 = vst.msk [vmem:[%s15637_s14 + $0x48] sm:$0xff] %vm5996_vm14, %v10031_v15  ;;  %v9793_v61 = vsel %vm9729_vm10, %v9697_v26, %v9761_v21  ;;  %v16324_v26 = vld [vmem:[#allocation24_spill] sm:$0xff]  ;;  %v16325_v21 = vld [vmem:[#allocation21_spill] sm:$0xff] }
 0x765   : > { %9948 = vrot.lane.b32.xlu1 %v9793_v61, %s12052_s11  ;;  %v9816_v15 = vsub.f32 1.0, %v16324_v26  ;;  %v9817_v61 = vsub.f32 1.0, %v16325_v21 }
 0x767   : > { %v9625_v56 = vpop.permute.xlu0 %9624  ;;  %v9921_v1 = vpop.permute.xlu2 %9920 }
 0x768   : > { %v9695_v0 = vadd.f32 %v9625_v56, %v16315_v59  ;;  %v10003_v63 = vmul.f32 %v16314_v43, %v9921_v1  ;;  %v11969_v56 = vld [vmem:[%s13144_s16 + $0x90] sm:$0xff]  ;;  %v11970_v59 = vld [vmem:[%s13144_s16 + $0x98] sm:$0xff] }
 0x769   : > { %v9848_v1 = vmul.f32 %v11969_v56, %v9816_v15 }
 0x76a   : > { %v9759_v51 = vmul.f32 0.2, %v9695_v0  ;;  %v10035_v47 = vadd.f32 %v10003_v63, %v9843_v55  ;;  %vm9727_vm11 = vcmp.ge.f32.partialorder %v9695_v0, 0.0 }
 0x76c   : > { %10067 = vst.msk [vmem:[%s15637_s14 + $0x68] sm:$0xff] %vm5996_vm14, %v10035_v47  ;;  %v9791_v3 = vsel %vm9727_vm11, %v9695_v0, %v9759_v51  ;;  %v9849_v0 = vmul.f32 %v11970_v59, %v9817_v61  ;;  %v16326_v51 = vld [vmem:[#allocation96_spill] sm:$0xff] }
 0x76d   : > { %9944 = vrot.lane.b32.xlu2 %v9791_v3, %s12052_s11 }
 0x76f   : > { %v9917_v22 = vpop.permute.xlu0 %9916  ;;  %v9627_v4 = vpop.permute.xlu1 %9626 }
 0x770   : > { %v10001_v30 = vmul.f32 %v16316_v60, %v9917_v22  ;;  %v9696_v32 = vadd.f32 %v9627_v4, %v16317_v20  ;;  %v16327_v4 = vld [vmem:[#allocation69_spill] sm:$0xff] }
 0x771   : > { %v9812_v34 = vsub.f32 1.0, %v16327_v4 }
 0x772   : > { %v10033_v50 = vadd.f32 %v10001_v30, %v9841_v23  ;;  %v9760_v48 = vmul.f32 0.2, %v9696_v32  ;;  %vm9728_vm12 = vcmp.ge.f32.partialorder %v9696_v32, 0.0  ;;  %v11971_v30 = vld [vmem:[%s13144_s16 + $0x70] sm:$0xff] }
 0x773   : > { %v9844_v20 = vmul.f32 %v11971_v30, %v9812_v34 }
 0x774   : > { %10065 = vst.msk [vmem:[%s15637_s14 + $0x58] sm:$0xff] %vm5996_vm14, %v10033_v50  ;;  %v9792_v38 = vsel %vm9728_vm12, %v9696_v32, %v9760_v48  ;;  %v16328_v48 = vld [vmem:[#allocation78_spill] sm:$0xff] }
 0x775   : > { %9946 = vrot.lane.b32.xlu0 %v9792_v38, %s12052_s11  ;;  %v9819_v38 = vsub.f32 1.0, %v16328_v48 }
 0x777   : > { %v9919_v29 = vpop.permute.xlu1 %9918  ;;  %v9635_v35 = vpop.permute.xlu2 %9634 }
 0x778   : > { %v10002_v7 = vmul.f32 %v16318_v28, %v9919_v29  ;;  %v9700_v2 = vadd.f32 %v9635_v35, %v16319_v49  ;;  %v16329_v28 = vld [vmem:[#allocation20_spill] sm:$0xff] }
 0x779   : > { %v9815_v12 = vsub.f32 1.0, %v16329_v28  ;;  %v11972_v35 = vld [vmem:[%s13144_s16 + $0xa8] sm:$0xff] }
 0x77a   : > { %v10034_v44 = vadd.f32 %v10002_v7, %v9842_v52  ;;  %v9764_v9 = vmul.f32 0.2, %v9700_v2  ;;  %vm9732_vm13 = vcmp.ge.f32.partialorder %v9700_v2, 0.0  ;;  %v9851_v6 = vmul.f32 %v11972_v35, %v9819_v38  ;;  %v11973_v49 = vld [vmem:[%s13144_s16 + $0x88] sm:$0xff] }
 0x77c   : > { %10066 = vst.msk [vmem:[%s15637_s14 + $0x60] sm:$0xff] %vm5996_vm14, %v10034_v44  ;;  %v9796_v19 = vsel %vm9732_vm13, %v9700_v2, %v9764_v9  ;;  %v9847_v2 = vmul.f32 %v11973_v49, %v9815_v12  ;;  %v11982_v49 = vld [vmem:[%s13144_s16 + $0xf0] sm:$0xff] }
 0x77d   : > { %9954 = vrot.lane.b32.xlu1 %v9796_v19, %s12052_s11  ;;  %v9820_v19 = vsub.f32 1.0, %v16330_v58 }
 0x77f   : > { %v9631_v31 = vpop.permute.xlu0 %9630  ;;  %v9927_v46 = vpop.permute.xlu2 %9926 }
 0x780   : > { %v9698_v5 = vadd.f32 %v9631_v31, %v16321_v8  ;;  %v10006_v37 = vmul.f32 %v16320_v45, %v9927_v46  ;;  %v11974_v46 = vld [vmem:[%s13144_s16 + $0xb0] sm:$0xff] }
 0x781   : > { %v9852_v41 = vmul.f32 %v11974_v46, %v9820_v19 }
 0x782   : > { %v9762_v16 = vmul.f32 0.2, %v9698_v5  ;;  %v10038_v42 = vadd.f32 %v10006_v37, %v9846_v17  ;;  %vm9730_vm15 = vcmp.ge.f32.partialorder %v9698_v5, 0.0 }
 0x784   : > { %10070 = vst.msk [vmem:[%s15637_s14 + $0x80] sm:$0xff] %vm5996_vm14, %v10038_v42  ;;  %v9794_v54 = vsel %vm9730_vm15, %v9698_v5, %v9762_v16  ;;  %v16331_v5 = vld [vmem:[#allocation57_spill] sm:$0xff]  ;;  %v11975_v42 = vld [vmem:[%s13144_s16 + $0xa0] sm:$0xff] }
 0x785   : > { %9950 = vrot.lane.b32.xlu2 %v9794_v54, %s12052_s11  ;;  %v9818_v37 = vsub.f32 1.0, %v16331_v5 }
 0x787   : > { %v9633_v36 = vpop.permute.xlu1 %9632  ;;  %v9850_v54 = vmul.f32 %v11975_v42, %v9818_v37 }
 0x788   : > { %v9699_v18 = vadd.f32 %v9633_v36, %v16322_v62 }
 0x78a   : > { %v9763_v39 = vmul.f32 0.2, %v9699_v18  ;;  %vm9731_vm0 = vcmp.ge.f32.partialorder %v9699_v18, 0.0 }
 0x78c   : > { %v9795_v14 = vsel %vm9731_vm0, %v9699_v18, %v9763_v39  ;;  %v16332_v18 = vld [vmem:[#allocation30_spill] sm:$0xff] }
 0x78d   : > { %9952 = vrot.lane.b32.xlu0 %v9795_v14, %s12052_s11  ;;  %v9822_v39 = vsub.f32 1.0, %v16332_v18 }
 0x78f   : > { %v9925_v27 = vpop.permute.xlu1 %9924 }
 0x790   : > { %v10005_v24 = vmul.f32 %v16323_v33, %v9925_v27  ;;  %v11976_v33 = vld [vmem:[%s13144_s16 + $0xc0] sm:$0xff] }
 0x791   : > { %v9854_v11 = vmul.f32 %v11976_v33, %v9822_v39 }
 0x792   : > { %v10037_v40 = vadd.f32 %v10005_v24, %v9845_v25  ;;  %v16333_v25 = vld [vmem:[#allocation31_spill] sm:$0xff] }
 0x793   : > { %v9823_v24 = vsub.f32 1.0, %v16333_v25 }
 0x794   : > { %10069 = vst.msk [vmem:[%s15637_s14 + $0x78] sm:$0xff] %vm5996_vm14, %v10037_v40 }
 0x797   : > { %v9931_v43 = vpop.permute.xlu1 %9930  ;;  %v9933_v10 = vpop.permute.xlu2 %9932 }
 0x798   : > { %v10008_v13 = vmul.f32 %v16324_v26, %v9931_v43  ;;  %v10009_v55 = vmul.f32 %v16325_v21, %v9933_v10  ;;  %v9637_v63 = vpop.permute.xlu0 %9636  ;;  %v11977_v26 = vld [vmem:[%s13144_s16 + $0xc8] sm:$0xff] }
 0x799   : > { %v9701_v47 = vadd.f32 %v9637_v63, %v16326_v51  ;;  %v9855_v15 = vmul.f32 %v11977_v26, %v9823_v24  ;;  %v16334_v43 = vld [vmem:[#allocation60_spill] sm:$0xff] }
 0x79a   : > { %v10040_v3 = vadd.f32 %v10008_v13, %v9848_v1  ;;  %v10041_v60 = vadd.f32 %v10009_v55, %v9849_v0  ;;  %v9821_v10 = vsub.f32 1.0, %v16334_v43  ;;  %v11978_v1 = vld [vmem:[%s13144_s16 + $0xb8] sm:$0xff]  ;;  %v16335_v55 = vld [vmem:[#allocation73_spill] sm:$0xff] }
 0x79b   : > { %v9765_v53 = vmul.f32 0.2, %v9701_v47  ;;  %vm9733_vm1 = vcmp.ge.f32.partialorder %v9701_v47, 0.0  ;;  %v9825_v63 = vsub.f32 1.0, %v16335_v55 }
 0x79c   : > { %10072 = vst.msk [vmem:[%s15637_s14 + $0x90] sm:$0xff] %vm5996_vm14, %v10040_v3  ;;  %v9853_v59 = vmul.f32 %v11978_v1, %v9821_v10 }
 0x79d   : > { %10073 = vst.msk [vmem:[%s15637_s14 + $0x98] sm:$0xff] %vm5996_vm14, %v10041_v60  ;;  %v9797_v22 = vsel %vm9733_vm1, %v9701_v47, %v9765_v53  ;;  %v11979_v47 = vld [vmem:[%s13144_s16 + $0xd8] sm:$0xff] }
 0x79e   : > { %9956 = vrot.lane.b32.xlu2 %v9797_v22, %s12052_s11  ;;  %v9857_v3 = vmul.f32 %v11979_v47, %v9825_v63  ;;  %v16336_v22 = vld [vmem:[#allocation77_spill] sm:$0xff] }
 0x7a0   : > { %v9923_v23 = vpop.permute.xlu0 %9922 }
 0x7a1   : > { %v10004_v32 = vmul.f32 %v16327_v4, %v9923_v23  ;;  %v9826_v4 = vsub.f32 1.0, %v16336_v22  ;;  %v11980_v23 = vld [vmem:[%s13144_s16 + $0xe0] sm:$0xff] }
 0x7a3   : > { %v10036_v50 = vadd.f32 %v10004_v32, %v9844_v20  ;;  %v9858_v30 = vmul.f32 %v11980_v23, %v9826_v4 }
 0x7a5   : > { %10068 = vst.msk [vmem:[%s15637_s14 + $0x70] sm:$0xff] %vm5996_vm14, %v10036_v50  ;;  %v16337_v50 = vld [vmem:[#allocation71_spill] sm:$0xff] }
 0x7a7   : > { %v9937_v29 = vpop.permute.xlu1 %9936 }
 0x7a8   : > { %v10011_v52 = vmul.f32 %v16328_v48, %v9937_v29  ;;  %v9929_v7 = vpop.permute.xlu0 %9928  ;;  %v9824_v48 = vsub.f32 1.0, %v16337_v50 }
 0x7a9   : > { %v10007_v44 = vmul.f32 %v16329_v28, %v9929_v7  ;;  %v11981_v28 = vld [vmem:[%s13144_s16 + $0xd0] sm:$0xff] }
 0x7aa   : > { %v10043_v9 = vadd.f32 %v10011_v52, %v9851_v6  ;;  %v9856_v12 = vmul.f32 %v11981_v28, %v9824_v48  ;;  %v16338_v6 = vld [vmem:[#allocation104_spill] sm:$0xff] }
 0x7ab   : > { %v10039_v45 = vadd.f32 %v10007_v44, %v9847_v2  ;;  %v9828_v52 = vsub.f32 1.0, %v16338_v6 }
 0x7ac   : > { %10075 = vst.msk [vmem:[%s15637_s14 + $0xa8] sm:$0xff] %vm5996_vm14, %v10043_v9 }
 0x7ad   : > { %10071 = vst.msk [vmem:[%s15637_s14 + $0x88] sm:$0xff] %vm5996_vm14, %v10039_v45  ;;  %v9860_v2 = vmul.f32 %v11982_v49, %v9828_v52  ;;  %v16339_v45 = vld [vmem:[#allocation105_spill] sm:$0xff] }
 0x7af   : > { %v9939_v31 = vpop.permute.xlu2 %9938 }
 0x7b0   : > { %v10012_v17 = vmul.f32 %v16330_v58, %v9939_v31  ;;  %v9829_v58 = vsub.f32 1.0, %v16339_v45  ;;  %v11983_v31 = vld [vmem:[%s13144_s16 + $0xf8] sm:$0xff] }
 0x7b2   : > { %v10044_v8 = vadd.f32 %v10012_v17, %v9852_v41  ;;  %v9861_v46 = vmul.f32 %v11983_v31, %v9829_v58 }
 0x7b4   : > { %10076 = vst.msk [vmem:[%s15637_s14 + $0xb0] sm:$0xff] %vm5996_vm14, %v10044_v8  ;;  %v16340_v8 = vld [vmem:[#allocation35_spill] sm:$0xff] }
 0x7b7   : > { %v9935_v16 = vpop.permute.xlu0 %9934 }
 0x7b8   : > { %v10010_v36 = vmul.f32 %v16331_v5, %v9935_v16  ;;  %v9827_v5 = vsub.f32 1.0, %v16340_v8  ;;  %v11984_v16 = vld [vmem:[%s13144_s16 + $0xe8] sm:$0xff]  ;;  %s12005_s16 = scalar_lea.hbm %s15882_s6, 512 }
 0x7b9   : > { %p12007_p1 = scmp.lt.s32.totalorder %s12005_s16, %s12001_s10 }
 0x7ba   : > { %v10042_v62 = vadd.f32 %v10010_v36, %v9850_v54  ;;  %v9859_v42 = vmul.f32 %v11984_v16, %v9827_v5 }
 0x7bb   : > { %p12008_p2 = por %p12007_p1, %p12006_p0 }
 0x7bc   : > { %10074 = vst.msk [vmem:[%s15637_s14 + $0xa0] sm:$0xff] %vm5996_vm14, %v10042_v62 }
 0x7bd   : > { %p12009_p3 = pnand %p12008_p2, %p12004_p13 }
 0x7bf   : > { %v9943_v14 = vpop.permute.xlu1 %9942 }
 0x7c0   : > { %v10014_v27 = vmul.f32 %v16332_v18, %v9943_v14 }
 0x7c2   : > { %v10046_v57 = vadd.f32 %v10014_v27, %v9854_v11 }
 0x7c4   : > { %10078 = vst.msk [vmem:[%s15637_s14 + $0xc0] sm:$0xff] %vm5996_vm14, %v10046_v57 }
 0x7c7   : > { %v9945_v40 = vpop.permute.xlu2 %9944 }
 0x7c8   : > { %v10015_v21 = vmul.f32 %v16333_v25, %v9945_v40 }
 0x7ca   : > { %v10047_v61 = vadd.f32 %v10015_v21, %v9855_v15 }
 0x7cc   : > { %10079 = vst.msk [vmem:[%s15637_s14 + $0xc8] sm:$0xff] %vm5996_vm14, %v10047_v61 }
 0x7cf   : > { %v9941_v56 = vpop.permute.xlu0 %9940 }
 0x7d0   : > { %v10013_v0 = vmul.f32 %v16334_v43, %v9941_v56 }
 0x7d2   : > { %v10045_v13 = vadd.f32 %v10013_v0, %v9853_v59 }
 0x7d4   : > { %10077 = vst.msk [vmem:[%s15637_s14 + $0xb8] sm:$0xff] %vm5996_vm14, %v10045_v13 }
 0x7d7   : > { %v9949_v51 = vpop.permute.xlu1 %9948 }
 0x7d8   : > { %v10017_v60 = vmul.f32 %v16335_v55, %v9949_v51 }
 0x7da   : > { %v10049_v53 = vadd.f32 %v10017_v60, %v9857_v3 }
 0x7dc   : > { %10081 = vst.msk [vmem:[%s15637_s14 + $0xd8] sm:$0xff] %vm5996_vm14, %v10049_v53 }
 0x7df   : > { %v9951_v34 = vpop.permute.xlu2 %9950 }
 0x7e0   : > { %v10018_v20 = vmul.f32 %v16336_v22, %v9951_v34 }
 0x7e2   : > { %v10050_v32 = vadd.f32 %v10018_v20, %v9858_v30 }
 0x7e4   : > { %10082 = vst.msk [vmem:[%s15637_s14 + $0xe0] sm:$0xff] %vm5996_vm14, %v10050_v32 }
 0x7e7   : > { %v9947_v38 = vpop.permute.xlu0 %9946 }
 0x7e8   : > { %v10016_v29 = vmul.f32 %v16337_v50, %v9947_v38 }
 0x7ea   : > { %v10048_v35 = vadd.f32 %v10016_v29, %v9856_v12 }
 0x7ec   : > { %10080 = vst.msk [vmem:[%s15637_s14 + $0xd0] sm:$0xff] %vm5996_vm14, %v10048_v35 }
 0x7ef   : > { %v9955_v7 = vpop.permute.xlu1 %9954 }
 0x7f0   : > { %v10020_v44 = vmul.f32 %v16338_v6, %v9955_v7 }
 0x7f2   : > { %v10052_v9 = vadd.f32 %v10020_v44, %v9860_v2 }
 0x7f4   : > { %10084 = vst.msk [vmem:[%s15637_s14 + $0xf0] sm:$0xff] %vm5996_vm14, %v10052_v9 }
 0x7f8   : > { %v9957_v19 = vpop.permute.xlu2 %9956 }
 0x7f9   : > { %v10021_v41 = vmul.f32 %v16339_v45, %v9957_v19 }
 0x7fb   : > { %v10053_v17 = vadd.f32 %v10021_v41, %v9861_v46 }
 0x7fd   : > { %10085 = vst.msk [vmem:[%s15637_s14 + $0xf8] sm:$0xff] %vm5996_vm14, %v10053_v17 }
 0x7ff   : > { %v9953_v37 = vpop.permute.xlu0 %9952 }
 0x800   : > { %v10019_v54 = vmul.f32 %v16340_v8, %v9953_v37 }
 0x802   : > { %v10051_v36 = vadd.f32 %v10019_v54, %v9859_v42 }
 0x804   : > { %10083 = vst.msk [vmem:[%s15637_s14 + $0xe8] sm:$0xff] %vm5996_vm14, %v10051_v36 }
 0x805   : > { %12012 = shalt.err (!%p12009_p3)
}
 0x806   : > { %s12053_s12 = smov 128   ;;  %s12054_s14 = smov 8  }
 0x807   : > { %11730 = dma.vmem_to_hbm [thread:$0]  (%p12128_p5), %s10100_s20, 4096, %s10102_s26, %s10087_s25, %s12053_s12, %s12053_s12, %s12054_s14  }
 0x808 PF: > { %p11736_p4 = scmp.ge.s32.totalorder %s12047_s24, 2  ;;  %s10116_s15 = sand.u32 1, %s12035_s21  }
 0x809   : > { %s10117_s18 = scalar_lea.sflag [#allocation4], %s10116_s15 }
 0x80a   : > { %p11733_p7 = pnand %p11736_p4, %p12132_p6 }
 0x80c   : > { %p11734_p8 = pneg %p11733_p7 }
 0x80e   : > { %12030 = dma.done.wait (%p11734_p8), %s10117_s18, 4096  }
 0x80f   : > { %12032 = vsyncadd (%p11734_p8), %s10117_s18, 4294963200  ;;  %p16_p9 = scmp.ge.s32.totalorder %s12115_s27, 4   ;;  %s16341_s21 = smov %s12039_s22 }
 0x810   : > { %s16342_s22 = smov %s12043_s23  ;;  %s16343_s23 = smov %s12126_s30 }
 0x811   : > { %s16344_s24 = smov %s12115_s27  ;;  %18 = sbr.rel (!%p16_p9) target bundleno = 3 (0x3), region = 103 }
 0x816   :  { %10123 = vsyncpa [#allocation4], 1 }
 0x817   :  { %10125 = vsyncpa [#allocation4 + $0x1], 1 }

</bundles_post_ra>
